<compile_context>
chip_gen: v5e
topology: v5e:2x2
jax: 0.10.0
libtpu: 0.0.40
codegen_flags: <defaults>
</compile_context>

<pallas_src>
import numpy as np
import jax
import jax.numpy as jnp
from jax import lax
from jax.experimental import pallas as pl
from jax.experimental.pallas import tpu as pltpu


# ---------------------------------------------------------------------------
# In-kernel helpers (operate on VMEM-resident values)
# ---------------------------------------------------------------------------
def _conv3x3_relu_im2col(x, w_flat, b_row):
    """3x3 'same' conv + bias + ReLU on a (H, W, Cin) tile.

    x      : (H, W, Cin)   f32 value
    w_flat : (9*Cin, Cout) weights, (dy, dx, cin) row order
    b_row  : (1, Cout)
    returns: (H, W, Cout)  f32
    """
    H, W, Cin = x.shape
    Cout = w_flat.shape[-1]
    # padding=1 built in-register: concat zero rows / cols (no HBM pad pass).
    zrow = jnp.zeros((1, W, Cin), x.dtype)
    zcol = jnp.zeros((H + 2, 1, Cin), x.dtype)
    xp = jnp.concatenate([zrow, x, zrow], axis=0)        # (H+2, W,   Cin)
    xp = jnp.concatenate([zcol, xp, zcol], axis=1)       # (H+2, W+2, Cin)
    # im2col: 9 shifted views concatenated along the lane (channel) axis.
    patches = [xp[dy:dy + H, dx:dx + W, :]
               for dy in range(3) for dx in range(3)]    # 9 x (H, W, Cin)
    col = jnp.concatenate(patches, axis=-1)              # (H, W, 9*Cin)
    col = col.reshape(H * W, 9 * Cin)                    # trivial: W % 8 == 0
    y = jnp.dot(col, w_flat, preferred_element_type=jnp.float32) + b_row
    y = jnp.maximum(y, 0.0)
    return y.reshape(H, W, Cout)


def _maxpool2x2(y):
    """2x2 / stride-2 max pool of a (H, W, C) tile (H, W even)."""
    H, W, C = y.shape
    H2, W2 = H // 2, W // 2
    # rows: split the major H axis, elementwise max of the two halves.
    y4 = y.reshape(H2, 2, W, C)
    hmax = jnp.maximum(y4[:, 0, :, :], y4[:, 1, :, :])   # (H2, W, C)
    # cols: static width-1 sublane slices + max, re-packed with a concat.
    cols = [jnp.maximum(hmax[:, 2 * j:2 * j + 1, :],
                        hmax[:, 2 * j + 1:2 * j + 2, :]) for j in range(W2)]
    return jnp.concatenate(cols, axis=1)                  # (H2, W2, C)


# ---------------------------------------------------------------------------
# Fused EncodingBlock kernel: conv1+ReLU -> conv2+ReLU -> skip + maxpool2x2
# ---------------------------------------------------------------------------
def _encoding_block_kernel(x_ref, w1_ref, b1_ref, w2_ref, b2_ref,
                           skip_ref, pool_ref):
    # x_ref    : (H, W, Cin)      one full image (batch dim squeezed)
    # w1_ref   : (9*Cin, Cmid)    b1_ref: (1, Cmid)
    # w2_ref   : (9*Cmid, Cout)   b2_ref: (1, Cout)
    # skip_ref : (H, W, Cout)     pool_ref: (H//2, W//2, Cout)
    x = x_ref[...]
    y1 = _conv3x3_relu_im2col(x, w1_ref[...], b1_ref[...])
    y2 = _conv3x3_relu_im2col(y1, w2_ref[...], b2_ref[...])
    skip_ref[...] = y2.astype(skip_ref.dtype)
    pool_ref[...] = _maxpool2x2(y2).astype(pool_ref.dtype)


def encoding_block_forward(x_nhwc, p):
    """One EncodingBlock. x_nhwc: (B, H, W, Cin). Returns (pooled, skip), NHWC."""
    B, H, W, Cin = x_nhwc.shape
    assert H % 2 == 0 and W % 2 == 0, "MaxPool2d(2) requires even H and W"
    Cmid = p["w1"].shape[-1]
    Cout = p["w2"].shape[-1]
    H2, W2 = H // 2, W // 2

    # Reshape weights / bias in the wrapper (im2col row order = dy, dx, cin).
    w1 = p["w1"].reshape(9 * Cin, Cmid)
    b1 = p["b1"].reshape(1, Cmid)
    w2 = p["w2"].reshape(9 * Cmid, Cout)
    b2 = p["b2"].reshape(1, Cout)

    skip, pooled = pl.pallas_call(
        _encoding_block_kernel,
        out_shape=(jax.ShapeDtypeStruct((B, H, W, Cout), x_nhwc.dtype),
                   jax.ShapeDtypeStruct((B, H2, W2, Cout), x_nhwc.dtype)),
        grid=(B,),
        in_specs=[
            pl.BlockSpec((None, H, W, Cin), lambda b: (b, 0, 0, 0)),
            pl.BlockSpec((9 * Cin, Cmid), lambda b: (0, 0)),
            pl.BlockSpec((1, Cmid), lambda b: (0, 0)),
            pl.BlockSpec((9 * Cmid, Cout), lambda b: (0, 0)),
            pl.BlockSpec((1, Cout), lambda b: (0, 0)),
        ],
        out_specs=(
            pl.BlockSpec((None, H, W, Cout), lambda b: (b, 0, 0, 0)),
            pl.BlockSpec((None, H2, W2, Cout), lambda b: (b, 0, 0, 0)),
        ),
        compiler_params=pltpu.CompilerParams(
            dimension_semantics=("parallel",)),
    )(x_nhwc, w1, b1, w2, b2)
    return pooled, skip


# ---------------------------------------------------------------------------
# Encoder (JAX glue around the Pallas kernel)
# ---------------------------------------------------------------------------
def init_encoder_params(key, in_channels, out_channels_first, num_encoding_blocks):
    """Deterministic parameter init, 2D branch of Encoder.__init__ (HWIO)."""
    params = []
    cin, cfirst = in_channels, out_channels_first
    for _ in range(num_encoding_blocks):
        key, k1, k2, k3, k4 = jax.random.split(key, 5)
        # conv1: cin -> cfirst ; conv2: cfirst -> cfirst  (dimensions == 2)
        w1 = jax.random.normal(k1, (3, 3, cin, cfirst), jnp.float32) / np.sqrt(9 * cin)
        b1 = jax.random.normal(k2, (cfirst,), jnp.float32) * 0.01
        w2 = jax.random.normal(k3, (3, 3, cfirst, cfirst), jnp.float32) / np.sqrt(9 * cfirst)
        b2 = jax.random.normal(k4, (cfirst,), jnp.float32) * 0.01
        params.append({"w1": w1, "b1": b1, "w2": w2, "b2": b2})
        cin = cfirst                       # dimensions == 2 channel schedule
        cfirst = cin * 2
    return params


def encoder_forward_nhwc(x_nhwc, params):
    """Native fast path: NHWC activations/skips end-to-end."""
    skips = []
    x = x_nhwc
    for p in params:
        x, skip = encoding_block_forward(x, p)
        skips.append(skip)
    return skips, x


@jax.jit
def encoder_forward(x_nchw, params):
    """Matches Encoder.forward: returns (skip_connections, x), NCHW like PyTorch."""
    x = jnp.transpose(x_nchw, (0, 2, 3, 1))          # NCHW -> NHWC once
    skips, out = encoder_forward_nhwc(x, params)
    skips = [jnp.transpose(s, (0, 3, 1, 2)) for s in skips]
    return skips, jnp.transpose(out, (0, 3, 1, 2))


# ---------------------------------------------------------------------------
# Pure-JAX reference (for correctness check)
# ---------------------------------------------------------------------------
def _conv_ref(x, w, b):
    y = lax.conv_general_dilated(x, w, window_strides=(1, 1),
                                 padding=((1, 1), (1, 1)),
                                 dimension_numbers=("NHWC", "HWIO", "NHWC"))
    return jax.nn.relu(y + b)


def _pool_ref(x):
    return lax.reduce_window(x, -jnp.inf, lax.max,
                             (1, 2, 2, 1), (1, 2, 2, 1), "VALID")


def encoder_ref(x_nchw, params):
    x = jnp.transpose(x_nchw, (0, 2, 3, 1))
    skips = []
    for p in params:
        x = _conv_ref(x, p["w1"], p["b1"])
        x = _conv_ref(x, p["w2"], p["b2"])
        skips.append(jnp.transpose(x, (0, 3, 1, 2)))
        x = _pool_ref(x)
    return skips, jnp.transpose(x, (0, 3, 1, 2))


if __name__ == "__main__":
    B, Cin, H, W = 2, 4, 16, 16
    out_channels_first = 8
    num_blocks = 2

    key = jax.random.PRNGKey(0)
    kx, kp = jax.random.split(key)
    x = jax.random.normal(kx, (B, Cin, H, W), jnp.float32)   # NCHW, like PyTorch
    params = init_encoder_params(kp, Cin, out_channels_first, num_blocks)

    skips, out = encoder_forward(x, params)
    out = jax.block_until_ready(out)
    skips = [jax.block_until_ready(s) for s in skips]

    skips_ref, out_ref = encoder_ref(x, params)
    np.testing.assert_allclose(np.asarray(out), np.asarray(out_ref), rtol=1e-4, atol=1e-4)
    for s, sr in zip(skips, skips_ref):
        np.testing.assert_allclose(np.asarray(s), np.asarray(sr), rtol=1e-4, atol=1e-4)

    # Channel schedule (dimensions==2): block1 -> 8 ch, block2 -> 16 ch.
    assert out.shape == (B, 2 * out_channels_first, H // 4, W // 4)
    assert skips[0].shape == (B, out_channels_first, H, W)
    assert skips[1].shape == (B, 2 * out_channels_first, H // 2, W // 2)

    print("KERNEL_OK")
</pallas_src>

<mosaic_0001>
module attributes {stable_mosaic.version = 11 : i64} {
  func.func @_encoding_block_kernel(%arg0: i32, %arg1: memref<1x16x16x4xf32, #tpu.memory_space<vmem>>, %arg2: memref<36x8xf32, #tpu.memory_space<vmem>>, %arg3: memref<1x8xf32, #tpu.memory_space<vmem>>, %arg4: memref<72x8xf32, #tpu.memory_space<vmem>>, %arg5: memref<1x8xf32, #tpu.memory_space<vmem>>, %arg6: memref<1x16x16x8xf32, #tpu.memory_space<vmem>>, %arg7: memref<1x8x8x8xf32, #tpu.memory_space<vmem>>) attributes {dimension_semantics = [#tpu.dimension_semantics<parallel>], iteration_bounds = array<i64: 2>, scalar_prefetch = 0 : i64, scratch_operands = 0 : i64, tpu.core_type = #tpu.core_type<tc>, window_params = [{transform_indices = @transform_0, window_bounds = array<i64: 1, 16, 16, 4>}, {pipeline_mode = #tpu.pipeline_mode<synchronous>, transform_indices = @transform_1, window_bounds = array<i64: 36, 8>}, {pipeline_mode = #tpu.pipeline_mode<synchronous>, transform_indices = @transform_2, window_bounds = array<i64: 1, 8>}, {pipeline_mode = #tpu.pipeline_mode<synchronous>, transform_indices = @transform_3, window_bounds = array<i64: 72, 8>}, {pipeline_mode = #tpu.pipeline_mode<synchronous>, transform_indices = @transform_4, window_bounds = array<i64: 1, 8>}, {transform_indices = @transform_5, window_bounds = array<i64: 1, 16, 16, 8>}, {transform_indices = @transform_6, window_bounds = array<i64: 1, 8, 8, 8>}]} {
    %c0 = arith.constant 0 : index
    %c0_0 = arith.constant 0 : index
    %c0_1 = arith.constant 0 : index
    %c0_2 = arith.constant 0 : index
    %0 = vector.load %arg1[%c0, %c0_0, %c0_1, %c0_2] : memref<1x16x16x4xf32, #tpu.memory_space<vmem>>, vector<1x16x16x4xf32>
    %1 = vector.shape_cast %0 : vector<1x16x16x4xf32> to vector<16x16x4xf32>
    %c0_3 = arith.constant 0 : index
    %c0_4 = arith.constant 0 : index
    %2 = vector.load %arg2[%c0_3, %c0_4] : memref<36x8xf32, #tpu.memory_space<vmem>>, vector<36x8xf32>
    %c0_5 = arith.constant 0 : index
    %c0_6 = arith.constant 0 : index
    %3 = vector.load %arg3[%c0_5, %c0_6] : memref<1x8xf32, #tpu.memory_space<vmem>>, vector<1x8xf32>
    %cst = arith.constant 0.000000e+00 : f32
    %4 = vector.broadcast %cst : f32 to vector<1x16x4xf32>
    %cst_7 = arith.constant 0.000000e+00 : f32
    %5 = vector.broadcast %cst_7 : f32 to vector<18x1x4xf32>
    %6 = tpu.concatenate %4, %1, %4 in 0 : vector<1x16x4xf32>, vector<16x16x4xf32>, vector<1x16x4xf32> -> vector<18x16x4xf32>
    %7 = tpu.concatenate %5, %6, %5 in 1 : vector<18x1x4xf32>, vector<18x16x4xf32>, vector<18x1x4xf32> -> vector<18x18x4xf32>
    %8 = vector.extract_strided_slice %7 {offsets = [0, 0, 0], sizes = [16, 16, 4], strides = [1, 1, 1]} : vector<18x18x4xf32> to vector<16x16x4xf32>
    %9 = vector.extract_strided_slice %7 {offsets = [0, 1, 0], sizes = [16, 16, 4], strides = [1, 1, 1]} : vector<18x18x4xf32> to vector<16x16x4xf32>
    %10 = vector.extract_strided_slice %7 {offsets = [0, 2, 0], sizes = [16, 16, 4], strides = [1, 1, 1]} : vector<18x18x4xf32> to vector<16x16x4xf32>
    %11 = vector.extract_strided_slice %7 {offsets = [1, 0, 0], sizes = [16, 16, 4], strides = [1, 1, 1]} : vector<18x18x4xf32> to vector<16x16x4xf32>
    %12 = vector.extract_strided_slice %7 {offsets = [1, 1, 0], sizes = [16, 16, 4], strides = [1, 1, 1]} : vector<18x18x4xf32> to vector<16x16x4xf32>
    %13 = vector.extract_strided_slice %7 {offsets = [1, 2, 0], sizes = [16, 16, 4], strides = [1, 1, 1]} : vector<18x18x4xf32> to vector<16x16x4xf32>
    %14 = vector.extract_strided_slice %7 {offsets = [2, 0, 0], sizes = [16, 16, 4], strides = [1, 1, 1]} : vector<18x18x4xf32> to vector<16x16x4xf32>
    %15 = vector.extract_strided_slice %7 {offsets = [2, 1, 0], sizes = [16, 16, 4], strides = [1, 1, 1]} : vector<18x18x4xf32> to vector<16x16x4xf32>
    %16 = vector.extract_strided_slice %7 {offsets = [2, 2, 0], sizes = [16, 16, 4], strides = [1, 1, 1]} : vector<18x18x4xf32> to vector<16x16x4xf32>
    %17 = tpu.concatenate %8, %9, %10, %11, %12, %13, %14, %15, %16 in 2 : vector<16x16x4xf32>, vector<16x16x4xf32>, vector<16x16x4xf32>, vector<16x16x4xf32>, vector<16x16x4xf32>, vector<16x16x4xf32>, vector<16x16x4xf32>, vector<16x16x4xf32>, vector<16x16x4xf32> -> vector<16x16x36xf32>
    %18 = vector.shape_cast %17 : vector<16x16x36xf32> to vector<256x36xf32>
    %cst_8 = arith.constant dense<0.000000e+00> : vector<256x8xf32>
    %19 = tpu.matmul %18, %2, %cst_8 {dimension_numbers = #tpu.dot_dimension_numbers<[1], [0], [0], [1], [0, 0, 1, 1], [], []>} : vector<256x36xf32>, vector<36x8xf32>, vector<256x8xf32> -> vector<256x8xf32>
    %20 = vector.broadcast %3 : vector<1x8xf32> to vector<256x8xf32>
    %21 = arith.addf %19, %20 : vector<256x8xf32>
    %cst_9 = arith.constant 0.000000e+00 : f32
    %22 = vector.broadcast %cst_9 : f32 to vector<256x8xf32>
    %23 = arith.maximumf %21, %22 : vector<256x8xf32>
    %24 = vector.shape_cast %23 : vector<256x8xf32> to vector<16x16x8xf32>
    %c0_10 = arith.constant 0 : index
    %c0_11 = arith.constant 0 : index
    %25 = vector.load %arg4[%c0_10, %c0_11] : memref<72x8xf32, #tpu.memory_space<vmem>>, vector<72x8xf32>
    %c0_12 = arith.constant 0 : index
    %c0_13 = arith.constant 0 : index
    %26 = vector.load %arg5[%c0_12, %c0_13] : memref<1x8xf32, #tpu.memory_space<vmem>>, vector<1x8xf32>
    %cst_14 = arith.constant 0.000000e+00 : f32
    %27 = vector.broadcast %cst_14 : f32 to vector<1x16x8xf32>
    %cst_15 = arith.constant 0.000000e+00 : f32
    %28 = vector.broadcast %cst_15 : f32 to vector<18x1x8xf32>
    %29 = tpu.concatenate %27, %24, %27 in 0 : vector<1x16x8xf32>, vector<16x16x8xf32>, vector<1x16x8xf32> -> vector<18x16x8xf32>
    %30 = tpu.concatenate %28, %29, %28 in 1 : vector<18x1x8xf32>, vector<18x16x8xf32>, vector<18x1x8xf32> -> vector<18x18x8xf32>
    %31 = vector.extract_strided_slice %30 {offsets = [0, 0, 0], sizes = [16, 16, 8], strides = [1, 1, 1]} : vector<18x18x8xf32> to vector<16x16x8xf32>
    %32 = vector.extract_strided_slice %30 {offsets = [0, 1, 0], sizes = [16, 16, 8], strides = [1, 1, 1]} : vector<18x18x8xf32> to vector<16x16x8xf32>
    %33 = vector.extract_strided_slice %30 {offsets = [0, 2, 0], sizes = [16, 16, 8], strides = [1, 1, 1]} : vector<18x18x8xf32> to vector<16x16x8xf32>
    %34 = vector.extract_strided_slice %30 {offsets = [1, 0, 0], sizes = [16, 16, 8], strides = [1, 1, 1]} : vector<18x18x8xf32> to vector<16x16x8xf32>
    %35 = vector.extract_strided_slice %30 {offsets = [1, 1, 0], sizes = [16, 16, 8], strides = [1, 1, 1]} : vector<18x18x8xf32> to vector<16x16x8xf32>
    %36 = vector.extract_strided_slice %30 {offsets = [1, 2, 0], sizes = [16, 16, 8], strides = [1, 1, 1]} : vector<18x18x8xf32> to vector<16x16x8xf32>
    %37 = vector.extract_strided_slice %30 {offsets = [2, 0, 0], sizes = [16, 16, 8], strides = [1, 1, 1]} : vector<18x18x8xf32> to vector<16x16x8xf32>
    %38 = vector.extract_strided_slice %30 {offsets = [2, 1, 0], sizes = [16, 16, 8], strides = [1, 1, 1]} : vector<18x18x8xf32> to vector<16x16x8xf32>
    %39 = vector.extract_strided_slice %30 {offsets = [2, 2, 0], sizes = [16, 16, 8], strides = [1, 1, 1]} : vector<18x18x8xf32> to vector<16x16x8xf32>
    %40 = tpu.concatenate %31, %32, %33, %34, %35, %36, %37, %38, %39 in 2 : vector<16x16x8xf32>, vector<16x16x8xf32>, vector<16x16x8xf32>, vector<16x16x8xf32>, vector<16x16x8xf32>, vector<16x16x8xf32>, vector<16x16x8xf32>, vector<16x16x8xf32>, vector<16x16x8xf32> -> vector<16x16x72xf32>
    %41 = vector.shape_cast %40 : vector<16x16x72xf32> to vector<256x72xf32>
    %cst_16 = arith.constant dense<0.000000e+00> : vector<256x8xf32>
    %42 = tpu.matmul %41, %25, %cst_16 {dimension_numbers = #tpu.dot_dimension_numbers<[1], [0], [0], [1], [0, 0, 1, 1], [], []>} : vector<256x72xf32>, vector<72x8xf32>, vector<256x8xf32> -> vector<256x8xf32>
    %43 = vector.broadcast %26 : vector<1x8xf32> to vector<256x8xf32>
    %44 = arith.addf %42, %43 : vector<256x8xf32>
    %cst_17 = arith.constant 0.000000e+00 : f32
    %45 = vector.broadcast %cst_17 : f32 to vector<256x8xf32>
    %46 = arith.maximumf %44, %45 : vector<256x8xf32>
    %47 = vector.shape_cast %46 : vector<256x8xf32> to vector<16x16x8xf32>
    %c0_18 = arith.constant 0 : index
    %c0_19 = arith.constant 0 : index
    %c0_20 = arith.constant 0 : index
    %c0_21 = arith.constant 0 : index
    %48 = vector.load %arg6[%c0_18, %c0_19, %c0_20, %c0_21] : memref<1x16x16x8xf32, #tpu.memory_space<vmem>>, vector<1x16x16x8xf32>
    %49 = vector.shape_cast %48 : vector<1x16x16x8xf32> to vector<16x16x8xf32>
    %50 = vector.shape_cast %47 : vector<16x16x8xf32> to vector<1x16x16x8xf32>
    tpu.vector_store %arg6[%c0_18, %c0_19, %c0_20, %c0_21], %50 {strides = array<i32>} : memref<1x16x16x8xf32, #tpu.memory_space<vmem>>, vector<1x16x16x8xf32>,
    %51 = vector.shape_cast %47 : vector<16x16x8xf32> to vector<8x2x16x8xf32>
    %52 = vector.extract_strided_slice %51 {offsets = [0, 0, 0, 0], sizes = [8, 1, 16, 8], strides = [1, 1, 1, 1]} : vector<8x2x16x8xf32> to vector<8x1x16x8xf32>
    %53 = vector.shape_cast %52 : vector<8x1x16x8xf32> to vector<8x16x8xf32>
    %54 = vector.extract_strided_slice %51 {offsets = [0, 1, 0, 0], sizes = [8, 1, 16, 8], strides = [1, 1, 1, 1]} : vector<8x2x16x8xf32> to vector<8x1x16x8xf32>
    %55 = vector.shape_cast %54 : vector<8x1x16x8xf32> to vector<8x16x8xf32>
    %56 = arith.maximumf %53, %55 : vector<8x16x8xf32>
    %57 = vector.extract_strided_slice %56 {offsets = [0, 0, 0], sizes = [8, 1, 8], strides = [1, 1, 1]} : vector<8x16x8xf32> to vector<8x1x8xf32>
    %58 = vector.extract_strided_slice %56 {offsets = [0, 1, 0], sizes = [8, 1, 8], strides = [1, 1, 1]} : vector<8x16x8xf32> to vector<8x1x8xf32>
    %59 = arith.maximumf %57, %58 : vector<8x1x8xf32>
    %60 = vector.extract_strided_slice %56 {offsets = [0, 2, 0], sizes = [8, 1, 8], strides = [1, 1, 1]} : vector<8x16x8xf32> to vector<8x1x8xf32>
    %61 = vector.extract_strided_slice %56 {offsets = [0, 3, 0], sizes = [8, 1, 8], strides = [1, 1, 1]} : vector<8x16x8xf32> to vector<8x1x8xf32>
    %62 = arith.maximumf %60, %61 : vector<8x1x8xf32>
    %63 = vector.extract_strided_slice %56 {offsets = [0, 4, 0], sizes = [8, 1, 8], strides = [1, 1, 1]} : vector<8x16x8xf32> to vector<8x1x8xf32>
    %64 = vector.extract_strided_slice %56 {offsets = [0, 5, 0], sizes = [8, 1, 8], strides = [1, 1, 1]} : vector<8x16x8xf32> to vector<8x1x8xf32>
    %65 = arith.maximumf %63, %64 : vector<8x1x8xf32>
    %66 = vector.extract_strided_slice %56 {offsets = [0, 6, 0], sizes = [8, 1, 8], strides = [1, 1, 1]} : vector<8x16x8xf32> to vector<8x1x8xf32>
    %67 = vector.extract_strided_slice %56 {offsets = [0, 7, 0], sizes = [8, 1, 8], strides = [1, 1, 1]} : vector<8x16x8xf32> to vector<8x1x8xf32>
    %68 = arith.maximumf %66, %67 : vector<8x1x8xf32>
    %69 = vector.extract_strided_slice %56 {offsets = [0, 8, 0], sizes = [8, 1, 8], strides = [1, 1, 1]} : vector<8x16x8xf32> to vector<8x1x8xf32>
    %70 = vector.extract_strided_slice %56 {offsets = [0, 9, 0], sizes = [8, 1, 8], strides = [1, 1, 1]} : vector<8x16x8xf32> to vector<8x1x8xf32>
    %71 = arith.maximumf %69, %70 : vector<8x1x8xf32>
    %72 = vector.extract_strided_slice %56 {offsets = [0, 10, 0], sizes = [8, 1, 8], strides = [1, 1, 1]} : vector<8x16x8xf32> to vector<8x1x8xf32>
    %73 = vector.extract_strided_slice %56 {offsets = [0, 11, 0], sizes = [8, 1, 8], strides = [1, 1, 1]} : vector<8x16x8xf32> to vector<8x1x8xf32>
    %74 = arith.maximumf %72, %73 : vector<8x1x8xf32>
    %75 = vector.extract_strided_slice %56 {offsets = [0, 12, 0], sizes = [8, 1, 8], strides = [1, 1, 1]} : vector<8x16x8xf32> to vector<8x1x8xf32>
    %76 = vector.extract_strided_slice %56 {offsets = [0, 13, 0], sizes = [8, 1, 8], strides = [1, 1, 1]} : vector<8x16x8xf32> to vector<8x1x8xf32>
    %77 = arith.maximumf %75, %76 : vector<8x1x8xf32>
    %78 = vector.extract_strided_slice %56 {offsets = [0, 14, 0], sizes = [8, 1, 8], strides = [1, 1, 1]} : vector<8x16x8xf32> to vector<8x1x8xf32>
    %79 = vector.extract_strided_slice %56 {offsets = [0, 15, 0], sizes = [8, 1, 8], strides = [1, 1, 1]} : vector<8x16x8xf32> to vector<8x1x8xf32>
    %80 = arith.maximumf %78, %79 : vector<8x1x8xf32>
    %81 = tpu.concatenate %59, %62, %65, %68, %71, %74, %77, %80 in 1 : vector<8x1x8xf32>, vector<8x1x8xf32>, vector<8x1x8xf32>, vector<8x1x8xf32>, vector<8x1x8xf32>, vector<8x1x8xf32>, vector<8x1x8xf32>, vector<8x1x8xf32> -> vector<8x8x8xf32>
    %c0_22 = arith.constant 0 : index
    %c0_23 = arith.constant 0 : index
    %c0_24 = arith.constant 0 : index
    %c0_25 = arith.constant 0 : index
    %82 = vector.load %arg7[%c0_22, %c0_23, %c0_24, %c0_25] : memref<1x8x8x8xf32, #tpu.memory_space<vmem>>, vector<1x8x8x8xf32>
    %83 = vector.shape_cast %82 : vector<1x8x8x8xf32> to vector<8x8x8xf32>
    %84 = vector.shape_cast %81 : vector<8x8x8xf32> to vector<1x8x8x8xf32>
    tpu.vector_store %arg7[%c0_22, %c0_23, %c0_24, %c0_25], %84 {strides = array<i32>} : memref<1x8x8x8xf32, #tpu.memory_space<vmem>>, vector<1x8x8x8xf32>,
    return
  }
  func.func @transform_0(%arg0: i32) -> (i32, i32, i32, i32) {
    %c0_i32 = arith.constant 0 : i32
    %c0_i32_0 = arith.constant 0 : i32
    %c0_i32_1 = arith.constant 0 : i32
    %c0_i32_2 = arith.constant 0 : i32
    return %arg0, %c0_i32, %c0_i32_0, %c0_i32_1 : i32, i32, i32, i32
  }
  func.func @transform_1(%arg0: i32) -> (i32, i32) {
    %c0_i32 = arith.constant 0 : i32
    %c0_i32_0 = arith.constant 0 : i32
    %c0_i32_1 = arith.constant 0 : i32
    return %c0_i32, %c0_i32_0 : i32, i32
  }
  func.func @transform_2(%arg0: i32) -> (i32, i32) {
    %c0_i32 = arith.constant 0 : i32
    %c0_i32_0 = arith.constant 0 : i32
    %c0_i32_1 = arith.constant 0 : i32
    return %c0_i32, %c0_i32_0 : i32, i32
  }
  func.func @transform_3(%arg0: i32) -> (i32, i32) {
    %c0_i32 = arith.constant 0 : i32
    %c0_i32_0 = arith.constant 0 : i32
    %c0_i32_1 = arith.constant 0 : i32
    return %c0_i32, %c0_i32_0 : i32, i32
  }
  func.func @transform_4(%arg0: i32) -> (i32, i32) {
    %c0_i32 = arith.constant 0 : i32
    %c0_i32_0 = arith.constant 0 : i32
    %c0_i32_1 = arith.constant 0 : i32
    return %c0_i32, %c0_i32_0 : i32, i32
  }
  func.func @transform_5(%arg0: i32) -> (i32, i32, i32, i32) {
    %c0_i32 = arith.constant 0 : i32
    %c0_i32_0 = arith.constant 0 : i32
    %c0_i32_1 = arith.constant 0 : i32
    %c0_i32_2 = arith.constant 0 : i32
    return %arg0, %c0_i32, %c0_i32_0, %c0_i32_1 : i32, i32, i32, i32
  }
  func.func @transform_6(%arg0: i32) -> (i32, i32, i32, i32) {
    %c0_i32 = arith.constant 0 : i32
    %c0_i32_0 = arith.constant 0 : i32
    %c0_i32_1 = arith.constant 0 : i32
    %c0_i32_2 = arith.constant 0 : i32
    return %arg0, %c0_i32, %c0_i32_0, %c0_i32_1 : i32, i32, i32, i32
  }
}

module attributes {stable_mosaic.version = 11 : i64} {
  func.func @_encoding_block_kernel(%arg0: i32, %arg1: memref<1x8x8x8xf32, #tpu.memory_space<vmem>>, %arg2: memref<72x16xf32, #tpu.memory_space<vmem>>, %arg3: memref<1x16xf32, #tpu.memory_space<vmem>>, %arg4: memref<144x16xf32, #tpu.memory_space<vmem>>, %arg5: memref<1x16xf32, #tpu.memory_space<vmem>>, %arg6: memref<1x8x8x16xf32, #tpu.memory_space<vmem>>, %arg7: memref<1x4x4x16xf32, #tpu.memory_space<vmem>>) attributes {dimension_semantics = [#tpu.dimension_semantics<parallel>], iteration_bounds = array<i64: 2>, scalar_prefetch = 0 : i64, scratch_operands = 0 : i64, tpu.core_type = #tpu.core_type<tc>, window_params = [{transform_indices = @transform_0, window_bounds = array<i64: 1, 8, 8, 8>}, {pipeline_mode = #tpu.pipeline_mode<synchronous>, transform_indices = @transform_1, window_bounds = array<i64: 72, 16>}, {pipeline_mode = #tpu.pipeline_mode<synchronous>, transform_indices = @transform_2, window_bounds = array<i64: 1, 16>}, {pipeline_mode = #tpu.pipeline_mode<synchronous>, transform_indices = @transform_3, window_bounds = array<i64: 144, 16>}, {pipeline_mode = #tpu.pipeline_mode<synchronous>, transform_indices = @transform_4, window_bounds = array<i64: 1, 16>}, {transform_indices = @transform_5, window_bounds = array<i64: 1, 8, 8, 16>}, {transform_indices = @transform_6, window_bounds = array<i64: 1, 4, 4, 16>}]} {
    %c0 = arith.constant 0 : index
    %c0_0 = arith.constant 0 : index
    %c0_1 = arith.constant 0 : index
    %c0_2 = arith.constant 0 : index
    %0 = vector.load %arg1[%c0, %c0_0, %c0_1, %c0_2] : memref<1x8x8x8xf32, #tpu.memory_space<vmem>>, vector<1x8x8x8xf32>
    %1 = vector.shape_cast %0 : vector<1x8x8x8xf32> to vector<8x8x8xf32>
    %c0_3 = arith.constant 0 : index
    %c0_4 = arith.constant 0 : index
    %2 = vector.load %arg2[%c0_3, %c0_4] : memref<72x16xf32, #tpu.memory_space<vmem>>, vector<72x16xf32>
    %c0_5 = arith.constant 0 : index
    %c0_6 = arith.constant 0 : index
    %3 = vector.load %arg3[%c0_5, %c0_6] : memref<1x16xf32, #tpu.memory_space<vmem>>, vector<1x16xf32>
    %cst = arith.constant 0.000000e+00 : f32
    %4 = vector.broadcast %cst : f32 to vector<1x8x8xf32>
    %cst_7 = arith.constant 0.000000e+00 : f32
    %5 = vector.broadcast %cst_7 : f32 to vector<10x1x8xf32>
    %6 = tpu.concatenate %4, %1, %4 in 0 : vector<1x8x8xf32>, vector<8x8x8xf32>, vector<1x8x8xf32> -> vector<10x8x8xf32>
    %7 = tpu.concatenate %5, %6, %5 in 1 : vector<10x1x8xf32>, vector<10x8x8xf32>, vector<10x1x8xf32> -> vector<10x10x8xf32>
    %8 = vector.extract_strided_slice %7 {offsets = [0, 0, 0], sizes = [8, 8, 8], strides = [1, 1, 1]} : vector<10x10x8xf32> to vector<8x8x8xf32>
    %9 = vector.extract_strided_slice %7 {offsets = [0, 1, 0], sizes = [8, 8, 8], strides = [1, 1, 1]} : vector<10x10x8xf32> to vector<8x8x8xf32>
    %10 = vector.extract_strided_slice %7 {offsets = [0, 2, 0], sizes = [8, 8, 8], strides = [1, 1, 1]} : vector<10x10x8xf32> to vector<8x8x8xf32>
    %11 = vector.extract_strided_slice %7 {offsets = [1, 0, 0], sizes = [8, 8, 8], strides = [1, 1, 1]} : vector<10x10x8xf32> to vector<8x8x8xf32>
    %12 = vector.extract_strided_slice %7 {offsets = [1, 1, 0], sizes = [8, 8, 8], strides = [1, 1, 1]} : vector<10x10x8xf32> to vector<8x8x8xf32>
    %13 = vector.extract_strided_slice %7 {offsets = [1, 2, 0], sizes = [8, 8, 8], strides = [1, 1, 1]} : vector<10x10x8xf32> to vector<8x8x8xf32>
    %14 = vector.extract_strided_slice %7 {offsets = [2, 0, 0], sizes = [8, 8, 8], strides = [1, 1, 1]} : vector<10x10x8xf32> to vector<8x8x8xf32>
    %15 = vector.extract_strided_slice %7 {offsets = [2, 1, 0], sizes = [8, 8, 8], strides = [1, 1, 1]} : vector<10x10x8xf32> to vector<8x8x8xf32>
    %16 = vector.extract_strided_slice %7 {offsets = [2, 2, 0], sizes = [8, 8, 8], strides = [1, 1, 1]} : vector<10x10x8xf32> to vector<8x8x8xf32>
    %17 = tpu.concatenate %8, %9, %10, %11, %12, %13, %14, %15, %16 in 2 : vector<8x8x8xf32>, vector<8x8x8xf32>, vector<8x8x8xf32>, vector<8x8x8xf32>, vector<8x8x8xf32>, vector<8x8x8xf32>, vector<8x8x8xf32>, vector<8x8x8xf32>, vector<8x8x8xf32> -> vector<8x8x72xf32>
    %18 = vector.shape_cast %17 : vector<8x8x72xf32> to vector<64x72xf32>
    %cst_8 = arith.constant dense<0.000000e+00> : vector<64x16xf32>
    %19 = tpu.matmul %18, %2, %cst_8 {dimension_numbers = #tpu.dot_dimension_numbers<[1], [0], [0], [1], [0, 0, 1, 1], [], []>} : vector<64x72xf32>, vector<72x16xf32>, vector<64x16xf32> -> vector<64x16xf32>
    %20 = vector.broadcast %3 : vector<1x16xf32> to vector<64x16xf32>
    %21 = arith.addf %19, %20 : vector<64x16xf32>
    %cst_9 = arith.constant 0.000000e+00 : f32
    %22 = vector.broadcast %cst_9 : f32 to vector<64x16xf32>
    %23 = arith.maximumf %21, %22 : vector<64x16xf32>
    %24 = vector.shape_cast %23 : vector<64x16xf32> to vector<8x8x16xf32>
    %c0_10 = arith.constant 0 : index
    %c0_11 = arith.constant 0 : index
    %25 = vector.load %arg4[%c0_10, %c0_11] : memref<144x16xf32, #tpu.memory_space<vmem>>, vector<144x16xf32>
    %c0_12 = arith.constant 0 : index
    %c0_13 = arith.constant 0 : index
    %26 = vector.load %arg5[%c0_12, %c0_13] : memref<1x16xf32, #tpu.memory_space<vmem>>, vector<1x16xf32>
    %cst_14 = arith.constant 0.000000e+00 : f32
    %27 = vector.broadcast %cst_14 : f32 to vector<1x8x16xf32>
    %cst_15 = arith.constant 0.000000e+00 : f32
    %28 = vector.broadcast %cst_15 : f32 to vector<10x1x16xf32>
    %29 = tpu.concatenate %27, %24, %27 in 0 : vector<1x8x16xf32>, vector<8x8x16xf32>, vector<1x8x16xf32> -> vector<10x8x16xf32>
    %30 = tpu.concatenate %28, %29, %28 in 1 : vector<10x1x16xf32>, vector<10x8x16xf32>, vector<10x1x16xf32> -> vector<10x10x16xf32>
    %31 = vector.extract_strided_slice %30 {offsets = [0, 0, 0], sizes = [8, 8, 16], strides = [1, 1, 1]} : vector<10x10x16xf32> to vector<8x8x16xf32>
    %32 = vector.extract_strided_slice %30 {offsets = [0, 1, 0], sizes = [8, 8, 16], strides = [1, 1, 1]} : vector<10x10x16xf32> to vector<8x8x16xf32>
    %33 = vector.extract_strided_slice %30 {offsets = [0, 2, 0], sizes = [8, 8, 16], strides = [1, 1, 1]} : vector<10x10x16xf32> to vector<8x8x16xf32>
    %34 = vector.extract_strided_slice %30 {offsets = [1, 0, 0], sizes = [8, 8, 16], strides = [1, 1, 1]} : vector<10x10x16xf32> to vector<8x8x16xf32>
    %35 = vector.extract_strided_slice %30 {offsets = [1, 1, 0], sizes = [8, 8, 16], strides = [1, 1, 1]} : vector<10x10x16xf32> to vector<8x8x16xf32>
    %36 = vector.extract_strided_slice %30 {offsets = [1, 2, 0], sizes = [8, 8, 16], strides = [1, 1, 1]} : vector<10x10x16xf32> to vector<8x8x16xf32>
    %37 = vector.extract_strided_slice %30 {offsets = [2, 0, 0], sizes = [8, 8, 16], strides = [1, 1, 1]} : vector<10x10x16xf32> to vector<8x8x16xf32>
    %38 = vector.extract_strided_slice %30 {offsets = [2, 1, 0], sizes = [8, 8, 16], strides = [1, 1, 1]} : vector<10x10x16xf32> to vector<8x8x16xf32>
    %39 = vector.extract_strided_slice %30 {offsets = [2, 2, 0], sizes = [8, 8, 16], strides = [1, 1, 1]} : vector<10x10x16xf32> to vector<8x8x16xf32>
    %40 = tpu.concatenate %31, %32, %33, %34, %35, %36, %37, %38, %39 in 2 : vector<8x8x16xf32>, vector<8x8x16xf32>, vector<8x8x16xf32>, vector<8x8x16xf32>, vector<8x8x16xf32>, vector<8x8x16xf32>, vector<8x8x16xf32>, vector<8x8x16xf32>, vector<8x8x16xf32> -> vector<8x8x144xf32>
    %41 = vector.shape_cast %40 : vector<8x8x144xf32> to vector<64x144xf32>
    %cst_16 = arith.constant dense<0.000000e+00> : vector<64x16xf32>
    %42 = tpu.matmul %41, %25, %cst_16 {dimension_numbers = #tpu.dot_dimension_numbers<[1], [0], [0], [1], [0, 0, 1, 1], [], []>} : vector<64x144xf32>, vector<144x16xf32>, vector<64x16xf32> -> vector<64x16xf32>
    %43 = vector.broadcast %26 : vector<1x16xf32> to vector<64x16xf32>
    %44 = arith.addf %42, %43 : vector<64x16xf32>
    %cst_17 = arith.constant 0.000000e+00 : f32
    %45 = vector.broadcast %cst_17 : f32 to vector<64x16xf32>
    %46 = arith.maximumf %44, %45 : vector<64x16xf32>
    %47 = vector.shape_cast %46 : vector<64x16xf32> to vector<8x8x16xf32>
    %c0_18 = arith.constant 0 : index
    %c0_19 = arith.constant 0 : index
    %c0_20 = arith.constant 0 : index
    %c0_21 = arith.constant 0 : index
    %48 = vector.load %arg6[%c0_18, %c0_19, %c0_20, %c0_21] : memref<1x8x8x16xf32, #tpu.memory_space<vmem>>, vector<1x8x8x16xf32>
    %49 = vector.shape_cast %48 : vector<1x8x8x16xf32> to vector<8x8x16xf32>
    %50 = vector.shape_cast %47 : vector<8x8x16xf32> to vector<1x8x8x16xf32>
    tpu.vector_store %arg6[%c0_18, %c0_19, %c0_20, %c0_21], %50 {strides = array<i32>} : memref<1x8x8x16xf32, #tpu.memory_space<vmem>>, vector<1x8x8x16xf32>,
    %51 = vector.shape_cast %47 : vector<8x8x16xf32> to vector<4x2x8x16xf32>
    %52 = vector.extract_strided_slice %51 {offsets = [0, 0, 0, 0], sizes = [4, 1, 8, 16], strides = [1, 1, 1, 1]} : vector<4x2x8x16xf32> to vector<4x1x8x16xf32>
    %53 = vector.shape_cast %52 : vector<4x1x8x16xf32> to vector<4x8x16xf32>
    %54 = vector.extract_strided_slice %51 {offsets = [0, 1, 0, 0], sizes = [4, 1, 8, 16], strides = [1, 1, 1, 1]} : vector<4x2x8x16xf32> to vector<4x1x8x16xf32>
    %55 = vector.shape_cast %54 : vector<4x1x8x16xf32> to vector<4x8x16xf32>
    %56 = arith.maximumf %53, %55 : vector<4x8x16xf32>
    %57 = vector.extract_strided_slice %56 {offsets = [0, 0, 0], sizes = [4, 1, 16], strides = [1, 1, 1]} : vector<4x8x16xf32> to vector<4x1x16xf32>
    %58 = vector.extract_strided_slice %56 {offsets = [0, 1, 0], sizes = [4, 1, 16], strides = [1, 1, 1]} : vector<4x8x16xf32> to vector<4x1x16xf32>
    %59 = arith.maximumf %57, %58 : vector<4x1x16xf32>
    %60 = vector.extract_strided_slice %56 {offsets = [0, 2, 0], sizes = [4, 1, 16], strides = [1, 1, 1]} : vector<4x8x16xf32> to vector<4x1x16xf32>
    %61 = vector.extract_strided_slice %56 {offsets = [0, 3, 0], sizes = [4, 1, 16], strides = [1, 1, 1]} : vector<4x8x16xf32> to vector<4x1x16xf32>
    %62 = arith.maximumf %60, %61 : vector<4x1x16xf32>
    %63 = vector.extract_strided_slice %56 {offsets = [0, 4, 0], sizes = [4, 1, 16], strides = [1, 1, 1]} : vector<4x8x16xf32> to vector<4x1x16xf32>
    %64 = vector.extract_strided_slice %56 {offsets = [0, 5, 0], sizes = [4, 1, 16], strides = [1, 1, 1]} : vector<4x8x16xf32> to vector<4x1x16xf32>
    %65 = arith.maximumf %63, %64 : vector<4x1x16xf32>
    %66 = vector.extract_strided_slice %56 {offsets = [0, 6, 0], sizes = [4, 1, 16], strides = [1, 1, 1]} : vector<4x8x16xf32> to vector<4x1x16xf32>
    %67 = vector.extract_strided_slice %56 {offsets = [0, 7, 0], sizes = [4, 1, 16], strides = [1, 1, 1]} : vector<4x8x16xf32> to vector<4x1x16xf32>
    %68 = arith.maximumf %66, %67 : vector<4x1x16xf32>
    %69 = tpu.concatenate %59, %62, %65, %68 in 1 : vector<4x1x16xf32>, vector<4x1x16xf32>, vector<4x1x16xf32>, vector<4x1x16xf32> -> vector<4x4x16xf32>
    %c0_22 = arith.constant 0 : index
    %c0_23 = arith.constant 0 : index
    %c0_24 = arith.constant 0 : index
    %c0_25 = arith.constant 0 : index
    %70 = vector.load %arg7[%c0_22, %c0_23, %c0_24, %c0_25] : memref<1x4x4x16xf32, #tpu.memory_space<vmem>>, vector<1x4x4x16xf32>
    %71 = vector.shape_cast %70 : vector<1x4x4x16xf32> to vector<4x4x16xf32>
    %72 = vector.shape_cast %69 : vector<4x4x16xf32> to vector<1x4x4x16xf32>
    tpu.vector_store %arg7[%c0_22, %c0_23, %c0_24, %c0_25], %72 {strides = array<i32>} : memref<1x4x4x16xf32, #tpu.memory_space<vmem>>, vector<1x4x4x16xf32>,
    return
  }
  func.func @transform_0(%arg0: i32) -> (i32, i32, i32, i32) {
    %c0_i32 = arith.constant 0 : i32
    %c0_i32_0 = arith.constant 0 : i32
    %c0_i32_1 = arith.constant 0 : i32
    %c0_i32_2 = arith.constant 0 : i32
    return %arg0, %c0_i32, %c0_i32_0, %c0_i32_1 : i32, i32, i32, i32
  }
  func.func @transform_1(%arg0: i32) -> (i32, i32) {
    %c0_i32 = arith.constant 0 : i32
    %c0_i32_0 = arith.constant 0 : i32
    %c0_i32_1 = arith.constant 0 : i32
    return %c0_i32, %c0_i32_0 : i32, i32
  }
  func.func @transform_2(%arg0: i32) -> (i32, i32) {
    %c0_i32 = arith.constant 0 : i32
    %c0_i32_0 = arith.constant 0 : i32
    %c0_i32_1 = arith.constant 0 : i32
    return %c0_i32, %c0_i32_0 : i32, i32
  }
  func.func @transform_3(%arg0: i32) -> (i32, i32) {
    %c0_i32 = arith.constant 0 : i32
    %c0_i32_0 = arith.constant 0 : i32
    %c0_i32_1 = arith.constant 0 : i32
    return %c0_i32, %c0_i32_0 : i32, i32
  }
  func.func @transform_4(%arg0: i32) -> (i32, i32) {
    %c0_i32 = arith.constant 0 : i32
    %c0_i32_0 = arith.constant 0 : i32
    %c0_i32_1 = arith.constant 0 : i32
    return %c0_i32, %c0_i32_0 : i32, i32
  }
  func.func @transform_5(%arg0: i32) -> (i32, i32, i32, i32) {
    %c0_i32 = arith.constant 0 : i32
    %c0_i32_0 = arith.constant 0 : i32
    %c0_i32_1 = arith.constant 0 : i32
    %c0_i32_2 = arith.constant 0 : i32
    return %arg0, %c0_i32, %c0_i32_0, %c0_i32_1 : i32, i32, i32, i32
  }
  func.func @transform_6(%arg0: i32) -> (i32, i32, i32, i32) {
    %c0_i32 = arith.constant 0 : i32
    %c0_i32_0 = arith.constant 0 : i32
    %c0_i32_1 = arith.constant 0 : i32
    %c0_i32_2 = arith.constant 0 : i32
    return %arg0, %c0_i32, %c0_i32_0, %c0_i32_1 : i32, i32, i32, i32
  }
}

</mosaic_0001>

<bundles_post_ra>
// kernel: encoder_forward.3
= control target key start
LH: loop header
LB: loop body
LE: loop exit
PB: predicated region body
PF: predicated region fallthrough
CT: control target
= control target key end

     0   :  { %s2495_s0 = inlined_call_operand.vmem [shape: f32[2,8,8,8], index: 0, kind: input, shape index: {}]   ;;  %s2496_s1 = inlined_call_operand.vmem [shape: f32[72,16], index: 1, kind: input, shape index: {}]   ;;  %s2497_s2 = inlined_call_operand.vmem [shape: f32[1,16], index: 2, kind: input, shape index: {}]   ;;  %s2498_s3 = inlined_call_operand.vmem [shape: f32[144,16], index: 3, kind: input, shape index: {}]   ;;  %s2499_s4 = inlined_call_operand.vmem [shape: f32[1,16], index: 4, kind: input, shape index: {}]   ;;  %s2500_s5 = inlined_call_operand.hbm [shape: f32[2,8,8,16], index: 5, kind: output, shape index: {0}]   ;;  %s2501_s6 = inlined_call_operand.hbm [shape: f32[2,4,4,16], index: 6, kind: output, shape index: {1}]  }
   0x1   :  { %2504 = sst [smem:[#allocation8_spill]] %s2495_s0 }
   0x2   :  { %12 = vsyncpa [#allocation3], 0 }
   0x3   :  { %14 = vsyncpa [#allocation3 + $0x1], 0 }
   0x4   :  { %15 = vsyncpa [#allocation5], 0 }
   0x5   :  { %17 = vsyncpa [#allocation5 + $0x1], 0  ;;  %s1793_s21 = smov 0   ;;  %s1795_s22 = smov 0  }
   0x6   :  { %s1797_s23 = smov 0   ;;  %s1799_s24 = smov 0  }
   0x7 LB: > { %s1814_s25 = sadd.s32 4294967295, %s1742_s24   ;;  %s1407_s26 = sadd.s32 4294967294, %s1742_s24   ;;  %s1742_s24 = sphi %s1799_s24, %s2513_s24   ;;  %s1738_s23 = sphi %s1797_s23, %s2512_s23   ;;  %s1734_s22 = sphi %s1795_s22, %s2511_s22   ;;  %s1730_s21 = sphi %s1793_s21, %s2510_s21  }
   0x8   : > { %s1818_s27 = sadd.s32 1, %s1742_s24   ;;  %s140_s28 = sadd.s32 1, %s1738_s23 }
   0x9   : > { %s137_s29 = ssub.s32 %s1742_s24, %s1818_s27  ;;  %p150_p0 = scmp.ne.s32.totalorder %s1738_s23, %s1734_s22 }
   0xa   : > { %p138_p1 = scmp.eq.s32.totalorder %s137_s29, 0  ;;  %p151_p2 = scmp.eq.s32.totalorder %s1814_s25, 1 }
   0xb   : > { %p156_p3 = scmp.ne.s32.totalorder %s1734_s22, %s1730_s21  ;;  %p157_p4 = scmp.eq.s32.totalorder %s1407_s26, 1 }
   0xc   : > { %s1829_s30 = scalar_select %p138_p1, %s1738_s23, %s140_s28  }
   0xd   : > { %p1831_p5 = por %p151_p2, %p150_p0  ;;  %p1835_p6 = por %p157_p4, %p156_p3 }
   0xe   : > { %p1410_p7 = scmp.ge.s32.totalorder %s1742_s24, 1  ;;  %p221_p8 = scmp.lt.s32.totalorder %s1742_s24, 3 }
  0x10   : > { %p222_p9 = pnand %p1410_p7, %p221_p8 }
  0x11   : > { %p256_p10 = scmp.lt.s32.totalorder (!%p222_p9), %s1814_s25, 1  ;;  %s2507_s0 = sld [smem:[#allocation8_spill]] (!%p222_p9) }
  0x12   : > { %225 = sbr.rel (%p222_p9) target bundleno = 742 (0x2e6), region = 40  ;;  %s2502_s14 = smov (!%p222_p9), 8  }
  0x13   : > { %s1746_s15 = smov (!%p222_p9), 24   ;;  %s1747_s16 = smov (!%p222_p9), 48  }
  0x14   : > { %s1748_s17 = smov (!%p222_p9), 16   ;;  %s1749_s18 = smov (!%p222_p9), 32  }
  0x15   : > { %s1750_s19 = smov (!%p222_p9), 40   ;;  %s1751_s20 = smov (!%p222_p9), 56  }
  0x16   : > { %s2503_s26 = smov (!%p222_p9), 64   ;;  %s1755_s11 = smov (!%p222_p9), 112  }
  0x17   : > { %vm306_vm0 = vcmask 1040384   ;;  %v1744_v0 = vmov 0.0   ;;  %s257_s9 = scalar_select %p256_p10, %s1814_s25, 1  ;;  %vm341_vm1 = vcmask 1046528   ;;  %vm390_vm2 = vcmask 1045504   ;;  %v277_v60 = vld [vmem:[%s2496_s1 + $0x40] sm:$0xff] }
  0x18   : > { %v288_v1 = vrot.slane %v1744_v0, 7  ;;  %v276_v61 = vld [vmem:[%s2496_s1 + $0x38] sm:$0xff]  ;;  %698 = vmatpush.msra.mxu0 %v277_v60  ;;  %v275_v0 = vld [vmem:[%s2496_s1 + $0x30] sm:$0xff]  ;;  %vm591_vm3 = vcmask 64512   ;;  %vm600_vm4 = vcmask 130048   ;;  %vm609_vm5 = vcmask 195584  }
  0x19   : > { %s1439_s10 = sshll.u32 %s257_s9, 6  ;;  %vm618_vm6 = vcmask 261120   ;;  %vm627_vm7 = vcmask 326656   ;;  %vm636_vm8 = vcmask 392192   ;;  %vm645_vm9 = vcmask 457728   ;;  %s1753_s9 = smov 80  }
  0x1a   : > { %v1844_v2 = vsel %vm306_vm0, 0.0, %v288_v1  ;;  %v316_v3 = vsel %vm306_vm0, %v288_v1, 0.0  ;;  %s1851_s13 = scalar_lea.vmem %s2507_s0, %s1439_s10  ;;  %699 = vmatpush.msra.mxu0 %v276_v61  ;;  %v274_v1 = vld [vmem:[%s2496_s1 + $0x28] sm:$0xff]  ;;  %vm654_vm10 = vcmask 523264   ;;  %vm666_vm11 = vcmask 588800   ;;  %s1754_s10 = smov 96  }
  0x1b   : > { %v342_v4 = vrot.slane %v1844_v2, 1  ;;  %v343_v5 = vrot.slane %v316_v3, 1  ;;  %v261_v7 = vld [vmem:[%s1851_s13] sm:$0xff]  ;;  %v262_v8 = vld [vmem:[%s1851_s13 + $0x8] sm:$0xff]  ;;  %v391_v11 = vrot.slane %v1844_v2, 2  ;;  %v392_v12 = vrot.slane %v316_v3, 2 }
  0x1c   : > { %v289_v9 = vrot.slane %v261_v7, 7  ;;  %v290_v10 = vrot.slane %v262_v8, 7  ;;  %v263_v30 = vld [vmem:[%s1851_s13 + $0x10] sm:$0xff]  ;;  %v264_v40 = vld [vmem:[%s1851_s13 + $0x18] sm:$0xff]  ;;  %v265_v50 = vld [vmem:[%s1851_s13 + $0x20] sm:$0xff]  ;;  %700 = vmatpush.msra.mxu0 %v275_v0  ;;  %vm1063_vm12 = vcmask 654336  }
  0x1d   : > { %v1854_v6 = vsel %vm341_vm1, %v342_v4, %v343_v5  ;;  %v1874_v18 = vsel %vm390_vm2, %v391_v11, %v392_v12  ;;  %v291_v31 = vrot.slane %v263_v30, 7  ;;  %v292_v41 = vrot.slane %v264_v40, 7  ;;  %v266_v62 = vld [vmem:[%s1851_s13 + $0x28] sm:$0xff]  ;;  %v273_v7 = vld [vmem:[%s2496_s1 + $0x20] sm:$0xff]  ;;  %v271_v11 = vld [vmem:[%s2496_s1 + $0x10] sm:$0xff]  ;;  %s1441_s12 = sshll.u32 %s1814_s25, 4 }
  0x1e   : > { %366 = vrot.lane.b32.xlu0 %v1854_v6, %s2502_s14  ;;  %v1862_v13 = vsel %vm306_vm0, 0.0, %v289_v9  ;;  %v317_v14 = vsel %vm306_vm0, %v289_v9, 0.0  ;;  %v1866_v15 = vsel %vm306_vm0, 0.0, %v290_v10  ;;  %v318_v19 = vsel %vm306_vm0, %v290_v10, 0.0  ;;  %701 = vmatpush.msra.mxu0 %v274_v1  ;;  %v272_v10 = vld [vmem:[%s2496_s1 + $0x18] sm:$0xff] }
  0x1f   : > { %440 = vrot.lane.b32.xlu1 %v1862_v13, %s1746_s15  ;;  %519 = vrot.lane.b32.xlu2 %v1866_v15, %s1747_s16  ;;  %v345_v16 = vrot.slane %v1862_v13, 1  ;;  %v346_v17 = vrot.slane %v317_v14, 1  ;;  %v394_v20 = vrot.slane %v1862_v13, 2  ;;  %v395_v21 = vrot.slane %v317_v14, 2 }
  0x20   : > { %v348_v23 = vrot.slane %v1866_v15, 1  ;;  %v349_v24 = vrot.slane %v318_v19, 1  ;;  %v397_v26 = vrot.slane %v1866_v15, 2  ;;  %v398_v27 = vrot.slane %v318_v19, 2  ;;  %702 = vmatpush.msra.mxu0 %v273_v7 }
  0x21   : > { %v347_v22 = vsel %vm341_vm1, %v345_v16, %v346_v17  ;;  %v396_v25 = vsel %vm390_vm2, %v394_v20, %v395_v21  ;;  %v1897_v32 = vsel %vm306_vm0, 0.0, %v291_v31  ;;  %v319_v33 = vsel %vm306_vm0, %v291_v31, 0.0  ;;  %v270_v17 = vld [vmem:[%s2496_s1 + $0x8] sm:$0xff]  ;;  %v269_v21 = vld [vmem:[%s2496_s1] sm:$0xff] }
  0x22   : > { %v350_v28 = vsel %vm341_vm1, %v348_v23, %v349_v24  ;;  %v399_v29 = vsel %vm390_vm2, %v397_v26, %v398_v27  ;;  %v351_v34 = vrot.slane %v1897_v32, 1  ;;  %v352_v35 = vrot.slane %v319_v33, 1  ;;  %703 = vmatpush.msra.mxu0 %v272_v10 }
  0x23   : > { %v400_v36 = vrot.slane %v1897_v32, 2  ;;  %v401_v37 = vrot.slane %v319_v33, 2  ;;  %v1915_v42 = vsel %vm306_vm0, 0.0, %v292_v41  ;;  %v320_v43 = vsel %vm306_vm0, %v292_v41, 0.0 }
  0x24   : > { %v353_v38 = vsel %vm341_vm1, %v351_v34, %v352_v35  ;;  %v354_v44 = vrot.slane %v1915_v42, 1  ;;  %v355_v45 = vrot.slane %v320_v43, 1  ;;  %v403_v46 = vrot.slane %v1915_v42, 2  ;;  %704 = vmatpush.msra.mxu0 %v271_v11 }
  0x25   : > { %v402_v39 = vsel %vm390_vm2, %v400_v36, %v401_v37  ;;  %v404_v47 = vrot.slane %v320_v43, 2  ;;  %v293_v51 = vrot.slane %v265_v50, 7  ;;  %v294_v63 = vrot.slane %v266_v62, 7 }
  0x26   : > { %415 = vrot.lane.b32.xlu0 %v1874_v18, %s1748_s17  ;;  %v356_v48 = vsel %vm341_vm1, %v354_v44, %v355_v45  ;;  %705 = vmatpush.msra.mxu0 %v270_v17  ;;  %v268_v45 = vld [vmem:[%s1851_s13 + $0x38] sm:$0xff]  ;;  %vm1072_vm13 = vcmask 785408   ;;  %vm1081_vm14 = vcmask 916480   ;;  %vm1259_vm15 = vcmask 1041408  }
  0x27   : > { %468 = vrot.lane.b32.xlu1 %v347_v22, %s1749_s18  ;;  %495 = vrot.lane.b32.xlu2 %v396_v25, %s1750_s19  ;;  %v405_v49 = vsel %vm390_vm2, %v403_v46, %v404_v47  ;;  %v1934_v52 = vsel %vm306_vm0, 0.0, %v293_v51  ;;  %v321_v53 = vsel %vm306_vm0, %v293_v51, 0.0  ;;  %v1966_v3 = vsel %vm306_vm0, 0.0, %v294_v63 }
  0x28   : > { %v357_v54 = vrot.slane %v1934_v52, 1  ;;  %v358_v55 = vrot.slane %v321_v53, 1  ;;  %v406_v56 = vrot.slane %v1934_v52, 2  ;;  %v407_v57 = vrot.slane %v321_v53, 2  ;;  %706 = vmatpush.msra.mxu0 %v269_v21 }
  0x29   : > { %v322_v4 = vsel %vm306_vm0, %v294_v63, 0.0  ;;  %v360_v8 = vrot.slane %v1966_v3, 1  ;;  %v409_v12 = vrot.slane %v1966_v3, 2 }
  0x2a   : > { %v359_v58 = vsel %vm341_vm1, %v357_v54, %v358_v55  ;;  %v408_v59 = vsel %vm390_vm2, %v406_v56, %v407_v57  ;;  %v361_v9 = vrot.slane %v322_v4, 1  ;;  %v410_v14 = vrot.slane %v322_v4, 2 }
  0x2c   : > { %v362_v16 = vsel %vm341_vm1, %v360_v8, %v361_v9  ;;  %v411_v19 = vsel %vm390_vm2, %v409_v12, %v410_v14 }
  0x2e   : > { %543 = vrot.lane.b32.xlu0 %v350_v28, %s1751_s20 }
  0x2f   : > { %567 = vrot.lane.b32.xlu1 %v399_v29, %s2503_s26  ;;  %368 = vrot.lane.b32.xlu2 %v347_v22, %s2502_s14  ;;  %v267_v22 = vld [vmem:[%s1851_s13 + $0x30] sm:$0xff] }
  0x30   : > { %v295_v23 = vrot.slane %v267_v22, 7 }
  0x32   : > { %v323_v26 = vsel %vm306_vm0, %v295_v23, 0.0 }
  0x33   : > { %v413_v34 = vrot.slane %v323_v26, 2 }
  0x36   : > { %417 = vrot.lane.b32.xlu0 %v396_v25, %s1748_s17  ;;  %v2001_v25 = vsel %vm306_vm0, 0.0, %v295_v23 }
  0x37   : > { %442 = vrot.lane.b32.xlu1 %v1866_v15, %s1746_s15  ;;  %470 = vrot.lane.b32.xlu2 %v350_v28, %s1749_s18  ;;  %v412_v33 = vrot.slane %v2001_v25, 2 }
  0x3e   : > { %497 = vrot.lane.b32.xlu0 %v399_v29, %s1750_s19 }
  0x3f   : > { %521 = vrot.lane.b32.xlu1 %v1897_v32, %s1747_s16  ;;  %545 = vrot.lane.b32.xlu2 %v353_v38, %s1751_s20 }
  0x46   : > { %569 = vrot.lane.b32.xlu0 %v402_v39, %s2503_s26 }
  0x47   : > { %370 = vrot.lane.b32.xlu1 %v350_v28, %s2502_s14  ;;  %419 = vrot.lane.b32.xlu2 %v399_v29, %s1748_s17  ;;  %v363_v28 = vrot.slane %v2001_v25, 1  ;;  %v364_v29 = vrot.slane %v323_v26, 1 }
  0x49   : > { %v365_v35 = vsel %vm341_vm1, %v363_v28, %v364_v29 }
  0x4e   : > { %444 = vrot.lane.b32.xlu0 %v1897_v32, %s1746_s15 }
  0x4f   : > { %472 = vrot.lane.b32.xlu1 %v353_v38, %s1749_s18  ;;  %499 = vrot.lane.b32.xlu2 %v402_v39, %s1750_s19 }
  0x56   : > { %523 = vrot.lane.b32.xlu0 %v1915_v42, %s1747_s16 }
  0x57   : > { %547 = vrot.lane.b32.xlu1 %v356_v48, %s1751_s20  ;;  %571 = vrot.lane.b32.xlu2 %v405_v49, %s2503_s26 }
  0x5e   : > { %372 = vrot.lane.b32.xlu0 %v353_v38, %s2502_s14  ;;  %v414_v38 = vsel %vm390_vm2, %v412_v33, %v413_v34 }
  0x5f   : > { %421 = vrot.lane.b32.xlu1 %v402_v39, %s1748_s17  ;;  %446 = vrot.lane.b32.xlu2 %v1915_v42, %s1746_s15 }
  0x66   : > { %474 = vrot.lane.b32.xlu0 %v356_v48, %s1749_s18 }
  0x67   : > { %501 = vrot.lane.b32.xlu1 %v405_v49, %s1750_s19  ;;  %525 = vrot.lane.b32.xlu2 %v1934_v52, %s1747_s16 }
  0x6e   : > { %549 = vrot.lane.b32.xlu0 %v359_v58, %s1751_s20 }
  0x6f   : > { %573 = vrot.lane.b32.xlu1 %v408_v59, %s2503_s26  ;;  %374 = vrot.lane.b32.xlu2 %v356_v48, %s2502_s14  ;;  %v296_v48 = vrot.slane %v268_v45, 7 }
  0x71   : > { %v315_v55 = vsel %vm306_vm0, 0.0, %v296_v48  ;;  %v324_v56 = vsel %vm306_vm0, %v296_v48, 0.0 }
  0x72   : > { %v465_v57 = vrot.slane %v315_v55, 1  ;;  %v492_v60 = vrot.slane %v315_v55, 2  ;;  %v493_v61 = vrot.slane %v324_v56, 2 }
  0x74   : > { %v494_v4 = vsel %vm390_vm2, %v492_v60, %v493_v61 }
  0x76   : > { %423 = vrot.lane.b32.xlu0 %v405_v49, %s1748_s17 }
  0x77   : > { %448 = vrot.lane.b32.xlu1 %v1934_v52, %s1746_s15  ;;  %476 = vrot.lane.b32.xlu2 %v359_v58, %s1749_s18 }
  0x79   : > { %v1969_v5 = vpop.permute.xlu2 %519 }
  0x7e   : > { %503 = vrot.lane.b32.xlu0 %v408_v59, %s1750_s19 }
  0x7f   : > { %527 = vrot.lane.b32.xlu1 %v1966_v3, %s1747_s16  ;;  %551 = vrot.lane.b32.xlu2 %v362_v16, %s1751_s20 }
  0x81   : > { %v496_v20 = vpop.permute.xlu2 %495 }
  0x86   : > { %575 = vrot.lane.b32.xlu0 %v411_v19, %s2503_s26 }
  0x87   : > { %376 = vrot.lane.b32.xlu1 %v359_v58, %s2502_s14  ;;  %425 = vrot.lane.b32.xlu2 %v408_v59, %s1748_s17  ;;  %v466_v58 = vrot.slane %v324_v56, 1 }
  0x89   : > { %v369_v24 = vpop.permute.xlu2 %368  ;;  %v467_v63 = vsel %vm341_vm1, %v465_v57, %v466_v58 }
  0x8a   : > { %v593_v1 = vsel %vm591_vm3, %v1862_v13, %v369_v24 }
  0x8e   : > { %450 = vrot.lane.b32.xlu0 %v1966_v3, %s1746_s15 }
  0x8f   : > { %478 = vrot.lane.b32.xlu1 %v362_v16, %s1749_s18  ;;  %505 = vrot.lane.b32.xlu2 %v411_v19, %s1750_s19 }
  0x90   : > { %v367_v27 = vpop.permute.xlu0 %366 }
  0x91   : > { %v441_v30 = vpop.permute.xlu1 %440  ;;  %v471_v31 = vpop.permute.xlu2 %470  ;;  %v592_v36 = vsel %vm591_vm3, %v1844_v2, %v367_v27 }
  0x96   : > { %529 = vrot.lane.b32.xlu0 %v2001_v25, %s1747_s16 }
  0x97   : > { %553 = vrot.lane.b32.xlu1 %v365_v35, %s1751_s20  ;;  %577 = vrot.lane.b32.xlu2 %v414_v38, %s2503_s26 }
  0x98   : > { %v416_v37 = vpop.permute.xlu0 %415 }
  0x99   : > { %v601_v39 = vsel %vm600_vm4, %v592_v36, %v416_v37  ;;  %v469_v41 = vpop.permute.xlu1 %468  ;;  %v546_v43 = vpop.permute.xlu2 %545 }
  0x9a   : > { %v610_v40 = vsel %vm609_vm5, %v601_v39, %v441_v30 }
  0x9b   : > { %v619_v44 = vsel %vm618_vm6, %v610_v40, %v469_v41 }
  0x9c   : > { %v628_v46 = vsel %vm627_vm7, %v619_v44, %v496_v20 }
  0x9d   : > { %v637_v49 = vsel %vm636_vm8, %v628_v46, %v1969_v5 }
  0x9e   : > { %378 = vrot.lane.b32.xlu0 %v362_v16, %s2502_s14 }
  0x9f   : > { %427 = vrot.lane.b32.xlu1 %v411_v19, %s1748_s17  ;;  %452 = vrot.lane.b32.xlu2 %v2001_v25, %s1746_s15 }
  0xa0   : > { %v544_v47 = vpop.permute.xlu0 %543 }
  0xa1   : > { %v646_v50 = vsel %vm645_vm9, %v637_v49, %v544_v47  ;;  %v568_v51 = vpop.permute.xlu1 %567  ;;  %v420_v53 = vpop.permute.xlu2 %419 }
  0xa2   : > { %v655_v54 = vsel %vm654_vm10, %v646_v50, %v568_v51 }
  0xa3   : > { %1415 = vmatmul.msk.f32.vlgmr.msra.gmra.mxu0 %vm666_vm11, %v655_v54 }
  0xa6   : > { %480 = vrot.lane.b32.xlu0 %v365_v35, %s1749_s18 }
  0xa7   : > { %507 = vrot.lane.b32.xlu1 %v414_v38, %s1750_s19  ;;  %531 = vrot.lane.b32.xlu2 %v315_v55, %s1747_s16 }
  0xa8   : > { %v418_v59 = vpop.permute.xlu0 %417 }
  0xa9   : > { %v443_v62 = vpop.permute.xlu1 %442  ;;  %v500_v0 = vpop.permute.xlu2 %499  ;;  %v602_v5 = vsel %vm600_vm4, %v593_v1, %v418_v59 }
  0xaa   : > { %v611_v7 = vsel %vm609_vm5, %v602_v5, %v443_v62 }
  0xab   : > { %v620_v9 = vsel %vm618_vm6, %v611_v7, %v471_v31 }
  0xae   : > { %555 = vrot.lane.b32.xlu0 %v467_v63, %s1751_s20 }
  0xaf   : > { %579 = vrot.lane.b32.xlu1 %v494_v4, %s2503_s26  ;;  %380 = vrot.lane.b32.xlu2 %v365_v35, %s2502_s14 }
  0xb0   : > { %v498_v8 = vpop.permute.xlu0 %497 }
  0xb1   : > { %v522_v10 = vpop.permute.xlu1 %521  ;;  %v572_v11 = vpop.permute.xlu2 %571  ;;  %v629_v12 = vsel %vm627_vm7, %v620_v9, %v498_v8 }
  0xb2   : > { %v638_v13 = vsel %vm636_vm8, %v629_v12, %v522_v10 }
  0xb3   : > { %v647_v14 = vsel %vm645_vm9, %v638_v13, %v546_v43 }
  0xb6   : > { %429 = vrot.lane.b32.xlu0 %v414_v38, %s1748_s17 }
  0xb7   : > { %454 = vrot.lane.b32.xlu1 %v315_v55, %s1746_s15  ;;  %482 = vrot.lane.b32.xlu2 %v467_v63, %s1749_s18  ;;  %s1440_s15 = sshll.u32 %s1814_s25, 6 }
  0xb8   : > { %v570_v16 = vpop.permute.xlu0 %569  ;;  %s1291_s28 = scalar_lea.hbm %s2500_s5, %s1440_s15 }
  0xb9   : > { %v656_v17 = vsel %vm654_vm10, %v647_v14, %v570_v16  ;;  %v371_v19 = vpop.permute.xlu1 %370  ;;  %v447_v20 = vpop.permute.xlu2 %446  ;;  %s1294_s14 = sshll.u32 %s1291_s28, 4  ;;  %s1295_s14 = int_to_ptr.hbm [resolvable:$true] %s1294_s14 }
  0xba   : > { %1416 = vmatmul.msk.f32.gmra.mxu0 %vm666_vm11, %v656_v17  ;;  %v594_v21 = vsel %vm591_vm3, %v1866_v15, %v371_v19 }
  0xbb   : > { %v603_v23 = vsel %vm600_vm4, %v594_v21, %v420_v53 }
  0xbe   : > { %509 = vrot.lane.b32.xlu0 %v494_v4, %s1750_s19  ;;  %s1668_s19 = scalar_lea.hbm %s2500_s5, 128 }
  0xbf   : > { %533 = vrot.lane.b32.xlu1 %v1844_v2, %s1747_s16  ;;  %557 = vrot.lane.b32.xlu2 %v1854_v6, %s1751_s20 }
  0xc0   : > { %v445_v22 = vpop.permute.xlu0 %444 }
  0xc1   : > { %v473_v24 = vpop.permute.xlu1 %472  ;;  %v612_v26 = vsel %vm609_vm5, %v603_v23, %v445_v22  ;;  %v526_v28 = vpop.permute.xlu2 %525 }
  0xc2   : > { %v621_v27 = vsel %vm618_vm6, %v612_v26, %v473_v24 }
  0xc3   : > { %v630_v15 = vsel %vm627_vm7, %v621_v27, %v500_v0 }
  0xc6   : > { %581 = vrot.lane.b32.xlu0 %v1874_v18, %s2503_s26 }
  0xc8   : > { %v524_v29 = vpop.permute.xlu0 %523 }
  0xc9   : > { %v639_v30 = vsel %vm636_vm8, %v630_v15, %v524_v29  ;;  %v548_v31 = vpop.permute.xlu1 %547  ;;  %v375_v36 = vpop.permute.xlu2 %374 }
  0xca   : > { %v648_v33 = vsel %vm645_vm9, %v639_v30, %v548_v31  ;;  %v596_v55 = vsel %vm591_vm3, %v1915_v42, %v375_v36  ;;  %v757_v31 = vld [vmem:[%s2498_s3 + $0x88] sm:$0xff] }
  0xcb   : > { %v657_v34 = vsel %vm654_vm10, %v648_v33, %v572_v11  ;;  %1164 = vmatpush.msra.mxu2 %v757_v31 }
  0xcc   : > { %1417 = vmatmul.msk.f32.gmra.mxu0 %vm666_vm11, %v657_v34  ;;  %v2112_v34 = vld [vmem:[%s2497_s2] ss:$0 sm:$0xff] }
  0xd0   : > { %v373_v35 = vpop.permute.xlu0 %372 }
  0xd1   : > { %v422_v37 = vpop.permute.xlu1 %421  ;;  %v595_v39 = vsel %vm591_vm3, %v1897_v32, %v373_v35  ;;  %v477_v43 = vpop.permute.xlu2 %476 }
  0xd2   : > { %v604_v40 = vsel %vm600_vm4, %v595_v39, %v422_v37 }
  0xd3   : > { %v613_v44 = vsel %vm609_vm5, %v604_v40, %v447_v20 }
  0xd8   : > { %v475_v38 = vpop.permute.xlu0 %474 }
  0xd9   : > { %v502_v41 = vpop.permute.xlu1 %501  ;;  %v622_v45 = vsel %vm618_vm6, %v613_v44, %v475_v38  ;;  %v552_v32 = vpop.permute.xlu2 %551 }
  0xda   : > { %v631_v46 = vsel %vm627_vm7, %v622_v45, %v502_v41 }
  0xdb   : > { %v640_v48 = vsel %vm636_vm8, %v631_v46, %v526_v28 }
  0xe0   : > { %v550_v47 = vpop.permute.xlu0 %549 }
  0xe1   : > { %v649_v49 = vsel %vm645_vm9, %v640_v48, %v550_v47  ;;  %v574_v50 = vpop.permute.xlu1 %573  ;;  %v426_v57 = vpop.permute.xlu2 %425 }
  0xe2   : > { %v658_v51 = vsel %vm654_vm10, %v649_v49, %v574_v50 }
  0xe3   : > { %1418 = vmatmul.msk.f32.gmra.mxu0 %vm666_vm11, %v658_v51 }
  0xe8   : > { %v424_v53 = vpop.permute.xlu0 %423 }
  0xe9   : > { %v449_v54 = vpop.permute.xlu1 %448  ;;  %v605_v56 = vsel %vm600_vm4, %v596_v55, %v424_v53  ;;  %v506_v5 = vpop.permute.xlu2 %505 }
  0xea   : > { %v614_v58 = vsel %vm609_vm5, %v605_v56, %v449_v54 }
  0xeb   : > { %v623_v60 = vsel %vm618_vm6, %v614_v58, %v477_v43 }
  0xf0   : > { %v504_v59 = vpop.permute.xlu0 %503 }
  0xf1   : > { %v528_v61 = vpop.permute.xlu1 %527  ;;  %v632_v62 = vsel %vm627_vm7, %v623_v60, %v504_v59  ;;  %v578_v11 = vpop.permute.xlu2 %577 }
  0xf2   : > { %v641_v63 = vsel %vm636_vm8, %v632_v62, %v528_v61 }
  0xf3   : > { %v650_v0 = vsel %vm645_vm9, %v641_v63, %v552_v32 }
  0xf8   : > { %v576_v1 = vpop.permute.xlu0 %575 }
  0xf9   : > { %v659_v4 = vsel %vm654_vm10, %v650_v0, %v576_v1  ;;  %v377_v42 = vpop.permute.xlu1 %376 }
  0xfa   : > { %1419 = vmatmul.msk.f32.gmra.mxu0 %vm666_vm11, %v659_v4  ;;  %v597_v7 = vsel %vm591_vm3, %v1934_v52, %v377_v42  ;;  %v453_v52 = vpop.permute.xlu2 %452 }
  0xfb   : > { %v606_v9 = vsel %vm600_vm4, %v597_v7, %v426_v57 }
 0x100   : > { %v451_v8 = vpop.permute.xlu0 %450 }
 0x101   : > { %v479_v10 = vpop.permute.xlu1 %478  ;;  %v615_v12 = vsel %vm609_vm5, %v606_v9, %v451_v8 }
 0x102   : > { %v624_v13 = vsel %vm618_vm6, %v615_v12, %v479_v10  ;;  %v532_v24 = vpop.permute.xlu2 %531 }
 0x103   : > { %v633_v16 = vsel %vm627_vm7, %v624_v13, %v506_v5 }
 0x108   : > { %v530_v14 = vpop.permute.xlu0 %529 }
 0x109   : > { %v642_v17 = vsel %vm636_vm8, %v633_v16, %v530_v14  ;;  %v554_v19 = vpop.permute.xlu1 %553 }
 0x10a   : > { %v651_v20 = vsel %vm645_vm9, %v642_v17, %v554_v19  ;;  %v381_v36 = vpop.permute.xlu2 %380 }
 0x10b   : > { %v660_v21 = vsel %vm654_vm10, %v651_v20, %v578_v11  ;;  %v599_v55 = vsel %vm591_vm3, %v2001_v25, %v381_v36 }
 0x10c   : > { %1420 = vmatmul.msk.f32.gmra.mxu0 %vm666_vm11, %v660_v21 }
 0x110   : > { %v379_v22 = vpop.permute.xlu0 %378 }
 0x111   : > { %v428_v23 = vpop.permute.xlu1 %427  ;;  %v598_v27 = vsel %vm591_vm3, %v1966_v3, %v379_v22  ;;  %v756_v3 = vld [vmem:[%s2498_s3 + $0x80] sm:$0xff] }
 0x112   : > { %v607_v28 = vsel %vm600_vm4, %v598_v27, %v428_v23  ;;  %1165 = vmatpush.msra.mxu2 %v756_v3  ;;  %v483_v54 = vpop.permute.xlu2 %482 }
 0x113   : > { %v616_v15 = vsel %vm609_vm5, %v607_v28, %v453_v52 }
 0x118   : > { %v481_v26 = vpop.permute.xlu0 %480 }
 0x119   : > { %v508_v29 = vpop.permute.xlu1 %507  ;;  %v625_v30 = vsel %vm618_vm6, %v616_v15, %v481_v26 }
 0x11a   : > { %v634_v33 = vsel %vm627_vm7, %v625_v30, %v508_v29  ;;  %v558_v4 = vpop.permute.xlu2 %557 }
 0x11b   : > { %v643_v37 = vsel %vm636_vm8, %v634_v33, %v532_v24 }
 0x120   : > { %v556_v35 = vpop.permute.xlu0 %555  ;;  %v708_v38 = vpop.f32.mrf.mxu0 }
 0x121   : > { %v652_v39 = vsel %vm645_vm9, %v643_v37, %v556_v35  ;;  %v709_v40 = vadd.f32 %v2112_v34, %v708_v38  ;;  %v580_v41 = vpop.permute.xlu1 %579 }
 0x122   : > { %v661_v43 = vsel %vm654_vm10, %v652_v39, %v580_v41 }
 0x123   : > { %v732_v44 = vmax.f32 %v709_v40, 0.0  ;;  %1421 = vmatmul.msk.f32.gmra.mxu0 %vm666_vm11, %v661_v43 }
 0x125   : > { %v767_v45 = vrot.slane %v732_v44, 7 }
 0x127   : > { %v2123_v47 = vsel %vm306_vm0, 0.0, %v767_v45  ;;  %v791_v48 = vsel %vm306_vm0, %v767_v45, 0.0 }
 0x128   : > { %v430_v46 = vpop.permute.xlu0 %429  ;;  %v813_v49 = vrot.slane %v2123_v47, 1  ;;  %v814_v50 = vrot.slane %v791_v48, 1  ;;  %v858_v51 = vrot.slane %v2123_v47, 2  ;;  %v859_v32 = vrot.slane %v791_v48, 2 }
 0x129   : > { %v455_v53 = vpop.permute.xlu1 %454  ;;  %v608_v60 = vsel %vm600_vm4, %v599_v55, %v430_v46 }
 0x12a   : > { %v860_v56 = vsel %vm390_vm2, %v858_v51, %v859_v32  ;;  %v815_v57 = vsel %vm341_vm1, %v813_v49, %v814_v50  ;;  %v617_v61 = vsel %vm609_vm5, %v608_v60, %v455_v53 }
 0x12b   : > { %v1521_v58 = vpack.i.bf16 %v860_v56, %v1874_v18  ;;  %v1516_v59 = vpack.i.bf16 %v815_v57, %v1854_v6  ;;  %v626_v63 = vsel %vm618_vm6, %v617_v61, %v483_v54 }
 0x12d   : > { %1522 = vrot.lane.b32.xlu2 %v1521_v58, %s1749_s18  ;;  %1517 = vrot.lane.b32.xlu1 %v1516_v59, %s1748_s17 }
 0x130   : > { %v510_v62 = vpop.permute.xlu0 %509 }
 0x131   : > { %v534_v25 = vpop.permute.xlu1 %533  ;;  %v635_v0 = vsel %vm627_vm7, %v626_v63, %v510_v62 }
 0x132   : > { %v644_v1 = vsel %vm636_vm8, %v635_v0, %v534_v25 }
 0x133   : > { %v653_v42 = vsel %vm645_vm9, %v644_v1, %v558_v4  ;;  %v755_v4 = vld [vmem:[%s2498_s3 + $0x78] sm:$0xff] }
 0x134   : > { %1109 = vmatpush.msra.mxu1 %v755_v4  ;;  %1442 = vmatpush.msra.mxu3 %v755_v4 }
 0x137   : > { %v711_v5 = vpop.f32.mrf.mxu0 }
 0x138   : > { %v712_v7 = vadd.f32 %v2112_v34, %v711_v5  ;;  %v582_v8 = vpop.permute.xlu0 %581  ;;  %v754_v5 = vld [vmem:[%s2498_s3 + $0x70] sm:$0xff] }
 0x139   : > { %v662_v9 = vsel %vm654_vm10, %v653_v42, %v582_v8  ;;  %1110 = vmatpush.msra.mxu1 %v754_v5  ;;  %1443 = vmatpush.msra.mxu3 %v754_v5 }
 0x13a   : > { %v733_v10 = vmax.f32 %v712_v7, 0.0  ;;  %1422 = vmatmul.msk.f32.gmra.mxu0 %vm666_vm11, %v662_v9  ;;  %v753_v7 = vld [vmem:[%s2498_s3 + $0x68] sm:$0xff] }
 0x13b   : > { %1111 = vmatpush.msra.mxu1 %v753_v7  ;;  %1444 = vmatpush.msra.mxu3 %v753_v7 }
 0x13c   : > { %v768_v11 = vrot.slane %v733_v10, 7 }
 0x13e   : > { %v2146_v12 = vsel %vm306_vm0, 0.0, %v768_v11  ;;  %v792_v13 = vsel %vm306_vm0, %v768_v11, 0.0 }
 0x13f   : > { %v816_v14 = vrot.slane %v2146_v12, 1  ;;  %v817_v16 = vrot.slane %v792_v13, 1  ;;  %v862_v17 = vrot.slane %v792_v13, 2  ;;  %v1526_v19 = vpack.i.bf16 %v2146_v12, %v2123_v47 }
 0x140   : > { %v861_v20 = vrot.slane %v2146_v12, 2 }
 0x141   : > { %1527 = vrot.lane.b32.xlu0 %v1526_v19, %s1747_s16  ;;  %v818_v21 = vsel %vm341_vm1, %v816_v14, %v817_v16  ;;  %v752_v19 = vld [vmem:[%s2498_s3 + $0x60] sm:$0xff] }
 0x142   : > { %v863_v52 = vsel %vm390_vm2, %v861_v20, %v862_v17  ;;  %v1531_v22 = vpack.i.bf16 %v818_v21, %v815_v57  ;;  %1112 = vmatpush.msra.mxu1 %v752_v19  ;;  %1445 = vmatpush.msra.mxu3 %v752_v19 }
 0x143   : > { %1423 = vmatmul.msk.f32.vlgmr.msra.gmra.mxu2 %vm600_vm4, %v863_v52  ;;  %v1536_v23 = vpack.i.bf16 %v863_v52, %v860_v56 }
 0x144   : > { %1532 = vrot.lane.b32.xlu1 %v1531_v22, %s2503_s26  ;;  %v751_v22 = vld [vmem:[%s2498_s3 + $0x58] sm:$0xff] }
 0x145   : > { %1537 = vrot.lane.b32.xlu2 %v1536_v23, %s1753_s9  ;;  %1113 = vmatpush.msra.mxu1 %v751_v22  ;;  %v750_v23 = vld [vmem:[%s2498_s3 + $0x50] sm:$0xff] }
 0x146   : > { %1446 = vmatpush.msra.mxu3 %v751_v22 }
 0x147   : > { %1114 = vmatpush.msra.mxu1 %v750_v23 }
 0x148   : > { %1447 = vmatpush.msra.mxu3 %v750_v23 }
 0x149   : > { %v714_v24 = vpop.f32.mrf.mxu0 }
 0x14a   : > { %v715_v26 = vadd.f32 %v2112_v34, %v714_v24  ;;  %v749_v24 = vld [vmem:[%s2498_s3 + $0x48] sm:$0xff] }
 0x14b   : > { %1115 = vmatpush.msra.mxu1 %v749_v24  ;;  %1448 = vmatpush.msra.mxu3 %v749_v24 }
 0x14c   : > { %v734_v27 = vmax.f32 %v715_v26, 0.0  ;;  %v748_v26 = vld [vmem:[%s2498_s3 + $0x40] sm:$0xff] }
 0x14d   : > { %1116 = vmatpush.msra.mxu1 %v748_v26  ;;  %1449 = vmatpush.msra.mxu3 %v748_v26 }
 0x14e   : > { %v769_v28 = vrot.slane %v734_v27, 7  ;;  %v747_v27 = vld [vmem:[%s2498_s3 + $0x38] sm:$0xff] }
 0x14f   : > { %1117 = vmatpush.msra.mxu1 %v747_v27  ;;  %1450 = vmatpush.msra.mxu3 %v747_v27 }
 0x150   : > { %v2161_v29 = vsel %vm306_vm0, 0.0, %v769_v28  ;;  %v793_v15 = vsel %vm306_vm0, %v769_v28, 0.0  ;;  %v746_v28 = vld [vmem:[%s2498_s3 + $0x30] sm:$0xff] }
 0x151   : > { %v819_v30 = vrot.slane %v2161_v29, 1  ;;  %v820_v31 = vrot.slane %v793_v15, 1  ;;  %v865_v33 = vrot.slane %v793_v15, 2  ;;  %v1541_v3 = vpack.i.bf16 %v2161_v29, %v2146_v12  ;;  %1118 = vmatpush.msra.mxu1 %v746_v28  ;;  %1451 = vmatpush.msra.mxu3 %v746_v28 }
 0x152   : > { %v864_v35 = vrot.slane %v2161_v29, 2 }
 0x153   : > { %1542 = vrot.lane.b32.xlu0 %v1541_v3, %s1754_s10  ;;  %v821_v36 = vsel %vm341_vm1, %v819_v30, %v820_v31  ;;  %v745_v31 = vld [vmem:[%s2498_s3 + $0x28] sm:$0xff]  ;;  %v744_v3 = vld [vmem:[%s2498_s3 + $0x20] sm:$0xff] }
 0x154   : > { %v866_v37 = vsel %vm390_vm2, %v864_v35, %v865_v33  ;;  %v1546_v38 = vpack.i.bf16 %v821_v36, %v818_v21  ;;  %1119 = vmatpush.msra.mxu1 %v745_v31  ;;  %1452 = vmatpush.msra.mxu3 %v745_v31  ;;  %v743_v35 = vld [vmem:[%s2498_s3 + $0x18] sm:$0xff] }
 0x155   : > { %1424 = vmatmul.msk.f32.gmra.mxu2 %vm600_vm4, %v866_v37 }
 0x156   : > { %1547 = vrot.lane.b32.xlu1 %v1546_v38, %s1755_s11  ;;  %1120 = vmatpush.msra.mxu1 %v744_v3 }
 0x157   : > { %1453 = vmatpush.msra.mxu3 %v744_v3 }
 0x158   : > { %1121 = vmatpush.msra.mxu1 %v743_v35 }
 0x159   : > { %1454 = vmatpush.msra.mxu3 %v743_v35 }
 0x160   : > { %v717_v39 = vpop.f32.mrf.mxu0 }
 0x161   : > { %v718_v40 = vadd.f32 %v2112_v34, %v717_v39  ;;  %v742_v39 = vld [vmem:[%s2498_s3 + $0x10] sm:$0xff] }
 0x162   : > { %1122 = vmatpush.msra.mxu1 %v742_v39  ;;  %1455 = vmatpush.msra.mxu3 %v742_v39 }
 0x163   : > { %v735_v41 = vmax.f32 %v718_v40, 0.0 }
 0x165   : > { %v770_v43 = vrot.slane %v735_v41, 7 }
 0x167   : > { %v2175_v44 = vsel %vm306_vm0, 0.0, %v770_v43  ;;  %v2178_v45 = vsel %vm306_vm0, %v770_v43, 0.0 }
 0x168   : > { %v868_v46 = vrot.slane %v2178_v45, 2  ;;  %v867_v48 = vrot.slane %v2175_v44, 2  ;;  %v823_v38 = vrot.slane %v2178_v45, 1 }
 0x16a   : > { %v2183_v49 = vsel %vm390_vm2, %v867_v48, %v868_v46 }
 0x16b   : > { %1425 = vmatmul.msk.f32.gmra.mxu2 %vm600_vm4, %v2183_v49 }
 0x177   : > { %v720_v50 = vpop.f32.mrf.mxu0 }
 0x178   : > { %v721_v51 = vadd.f32 %v2112_v34, %v720_v50 }
 0x17a   : > { %v736_v32 = vmax.f32 %v721_v51, 0.0  ;;  %v741_v51 = vld [vmem:[%s2498_s3 + $0x8] sm:$0xff] }
 0x17b   : > { %1123 = vmatpush.msra.mxu1 %v741_v51  ;;  %1456 = vmatpush.msra.mxu3 %v741_v51 }
 0x17c   : > { %v771_v53 = vrot.slane %v736_v32, 7 }
 0x17e   : > { %v2189_v54 = vsel %vm306_vm0, 0.0, %v771_v53  ;;  %v795_v55 = vsel %vm306_vm0, %v771_v53, 0.0 }
 0x17f   : > { %v825_v56 = vrot.slane %v2189_v54, 1  ;;  %v826_v57 = vrot.slane %v795_v55, 1  ;;  %v871_v58 = vrot.slane %v795_v55, 2  ;;  %v870_v59 = vrot.slane %v2189_v54, 2  ;;  %v740_v55 = vld [vmem:[%s2498_s3] sm:$0xff] }
 0x180   : > { %1124 = vmatpush.msra.mxu1 %v740_v55  ;;  %1457 = vmatpush.msra.mxu3 %v740_v55 }
 0x181   : > { %v2195_v60 = vsel %vm390_vm2, %v870_v59, %v871_v58  ;;  %v2198_v61 = vsel %vm341_vm1, %v825_v56, %v826_v57 }
 0x182   : > { %1426 = vmatmul.msk.f32.gmra.mxu2 %vm600_vm4, %v2195_v60  ;;  %v1556_v62 = vpack.i.bf16 %v863_v52, %v2195_v60  ;;  %v1551_v63 = vpack.i.bf16 %v818_v21, %v2198_v61 }
 0x184   : > { %1557 = vrot.lane.b32.xlu0 %v1556_v62, %s1749_s18  ;;  %1552 = vrot.lane.b32.xlu2 %v1551_v63, %s1748_s17 }
 0x189   : > { %v723_v25 = vpop.f32.mrf.mxu0 }
 0x18a   : > { %v724_v0 = vadd.f32 %v2112_v34, %v723_v25 }
 0x18c   : > { %v737_v1 = vmax.f32 %v724_v0, 0.0 }
 0x18e   : > { %v772_v42 = vrot.slane %v737_v1, 7  ;;  %v1523_v1 = vpop.permute.xlu2 %1522 }
 0x190   : > { %v2217_v8 = vsel %vm306_vm0, 0.0, %v772_v42  ;;  %v796_v9 = vsel %vm306_vm0, %v772_v42, 0.0 }
 0x191   : > { %v828_v10 = vrot.slane %v2217_v8, 1  ;;  %v829_v11 = vrot.slane %v796_v9, 1  ;;  %v874_v13 = vrot.slane %v796_v9, 2  ;;  %v1561_v14 = vpack.i.bf16 %v2161_v29, %v2217_v8 }
 0x192   : > { %v873_v16 = vrot.slane %v2217_v8, 2 }
 0x193   : > { %1562 = vrot.lane.b32.xlu1 %v1561_v14, %s1747_s16  ;;  %v2226_v17 = vsel %vm341_vm1, %v828_v10, %v829_v11 }
 0x194   : > { %v875_v20 = vsel %vm390_vm2, %v873_v16, %v874_v13  ;;  %v1566_v21 = vpack.i.bf16 %v821_v36, %v2226_v17 }
 0x195   : > { %1427 = vmatmul.msk.f32.gmra.mxu2 %vm600_vm4, %v875_v20  ;;  %v1571_v52 = vpack.i.bf16 %v866_v37, %v875_v20  ;;  %v822_v37 = vrot.slane %v2175_v44, 1 }
 0x196   : > { %1567 = vrot.lane.b32.xlu2 %v1566_v21, %s2503_s26 }
 0x197   : > { %1572 = vrot.lane.b32.xlu0 %v1571_v52, %s1753_s9  ;;  %v824_v32 = vsel %vm341_vm1, %v822_v37, %v823_v38  ;;  %v1525_v38 = vunpack.i.h.bf16 %v1523_v1 }
 0x19b   : > { %1582 = vrot.lane.b32.xlu1 %v1571_v52, %s1749_s18  ;;  %v1524_v52 = vunpack.i.l.bf16 %v1523_v1 }
 0x19f   : > { %1577 = vrot.lane.b32.xlu0 %v1566_v21, %s1748_s17  ;;  %v1518_v63 = vpop.permute.xlu1 %1517  ;;  %v1538_v23 = vpop.permute.xlu2 %1537 }
 0x1a0   : > { %v726_v15 = vpop.f32.mrf.mxu0  ;;  %v1519_v4 = vunpack.i.l.bf16 %v1518_v63  ;;  %v1520_v26 = vunpack.i.h.bf16 %v1518_v63 }
 0x1a1   : > { %v727_v30 = vadd.f32 %v2112_v34, %v726_v15 }
 0x1a2   : > { %v1031_v20 = vsel %vm600_vm4, %v1844_v2, %v1519_v4  ;;  %v1032_v3 = vsel %vm600_vm4, %v2123_v47, %v1520_v26 }
 0x1a3   : > { %v738_v33 = vmax.f32 %v727_v30, 0.0  ;;  %v1039_v24 = vsel %vm618_vm6, %v1031_v20, %v1524_v52  ;;  %v1539_v30 = vunpack.i.l.bf16 %v1538_v23  ;;  %v1040_v47 = vsel %vm618_vm6, %v1032_v3, %v1525_v38 }
 0x1a5   : > { %v773_v36 = vrot.slane %v738_v33, 7 }
 0x1a7   : > { %v2272_v40 = vsel %vm306_vm0, 0.0, %v773_v36  ;;  %v797_v41 = vsel %vm306_vm0, %v773_v36, 0.0 }
 0x1a8   : > { %v831_v43 = vrot.slane %v2272_v40, 1  ;;  %v832_v46 = vrot.slane %v797_v41, 1  ;;  %v877_v48 = vrot.slane %v797_v41, 2  ;;  %v1591_v50 = vpack.i.bf16 %v2175_v44, %v2272_v40 }
 0x1a9   : > { %v876_v45 = vrot.slane %v2272_v40, 2 }
 0x1aa   : > { %1592 = vrot.lane.b32.xlu2 %v1591_v50, %s1747_s16  ;;  %v833_v53 = vsel %vm341_vm1, %v831_v43, %v832_v46  ;;  %1587 = vrot.lane.b32.xlu1 %v1591_v50, %s1754_s10 }
 0x1ab   : > { %v878_v56 = vsel %vm390_vm2, %v876_v45, %v877_v48  ;;  %v1601_v57 = vpack.i.bf16 %v824_v32, %v833_v53 }
 0x1ac   : > { %1428 = vmatmul.msk.f32.gmra.mxu2 %vm600_vm4, %v878_v56  ;;  %v1606_v58 = vpack.i.bf16 %v2183_v49, %v878_v56 }
 0x1ad   : > { %1602 = vrot.lane.b32.xlu0 %v1601_v57, %s2503_s26 }
 0x1b2   : > { %1597 = vrot.lane.b32.xlu2 %v1601_v57, %s1755_s11  ;;  %1607 = vrot.lane.b32.xlu1 %v1606_v58, %s1753_s9 }
 0x1b3   : > { %v1528_v42 = vpop.permute.xlu0 %1527 }
 0x1b4   : > { %v1529_v21 = vunpack.i.l.bf16 %v1528_v42  ;;  %v1530_v35 = vunpack.i.h.bf16 %v1528_v42 }
 0x1b6   : > { %v1533_v13 = vpop.permute.xlu1 %1532  ;;  %v1047_v27 = vsel %vm636_vm8, %v1039_v24, %v1529_v21  ;;  %v1048_v43 = vsel %vm636_vm8, %v1040_v47, %v1530_v35 }
 0x1b7   : > { %v729_v59 = vpop.f32.mrf.mxu0  ;;  %v1534_v22 = vunpack.i.l.bf16 %v1533_v13  ;;  %v1535_v39 = vunpack.i.h.bf16 %v1533_v13 }
 0x1b8   : > { %v730_v62 = vadd.f32 %v2112_v34, %v729_v59 }
 0x1b9   : > { %v1056_v46 = vsel %vm654_vm10, %v1048_v43, %v1535_v39 }
 0x1ba   : > { %v739_v25 = vmax.f32 %v730_v62, 0.0  ;;  %1617 = vrot.lane.b32.xlu2 %v1606_v58, %s1749_s18  ;;  %1612 = vrot.lane.b32.xlu1 %v1601_v57, %s1748_s17  ;;  %s2389_s18 = sand.u32 1, %s1734_s22   ;;  %s1662_s17 = sshra.s32 %s1295_s14, 4  ;;  %s1663_s17 = int_to_ptr.hbm [resolvable:$true] %s1662_s17 }
 0x1bb   : > { %p1669_p0 = scmp.lt.s32.totalorder %s1663_s17, %s2500_s5 }
 0x1bc   : > { %v774_v0 = vrot.slane %v739_v25, 7 }
 0x1be   : > { %v790_v5 = vsel %vm306_vm0, 0.0, %v774_v0  ;;  %v798_v49 = vsel %vm306_vm0, %v774_v0, 0.0 }
 0x1bf   : > { %v929_v7 = vrot.slane %v790_v5, 1  ;;  %v930_v9 = vrot.slane %v798_v49, 1  ;;  %v957_v10 = vrot.slane %v798_v49, 2  ;;  %v1626_v11 = vpack.i.bf16 %v2189_v54, %v790_v5 }
 0x1c0   : > { %v956_v34 = vrot.slane %v790_v5, 2 }
 0x1c1   : > { %1627 = vrot.lane.b32.xlu0 %v1626_v11, %s1747_s16  ;;  %v931_v14 = vsel %vm341_vm1, %v929_v7, %v930_v9  ;;  %vm1264_vm1 = vcmask 1042432   ;;  %s1275_s16 = scalar_lea.sflag [#allocation3], %s2389_s18 }
 0x1c2   : > { %v958_v16 = vsel %vm390_vm2, %v956_v34, %v957_v10  ;;  %v1636_v19 = vpack.i.bf16 %v2198_v61, %v931_v14  ;;  %1622 = vrot.lane.b32.xlu2 %v1626_v11, %s1754_s10  ;;  %v1055_v61 = vsel %vm654_vm10, %v1047_v27, %v1534_v22  ;;  %vm1269_vm2 = vcmask 125952  }
 0x1c3   : > { %1429 = vmatmul.msk.f32.gmra.mxu2 %vm600_vm4, %v958_v16  ;;  %v1641_v31 = vpack.i.bf16 %v2195_v60, %v958_v16  ;;  %v1064_v37 = vsel %vm1063_vm12, %v1055_v61, %v1539_v30 }
 0x1c4   : > { %1637 = vrot.lane.b32.xlu1 %v1636_v19, %s2503_s26 }
 0x1c5   : > { %v1543_v28 = vpop.permute.xlu0 %1542 }
 0x1c6   : > { %v1544_v15 = vunpack.i.l.bf16 %v1543_v28  ;;  %v1545_v48 = vunpack.i.h.bf16 %v1543_v28 }
 0x1c8   : > { %v1548_v33 = vpop.permute.xlu1 %1547  ;;  %v1073_v41 = vsel %vm1072_vm13, %v1064_v37, %v1544_v15 }
 0x1c9   : > { %1632 = vrot.lane.b32.xlu0 %v1636_v19, %s1755_s11  ;;  %v1549_v36 = vunpack.i.l.bf16 %v1548_v33  ;;  %v1550_v50 = vunpack.i.h.bf16 %v1548_v33 }
 0x1ca   : > { %1642 = vrot.lane.b32.xlu2 %v1641_v31, %s1753_s9  ;;  %s1411_s9 = sshll.u32 %s2389_s18, 6 }
 0x1cb   : > { %1430 = vmatmul.msk.f32.gmra.mxu2 %vm600_vm4, %v1874_v18  ;;  %v1082_v60 = vsel %vm1081_vm14, %v1073_v41, %v1549_v36  ;;  %v1540_v18 = vunpack.i.h.bf16 %v1538_v23 }
 0x1cc   : > { %1021 = vrot.lane.b32.xlu1 %v1854_v6, %s1755_s11  ;;  %1125 = vmatmul.f32.vlgmr.msra.gmra.mxu1 %v1082_v60 }
 0x1cd   : > { %v1065_v45 = vsel %vm1063_vm12, %v1056_v46, %v1540_v18 }
 0x1ce   : > { %v1074_v6 = vsel %vm1072_vm13, %v1065_v45, %v1545_v48 }
 0x1cf   : > { %v1083_v51 = vsel %vm1081_vm14, %v1074_v6, %v1550_v50 }
 0x1d1   : > { %997 = vrot.lane.b32.xlu0 %v1844_v2, %s1754_s10 }
 0x1d2   : > { %991 = vrot.lane.b32.xlu2 %v2217_v8, %s1754_s10  ;;  %s2395_s10 = scalar_lea.vmem [#allocation2], %s1411_s9  ;;  %s1664_s9 = scalar_lea.hbm %s1663_s17, 64 }
 0x1d3   : > { %s1292_s29 = sshll.u32 %s2395_s10, 4  ;;  %p1665_p11 = scmp.ne.s32.totalorder %s1663_s17, %s1664_s9  ;;  %s1293_s29 = int_to_ptr.vmem [resolvable:$true] %s1292_s29 }
 0x1d4   : > { %1128 = vmatmul.f32.gmra.mxu1 %v1083_v51  ;;  %p1670_p1 = scmp.lt.s32.totalorder %s1668_s19, %s1664_s9 }
 0x1d5   : > { %p1666_p12 = pnand %p1665_p11, %p1831_p5 }
 0x1d6   : > { %p1671_p2 = por %p1670_p1, %p1669_p0 }
 0x1d7   : > { %p1667_p13 = pneg %p1666_p12 }
 0x1d9   : > { %1015 = vrot.lane.b32.xlu0 %v2226_v17, %s1755_s11  ;;  %s1412_s11 = sshll.u32 %s2389_s18, 4  ;;  %p1672_p3 = pnand %p1671_p2, %p1667_p13 }
 0x1da   : > { %s2406_s13 = scalar_lea.vmem [#allocation4], %s1412_s11 }
 0x1de   : > { %v1553_v32 = vpop.permute.xlu2 %1552 }
 0x1df   : > { %v1555_v58 = vunpack.i.h.bf16 %v1553_v32  ;;  %v1554_v2 = vunpack.i.l.bf16 %v1553_v32 }
 0x1e1   : > { %v1033_v1 = vsel %vm600_vm4, %v2146_v12, %v1555_v58  ;;  %v1036_v4 = vsel %vm600_vm4, %v2189_v54, %v1554_v2 }
 0x1f0   : > { %v1568_v53 = vpop.permute.xlu2 %1567 }
 0x1f1   : > { %v1570_v9 = vunpack.i.h.bf16 %v1568_v53  ;;  %v1569_v10 = vunpack.i.l.bf16 %v1568_v53 }
 0x1f6   : > { %v1558_v56 = vpop.permute.xlu0 %1557 }
 0x1f7   : > { %v1560_v59 = vunpack.i.h.bf16 %v1558_v56  ;;  %v1559_v62 = vunpack.i.l.bf16 %v1558_v56 }
 0x1f9   : > { %v1041_v17 = vsel %vm618_vm6, %v1033_v1, %v1560_v59  ;;  %v1044_v49 = vsel %vm618_vm6, %v1036_v4, %v1559_v62 }
 0x204   : > { %v1593_v57 = vpop.permute.xlu2 %1592 }
 0x205   : > { %v1563_v55 = vpop.permute.xlu1 %1562  ;;  %v1595_v48 = vunpack.i.h.bf16 %v1593_v57  ;;  %v1594_v18 = vunpack.i.l.bf16 %v1593_v57 }
 0x206   : > { %v1565_v63 = vunpack.i.h.bf16 %v1563_v55  ;;  %v1564_v25 = vunpack.i.l.bf16 %v1563_v55 }
 0x208   : > { %v1049_v42 = vsel %vm636_vm8, %v1041_v17, %v1565_v63  ;;  %v1052_v7 = vsel %vm636_vm8, %v1044_v49, %v1564_v25 }
 0x209   : > { %v1573_v5 = vpop.permute.xlu0 %1572  ;;  %v1057_v14 = vsel %vm654_vm10, %v1049_v42, %v1570_v9  ;;  %v1060_v12 = vsel %vm654_vm10, %v1052_v7, %v1569_v10 }
 0x20a   : > { %v1575_v11 = vunpack.i.h.bf16 %v1573_v5  ;;  %v1574_v34 = vunpack.i.l.bf16 %v1573_v5 }
 0x20c   : > { %v1598_v13 = vpop.permute.xlu2 %1597  ;;  %v1066_v52 = vsel %vm1063_vm12, %v1057_v14, %v1575_v11  ;;  %v1069_v22 = vsel %vm1063_vm12, %v1060_v12, %v1574_v34 }
 0x20d   : > { %v1583_v0 = vpop.permute.xlu1 %1582  ;;  %v1600_v20 = vunpack.i.h.bf16 %v1598_v13  ;;  %v1599_v21 = vunpack.i.l.bf16 %v1598_v13 }
 0x20e   : > { %v1585_v37 = vunpack.i.h.bf16 %v1583_v0  ;;  %v1584_v38 = vunpack.i.l.bf16 %v1583_v0 }
 0x211   : > { %v1578_v26 = vpop.permute.xlu0 %1577 }
 0x212   : > { %v1580_v31 = vunpack.i.h.bf16 %v1578_v26  ;;  %v1579_v33 = vunpack.i.l.bf16 %v1578_v26 }
 0x214   : > { %v1618_v15 = vpop.permute.xlu2 %1617  ;;  %v1034_v35 = vsel %vm600_vm4, %v2161_v29, %v1580_v31  ;;  %v1037_v36 = vsel %vm600_vm4, %v2217_v8, %v1579_v33  ;;  %v1167_v33 = vpop.f32.mrf.mxu2 }
 0x215   : > { %v1042_v60 = vsel %vm618_vm6, %v1034_v35, %v1585_v37  ;;  %v1045_v47 = vsel %vm618_vm6, %v1037_v36, %v1584_v38  ;;  %v1619_v55 = vunpack.i.l.bf16 %v1618_v15  ;;  %v1620_v13 = vunpack.i.h.bf16 %v1618_v15 }
 0x216   : > { %v1050_v29 = vsel %vm636_vm8, %v1042_v60, %v1595_v48  ;;  %v1053_v51 = vsel %vm636_vm8, %v1045_v47, %v1594_v18 }
 0x21c   : > { %v1588_v16 = vpop.permute.xlu1 %1587  ;;  %v1623_v41 = vpop.permute.xlu2 %1622 }
 0x21d   : > { %v1590_v54 = vunpack.i.h.bf16 %v1588_v16  ;;  %v1589_v19 = vunpack.i.l.bf16 %v1588_v16  ;;  %v1625_v2 = vunpack.i.h.bf16 %v1623_v41  ;;  %v1624_v59 = vunpack.i.l.bf16 %v1623_v41  ;;  %v1170_v38 = vpop.f32.mrf.mxu2 }
 0x21f   : > { %v1075_v23 = vsel %vm1072_vm13, %v1066_v52, %v1590_v54  ;;  %v1078_v24 = vsel %vm1072_vm13, %v1069_v22, %v1589_v19  ;;  %v1603_v30 = vpop.permute.xlu0 %1602 }
 0x220   : > { %v1084_v27 = vsel %vm1081_vm14, %v1075_v23, %v1600_v20  ;;  %v1087_v28 = vsel %vm1081_vm14, %v1078_v24, %v1599_v21  ;;  %v1605_v43 = vunpack.i.h.bf16 %v1603_v30  ;;  %v1604_v46 = vunpack.i.l.bf16 %v1603_v30  ;;  %v2385_v24 = vld [vmem:[%s2499_s4] ss:$0 sm:$0xff] }
 0x221   : > { %1131 = vmatmul.f32.gmra.mxu1 %v1084_v27  ;;  %1140 = vmatmul.f32.vlgmr.msra.gmra.mxu3 %v1087_v28 }
 0x222   : > { %v1058_v8 = vsel %vm654_vm10, %v1050_v29, %v1605_v43  ;;  %v1061_v32 = vsel %vm654_vm10, %v1053_v51, %v1604_v46 }
 0x224   : > { %v1608_v61 = vpop.permute.xlu1 %1607  ;;  %v1643_v49 = vpop.permute.xlu2 %1642 }
 0x225   : > { %v1610_v50 = vunpack.i.h.bf16 %v1608_v61  ;;  %v1609_v45 = vunpack.i.l.bf16 %v1608_v61  ;;  %v1644_v14 = vunpack.i.l.bf16 %v1643_v49  ;;  %v1645_v23 = vunpack.i.h.bf16 %v1643_v49  ;;  %v1173_v29 = vpop.f32.mrf.mxu2 }
 0x227   : > { %v1067_v56 = vsel %vm1063_vm12, %v1058_v8, %v1610_v50  ;;  %v1070_v58 = vsel %vm1063_vm12, %v1061_v32, %v1609_v45 }
 0x228   : > { %v1076_v5 = vsel %vm1072_vm13, %v1067_v56, %v1625_v2  ;;  %v1079_v17 = vsel %vm1072_vm13, %v1070_v58, %v1624_v59 }
 0x22c   : > { %v1613_v3 = vpop.permute.xlu1 %1612  ;;  %v992_v27 = vpop.permute.xlu2 %991 }
 0x22d   : > { %v1614_v6 = vunpack.i.l.bf16 %v1613_v3  ;;  %v1615_v25 = vunpack.i.h.bf16 %v1613_v3  ;;  %v1176_v51 = vpop.f32.mrf.mxu2 }
 0x22f   : > { %v1038_v57 = vsel %vm600_vm4, %v2272_v40, %v1614_v6  ;;  %v1035_v40 = vsel %vm600_vm4, %v2175_v44, %v1615_v25 }
 0x230   : > { %v1046_v42 = vsel %vm618_vm6, %v1038_v57, %v1619_v55  ;;  %v1043_v54 = vsel %vm618_vm6, %v1035_v40, %v1620_v13 }
 0x233   : > { %v1628_v39 = vpop.permute.xlu0 %1627 }
 0x234   : > { %v1629_v62 = vunpack.i.l.bf16 %v1628_v39  ;;  %v1630_v11 = vunpack.i.h.bf16 %v1628_v39 }
 0x235   : > { %v1179_v8 = vpop.f32.mrf.mxu2 }
 0x236   : > { %v1638_v53 = vpop.permute.xlu1 %1637  ;;  %v1054_v10 = vsel %vm636_vm8, %v1046_v42, %v1629_v62  ;;  %v1051_v21 = vsel %vm636_vm8, %v1043_v54, %v1630_v11 }
 0x237   : > { %v1639_v0 = vunpack.i.l.bf16 %v1638_v53  ;;  %v1640_v12 = vunpack.i.h.bf16 %v1638_v53 }
 0x239   : > { %v1062_v34 = vsel %vm654_vm10, %v1054_v10, %v1639_v0  ;;  %v1059_v22 = vsel %vm654_vm10, %v1051_v21, %v1640_v12 }
 0x23a   : > { %v1071_v20 = vsel %vm1063_vm12, %v1062_v34, %v1644_v14  ;;  %v1068_v26 = vsel %vm1063_vm12, %v1059_v22, %v1645_v23 }
 0x23b   : > { %v1633_v63 = vpop.permute.xlu0 %1632  ;;  %v1077_v15 = vsel %vm1072_vm13, %v1068_v26, %v992_v27 }
 0x23c   : > { %v1635_v1 = vunpack.i.h.bf16 %v1633_v63  ;;  %v1634_v4 = vunpack.i.l.bf16 %v1633_v63 }
 0x23d   : > { %v1182_v59 = vpop.f32.mrf.mxu2 }
 0x23e   : > { %v1085_v7 = vsel %vm1081_vm14, %v1076_v5, %v1635_v1  ;;  %v1088_v9 = vsel %vm1081_vm14, %v1079_v17, %v1634_v4  ;;  %v1022_v16 = vpop.permute.xlu1 %1021 }
 0x23f   : > { %1134 = vmatmul.f32.gmra.mxu1 %v1085_v7  ;;  %1143 = vmatmul.f32.gmra.mxu3 %v1088_v9 }
 0x243   : > { %v998_v19 = vpop.permute.xlu0 %997 }
 0x244   : > { %v1080_v52 = vsel %vm1072_vm13, %v1071_v20, %v998_v19 }
 0x245   : > { %v1089_v44 = vsel %vm1081_vm14, %v1080_v52, %v1022_v16 }
 0x246   : > { %v1185_v1 = vpop.f32.mrf.mxu2 }
 0x247   : > { %1146 = vmatmul.f32.gmra.mxu3 %v1089_v44 }
 0x249   : > { %v1126_v61 = vpop.f32.mrf.mxu1 }
 0x24a   : > { %v1127_v30 = vadd.f32 %v2385_v24, %v1126_v61 }
 0x24b   : > { %v1016_v28 = vpop.permute.xlu0 %1015 }
 0x24c   : > { %v1086_v31 = vsel %vm1081_vm14, %v1077_v15, %v1016_v28  ;;  %v1168_v3 = vadd.f32 %v1167_v33, %v1127_v30 }
 0x24d   : > { %1137 = vmatmul.f32.gmra.mxu1 %v1086_v31 }
 0x24e   : > { %v1191_v35 = vmax.f32 %v1168_v3, 0.0  ;;  %v1188_v34 = vpop.f32.mrf.mxu2 }
 0x250   : > { %1199 = vst.msk [vmem:[%s2395_s10] sm:$0xff] %vm600_vm4, %v1191_v35 }
 0x251   : > { %v1129_v36 = vpop.f32.mrf.mxu1 }
 0x252   : > { %v1130_v37 = vadd.f32 %v2385_v24, %v1129_v36 }
 0x254   : > { %v1171_v39 = vadd.f32 %v1170_v38, %v1130_v37 }
 0x256   : > { %v1192_v41 = vmax.f32 %v1171_v39, 0.0 }
 0x258   : > { %1200 = vst.msk [vmem:[%s2395_s10 + $0x8] sm:$0xff] %vm600_vm4, %v1192_v41  ;;  %v1207_v60 = vmax.f32 %v1191_v35, %v1192_v41 }
 0x25a   : > { %v1215_v47 = vrot.slane %v1207_v60, 1 }
 0x25c   : > { %v1223_v43 = vmax.f32 %v1207_v60, %v1215_v47 }
 0x25e   : > { %v1231_v46 = vrot.slane %v1223_v43, 1  ;;  %v1239_v48 = vrot.slane %v1223_v43, 2  ;;  %v1247_v18 = vrot.slane %v1223_v43, 3 }
 0x260   : > { %v1255_v50 = vsel %vm306_vm0, %v1223_v43, %v1231_v46 }
 0x261   : > { %v1260_v45 = vsel %vm1259_vm15, %v1255_v50, %v1239_v48 }
 0x262   : > { %v1265_v6 = vsel %vm1264_vm1, %v1260_v45, %v1247_v18 }
 0x263   : > { %1270 = vst.msk [vmem:[%s2406_s13] sm:$0xf] %vm1269_vm2, %v1265_v6 }
 0x29e   : > { %v1132_v32 = vpop.f32.mrf.mxu1 }
 0x29f   : > { %v1133_v53 = vadd.f32 %v2385_v24, %v1132_v32 }
 0x2a1   : > { %v1174_v55 = vadd.f32 %v1173_v29, %v1133_v53 }
 0x2a3   : > { %v1193_v56 = vmax.f32 %v1174_v55, 0.0 }
 0x2a4   : > { %v1141_v58 = vpop.f32.mrf.mxu3 }
 0x2a5   : > { %1201 = vst.msk [vmem:[%s2395_s10 + $0x10] sm:$0xff] %vm600_vm4, %v1193_v56  ;;  %v1142_v2 = vadd.f32 %v2385_v24, %v1141_v58 }
 0x2a7   : > { %v1183_v57 = vadd.f32 %v1182_v59, %v1142_v2 }
 0x2a9   : > { %v1196_v62 = vmax.f32 %v1183_v57, 0.0 }
 0x2ab   : > { %1204 = vst.msk [vmem:[%s2395_s10 + $0x28] sm:$0xff] %vm600_vm4, %v1196_v62 }
 0x2bc   : > { %v1135_v63 = vpop.f32.mrf.mxu1 }
 0x2bd   : > { %v1136_v25 = vadd.f32 %v2385_v24, %v1135_v63 }
 0x2bf   : > { %v1177_v0 = vadd.f32 %v1176_v51, %v1136_v25 }
 0x2c1   : > { %v1194_v4 = vmax.f32 %v1177_v0, 0.0 }
 0x2c2   : > { %v1144_v5 = vpop.f32.mrf.mxu3 }
 0x2c3   : > { %1202 = vst.msk [vmem:[%s2395_s10 + $0x18] sm:$0xff] %vm600_vm4, %v1194_v4  ;;  %v1208_v17 = vmax.f32 %v1193_v56, %v1194_v4  ;;  %v1145_v49 = vadd.f32 %v2385_v24, %v1144_v5 }
 0x2c5   : > { %v1216_v42 = vrot.slane %v1208_v17, 1  ;;  %v1186_v7 = vadd.f32 %v1185_v1, %v1145_v49 }
 0x2c7   : > { %v1224_v9 = vmax.f32 %v1208_v17, %v1216_v42  ;;  %v1197_v10 = vmax.f32 %v1186_v7, 0.0 }
 0x2c9   : > { %v1232_v40 = vrot.slane %v1224_v9, 1  ;;  %v1240_v11 = vrot.slane %v1224_v9, 2  ;;  %1205 = vst.msk [vmem:[%s2395_s10 + $0x30] sm:$0xff] %vm600_vm4, %v1197_v10  ;;  %v1248_v12 = vrot.slane %v1224_v9, 3 }
 0x2ca   : > { %v1138_v13 = vpop.f32.mrf.mxu1  ;;  %v1147_v14 = vpop.f32.mrf.mxu3 }
 0x2cb   : > { %v1256_v16 = vsel %vm306_vm0, %v1224_v9, %v1232_v40  ;;  %v1139_v54 = vadd.f32 %v2385_v24, %v1138_v13  ;;  %v1148_v19 = vadd.f32 %v2385_v24, %v1147_v14 }
 0x2cc   : > { %v1261_v20 = vsel %vm1259_vm15, %v1256_v16, %v1240_v11 }
 0x2cd   : > { %v1266_v21 = vsel %vm1264_vm1, %v1261_v20, %v1248_v12  ;;  %v1180_v52 = vadd.f32 %v1179_v8, %v1139_v54  ;;  %v1189_v22 = vadd.f32 %v1188_v34, %v1148_v19 }
 0x2ce   : > { %1271 = vst.msk [vmem:[%s2406_s13 + $0x4] sm:$0xf] %vm1269_vm2, %v1266_v21 }
 0x2cf   : > { %v1195_v44 = vmax.f32 %v1180_v52, 0.0  ;;  %v1198_v23 = vmax.f32 %v1189_v22, 0.0 }
 0x2d1   : > { %1203 = vst.msk [vmem:[%s2395_s10 + $0x20] sm:$0xff] %vm600_vm4, %v1195_v44  ;;  %v1209_v24 = vmax.f32 %v1195_v44, %v1196_v62  ;;  %v1210_v26 = vmax.f32 %v1197_v10, %v1198_v23 }
 0x2d2   : > { %1206 = vst.msk [vmem:[%s2395_s10 + $0x38] sm:$0xff] %vm600_vm4, %v1198_v23 }
 0x2d3   : > { %v1217_v27 = vrot.slane %v1209_v24, 1  ;;  %v1218_v28 = vrot.slane %v1210_v26, 1 }
 0x2d4   : > { %1675 = shalt.err (!%p1672_p3)
}
 0x2d5   : > { %s1756_s25 = smov 128   ;;  %s2508_s10 = smov 8   ;;  %v1225_v61 = vmax.f32 %v1209_v24, %v1217_v27  ;;  %v1226_v15 = vmax.f32 %v1210_v26, %v1218_v28 }
 0x2d6   : > { %1458 = dma.vmem_to_hbm [thread:$0]  (%p1831_p5), %s1293_s29, 1024, %s1295_s14, %s1275_s16, %s1756_s25, %s1756_s25, %s2508_s10  }
 0x2d7   : > { %s1308_s11 = scalar_lea.hbm %s2501_s6, %s1441_s12  ;;  %v1233_v30 = vrot.slane %v1225_v61, 1  ;;  %v1241_v31 = vrot.slane %v1225_v61, 2  ;;  %v1234_v33 = vrot.slane %v1226_v15, 1  ;;  %s1309_s17 = sshll.u32 %s2406_s13, 4  ;;  %v1242_v3 = vrot.slane %v1226_v15, 2  ;;  %s1310_s17 = int_to_ptr.vmem [resolvable:$true] %s1309_s17 }
 0x2d8   : > { %s1311_s9 = sshll.u32 %s1308_s11, 4  ;;  %v1249_v35 = vrot.slane %v1225_v61, 3  ;;  %v1250_v37 = vrot.slane %v1226_v15, 3  ;;  %s1280_s0 = scalar_lea.sflag [#allocation5], %s2389_s18  ;;  %s1312_s9 = int_to_ptr.hbm [resolvable:$true] %s1311_s9 }
 0x2d9   : > { %v1257_v36 = vsel %vm306_vm0, %v1225_v61, %v1233_v30  ;;  %v1258_v38 = vsel %vm306_vm0, %v1226_v15, %v1234_v33  ;;  %s1690_s26 = sshra.s32 %s1312_s9, 4  ;;  %s1696_s16 = scalar_lea.hbm %s2501_s6, 32  ;;  %s1691_s26 = int_to_ptr.hbm [resolvable:$true] %s1690_s26 }
 0x2da   : > { %v1262_v39 = vsel %vm1259_vm15, %v1257_v36, %v1241_v31  ;;  %v1263_v41 = vsel %vm1259_vm15, %v1258_v38, %v1242_v3  ;;  %s1692_s29 = scalar_lea.hbm %s1691_s26, 16  ;;  %p1697_p9 = scmp.lt.s32.totalorder %s1691_s26, %s2501_s6 }
 0x2db   : > { %v1267_v60 = vsel %vm1264_vm1, %v1262_v39, %v1249_v35  ;;  %v1268_v47 = vsel %vm1264_vm1, %v1263_v41, %v1250_v37  ;;  %p1693_p4 = scmp.ne.s32.totalorder %s1691_s26, %s1692_s29  ;;  %p1698_p10 = scmp.lt.s32.totalorder %s1696_s16, %s1692_s29 }
 0x2dc   : > { %1272 = vst.msk [vmem:[%s2406_s13 + $0x8] sm:$0xf] %vm1269_vm2, %v1267_v60 }
 0x2dd   : > { %1273 = vst.msk [vmem:[%s2406_s13 + $0xc] sm:$0xf] %vm1269_vm2, %v1268_v47  ;;  %p1694_p7 = pnand %p1693_p4, %p1831_p5  ;;  %p1699_p11 = por %p1698_p10, %p1697_p9 }
 0x2df   : > { %p1695_p8 = pneg %p1694_p7 }
 0x2e1   : > { %p1700_p12 = pnand %p1699_p11, %p1695_p8 }
 0x2e3   : > { %1703 = shalt.err (!%p1700_p12)
}
 0x2e4   : > { %s1757_s18 = smov 4   ;;  %s2509_s13 = smov 64  }
 0x2e5   : > { %1459 = dma.vmem_to_hbm [thread:$0]  (%p1831_p5), %s1310_s17, 256, %s1312_s9, %s1280_s0, %s2509_s13, %s2509_s13, %s1757_s18  }
 0x2e6 PF: > { %p1469_p13 = scmp.ge.s32.totalorder %s1742_s24, 2  ;;  %s1326_s20 = sand.u32 1, %s1730_s21  }
 0x2e7   : > { %s1327_s28 = scalar_lea.sflag [#allocation3], %s1326_s20 }
 0x2e8   : > { %p1463_p0 = pnand %p1469_p13, %p1835_p6 }
 0x2ea   : > { %p1464_p1 = pneg %p1463_p0 }
 0x2ec   : > { %1721 = dma.done.wait (%p1464_p1), %s1327_s28, 1024  }
 0x2ed   : > { %1723 = vsyncadd (%p1464_p1), %s1327_s28, 4294966272  ;;  %s1337_s25 = scalar_lea.sflag [#allocation5], %s1326_s20 }
 0x2ee   : > { %1725 = dma.done.wait (%p1464_p1), %s1337_s25, 256  }
 0x2ef   : > { %1727 = vsyncadd (%p1464_p1), %s1337_s25, 4294967040  ;;  %p20_p5 = scmp.ge.s32.totalorder %s1818_s27, 4   ;;  %s2510_s21 = smov %s1734_s22 }
 0x2f0   : > { %s2511_s22 = smov %s1738_s23  ;;  %s2512_s23 = smov %s1829_s30 }
 0x2f1   : > { %s2513_s24 = smov %s1818_s27  ;;  %22 = sbr.rel (!%p20_p5) target bundleno = 7 (0x7), region = 92 }
 0x2f6   :  { %1343 = vsyncpa [#allocation3], 1 }
 0x2f7   :  { %1345 = vsyncpa [#allocation3 + $0x1], 1 }
 0x2f8   :  { %1346 = vsyncpa [#allocation5], 1 }
 0x2f9   :  { %1348 = vsyncpa [#allocation5 + $0x1], 1 }

// kernel: encoder_forward.2
= control target key start
LH: loop header
LB: loop body
LE: loop exit
PB: predicated region body
PF: predicated region fallthrough
CT: control target
= control target key end

     0   :  { %s4200_s21 = smov 0   ;;  %s8309_s0 = inlined_call_operand.vmem [shape: f32[2,16,16,4], index: 0, kind: input, shape index: {}]   ;;  %s8310_s1 = inlined_call_operand.vmem [shape: f32[36,8], index: 1, kind: input, shape index: {}]   ;;  %s8311_s2 = inlined_call_operand.vmem [shape: f32[1,8], index: 2, kind: input, shape index: {}]   ;;  %s8312_s3 = inlined_call_operand.vmem [shape: f32[72,8], index: 3, kind: input, shape index: {}]   ;;  %s8313_s4 = inlined_call_operand.vmem [shape: f32[1,8], index: 4, kind: input, shape index: {}]   ;;  %s8314_s5 = inlined_call_operand.vmem [shape: f32[2,16,16,8], index: 5, kind: output, shape index: {0}]   ;;  %s8315_s6 = inlined_call_operand.vmem [shape: f32[2,8,8,8], index: 6, kind: output, shape index: {1}]  }
   0x1 LB: > { %s3986_s22 = sadd.s32 4294967295, %s4150_s21   ;;  %p3990_p0 = scmp.ge.s32.totalorder %s4150_s21, 1  ;;  %s4150_s21 = sphi %s4200_s21, %s17_s21  }
   0x2   : > { %p215_p1 = scmp.lt.s32.totalorder %s4150_s21, 3 }
   0x4   : > { %p216_p2 = pnand %p3990_p0, %p215_p1 }
   0x6   : > { %219 = sbr.rel (%p216_p2) target bundleno = 1874 (0x752), region = 40 }
   0xb   : > { %vm336_vm0 = vcmask 1040384   ;;  %p250_p3 = scmp.lt.s32.totalorder %s3986_s22, 1  ;;  %v4152_v0 = vmov 0.0   ;;  %vm502_vm1 = vcmask 1046528   ;;  %s4153_s27 = smov 4   ;;  %vm679_vm2 = vcmask 1045504  }
   0xc   : > { %v4208_v1 = vrot.slane %v4152_v0, 7  ;;  %s4154_s28 = smov 8   ;;  %s4155_s29 = smov 12   ;;  %vm1808_vm3 = vcmask 1043456   ;;  %vm1444_vm4 = vcmask 31744   ;;  %vm1510_vm5 = vcmask 97280  }
   0xd   : > { %s9447_s22 = smov (!%p250_p3, %s3986_s22), 1  ;;  %s4156_s30 = smov 16   ;;  %vm1477_vm6 = vcmask 64512   ;;  %vm1543_vm7 = vcmask 130048   ;;  %vm1609_vm8 = vcmask 195584   ;;  %vm1576_vm9 = vcmask 162816  }
   0xe   : > { %8557 = vst [vmem:[#allocation2_spill] sm:$0xff] %v4208_v1  ;;  %v4214_v2 = vsel %vm336_vm0, 0.0, %v4208_v1  ;;  %v4218_v3 = vsel %vm336_vm0, %v4208_v1, 0.0  ;;  %v504_v4 = vrot.slane %v4208_v1, 1  ;;  %s4064_s23 = sshll.u32 %s9447_s22, 8  ;;  %s4157_s7 = smov 20  }
   0xf   : > { %8558 = vst [vmem:[#allocation3_spill] sm:$0xff] %v4214_v2  ;;  %v503_v5 = vrot.slane %v4214_v2, 1  ;;  %v506_v6 = vrot.slane %v4218_v3, 1  ;;  %s4229_s26 = scalar_lea.vmem %s8309_s0, %s4064_s23  ;;  %s4158_s8 = smov 24   ;;  %vm1642_vm10 = vcmask 228352   ;;  %vm1711_vm11 = vcmask 293888  }
  0x10   : > { %v267_v9 = vld [vmem:[%s4229_s26 + $0x10] sm:$0xff]  ;;  %v268_v10 = vld [vmem:[%s4229_s26 + $0x18] sm:$0xff]  ;;  %v265_v11 = vld [vmem:[%s4229_s26] sm:$0xff]  ;;  %s4159_s9 = smov 28   ;;  %s4160_s10 = smov 32   ;;  %vm1675_vm12 = vcmask 261120  }
  0x11   : > { %v4232_v7 = vsel %vm502_vm1, %v503_v5, %v504_v4  ;;  %v4235_v8 = vsel %vm502_vm1, %v504_v4, %v506_v6  ;;  %v342_v13 = vrot.slane %v267_v9, 7  ;;  %v343_v14 = vrot.slane %v268_v10, 7  ;;  %v266_v15 = vld [vmem:[%s4229_s26 + $0x8] sm:$0xff]  ;;  %v269_v17 = vld [vmem:[%s4229_s26 + $0x20] sm:$0xff]  ;;  %v271_v36 = vld [vmem:[%s4229_s26 + $0x30] sm:$0xff] }
  0x12   : > { %8559 = vst [vmem:[#allocation4_spill] sm:$0xff] %v4232_v7  ;;  %v4242_v12 = vpack.i.bf16 %v4235_v8, %v4232_v7  ;;  %v339_v16 = vrot.slane %v265_v11, 7  ;;  %v270_v18 = vld [vmem:[%s4229_s26 + $0x28] sm:$0xff]  ;;  %v340_v19 = vrot.slane %v266_v15, 7  ;;  %v345_v20 = vrot.slane %v269_v17, 7  ;;  %v272_v37 = vld [vmem:[%s4229_s26 + $0x38] sm:$0xff] }
  0x13   : > { %8560 = vst [vmem:[#allocation5_spill] sm:$0xff] %v4235_v8  ;;  %v346_v21 = vrot.slane %v270_v18, 7  ;;  %v4250_v22 = vsel %vm336_vm0, %v342_v13, %v343_v14  ;;  %v4253_v23 = vsel %vm336_vm0, %v343_v14, 0.0  ;;  %v4259_v25 = vsel %vm336_vm0, 0.0, %v342_v13  ;;  %v273_v46 = vld [vmem:[%s4229_s26 + $0x40] sm:$0xff]  ;;  %v274_v47 = vld [vmem:[%s4229_s26 + $0x48] sm:$0xff] }
  0x14   : > { %8561 = vst [vmem:[#allocation6_spill] sm:$0xff] %v4242_v12  ;;  %4103 = vrot.lane.b32.xlu0 %v4242_v12, %s4153_s27  ;;  %v4256_v24 = vsel %vm336_vm0, 0.0, %v339_v16  ;;  %v514_v26 = vrot.slane %v4250_v22, 1  ;;  %v516_v27 = vrot.slane %v4253_v23, 1  ;;  %v4264_v28 = vsel %vm336_vm0, %v339_v16, %v340_v19  ;;  %v275_v55 = vld [vmem:[%s4229_s26 + $0x50] sm:$0xff]  ;;  %v276_v57 = vld [vmem:[%s4229_s26 + $0x58] sm:$0xff] }
  0x15   : > { %8562 = vst [vmem:[#allocation7_spill] sm:$0xff] %v4256_v24  ;;  %v4267_v29 = vsel %vm336_vm0, %v340_v19, 0.0  ;;  %v509_v30 = vrot.slane %v4264_v28, 1  ;;  %v508_v32 = vrot.slane %v4256_v24, 1  ;;  %v4273_v33 = vsel %vm336_vm0, %v345_v20, %v346_v21  ;;  %v277_v14 = vld [vmem:[%s4229_s26 + $0x60] sm:$0xff]  ;;  %v278_v16 = vld [vmem:[%s4229_s26 + $0x68] sm:$0xff] }
  0x16   : > { %8563 = vst [vmem:[#allocation8_spill] sm:$0xff] %v4264_v28  ;;  %v511_v31 = vrot.slane %v4267_v29, 1  ;;  %v4276_v34 = vsel %vm502_vm1, %v514_v26, %v516_v27  ;;  %v4279_v35 = vsel %vm336_vm0, 0.0, %v345_v20  ;;  %v519_v41 = vrot.slane %v4273_v33, 1  ;;  %v288_v7 = vld [vmem:[%s4229_s26 + $0xb8] sm:$0xff] }
  0x17   : > { %8564 = vst [vmem:[#allocation9_spill] sm:$0xff] %v4276_v34  ;;  %593 = vrot.lane.b32.xlu2 %v4276_v34, %s4153_s27  ;;  %v4291_v39 = vsel %vm502_vm1, %v508_v32, %v509_v30  ;;  %v518_v40 = vrot.slane %v4279_v35, 1  ;;  %v513_v42 = vrot.slane %v4259_v25, 1  ;;  %v4297_v43 = vsel %vm336_vm0, %v346_v21, 0.0 }
  0x18   : > { %v4286_v38 = vsel %vm502_vm1, %v509_v30, %v511_v31  ;;  %v348_v44 = vrot.slane %v271_v36, 7  ;;  %v349_v45 = vrot.slane %v272_v37, 7  ;;  %v521_v50 = vrot.slane %v4297_v43, 1  ;;  %v279_v30 = vld [vmem:[%s4229_s26 + $0x70] sm:$0xff]  ;;  %v280_v31 = vld [vmem:[%s4229_s26 + $0x78] sm:$0xff] }
  0x19   : > { %589 = vrot.lane.b32.xlu1 %v4286_v38, %s4153_s27  ;;  %v4304_v48 = vsel %vm502_vm1, %v518_v40, %v519_v41  ;;  %v4307_v49 = vsel %vm502_vm1, %v513_v42, %v514_v26  ;;  %v351_v53 = vrot.slane %v273_v46, 7  ;;  %v352_v54 = vrot.slane %v274_v47, 7  ;;  %v281_v46 = vld [vmem:[%s4229_s26 + $0x80] sm:$0xff]  ;;  %v282_v47 = vld [vmem:[%s4229_s26 + $0x88] sm:$0xff] }
  0x1a   : > { %v4311_v51 = vsel %vm336_vm0, %v348_v44, %v349_v45  ;;  %v4314_v52 = vsel %vm336_vm0, %v349_v45, 0.0  ;;  %v4318_v56 = vsel %vm336_vm0, 0.0, %v348_v44  ;;  %v4326_v58 = vsel %vm502_vm1, %v519_v41, %v521_v50 }
  0x1b   : > { %8565 = vst [vmem:[#allocation10_spill] sm:$0xff] %v4311_v51  ;;  %v524_v59 = vrot.slane %v4311_v51, 1  ;;  %v526_v60 = vrot.slane %v4314_v52, 1  ;;  %v354_v61 = vrot.slane %v275_v55, 7  ;;  %v523_v62 = vrot.slane %v4318_v56, 1 }
  0x1c   : > { %587 = vrot.lane.b32.xlu0 %v4291_v39, %s4153_s27  ;;  %8566 = vst [vmem:[#allocation11_spill] sm:$0xff] %v4326_v58  ;;  %v4332_v63 = vsel %vm336_vm0, %v351_v53, %v352_v54  ;;  %v4335_v0 = vsel %vm336_vm0, 0.0, %v351_v53  ;;  %v355_v4 = vrot.slane %v276_v57, 7  ;;  %v4355_v15 = vsel %vm336_vm0, %v352_v54, 0.0 }
  0x1d   : > { %8567 = vst [vmem:[#allocation12_spill] sm:$0xff] %v4332_v63  ;;  %v4340_v5 = vsel %vm502_vm1, %v524_v59, %v526_v60  ;;  %v528_v6 = vrot.slane %v4335_v0, 1  ;;  %v529_v9 = vrot.slane %v4332_v63, 1  ;;  %v4345_v10 = vsel %vm502_vm1, %v523_v62, %v524_v59 }
  0x1e   : > { %8568 = vst [vmem:[#allocation13_spill] sm:$0xff] %v4335_v0  ;;  %v4348_v11 = vsel %vm336_vm0, %v354_v61, %v355_v4  ;;  %v4351_v13 = vsel %vm336_vm0, 0.0, %v354_v61  ;;  %v357_v20 = vrot.slane %v277_v14, 7  ;;  %v531_v21 = vrot.slane %v4355_v15, 1 }
  0x1f   : > { %595 = vrot.lane.b32.xlu2 %v4304_v48, %s4153_s27  ;;  %8569 = vst [vmem:[#allocation14_spill] sm:$0xff] %v4340_v5  ;;  %v4363_v17 = vsel %vm502_vm1, %v528_v6, %v529_v9  ;;  %v533_v18 = vrot.slane %v4351_v13, 1  ;;  %v534_v19 = vrot.slane %v4348_v11, 1  ;;  %v4369_v26 = vsel %vm336_vm0, %v355_v4, 0.0 }
  0x20   : > { %8570 = vst [vmem:[#allocation15_spill] sm:$0xff] %v4345_v10  ;;  %v358_v27 = vrot.slane %v278_v16, 7  ;;  %v536_v36 = vrot.slane %v4369_v26, 1  ;;  %v4380_v37 = vsel %vm336_vm0, 0.0, %v357_v20  ;;  %v360_v40 = vrot.slane %v279_v30, 7 }
  0x21   : > { %591 = vrot.lane.b32.xlu1 %v4307_v49, %s4153_s27  ;;  %8571 = vst [vmem:[#allocation16_spill] sm:$0xff] %v4348_v11  ;;  %v4376_v32 = vsel %vm502_vm1, %v533_v18, %v534_v19  ;;  %v4383_v41 = vsel %vm502_vm1, %v529_v9, %v531_v21  ;;  %v361_v45 = vrot.slane %v280_v31, 7  ;;  %v538_v55 = vrot.slane %v4380_v37, 1  ;;  %v283_v9 = vld [vmem:[%s4229_s26 + $0x90] sm:$0xff] }
  0x22   : > { %8572 = vst [vmem:[#allocation17_spill] sm:$0xff] %v4351_v13  ;;  %v4386_v42 = vsel %vm336_vm0, %v357_v20, %v358_v27  ;;  %v4389_v44 = vsel %vm336_vm0, %v358_v27, 0.0  ;;  %v4398_v50 = vsel %vm502_vm1, %v534_v19, %v536_v36  ;;  %v4407_v59 = vsel %vm336_vm0, 0.0, %v360_v40  ;;  %v284_v19 = vld [vmem:[%s4229_s26 + $0x98] sm:$0xff] }
  0x23   : > { %8573 = vst [vmem:[#allocation18_spill] sm:$0xff] %v4363_v17  ;;  %v539_v53 = vrot.slane %v4386_v42, 1  ;;  %v541_v54 = vrot.slane %v4389_v44, 1  ;;  %v4404_v57 = vsel %vm336_vm0, %v360_v40, %v361_v45  ;;  %v363_v60 = vrot.slane %v281_v46, 7  ;;  %v285_v46 = vld [vmem:[%s4229_s26 + $0xa0] sm:$0xff] }
  0x24   : > { %597 = vrot.lane.b32.xlu0 %v4326_v58, %s4153_s27  ;;  %8574 = vst [vmem:[#allocation19_spill] sm:$0xff] %v4376_v32  ;;  %v364_v61 = vrot.slane %v282_v47, 7  ;;  %v543_v4 = vrot.slane %v4407_v59, 1  ;;  %v544_v6 = vrot.slane %v4404_v57, 1  ;;  %v4428_v20 = vsel %vm336_vm0, %v361_v45, 0.0  ;;  %v286_v47 = vld [vmem:[%s4229_s26 + $0xa8] sm:$0xff] }
  0x25   : > { %8575 = vst [vmem:[#allocation20_spill] sm:$0xff] %v4380_v37  ;;  %v4412_v62 = vsel %vm502_vm1, %v539_v53, %v541_v54  ;;  %v4418_v14 = vsel %vm502_vm1, %v538_v55, %v539_v53  ;;  %v4424_v18 = vsel %vm336_vm0, 0.0, %v363_v60  ;;  %v366_v21 = vrot.slane %v283_v9, 7 }
  0x26   : > { %8576 = vst [vmem:[#allocation21_spill] sm:$0xff] %v4383_v41  ;;  %v4421_v16 = vsel %vm336_vm0, %v363_v60, %v364_v61  ;;  %v4435_v27 = vsel %vm502_vm1, %v543_v4, %v544_v6  ;;  %v548_v30 = vrot.slane %v4424_v18, 1  ;;  %v367_v36 = vrot.slane %v284_v19, 7  ;;  %v287_v19 = vld [vmem:[%s4229_s26 + $0xb0] sm:$0xff] }
  0x27   : > { %601 = vrot.lane.b32.xlu2 %v4340_v5, %s4153_s27  ;;  %8577 = vst [vmem:[#allocation22_spill] sm:$0xff] %v4386_v42  ;;  %v549_v31 = vrot.slane %v4421_v16, 1  ;;  %v546_v40 = vrot.slane %v4428_v20, 1  ;;  %v4441_v45 = vsel %vm336_vm0, %v364_v61, 0.0  ;;  %v369_v61 = vrot.slane %v285_v46, 7 }
  0x28   : > { %8578 = vst [vmem:[#allocation23_spill] sm:$0xff] %v4398_v50  ;;  %v551_v54 = vrot.slane %v4441_v45, 1  ;;  %v4452_v55 = vsel %vm336_vm0, %v366_v21, %v367_v36  ;;  %v4455_v60 = vsel %vm336_vm0, %v367_v36, 0.0  ;;  %v370_v9 = vrot.slane %v286_v47, 7 }
  0x29   : > { %599 = vrot.lane.b32.xlu1 %v4345_v10, %s4153_s27  ;;  %8579 = vst [vmem:[#allocation24_spill] sm:$0xff] %v4407_v59  ;;  %v4448_v53 = vsel %vm502_vm1, %v548_v30, %v549_v31  ;;  %v4458_v4 = vsel %vm502_vm1, %v544_v6, %v546_v40  ;;  %v4462_v8 = vsel %vm336_vm0, 0.0, %v366_v21  ;;  %v554_v30 = vrot.slane %v4452_v55, 1  ;;  %v294_v10 = vld [vmem:[%s4229_s26 + $0xe8] sm:$0xff] }
  0x2a   : > { %8580 = vst [vmem:[#allocation25_spill] sm:$0xff] %v4412_v62  ;;  %v556_v12 = vrot.slane %v4455_v60, 1  ;;  %v4472_v6 = vsel %vm502_vm1, %v549_v31, %v551_v54  ;;  %v372_v36 = vrot.slane %v287_v19, 7  ;;  %v553_v21 = vrot.slane %v4462_v8, 1 }
  0x2b   : > { %8581 = vst [vmem:[#allocation26_spill] sm:$0xff] %v4418_v14  ;;  %v4476_v40 = vsel %vm336_vm0, %v369_v61, %v370_v9  ;;  %v4479_v46 = vsel %vm336_vm0, 0.0, %v369_v61  ;;  %v373_v47 = vrot.slane %v288_v7, 7  ;;  %v4492_v19 = vsel %vm336_vm0, %v370_v9, 0.0 }
  0x2c   : > { %603 = vrot.lane.b32.xlu0 %v4363_v17, %s4153_s27  ;;  %8582 = vst [vmem:[#allocation27_spill] sm:$0xff] %v4435_v27  ;;  %v559_v31 = vrot.slane %v4476_v40, 1  ;;  %v4489_v54 = vsel %vm336_vm0, 0.0, %v372_v36  ;;  %v4495_v7 = vsel %vm502_vm1, %v553_v21, %v554_v30  ;;  %v681_v34 = vrot.slane %v4208_v1, 2 }
  0x2d   : > { %8583 = vst [vmem:[#allocation28_spill] sm:$0xff] %v4448_v53  ;;  %v4498_v61 = vsel %vm336_vm0, %v372_v36, %v373_v47  ;;  %vm3214_vm13 = vcmask 326656   ;;  %vm3280_vm14 = vcmask 457728   ;;  %vm3247_vm15 = vcmask 392192  }
  0x2e   : > { %8584 = vst [vmem:[#allocation29_spill] sm:$0xff] %v4452_v55 }
  0x2f   : > { %607 = vrot.lane.b32.xlu2 %v4376_v32, %s4153_s27  ;;  %8585 = vst [vmem:[#allocation30_spill] sm:$0xff] %v4458_v4 }
  0x30   : > { %8586 = vst [vmem:[#allocation31_spill] sm:$0xff] %v4472_v6 }
  0x31   : > { %605 = vrot.lane.b32.xlu1 %v4383_v41, %s4153_s27  ;;  %8587 = vst [vmem:[#allocation32_spill] sm:$0xff] %v4476_v40 }
  0x32   : > { %8588 = vst [vmem:[#allocation33_spill] sm:$0xff] %v4479_v46 }
  0x33   : > { %8590 = vst [vmem:[#allocation35_spill] sm:$0xff] %v4489_v54 }
  0x34   : > { %609 = vrot.lane.b32.xlu0 %v4398_v50, %s4153_s27  ;;  %8591 = vst [vmem:[#allocation36_spill] sm:$0xff] %v4495_v7  ;;  %v292_v50 = vld [vmem:[%s4229_s26 + $0xd8] sm:$0xff] }
  0x35   : > { %8592 = vst [vmem:[#allocation37_spill] sm:$0xff] %v4498_v61  ;;  %v379_v17 = vrot.slane %v292_v50, 7 }
  0x37   : > { %613 = vrot.lane.b32.xlu2 %v4412_v62, %s4153_s27  ;;  %v4513_v62 = vsel %vm336_vm0, %v373_v47, 0.0 }
  0x39   : > { %611 = vrot.lane.b32.xlu1 %v4418_v14, %s4153_s27  ;;  %v561_v14 = vrot.slane %v4492_v19, 1 }
  0x3c   : > { %615 = vrot.lane.b32.xlu0 %v4435_v27, %s4153_s27  ;;  %v563_v27 = vrot.slane %v4489_v54, 1 }
  0x3f   : > { %619 = vrot.lane.b32.xlu2 %v4448_v53, %s4153_s27  ;;  %v4484_v53 = vsel %vm502_vm1, %v554_v30, %v556_v12  ;;  %v289_v12 = vld [vmem:[%s4229_s26 + $0xc0] sm:$0xff]  ;;  %v564_v30 = vrot.slane %v4498_v61, 1 }
  0x40   : > { %8589 = vst [vmem:[#allocation34_spill] sm:$0xff] %v4484_v53  ;;  %v375_v36 = vrot.slane %v289_v12, 7 }
  0x41   : > { %617 = vrot.lane.b32.xlu1 %v4458_v4, %s4153_s27  ;;  %v558_v4 = vrot.slane %v4479_v46, 1  ;;  %v4520_v41 = vsel %vm502_vm1, %v563_v27, %v564_v30 }
  0x42   : > { %8594 = vst [vmem:[#allocation39_spill] sm:$0xff] %v4520_v41  ;;  %v4533_v47 = vsel %vm336_vm0, 0.0, %v375_v36 }
  0x43   : > { %v4509_v9 = vsel %vm502_vm1, %v558_v4, %v559_v31  ;;  %v4523_v4 = vsel %vm502_vm1, %v559_v31, %v561_v14  ;;  %8597 = vst [vmem:[#allocation42_spill] sm:$0xff] %v4533_v47 }
  0x44   : > { %621 = vrot.lane.b32.xlu0 %v4472_v6, %s4153_s27  ;;  %v290_v6 = vld [vmem:[%s4229_s26 + $0xc8] sm:$0xff]  ;;  %8593 = vst [vmem:[#allocation38_spill] sm:$0xff] %v4509_v9 }
  0x45   : > { %v376_v21 = vrot.slane %v290_v6, 7  ;;  %8595 = vst [vmem:[#allocation40_spill] sm:$0xff] %v4523_v4 }
  0x47   : > { %625 = vrot.lane.b32.xlu2 %v4484_v53, %s4153_s27  ;;  %v291_v53 = vld [vmem:[%s4229_s26 + $0xd0] sm:$0xff]  ;;  %v4527_v32 = vsel %vm336_vm0, %v375_v36, %v376_v21  ;;  %v4530_v6 = vsel %vm336_vm0, %v376_v21, 0.0  ;;  %v568_v36 = vrot.slane %v4533_v47, 1 }
  0x48   : > { %8596 = vst [vmem:[#allocation41_spill] sm:$0xff] %v4527_v32  ;;  %v378_v12 = vrot.slane %v291_v53, 7  ;;  %v569_v27 = vrot.slane %v4527_v32, 1  ;;  %v571_v31 = vrot.slane %v4530_v6, 1 }
  0x49   : > { %623 = vrot.lane.b32.xlu1 %v4495_v7, %s4153_s27  ;;  %v566_v7 = vrot.slane %v4513_v62, 1 }
  0x4a   : > { %v4548_v53 = vsel %vm336_vm0, %v378_v12, %v379_v17  ;;  %v4551_v50 = vsel %vm336_vm0, 0.0, %v378_v12  ;;  %v4561_v5 = vsel %vm502_vm1, %v568_v36, %v569_v27 }
  0x4b   : > { %v4542_v14 = vsel %vm502_vm1, %v564_v30, %v566_v7  ;;  %8599 = vst [vmem:[#allocation44_spill] sm:$0xff] %v4548_v53  ;;  %v4556_v7 = vsel %vm502_vm1, %v569_v27, %v571_v31  ;;  %v573_v30 = vrot.slane %v4551_v50, 1 }
  0x4c   : > { %627 = vrot.lane.b32.xlu0 %v4509_v9, %s4153_s27  ;;  %v293_v9 = vld [vmem:[%s4229_s26 + $0xe0] sm:$0xff]  ;;  %8598 = vst [vmem:[#allocation43_spill] sm:$0xff] %v4542_v14 }
  0x4d   : > { %8600 = vst [vmem:[#allocation45_spill] sm:$0xff] %v4551_v50  ;;  %v381_v21 = vrot.slane %v293_v9, 7 }
  0x4e   : > { %8601 = vst [vmem:[#allocation46_spill] sm:$0xff] %v4556_v7 }
  0x4f   : > { %631 = vrot.lane.b32.xlu2 %v4520_v41, %s4153_s27  ;;  %v382_v41 = vrot.slane %v294_v10, 7  ;;  %8602 = vst [vmem:[#allocation47_spill] sm:$0xff] %v4561_v5  ;;  %v4567_v12 = vsel %vm336_vm0, 0.0, %v381_v21  ;;  %v4570_v10 = vsel %vm336_vm0, %v379_v17, 0.0 }
  0x50   : > { %8604 = vst [vmem:[#allocation49_spill] sm:$0xff] %v4567_v12  ;;  %v578_v27 = vrot.slane %v4567_v12, 1  ;;  %v576_v36 = vrot.slane %v4570_v10, 1 }
  0x51   : > { %629 = vrot.lane.b32.xlu1 %v4523_v4, %s4153_s27  ;;  %v574_v4 = vrot.slane %v4548_v53, 1  ;;  %v4564_v58 = vsel %vm336_vm0, %v381_v21, %v382_v41  ;;  %v4583_v21 = vsel %vm336_vm0, %v382_v41, 0.0 }
  0x52   : > { %8603 = vst [vmem:[#allocation48_spill] sm:$0xff] %v4564_v58  ;;  %v579_v31 = vrot.slane %v4564_v58, 1 }
  0x53   : > { %v4577_v9 = vsel %vm502_vm1, %v573_v30, %v574_v4  ;;  %v683_v30 = vrot.slane %v4218_v3, 2  ;;  %v686_v3 = vrot.slane %v4264_v28, 2 }
  0x54   : > { %633 = vrot.lane.b32.xlu0 %v4542_v14, %s4153_s27  ;;  %8605 = vst [vmem:[#allocation50_spill] sm:$0xff] %v4577_v9  ;;  %v4588_v17 = vsel %vm502_vm1, %v578_v27, %v579_v31  ;;  %v680_v14 = vrot.slane %v4214_v2, 2  ;;  %v685_v27 = vrot.slane %v4256_v24, 2  ;;  %v698_v2 = vrot.slane %v4297_v43, 2 }
  0x55   : > { %v706_v43 = vrot.slane %v4332_v63, 2 }
  0x56   : > { %v4615_v1 = vsel %vm679_vm2, %v685_v27, %v686_v3  ;;  %v690_v27 = vrot.slane %v4259_v25, 2 }
  0x57   : > { %637 = vrot.lane.b32.xlu2 %v4556_v7, %s4153_s27  ;;  %v4593_v7 = vsel %vm502_vm1, %v574_v4, %v576_v36  ;;  %v4607_v4 = vsel %vm679_vm2, %v680_v14, %v681_v34  ;;  %v4610_v36 = vsel %vm679_vm2, %v681_v34, %v683_v30  ;;  %v691_v14 = vrot.slane %v4250_v22, 2 }
  0x58   : > { %8606 = vst [vmem:[#allocation51_spill] sm:$0xff] %v4593_v7  ;;  %v693_v30 = vrot.slane %v4253_v23, 2 }
  0x59   : > { %635 = vrot.lane.b32.xlu1 %v4561_v5, %s4153_s27  ;;  %v581_v5 = vrot.slane %v4583_v21, 1  ;;  %8607 = vst [vmem:[#allocation52_spill] sm:$0xff] %v4607_v4 }
  0x5a   : > { %8608 = vst [vmem:[#allocation53_spill] sm:$0xff] %v4610_v36 }
  0x5b   : > { %v4602_v41 = vsel %vm502_vm1, %v579_v31, %v581_v5  ;;  %v4619_v5 = vpack.i.bf16 %v4610_v36, %v4607_v4  ;;  %v688_v31 = vrot.slane %v4267_v29, 2  ;;  %v4635_v29 = vsel %vm679_vm2, %v691_v14, %v693_v30 }
  0x5c   : > { %639 = vrot.lane.b32.xlu0 %v4577_v9, %s4153_s27  ;;  %8610 = vst [vmem:[#allocation55_spill] sm:$0xff] %v4635_v29  ;;  %v695_v36 = vrot.slane %v4279_v35, 2  ;;  %v696_v4 = vrot.slane %v4273_v33, 2 }
  0x5d   : > { %8609 = vst [vmem:[#allocation54_spill] sm:$0xff] %v4619_v5  ;;  %v4627_v34 = vsel %vm679_vm2, %v686_v3, %v688_v31  ;;  %v700_v3 = vrot.slane %v4318_v56, 2  ;;  %v701_v31 = vrot.slane %v4311_v51, 2 }
  0x5e   : > { %v4647_v23 = vsel %vm679_vm2, %v695_v36, %v696_v4 }
  0x5f   : > { %643 = vrot.lane.b32.xlu2 %v4588_v17, %s4153_s27 }
  0x61   : > { %641 = vrot.lane.b32.xlu1 %v4593_v7, %s4153_s27 }
  0x64   : > { %645 = vrot.lane.b32.xlu0 %v4602_v41, %s4153_s27  ;;  %s4162_s27 = smov 48  }
  0x67   : > { %764 = vrot.lane.b32.xlu2 %v4615_v1, %s4154_s28 }
  0x69   : > { %4108 = vrot.lane.b32.xlu1 %v4619_v5, %s4154_s28  ;;  %v4640_v5 = vsel %vm679_vm2, %v690_v27, %v691_v14  ;;  %v4657_v14 = vsel %vm679_vm2, %v700_v3, %v701_v31  ;;  %v703_v27 = vrot.slane %v4314_v52, 2  ;;  %v705_v52 = vrot.slane %v4335_v0, 2 }
  0x6a   : > { %8612 = vst [vmem:[#allocation57_spill] sm:$0xff] %v4657_v14 }
  0x6b   : > { %v4668_v36 = vsel %vm679_vm2, %v701_v31, %v703_v27  ;;  %v4683_v31 = vsel %vm679_vm2, %v705_v52, %v706_v43  ;;  %v715_v27 = vrot.slane %v4380_v37, 2  ;;  %v718_v52 = vrot.slane %v4389_v44, 2 }
  0x6c   : > { %766 = vrot.lane.b32.xlu0 %v4627_v34, %s4154_s28  ;;  %8614 = vst [vmem:[#allocation59_spill] sm:$0xff] %v4668_v36  ;;  %v720_v44 = vrot.slane %v4407_v59, 2 }
  0x6d   : > { %8617 = vst [vmem:[#allocation62_spill] sm:$0xff] %v4683_v31 }
  0x6f   : > { %770 = vrot.lane.b32.xlu2 %v4635_v29, %s4154_s28  ;;  %v4661_v29 = vsel %vm679_vm2, %v696_v4, %v698_v2  ;;  %v710_v4 = vrot.slane %v4351_v13, 2 }
  0x70   : > { %8613 = vst [vmem:[#allocation58_spill] sm:$0xff] %v4661_v29 }
  0x71   : > { %768 = vrot.lane.b32.xlu1 %v4640_v5, %s4154_s28  ;;  %v4651_v30 = vpop.permute.xlu2 %593 }
  0x72   : > { %8611 = vst [vmem:[#allocation56_spill] sm:$0xff] %v4651_v30  ;;  %v708_v30 = vrot.slane %v4355_v15, 2 }
  0x74   : > { %772 = vrot.lane.b32.xlu0 %v4647_v23, %s4154_s28  ;;  %v4678_v2 = vsel %vm679_vm2, %v706_v43, %v708_v30  ;;  %v716_v30 = vrot.slane %v4386_v42, 2 }
  0x75   : > { %8616 = vst [vmem:[#allocation61_spill] sm:$0xff] %v4678_v2 }
  0x76   : > { %v4700_v43 = vsel %vm679_vm2, %v715_v27, %v716_v30  ;;  %v723_v27 = vrot.slane %v4428_v20, 2 }
  0x77   : > { %776 = vrot.lane.b32.xlu2 %v4657_v14, %s4154_s28  ;;  %v711_v14 = vrot.slane %v4348_v11, 2  ;;  %8620 = vst [vmem:[#allocation65_spill] sm:$0xff] %v4700_v43 }
  0x79   : > { %774 = vrot.lane.b32.xlu1 %v4661_v29, %s4154_s28  ;;  %v4672_v3 = vpop.permute.xlu2 %595  ;;  %v4690_v15 = vsel %vm679_vm2, %v710_v4, %v711_v14 }
  0x7a   : > { %8615 = vst [vmem:[#allocation60_spill] sm:$0xff] %v4672_v3 }
  0x7b   : > { %8618 = vst [vmem:[#allocation63_spill] sm:$0xff] %v4690_v15 }
  0x7c   : > { %778 = vrot.lane.b32.xlu0 %v4668_v36, %s4154_s28  ;;  %v713_v36 = vrot.slane %v4369_v26, 2  ;;  %v4713_v26 = vsel %vm679_vm2, %v716_v30, %v718_v52  ;;  %v726_v30 = vrot.slane %v4421_v16, 2 }
  0x7d   : > { %8623 = vst [vmem:[#allocation68_spill] sm:$0xff] %v4713_v26 }
  0x7e   : > { %v4706_v4 = vsel %vm679_vm2, %v711_v14, %v713_v36  ;;  %v725_v36 = vrot.slane %v4424_v18, 2 }
  0x7f   : > { %782 = vrot.lane.b32.xlu2 %v4678_v2, %s4154_s28  ;;  %8622 = vst [vmem:[#allocation67_spill] sm:$0xff] %v4706_v4 }
  0x81   : > { %780 = vrot.lane.b32.xlu1 %v4683_v31, %s4154_s28  ;;  %v4694_v3 = vpop.permute.xlu2 %601 }
  0x82   : > { %8619 = vst [vmem:[#allocation64_spill] sm:$0xff] %v4694_v3  ;;  %v721_v3 = vrot.slane %v4404_v57, 2 }
  0x84   : > { %784 = vrot.lane.b32.xlu0 %v4690_v15, %s4154_s28  ;;  %v4725_v14 = vsel %vm679_vm2, %v721_v3, %v723_v27  ;;  %v4732_v20 = vsel %vm679_vm2, %v720_v44, %v721_v3  ;;  %v730_v27 = vrot.slane %v4462_v8, 2  ;;  %v733_v44 = vrot.slane %v4455_v60, 2 }
  0x85   : > { %8626 = vst [vmem:[#allocation71_spill] sm:$0xff] %v4725_v14  ;;  %v735_v60 = vrot.slane %v4479_v46, 2 }
  0x86   : > { %v4703_v2 = vpop.permute.xlu0 %4103  ;;  %8628 = vst [vmem:[#allocation73_spill] sm:$0xff] %v4732_v20 }
  0x87   : > { %8621 = vst [vmem:[#allocation66_spill] sm:$0xff] %v4703_v2  ;;  %788 = vrot.lane.b32.xlu2 %v4700_v43, %s4154_s28 }
  0x89   : > { %786 = vrot.lane.b32.xlu1 %v4706_v4, %s4154_s28  ;;  %v4717_v15 = vpop.permute.xlu2 %607 }
  0x8a   : > { %8624 = vst [vmem:[#allocation69_spill] sm:$0xff] %v4717_v15  ;;  %v4739_v15 = vsel %vm679_vm2, %v725_v36, %v726_v30 }
  0x8b   : > { %v4720_v2 = vpop.permute.xlu1 %589  ;;  %8629 = vst [vmem:[#allocation74_spill] sm:$0xff] %v4739_v15 }
  0x8c   : > { %8625 = vst [vmem:[#allocation70_spill] sm:$0xff] %v4720_v2  ;;  %790 = vrot.lane.b32.xlu0 %v4713_v26, %s4154_s28  ;;  %v731_v2 = vrot.slane %v4452_v55, 2 }
  0x8e   : > { %v4729_v52 = vpop.permute.xlu0 %587  ;;  %v4751_v3 = vsel %vm679_vm2, %v730_v27, %v731_v2  ;;  %v738_v27 = vrot.slane %v4492_v19, 2 }
  0x8f   : > { %8627 = vst [vmem:[#allocation72_spill] sm:$0xff] %v4729_v52  ;;  %794 = vrot.lane.b32.xlu2 %v4725_v14, %s4154_s28  ;;  %v728_v52 = vrot.slane %v4441_v45, 2  ;;  %v4764_v45 = vsel %vm679_vm2, %v731_v2, %v733_v44  ;;  %v741_v2 = vrot.slane %v4498_v61, 2 }
  0x90   : > { %8632 = vst [vmem:[#allocation77_spill] sm:$0xff] %v4751_v3 }
  0x91   : > { %792 = vrot.lane.b32.xlu1 %v4732_v20, %s4154_s28  ;;  %v4743_v26 = vpop.permute.xlu2 %613  ;;  %v4757_v14 = vsel %vm679_vm2, %v726_v30, %v728_v52  ;;  %8635 = vst [vmem:[#allocation80_spill] sm:$0xff] %v4764_v45  ;;  %v740_v52 = vrot.slane %v4489_v54, 2 }
  0x92   : > { %8630 = vst [vmem:[#allocation75_spill] sm:$0xff] %v4743_v26  ;;  %v736_v26 = vrot.slane %v4476_v40, 2 }
  0x93   : > { %v4746_v43 = vpop.permute.xlu1 %591  ;;  %8634 = vst [vmem:[#allocation79_spill] sm:$0xff] %v4757_v14 }
  0x94   : > { %8631 = vst [vmem:[#allocation76_spill] sm:$0xff] %v4746_v43  ;;  %796 = vrot.lane.b32.xlu0 %v4739_v15, %s4154_s28  ;;  %v4776_v30 = vsel %vm679_vm2, %v736_v26, %v738_v27  ;;  %v4783_v19 = vsel %vm679_vm2, %v735_v60, %v736_v26  ;;  %v745_v27 = vrot.slane %v4533_v47, 2  ;;  %v748_v60 = vrot.slane %v4530_v6, 2 }
  0x95   : > { %8638 = vst [vmem:[#allocation83_spill] sm:$0xff] %v4776_v30  ;;  %v750_v6 = vrot.slane %v4551_v50, 2 }
  0x96   : > { %v4754_v36 = vpop.permute.xlu0 %597 }
  0x97   : > { %8633 = vst [vmem:[#allocation78_spill] sm:$0xff] %v4754_v36  ;;  %800 = vrot.lane.b32.xlu2 %v4751_v3, %s4154_s28 }
  0x99   : > { %798 = vrot.lane.b32.xlu1 %v4757_v14, %s4154_s28  ;;  %v4768_v43 = vpop.permute.xlu2 %619 }
  0x9a   : > { %8636 = vst [vmem:[#allocation81_spill] sm:$0xff] %v4768_v43  ;;  %v746_v43 = vrot.slane %v4527_v32, 2 }
  0x9b   : > { %v4771_v36 = vpop.permute.xlu1 %599 }
  0x9c   : > { %8637 = vst [vmem:[#allocation82_spill] sm:$0xff] %v4771_v36  ;;  %802 = vrot.lane.b32.xlu0 %v4764_v45, %s4154_s28  ;;  %v4790_v36 = vsel %vm679_vm2, %v740_v52, %v741_v2  ;;  %v4802_v26 = vsel %vm679_vm2, %v745_v27, %v746_v43  ;;  %v753_v27 = vrot.slane %v4570_v10, 2 }
  0x9d   : > { %8642 = vst [vmem:[#allocation87_spill] sm:$0xff] %v4802_v26 }
  0x9e   : > { %v4780_v44 = vpop.permute.xlu0 %603 }
  0x9f   : > { %8639 = vst [vmem:[#allocation84_spill] sm:$0xff] %v4780_v44  ;;  %806 = vrot.lane.b32.xlu2 %v4776_v30, %s4154_s28  ;;  %v743_v44 = vrot.slane %v4513_v62, 2  ;;  %v4815_v62 = vsel %vm679_vm2, %v746_v43, %v748_v60  ;;  %v756_v43 = vrot.slane %v4564_v58, 2 }
  0xa0   : > { %8645 = vst [vmem:[#allocation90_spill] sm:$0xff] %v4815_v62 }
  0xa1   : > { %804 = vrot.lane.b32.xlu1 %v4783_v19, %s4154_s28  ;;  %v4794_v45 = vpop.permute.xlu2 %625  ;;  %v4808_v30 = vsel %vm679_vm2, %v741_v2, %v743_v44  ;;  %v755_v44 = vrot.slane %v4567_v12, 2 }
  0xa2   : > { %8640 = vst [vmem:[#allocation85_spill] sm:$0xff] %v4794_v45 }
  0xa3   : > { %v4797_v3 = vpop.permute.xlu1 %605  ;;  %8644 = vst [vmem:[#allocation89_spill] sm:$0xff] %v4808_v30 }
  0xa4   : > { %8641 = vst [vmem:[#allocation86_spill] sm:$0xff] %v4797_v3  ;;  %808 = vrot.lane.b32.xlu0 %v4790_v36, %s4154_s28  ;;  %v751_v3 = vrot.slane %v4548_v53, 2 }
  0xa6   : > { %v4805_v52 = vpop.permute.xlu0 %609  ;;  %v4827_v2 = vsel %vm679_vm2, %v751_v3, %v753_v27  ;;  %v4834_v10 = vsel %vm679_vm2, %v750_v6, %v751_v3 }
  0xa7   : > { %8643 = vst [vmem:[#allocation88_spill] sm:$0xff] %v4805_v52  ;;  %812 = vrot.lane.b32.xlu2 %v4802_v26, %s4154_s28 }
  0xa8   : > { %8648 = vst [vmem:[#allocation93_spill] sm:$0xff] %v4827_v2 }
  0xa9   : > { %810 = vrot.lane.b32.xlu1 %v4808_v30, %s4154_s28  ;;  %v4819_v45 = vpop.permute.xlu2 %631  ;;  %8650 = vst [vmem:[#allocation95_spill] sm:$0xff] %v4834_v10 }
  0xaa   : > { %8646 = vst [vmem:[#allocation91_spill] sm:$0xff] %v4819_v45  ;;  %v758_v45 = vrot.slane %v4583_v21, 2 }
  0xab   : > { %v4822_v52 = vpop.permute.xlu1 %611 }
  0xac   : > { %8647 = vst [vmem:[#allocation92_spill] sm:$0xff] %v4822_v52  ;;  %814 = vrot.lane.b32.xlu0 %v4815_v62, %s4154_s28  ;;  %v4841_v52 = vsel %vm679_vm2, %v755_v44, %v756_v43  ;;  %v4853_v6 = vsel %vm679_vm2, %v756_v43, %v758_v45 }
  0xae   : > { %v4831_v60 = vpop.permute.xlu0 %615 }
  0xaf   : > { %8649 = vst [vmem:[#allocation94_spill] sm:$0xff] %v4831_v60  ;;  %818 = vrot.lane.b32.xlu2 %v4827_v2, %s4154_s28 }
  0xb1   : > { %816 = vrot.lane.b32.xlu1 %v4834_v10, %s4154_s28  ;;  %v4843_v27 = vpop.permute.xlu2 %637 }
  0xb2   : > { %8651 = vst [vmem:[#allocation96_spill] sm:$0xff] %v4843_v27 }
  0xb3   : > { %v4846_v62 = vpop.permute.xlu1 %617 }
  0xb4   : > { %8652 = vst [vmem:[#allocation97_spill] sm:$0xff] %v4846_v62  ;;  %820 = vrot.lane.b32.xlu0 %v4841_v52, %s4154_s28 }
  0xb6   : > { %v4850_v3 = vpop.permute.xlu0 %621 }
  0xb7   : > { %8653 = vst [vmem:[#allocation98_spill] sm:$0xff] %v4850_v3  ;;  %857 = vrot.lane.b32.xlu2 %v4256_v24, %s4155_s29 }
  0xb9   : > { %822 = vrot.lane.b32.xlu1 %v4853_v6, %s4154_s28  ;;  %v4859_v44 = vpop.permute.xlu2 %643 }
  0xba   : > { %8654 = vst [vmem:[#allocation99_spill] sm:$0xff] %v4859_v44 }
  0xbb   : > { %v4861_v21 = vpop.permute.xlu1 %623 }
  0xbc   : > { %8655 = vst [vmem:[#allocation100_spill] sm:$0xff] %v4861_v21  ;;  %859 = vrot.lane.b32.xlu0 %v4264_v28, %s4155_s29  ;;  %v4971_v28 = vld [vmem:[%s4229_s26 + $0xf8] sm:$0xff] }
  0xbe   : > { %v4865_v60 = vpop.permute.xlu0 %627 }
  0xbf   : > { %8656 = vst [vmem:[#allocation101_spill] sm:$0xff] %v4865_v60  ;;  %863 = vrot.lane.b32.xlu2 %v4250_v22, %s4155_s29 }
  0xc1   : > { %861 = vrot.lane.b32.xlu1 %v4259_v25, %s4155_s29  ;;  %v4871_v45 = vpop.permute.xlu2 %764 }
  0xc2   : > { %8657 = vst [vmem:[#allocation102_spill] sm:$0xff] %v4871_v45 }
  0xc3   : > { %v4873_v43 = vpop.permute.xlu1 %629 }
  0xc4   : > { %8658 = vst [vmem:[#allocation103_spill] sm:$0xff] %v4873_v43  ;;  %865 = vrot.lane.b32.xlu0 %v4279_v35, %s4155_s29 }
  0xc6   : > { %v4877_v44 = vpop.permute.xlu0 %633 }
  0xc7   : > { %8659 = vst [vmem:[#allocation104_spill] sm:$0xff] %v4877_v44  ;;  %869 = vrot.lane.b32.xlu2 %v4318_v56, %s4155_s29 }
  0xc9   : > { %867 = vrot.lane.b32.xlu1 %v4273_v33, %s4155_s29  ;;  %v4883_v27 = vpop.permute.xlu2 %770 }
  0xca   : > { %8660 = vst [vmem:[#allocation105_spill] sm:$0xff] %v4883_v27 }
  0xcb   : > { %v4885_v60 = vpop.permute.xlu1 %635 }
  0xcc   : > { %8661 = vst [vmem:[#allocation106_spill] sm:$0xff] %v4885_v60  ;;  %871 = vrot.lane.b32.xlu0 %v4311_v51, %s4155_s29 }
  0xce   : > { %v4889_v21 = vpop.permute.xlu0 %639 }
  0xcf   : > { %8662 = vst [vmem:[#allocation107_spill] sm:$0xff] %v4889_v21  ;;  %875 = vrot.lane.b32.xlu2 %v4332_v63, %s4155_s29 }
  0xd1   : > { %873 = vrot.lane.b32.xlu1 %v4335_v0, %s4155_s29  ;;  %v4895_v44 = vpop.permute.xlu2 %776 }
  0xd2   : > { %8663 = vst [vmem:[#allocation108_spill] sm:$0xff] %v4895_v44 }
  0xd3   : > { %v4897_v43 = vpop.permute.xlu1 %641 }
  0xd4   : > { %8664 = vst [vmem:[#allocation109_spill] sm:$0xff] %v4897_v43  ;;  %877 = vrot.lane.b32.xlu0 %v4351_v13, %s4155_s29 }
  0xd6   : > { %v4901_v3 = vpop.permute.xlu0 %645 }
  0xd7   : > { %8665 = vst [vmem:[#allocation110_spill] sm:$0xff] %v4901_v3  ;;  %881 = vrot.lane.b32.xlu2 %v4380_v37, %s4155_s29 }
  0xd9   : > { %879 = vrot.lane.b32.xlu1 %v4348_v11, %s4155_s29  ;;  %v4907_v21 = vpop.permute.xlu2 %782 }
  0xda   : > { %8666 = vst [vmem:[#allocation111_spill] sm:$0xff] %v4907_v21 }
  0xdb   : > { %v4909_v60 = vpop.permute.xlu1 %4108 }
  0xdc   : > { %8667 = vst [vmem:[#allocation112_spill] sm:$0xff] %v4909_v60  ;;  %883 = vrot.lane.b32.xlu0 %v4386_v42, %s4155_s29 }
  0xde   : > { %v4913_v44 = vpop.permute.xlu0 %766 }
  0xdf   : > { %8668 = vst [vmem:[#allocation113_spill] sm:$0xff] %v4913_v44  ;;  %887 = vrot.lane.b32.xlu2 %v4404_v57, %s4155_s29 }
  0xe1   : > { %885 = vrot.lane.b32.xlu1 %v4407_v59, %s4155_s29  ;;  %v4919_v3 = vpop.permute.xlu2 %788 }
  0xe2   : > { %8669 = vst [vmem:[#allocation114_spill] sm:$0xff] %v4919_v3 }
  0xe3   : > { %v4921_v43 = vpop.permute.xlu1 %768 }
  0xe4   : > { %8670 = vst [vmem:[#allocation115_spill] sm:$0xff] %v4921_v43  ;;  %889 = vrot.lane.b32.xlu0 %v4424_v18, %s4155_s29 }
  0xe6   : > { %v4925_v21 = vpop.permute.xlu0 %772 }
  0xe7   : > { %8671 = vst [vmem:[#allocation116_spill] sm:$0xff] %v4925_v21  ;;  %893 = vrot.lane.b32.xlu2 %v4462_v8, %s4155_s29 }
  0xe9   : > { %891 = vrot.lane.b32.xlu1 %v4421_v16, %s4155_s29  ;;  %v4931_v62 = vpop.permute.xlu2 %794 }
  0xea   : > { %8672 = vst [vmem:[#allocation117_spill] sm:$0xff] %v4931_v62 }
  0xeb   : > { %v4933_v27 = vpop.permute.xlu1 %774 }
  0xec   : > { %8673 = vst [vmem:[#allocation118_spill] sm:$0xff] %v4933_v27  ;;  %895 = vrot.lane.b32.xlu0 %v4452_v55, %s4155_s29 }
  0xee   : > { %v4937_v3 = vpop.permute.xlu0 %778 }
  0xef   : > { %8674 = vst [vmem:[#allocation119_spill] sm:$0xff] %v4937_v3  ;;  %899 = vrot.lane.b32.xlu2 %v4476_v40, %s4155_s29 }
  0xf1   : > { %897 = vrot.lane.b32.xlu1 %v4479_v46, %s4155_s29  ;;  %v4943_v21 = vpop.permute.xlu2 %800 }
  0xf2   : > { %8675 = vst [vmem:[#allocation120_spill] sm:$0xff] %v4943_v21 }
  0xf3   : > { %v4945_v43 = vpop.permute.xlu1 %780 }
  0xf4   : > { %8676 = vst [vmem:[#allocation121_spill] sm:$0xff] %v4945_v43  ;;  %901 = vrot.lane.b32.xlu0 %v4489_v54, %s4155_s29  ;;  %v295_v43 = vld [vmem:[%s4229_s26 + $0xf0] sm:$0xff]  ;;  %s4161_s26 = smov 40  }
  0xf6   : > { %v4949_v27 = vpop.permute.xlu0 %784 }
  0xf7   : > { %8677 = vst [vmem:[#allocation122_spill] sm:$0xff] %v4949_v27  ;;  %905 = vrot.lane.b32.xlu2 %v4533_v47, %s4155_s29  ;;  %v384_v27 = vrot.slane %v295_v43, 7 }
  0xf9   : > { %903 = vrot.lane.b32.xlu1 %v4498_v61, %s4155_s29  ;;  %v4955_v3 = vpop.permute.xlu2 %806 }
  0xfa   : > { %8678 = vst [vmem:[#allocation123_spill] sm:$0xff] %v4955_v3 }
  0xfb   : > { %v4957_v62 = vpop.permute.xlu1 %786 }
  0xfc   : > { %8679 = vst [vmem:[#allocation124_spill] sm:$0xff] %v4957_v62  ;;  %907 = vrot.lane.b32.xlu0 %v4527_v32, %s4155_s29  ;;  %v4978_v62 = vsel %vm336_vm0, 0.0, %v384_v27 }
  0xfe   : > { %v4961_v21 = vpop.permute.xlu0 %790 }
  0xff   : > { %8680 = vst [vmem:[#allocation125_spill] sm:$0xff] %v4961_v21  ;;  %911 = vrot.lane.b32.xlu2 %v4548_v53, %s4155_s29  ;;  %v8399_v21 = vrot.slane %v4971_v28, 7 }
 0x101   : > { %909 = vrot.lane.b32.xlu1 %v4551_v50, %s4155_s29  ;;  %v4968_v44 = vpop.permute.xlu2 %812  ;;  %v4990_v43 = vsel %vm336_vm0, %v384_v27, %v8399_v21 }
 0x102   : > { %8681 = vst [vmem:[#allocation126_spill] sm:$0xff] %v4968_v44 }
 0x103   : > { %v4973_v3 = vpop.permute.xlu1 %792 }
 0x104   : > { %8682 = vst [vmem:[#allocation127_spill] sm:$0xff] %v4973_v3  ;;  %913 = vrot.lane.b32.xlu0 %v4567_v12, %s4155_s29 }
 0x106   : > { %v4981_v45 = vpop.permute.xlu0 %796 }
 0x107   : > { %8683 = vst [vmem:[#allocation128_spill] sm:$0xff] %v4981_v45  ;;  %917 = vrot.lane.b32.xlu2 %v4978_v62, %s4155_s29 }
 0x109   : > { %915 = vrot.lane.b32.xlu1 %v4564_v58, %s4155_s29  ;;  %v4992_v3 = vpop.permute.xlu2 %818 }
 0x10a   : > { %8684 = vst [vmem:[#allocation129_spill] sm:$0xff] %v4992_v3  ;;  %v8690_v3 = vld [vmem:[#allocation9_spill] sm:$0xff] }
 0x10b   : > { %v4994_v44 = vpop.permute.xlu1 %798 }
 0x10c   : > { %8685 = vst [vmem:[#allocation130_spill] sm:$0xff] %v4994_v44  ;;  %919 = vrot.lane.b32.xlu0 %v4990_v43, %s4155_s29  ;;  %s4164_s29 = smov 56  }
 0x10e   : > { %v4998_v24 = vpop.permute.xlu0 %802 }
 0x10f   : > { %8686 = vst [vmem:[#allocation131_spill] sm:$0xff] %v4998_v24  ;;  %961 = vrot.lane.b32.xlu2 %v4286_v38, %s4156_s30 }
 0x111   : > { %959 = vrot.lane.b32.xlu1 %v4291_v39, %s4156_s30  ;;  %v5004_v45 = vpop.permute.xlu2 %857  ;;  %v8693_v39 = vld [vmem:[#allocation11_spill] sm:$0xff] }
 0x112   : > { %8687 = vst [vmem:[#allocation132_spill] sm:$0xff] %v5004_v45 }
 0x113   : > { %v5006_v27 = vpop.permute.xlu1 %804 }
 0x114   : > { %8688 = vst [vmem:[#allocation133_spill] sm:$0xff] %v5006_v27  ;;  %963 = vrot.lane.b32.xlu0 %v4307_v49, %s4156_s30  ;;  %v8695_v27 = vld [vmem:[#allocation14_spill] sm:$0xff] }
 0x116   : > { %v5010_v21 = vpop.permute.xlu0 %808 }
 0x117   : > { %8689 = vst [vmem:[#allocation134_spill] sm:$0xff] %v5010_v21  ;;  %967 = vrot.lane.b32.xlu2 %v4304_v48, %s4156_s30  ;;  %v8696_v21 = vld [vmem:[#allocation15_spill] sm:$0xff] }
 0x119   : > { %965 = vrot.lane.b32.xlu1 %v8690_v3, %s4156_s30  ;;  %v5016_v24 = vpop.permute.xlu2 %863  ;;  %v8699_v3 = vld [vmem:[#allocation18_spill] sm:$0xff] }
 0x11a   : > { %8691 = vst [vmem:[#allocation135_spill] sm:$0xff] %v5016_v24 }
 0x11b   : > { %v5018_v38 = vpop.permute.xlu1 %810 }
 0x11c   : > { %8692 = vst [vmem:[#allocation136_spill] sm:$0xff] %v5018_v38  ;;  %969 = vrot.lane.b32.xlu0 %v8693_v39, %s4156_s30  ;;  %v8701_v38 = vld [vmem:[#allocation19_spill] sm:$0xff] }
 0x11e   : > { %v5022_v44 = vpop.permute.xlu0 %814 }
 0x11f   : > { %8694 = vst [vmem:[#allocation137_spill] sm:$0xff] %v5022_v44  ;;  %973 = vrot.lane.b32.xlu2 %v8695_v27, %s4156_s30  ;;  %v8702_v44 = vld [vmem:[#allocation21_spill] sm:$0xff] }
 0x121   : > { %971 = vrot.lane.b32.xlu1 %v8696_v21, %s4156_s30  ;;  %v5028_v45 = vpop.permute.xlu2 %869  ;;  %v8705_v21 = vld [vmem:[#allocation23_spill] sm:$0xff] }
 0x122   : > { %8697 = vst [vmem:[#allocation138_spill] sm:$0xff] %v5028_v45 }
 0x123   : > { %v5030_v60 = vpop.permute.xlu1 %816 }
 0x124   : > { %8698 = vst [vmem:[#allocation139_spill] sm:$0xff] %v5030_v60  ;;  %975 = vrot.lane.b32.xlu0 %v8699_v3, %s4156_s30  ;;  %v8707_v60 = vld [vmem:[#allocation25_spill] sm:$0xff] }
 0x126   : > { %v5034_v24 = vpop.permute.xlu0 %820 }
 0x127   : > { %8700 = vst [vmem:[#allocation140_spill] sm:$0xff] %v5034_v24  ;;  %979 = vrot.lane.b32.xlu2 %v8701_v38, %s4156_s30  ;;  %v8708_v24 = vld [vmem:[#allocation26_spill] sm:$0xff] }
 0x129   : > { %977 = vrot.lane.b32.xlu1 %v8702_v44, %s4156_s30  ;;  %v5040_v39 = vpop.permute.xlu2 %875  ;;  %v8711_v44 = vld [vmem:[#allocation27_spill] sm:$0xff] }
 0x12a   : > { %8703 = vst [vmem:[#allocation141_spill] sm:$0xff] %v5040_v39 }
 0x12b   : > { %v5042_v27 = vpop.permute.xlu1 %822 }
 0x12c   : > { %8704 = vst [vmem:[#allocation142_spill] sm:$0xff] %v5042_v27  ;;  %981 = vrot.lane.b32.xlu0 %v8705_v21, %s4156_s30  ;;  %v8713_v27 = vld [vmem:[#allocation28_spill] sm:$0xff] }
 0x12e   : > { %v5046_v45 = vpop.permute.xlu0 %859 }
 0x12f   : > { %8706 = vst [vmem:[#allocation143_spill] sm:$0xff] %v5046_v45  ;;  %985 = vrot.lane.b32.xlu2 %v8707_v60, %s4156_s30  ;;  %v8714_v45 = vld [vmem:[#allocation30_spill] sm:$0xff] }
 0x131   : > { %983 = vrot.lane.b32.xlu1 %v8708_v24, %s4156_s30  ;;  %v5052_v3 = vpop.permute.xlu2 %881  ;;  %v8717_v24 = vld [vmem:[#allocation31_spill] sm:$0xff] }
 0x132   : > { %8709 = vst [vmem:[#allocation144_spill] sm:$0xff] %v5052_v3 }
 0x133   : > { %v5054_v38 = vpop.permute.xlu1 %861 }
 0x134   : > { %8710 = vst [vmem:[#allocation145_spill] sm:$0xff] %v5054_v38  ;;  %987 = vrot.lane.b32.xlu0 %v8711_v44, %s4156_s30  ;;  %v8719_v38 = vld [vmem:[#allocation34_spill] sm:$0xff] }
 0x136   : > { %v5058_v39 = vpop.permute.xlu0 %865 }
 0x137   : > { %8712 = vst [vmem:[#allocation146_spill] sm:$0xff] %v5058_v39  ;;  %991 = vrot.lane.b32.xlu2 %v8713_v27, %s4156_s30  ;;  %v8720_v39 = vld [vmem:[#allocation36_spill] sm:$0xff] }
 0x139   : > { %989 = vrot.lane.b32.xlu1 %v8714_v45, %s4156_s30  ;;  %v5064_v21 = vpop.permute.xlu2 %887  ;;  %v8723_v45 = vld [vmem:[#allocation38_spill] sm:$0xff] }
 0x13a   : > { %8715 = vst [vmem:[#allocation147_spill] sm:$0xff] %v5064_v21 }
 0x13b   : > { %v5066_v60 = vpop.permute.xlu1 %867 }
 0x13c   : > { %8716 = vst [vmem:[#allocation148_spill] sm:$0xff] %v5066_v60  ;;  %993 = vrot.lane.b32.xlu0 %v8717_v24, %s4156_s30  ;;  %v8725_v60 = vld [vmem:[#allocation39_spill] sm:$0xff] }
 0x13e   : > { %v5070_v3 = vpop.permute.xlu0 %871 }
 0x13f   : > { %8718 = vst [vmem:[#allocation149_spill] sm:$0xff] %v5070_v3  ;;  %997 = vrot.lane.b32.xlu2 %v8719_v38, %s4156_s30  ;;  %v8726_v3 = vld [vmem:[#allocation40_spill] sm:$0xff] }
 0x141   : > { %995 = vrot.lane.b32.xlu1 %v8720_v39, %s4156_s30  ;;  %v5076_v44 = vpop.permute.xlu2 %893  ;;  %v8729_v39 = vld [vmem:[#allocation43_spill] sm:$0xff] }
 0x142   : > { %8721 = vst [vmem:[#allocation150_spill] sm:$0xff] %v5076_v44 }
 0x143   : > { %v5078_v27 = vpop.permute.xlu1 %873 }
 0x144   : > { %8722 = vst [vmem:[#allocation151_spill] sm:$0xff] %v5078_v27  ;;  %999 = vrot.lane.b32.xlu0 %v8723_v45, %s4156_s30  ;;  %v8731_v27 = vld [vmem:[#allocation46_spill] sm:$0xff] }
 0x146   : > { %v5082_v21 = vpop.permute.xlu0 %877 }
 0x147   : > { %8724 = vst [vmem:[#allocation152_spill] sm:$0xff] %v5082_v21  ;;  %1003 = vrot.lane.b32.xlu2 %v8725_v60, %s4156_s30  ;;  %v8732_v21 = vld [vmem:[#allocation47_spill] sm:$0xff] }
 0x149   : > { %1001 = vrot.lane.b32.xlu1 %v8726_v3, %s4156_s30  ;;  %v5088_v24 = vpop.permute.xlu2 %899 }
 0x14a   : > { %8727 = vst [vmem:[#allocation40_spill] sm:$0xff] %v5088_v24 }
 0x14b   : > { %v5090_v38 = vpop.permute.xlu1 %879 }
 0x14c   : > { %8728 = vst [vmem:[#allocation153_spill] sm:$0xff] %v5090_v38  ;;  %1005 = vrot.lane.b32.xlu0 %v8729_v39, %s4156_s30  ;;  %v8736_v38 = vrot.slane %v4971_v28, 7 }
 0x14e   : > { %v5094_v44 = vpop.permute.xlu0 %883  ;;  %v5111_v39 = vsel %vm336_vm0, %v8736_v38, 0.0 }
 0x14f   : > { %8730 = vst [vmem:[#allocation154_spill] sm:$0xff] %v5094_v44  ;;  %1009 = vrot.lane.b32.xlu2 %v8731_v27, %s4156_s30  ;;  %v955_v44 = vrot.slane %v4990_v43, 1 }
 0x151   : > { %1007 = vrot.lane.b32.xlu1 %v8732_v21, %s4156_s30  ;;  %v5100_v45 = vpop.permute.xlu2 %905 }
 0x152   : > { %8733 = vst [vmem:[#allocation46_spill] sm:$0xff] %v5100_v45 }
 0x153   : > { %v5102_v60 = vpop.permute.xlu1 %885 }
 0x154   : > { %8734 = vst [vmem:[#allocation47_spill] sm:$0xff] %v5102_v60  ;;  %1011 = vrot.lane.b32.xlu0 %v4577_v9, %s4156_s30  ;;  %v957_v60 = vrot.slane %v5111_v39, 1  ;;  %v954_v9 = vrot.slane %v4978_v62, 1 }
 0x156   : > { %v5106_v24 = vpop.permute.xlu0 %889  ;;  %v5127_v28 = vsel %vm502_vm1, %v955_v44, %v957_v60 }
 0x157   : > { %8735 = vst [vmem:[#allocation155_spill] sm:$0xff] %v5106_v24  ;;  %1015 = vrot.lane.b32.xlu2 %v4588_v17, %s4156_s30 }
 0x159   : > { %1013 = vrot.lane.b32.xlu1 %v4593_v7, %s4156_s30  ;;  %v5119_v45 = vpop.permute.xlu2 %911  ;;  %v5132_v7 = vsel %vm502_vm1, %v954_v9, %v955_v44 }
 0x15a   : > { %8737 = vst [vmem:[#allocation156_spill] sm:$0xff] %v5119_v45 }
 0x15b   : > { %v5122_v24 = vpop.permute.xlu1 %891 }
 0x15c   : > { %8738 = vst [vmem:[#allocation157_spill] sm:$0xff] %v5122_v24  ;;  %1017 = vrot.lane.b32.xlu0 %v4602_v41, %s4156_s30 }
 0x15e   : > { %v5129_v38 = vpop.permute.xlu0 %895 }
 0x15f   : > { %8739 = vst [vmem:[#allocation158_spill] sm:$0xff] %v5129_v38  ;;  %1021 = vrot.lane.b32.xlu2 %v5127_v28, %s4156_s30 }
 0x161   : > { %1019 = vrot.lane.b32.xlu1 %v5132_v7, %s4156_s30  ;;  %v5138_v45 = vpop.permute.xlu2 %917 }
 0x162   : > { %8740 = vst [vmem:[#allocation159_spill] sm:$0xff] %v5138_v45  ;;  %v8745_v45 = vld [vmem:[#allocation55_spill] sm:$0xff] }
 0x163   : > { %v5140_v24 = vpop.permute.xlu1 %897 }
 0x164   : > { %8741 = vst [vmem:[#allocation160_spill] sm:$0xff] %v5140_v24  ;;  %1060 = vrot.lane.b32.xlu0 %v4615_v1, %s4157_s7 }
 0x166   : > { %v5144_v60 = vpop.permute.xlu0 %901 }
 0x167   : > { %8742 = vst [vmem:[#allocation161_spill] sm:$0xff] %v5144_v60  ;;  %1064 = vrot.lane.b32.xlu2 %v4640_v5, %s4157_s7 }
 0x169   : > { %1062 = vrot.lane.b32.xlu1 %v4627_v34, %s4157_s7  ;;  %v5150_v9 = vpop.permute.xlu2 %961  ;;  %v8749_v34 = vld [vmem:[#allocation57_spill] sm:$0xff] }
 0x16a   : > { %8743 = vst [vmem:[#allocation162_spill] sm:$0xff] %v5150_v9 }
 0x16b   : > { %v5152_v44 = vpop.permute.xlu1 %903 }
 0x16c   : > { %8744 = vst [vmem:[#allocation163_spill] sm:$0xff] %v5152_v44  ;;  %1066 = vrot.lane.b32.xlu0 %v8745_v45, %s4157_s7 }
 0x16e   : > { %v5156_v24 = vpop.permute.xlu0 %907 }
 0x16f   : > { %8746 = vst [vmem:[#allocation55_spill] sm:$0xff] %v5156_v24  ;;  %1070 = vrot.lane.b32.xlu2 %v4661_v29, %s4157_s7  ;;  %v8751_v24 = vld [vmem:[#allocation59_spill] sm:$0xff]  ;;  %v8754_v29 = vld [vmem:[#allocation61_spill] sm:$0xff] }
 0x171   : > { %1068 = vrot.lane.b32.xlu1 %v4647_v23, %s4157_s7  ;;  %v5162_v1 = vpop.permute.xlu2 %967 }
 0x172   : > { %8747 = vst [vmem:[#allocation164_spill] sm:$0xff] %v5162_v1 }
 0x173   : > { %v5164_v60 = vpop.permute.xlu1 %909 }
 0x174   : > { %8748 = vst [vmem:[#allocation165_spill] sm:$0xff] %v5164_v60  ;;  %1072 = vrot.lane.b32.xlu0 %v8749_v34, %s4157_s7 }
 0x176   : > { %v5168_v38 = vpop.permute.xlu0 %913 }
 0x177   : > { %8750 = vst [vmem:[#allocation57_spill] sm:$0xff] %v5168_v38  ;;  %1076 = vrot.lane.b32.xlu2 %v4683_v31, %s4157_s7  ;;  %v8756_v38 = vld [vmem:[#allocation63_spill] sm:$0xff] }
 0x179   : > { %1074 = vrot.lane.b32.xlu1 %v8751_v24, %s4157_s7  ;;  %v5174_v44 = vpop.permute.xlu2 %973  ;;  %v8759_v24 = vld [vmem:[#allocation65_spill] sm:$0xff] }
 0x17a   : > { %8752 = vst [vmem:[#allocation166_spill] sm:$0xff] %v5174_v44 }
 0x17b   : > { %v5176_v9 = vpop.permute.xlu1 %915 }
 0x17c   : > { %8753 = vst [vmem:[#allocation167_spill] sm:$0xff] %v5176_v9  ;;  %1078 = vrot.lane.b32.xlu0 %v8754_v29, %s4157_s7 }
 0x17e   : > { %v5180_v1 = vpop.permute.xlu0 %919 }
 0x17f   : > { %8755 = vst [vmem:[#allocation61_spill] sm:$0xff] %v5180_v1  ;;  %1082 = vrot.lane.b32.xlu2 %v4706_v4, %s4157_s7  ;;  %v8761_v1 = vld [vmem:[#allocation68_spill] sm:$0xff] }
 0x181   : > { %1080 = vrot.lane.b32.xlu1 %v8756_v38, %s4157_s7  ;;  %v5186_v60 = vpop.permute.xlu2 %979  ;;  %v8764_v38 = vld [vmem:[#allocation71_spill] sm:$0xff] }
 0x182   : > { %8757 = vst [vmem:[#allocation168_spill] sm:$0xff] %v5186_v60 }
 0x183   : > { %v5188_v31 = vpop.permute.xlu1 %959 }
 0x184   : > { %8758 = vst [vmem:[#allocation169_spill] sm:$0xff] %v5188_v31  ;;  %1084 = vrot.lane.b32.xlu0 %v8759_v24, %s4157_s7 }
 0x186   : > { %v5192_v44 = vpop.permute.xlu0 %963 }
 0x187   : > { %8760 = vst [vmem:[#allocation65_spill] sm:$0xff] %v5192_v44  ;;  %1088 = vrot.lane.b32.xlu2 %v4732_v20, %s4157_s7  ;;  %v8768_v20 = vld [vmem:[#allocation77_spill] sm:$0xff] }
 0x189   : > { %1086 = vrot.lane.b32.xlu1 %v8761_v1, %s4157_s7  ;;  %v5198_v9 = vpop.permute.xlu2 %985 }
 0x18a   : > { %8762 = vst [vmem:[#allocation68_spill] sm:$0xff] %v5198_v9 }
 0x18b   : > { %v5200_v4 = vpop.permute.xlu1 %965 }
 0x18c   : > { %8763 = vst [vmem:[#allocation170_spill] sm:$0xff] %v5200_v4  ;;  %1090 = vrot.lane.b32.xlu0 %v8764_v38, %s4157_s7 }
 0x18e   : > { %v5204_v60 = vpop.permute.xlu0 %969 }
 0x18f   : > { %8765 = vst [vmem:[#allocation71_spill] sm:$0xff] %v5204_v60  ;;  %1094 = vrot.lane.b32.xlu2 %v4757_v14, %s4157_s7  ;;  %v8770_v60 = vld [vmem:[#allocation80_spill] sm:$0xff] }
 0x191   : > { %1092 = vrot.lane.b32.xlu1 %v4739_v15, %s4157_s7  ;;  %v5210_v44 = vpop.permute.xlu2 %991  ;;  %v8773_v15 = vld [vmem:[#allocation83_spill] sm:$0xff] }
 0x192   : > { %8766 = vst [vmem:[#allocation171_spill] sm:$0xff] %v5210_v44 }
 0x193   : > { %v5212_v31 = vpop.permute.xlu1 %971 }
 0x194   : > { %8767 = vst [vmem:[#allocation172_spill] sm:$0xff] %v5212_v31  ;;  %1096 = vrot.lane.b32.xlu0 %v8768_v20, %s4157_s7 }
 0x196   : > { %v5216_v9 = vpop.permute.xlu0 %975 }
 0x197   : > { %8769 = vst [vmem:[#allocation77_spill] sm:$0xff] %v5216_v9  ;;  %1100 = vrot.lane.b32.xlu2 %v4783_v19, %s4157_s7 }
 0x199   : > { %1098 = vrot.lane.b32.xlu1 %v8770_v60, %s4157_s7  ;;  %v5222_v4 = vpop.permute.xlu2 %997 }
 0x19a   : > { %8771 = vst [vmem:[#allocation80_spill] sm:$0xff] %v5222_v4 }
 0x19b   : > { %v5224_v14 = vpop.permute.xlu1 %977 }
 0x19c   : > { %8772 = vst [vmem:[#allocation173_spill] sm:$0xff] %v5224_v14  ;;  %1102 = vrot.lane.b32.xlu0 %v8773_v15, %s4157_s7 }
 0x19e   : > { %v5228_v44 = vpop.permute.xlu0 %981 }
 0x19f   : > { %8774 = vst [vmem:[#allocation83_spill] sm:$0xff] %v5228_v44  ;;  %1106 = vrot.lane.b32.xlu2 %v4808_v30, %s4157_s7  ;;  %v8778_v44 = vld [vmem:[#allocation90_spill] sm:$0xff] }
 0x1a1   : > { %1104 = vrot.lane.b32.xlu1 %v4790_v36, %s4157_s7  ;;  %v5234_v9 = vpop.permute.xlu2 %1003 }
 0x1a2   : > { %8775 = vst [vmem:[#allocation174_spill] sm:$0xff] %v5234_v9  ;;  %v1056_v9 = vrot.slane %v4990_v43, 2 }
 0x1a3   : > { %v5236_v31 = vpop.permute.xlu1 %983 }
 0x1a4   : > { %8776 = vst [vmem:[#allocation175_spill] sm:$0xff] %v5236_v31  ;;  %1108 = vrot.lane.b32.xlu0 %v4802_v26, %s4157_s7  ;;  %v1055_v31 = vrot.slane %v4978_v62, 2 }
 0x1a6   : > { %v5240_v4 = vpop.permute.xlu0 %987 }
 0x1a7   : > { %8777 = vst [vmem:[#allocation176_spill] sm:$0xff] %v5240_v4  ;;  %1112 = vrot.lane.b32.xlu2 %v4834_v10, %s4157_s7  ;;  %v5261_v4 = vsel %vm679_vm2, %v1055_v31, %v1056_v9 }
 0x1a9   : > { %1110 = vrot.lane.b32.xlu1 %v8778_v44, %s4157_s7  ;;  %v5246_v14 = vpop.permute.xlu2 %1009 }
 0x1aa   : > { %8779 = vst [vmem:[#allocation90_spill] sm:$0xff] %v5246_v14 }
 0x1ab   : > { %v5248_v30 = vpop.permute.xlu1 %989 }
 0x1ac   : > { %8780 = vst [vmem:[#allocation177_spill] sm:$0xff] %v5248_v30  ;;  %1114 = vrot.lane.b32.xlu0 %v4827_v2, %s4157_s7  ;;  %v1058_v30 = vrot.slane %v5111_v39, 2 }
 0x1ae   : > { %v5254_v26 = vpop.permute.xlu0 %993 }
 0x1af   : > { %8781 = vst [vmem:[#allocation178_spill] sm:$0xff] %v5254_v26  ;;  %1118 = vrot.lane.b32.xlu2 %v4853_v6, %s4157_s7  ;;  %v5273_v26 = vsel %vm679_vm2, %v1056_v9, %v1058_v30 }
 0x1b1   : > { %1116 = vrot.lane.b32.xlu1 %v4841_v52, %s4157_s7  ;;  %v5263_v14 = vpop.permute.xlu2 %1015 }
 0x1b2   : > { %8782 = vst [vmem:[#allocation179_spill] sm:$0xff] %v5263_v14 }
 0x1b3   : > { %v5266_v10 = vpop.permute.xlu1 %995 }
 0x1b4   : > { %1120 = vrot.lane.b32.xlu0 %v5261_v4, %s4157_s7 }
 0x1b6   : > { %v5270_v2 = vpop.permute.xlu0 %999 }
 0x1b7   : > { %8783 = vst [vmem:[#allocation180_spill] sm:$0xff] %v5270_v2  ;;  %1156 = vrot.lane.b32.xlu2 %v4259_v25, %s4158_s8 }
 0x1b9   : > { %1122 = vrot.lane.b32.xlu1 %v5273_v26, %s4157_s7  ;;  %v5279_v31 = vpop.permute.xlu2 %1021 }
 0x1ba   : > { %8784 = vst [vmem:[#allocation181_spill] sm:$0xff] %v5279_v31 }
 0x1bb   : > { %v5281_v39 = vpop.permute.xlu1 %1001 }
 0x1bc   : > { %8785 = vst [vmem:[#allocation182_spill] sm:$0xff] %v5281_v39  ;;  %1158 = vrot.lane.b32.xlu0 %v4250_v22, %s4158_s8 }
 0x1be   : > { %v5285_v14 = vpop.permute.xlu0 %1005 }
 0x1bf   : > { %8786 = vst [vmem:[#allocation183_spill] sm:$0xff] %v5285_v14  ;;  %1162 = vrot.lane.b32.xlu2 %v4273_v33, %s4158_s8 }
 0x1c1   : > { %1160 = vrot.lane.b32.xlu1 %v4279_v35, %s4158_s8  ;;  %v5291_v30 = vpop.permute.xlu2 %1064 }
 0x1c3   : > { %v5293_v9 = vpop.permute.xlu1 %1007 }
 0x1c4   : > { %8787 = vst [vmem:[#allocation184_spill] sm:$0xff] %v5293_v9  ;;  %1164 = vrot.lane.b32.xlu0 %v4318_v56, %s4158_s8 }
 0x1c6   : > { %v5297_v31 = vpop.permute.xlu0 %1011 }
 0x1c7   : > { %8788 = vst [vmem:[#allocation185_spill] sm:$0xff] %v5297_v31  ;;  %1168 = vrot.lane.b32.xlu2 %v4335_v0, %s4158_s8 }
 0x1c9   : > { %1166 = vrot.lane.b32.xlu1 %v4311_v51, %s4158_s8  ;;  %v5303_v14 = vpop.permute.xlu2 %1070  ;;  %v8835_v51 = vld [vmem:[#allocation39_spill] sm:$0xff] }
 0x1cb   : > { %v5305_v39 = vpop.permute.xlu1 %1013 }
 0x1cc   : > { %8789 = vst [vmem:[#allocation186_spill] sm:$0xff] %v5305_v39  ;;  %1170 = vrot.lane.b32.xlu0 %v4332_v63, %s4158_s8 }
 0x1ce   : > { %v5309_v2 = vpop.permute.xlu0 %1017 }
 0x1cf   : > { %8790 = vst [vmem:[#allocation187_spill] sm:$0xff] %v5309_v2  ;;  %1174 = vrot.lane.b32.xlu2 %v4348_v11, %s4158_s8 }
 0x1d1   : > { %1172 = vrot.lane.b32.xlu1 %v4351_v13, %s4158_s8  ;;  %v5315_v31 = vpop.permute.xlu2 %1076 }
 0x1d3   : > { %v5317_v9 = vpop.permute.xlu1 %1019 }
 0x1d4   : > { %8791 = vst [vmem:[#allocation188_spill] sm:$0xff] %v5317_v9  ;;  %1176 = vrot.lane.b32.xlu0 %v4380_v37, %s4158_s8 }
 0x1d6   : > { %v5321_v0 = vpop.permute.xlu0 %1060 }
 0x1d7   : > { %1180 = vrot.lane.b32.xlu2 %v4407_v59, %s4158_s8 }
 0x1d9   : > { %1178 = vrot.lane.b32.xlu1 %v4386_v42, %s4158_s8  ;;  %v5327_v2 = vpop.permute.xlu2 %1082 }
 0x1da   : > { %8792 = vst [vmem:[#allocation189_spill] sm:$0xff] %v5327_v2 }
 0x1db   : > { %v5329_v39 = vpop.permute.xlu1 %1062 }
 0x1dc   : > { %1182 = vrot.lane.b32.xlu0 %v4404_v57, %s4158_s8 }
 0x1de   : > { %v5333_v11 = vpop.permute.xlu0 %1066 }
 0x1df   : > { %1186 = vrot.lane.b32.xlu2 %v4421_v16, %s4158_s8 }
 0x1e1   : > { %1184 = vrot.lane.b32.xlu1 %v4424_v18, %s4158_s8  ;;  %v5339_v9 = vpop.permute.xlu2 %1088 }
 0x1e2   : > { %8793 = vst [vmem:[#allocation190_spill] sm:$0xff] %v5339_v9 }
 0x1e3   : > { %v5341_v59 = vpop.permute.xlu1 %1068 }
 0x1e4   : > { %1188 = vrot.lane.b32.xlu0 %v4462_v8, %s4158_s8 }
 0x1e6   : > { %v5345_v42 = vpop.permute.xlu0 %1072 }
 0x1e7   : > { %1192 = vrot.lane.b32.xlu2 %v4479_v46, %s4158_s8 }
 0x1e9   : > { %1190 = vrot.lane.b32.xlu1 %v4452_v55, %s4158_s8  ;;  %v5351_v37 = vpop.permute.xlu2 %1094 }
 0x1eb   : > { %v5353_v13 = vpop.permute.xlu1 %1074 }
 0x1ec   : > { %1194 = vrot.lane.b32.xlu0 %v4476_v40, %s4158_s8 }
 0x1ee   : > { %v5357_v9 = vpop.permute.xlu0 %1078 }
 0x1ef   : > { %8794 = vst [vmem:[#allocation191_spill] sm:$0xff] %v5357_v9  ;;  %1198 = vrot.lane.b32.xlu2 %v4498_v61, %s4158_s8 }
 0x1f1   : > { %1196 = vrot.lane.b32.xlu1 %v4489_v54, %s4158_s8  ;;  %v5363_v2 = vpop.permute.xlu2 %1100 }
 0x1f2   : > { %8795 = vst [vmem:[#allocation192_spill] sm:$0xff] %v5363_v2 }
 0x1f3   : > { %v5365_v63 = vpop.permute.xlu1 %1080 }
 0x1f4   : > { %8796 = vst [vmem:[#allocation193_spill] sm:$0xff] %v5365_v63  ;;  %1200 = vrot.lane.b32.xlu0 %v4533_v47, %s4158_s8 }
 0x1f6   : > { %v5369_v46 = vpop.permute.xlu0 %1084 }
 0x1f7   : > { %8797 = vst [vmem:[#allocation194_spill] sm:$0xff] %v5369_v46  ;;  %1204 = vrot.lane.b32.xlu2 %v4551_v50, %s4158_s8 }
 0x1f9   : > { %1202 = vrot.lane.b32.xlu1 %v4527_v32, %s4158_s8  ;;  %v5375_v40 = vpop.permute.xlu2 %1106  ;;  %v8803_v32 = vld [vmem:[#allocation3_spill] sm:$0xff] }
 0x1fa   : > { %8798 = vst [vmem:[#allocation195_spill] sm:$0xff] %v5375_v40 }
 0x1fb   : > { %v5377_v61 = vpop.permute.xlu1 %1086 }
 0x1fc   : > { %8799 = vst [vmem:[#allocation196_spill] sm:$0xff] %v5377_v61  ;;  %1206 = vrot.lane.b32.xlu0 %v4548_v53, %s4158_s8  ;;  %v8804_v61 = vld [vmem:[#allocation2_spill] sm:$0xff] }
 0x1fd   : > { %v5395_v46 = vpack.i.bf16 %v8804_v61, %v8803_v32 }
 0x1fe   : > { %v5381_v54 = vpop.permute.xlu0 %1090 }
 0x1ff   : > { %8800 = vst [vmem:[#allocation197_spill] sm:$0xff] %v5381_v54  ;;  %1210 = vrot.lane.b32.xlu2 %v4564_v58, %s4158_s8 }
 0x200   : > { %8805 = vst [vmem:[#allocation200_spill] sm:$0xff] %v5395_v46 }
 0x201   : > { %1208 = vrot.lane.b32.xlu1 %v4567_v12, %s4158_s8  ;;  %v5387_v47 = vpop.permute.xlu2 %1112 }
 0x202   : > { %8801 = vst [vmem:[#allocation198_spill] sm:$0xff] %v5387_v47  ;;  %v8812_v47 = vld [vmem:[#allocation14_spill] sm:$0xff] }
 0x203   : > { %v5389_v50 = vpop.permute.xlu1 %1092 }
 0x204   : > { %8802 = vst [vmem:[#allocation199_spill] sm:$0xff] %v5389_v50  ;;  %1212 = vrot.lane.b32.xlu0 %v4978_v62, %s4158_s8  ;;  %v8808_v50 = vld [vmem:[#allocation9_spill] sm:$0xff] }
 0x206   : > { %v5397_v53 = vpop.permute.xlu0 %1096 }
 0x207   : > { %4113 = vrot.lane.b32.xlu2 %v5395_v46, %s4158_s8 }
 0x209   : > { %1214 = vrot.lane.b32.xlu1 %v4990_v43, %s4158_s8  ;;  %v5403_v58 = vpop.permute.xlu2 %1118  ;;  %v8810_v43 = vld [vmem:[#allocation11_spill] sm:$0xff] }
 0x20a   : > { %8806 = vst [vmem:[#allocation201_spill] sm:$0xff] %v5403_v58 }
 0x20b   : > { %v5405_v12 = vpop.permute.xlu1 %1098 }
 0x20c   : > { %1252 = vrot.lane.b32.xlu0 %v4307_v49, %s4159_s9  ;;  %v8813_v49 = vld [vmem:[#allocation15_spill] sm:$0xff] }
 0x20e   : > { %v5409_v62 = vpop.permute.xlu0 %1102 }
 0x20f   : > { %8807 = vst [vmem:[#allocation202_spill] sm:$0xff] %v5409_v62  ;;  %1256 = vrot.lane.b32.xlu2 %v4304_v48, %s4159_s9 }
 0x211   : > { %1254 = vrot.lane.b32.xlu1 %v8808_v50, %s4159_s9  ;;  %v5415_v46 = vpop.permute.xlu2 %1156  ;;  %v8815_v50 = vld [vmem:[#allocation18_spill] sm:$0xff] }
 0x213   : > { %v5417_v54 = vpop.permute.xlu1 %1104 }
 0x214   : > { %8809 = vst [vmem:[#allocation9_spill] sm:$0xff] %v5417_v54  ;;  %1258 = vrot.lane.b32.xlu0 %v8810_v43, %s4159_s9  ;;  %v8817_v54 = vld [vmem:[#allocation19_spill] sm:$0xff]  ;;  %v8818_v43 = vld [vmem:[#allocation21_spill] sm:$0xff] }
 0x216   : > { %v5421_v58 = vpop.permute.xlu0 %1108 }
 0x217   : > { %8811 = vst [vmem:[#allocation11_spill] sm:$0xff] %v5421_v58  ;;  %1262 = vrot.lane.b32.xlu2 %v8812_v47, %s4159_s9 }
 0x219   : > { %1260 = vrot.lane.b32.xlu1 %v8813_v49, %s4159_s9  ;;  %v5427_v40 = vpop.permute.xlu2 %1162  ;;  %v8820_v49 = vld [vmem:[#allocation23_spill] sm:$0xff] }
 0x21b   : > { %v5429_v48 = vpop.permute.xlu1 %1110 }
 0x21c   : > { %8814 = vst [vmem:[#allocation14_spill] sm:$0xff] %v5429_v48  ;;  %1264 = vrot.lane.b32.xlu0 %v8815_v50, %s4159_s9  ;;  %v8822_v48 = vld [vmem:[#allocation25_spill] sm:$0xff]  ;;  %v8823_v50 = vld [vmem:[#allocation26_spill] sm:$0xff] }
 0x21e   : > { %v5433_v63 = vpop.permute.xlu0 %1114 }
 0x21f   : > { %8816 = vst [vmem:[#allocation15_spill] sm:$0xff] %v5433_v63  ;;  %1268 = vrot.lane.b32.xlu2 %v8817_v54, %s4159_s9 }
 0x221   : > { %1266 = vrot.lane.b32.xlu1 %v8818_v43, %s4159_s9  ;;  %v5439_v58 = vpop.permute.xlu2 %1168  ;;  %v8826_v43 = vld [vmem:[#allocation27_spill] sm:$0xff] }
 0x223   : > { %v5441_v47 = vpop.permute.xlu1 %1116 }
 0x224   : > { %8819 = vst [vmem:[#allocation18_spill] sm:$0xff] %v5441_v47  ;;  %1270 = vrot.lane.b32.xlu0 %v8820_v49, %s4159_s9  ;;  %v8827_v47 = vld [vmem:[#allocation28_spill] sm:$0xff]  ;;  %v8828_v49 = vld [vmem:[#allocation30_spill] sm:$0xff] }
 0x226   : > { %v5445_v62 = vpop.permute.xlu0 %1120 }
 0x227   : > { %8821 = vst [vmem:[#allocation19_spill] sm:$0xff] %v5445_v62  ;;  %1274 = vrot.lane.b32.xlu2 %v8822_v48, %s4159_s9 }
 0x229   : > { %1272 = vrot.lane.b32.xlu1 %v8823_v50, %s4159_s9  ;;  %v5451_v63 = vpop.permute.xlu2 %1174  ;;  %v8830_v50 = vld [vmem:[#allocation31_spill] sm:$0xff] }
 0x22a   : > { %8824 = vst [vmem:[#allocation21_spill] sm:$0xff] %v5451_v63 }
 0x22b   : > { %v5453_v54 = vpop.permute.xlu1 %1122 }
 0x22c   : > { %8825 = vst [vmem:[#allocation23_spill] sm:$0xff] %v5453_v54  ;;  %1276 = vrot.lane.b32.xlu0 %v8826_v43, %s4159_s9  ;;  %v8831_v54 = vld [vmem:[#allocation34_spill] sm:$0xff]  ;;  %v8832_v43 = vld [vmem:[#allocation36_spill] sm:$0xff] }
 0x22e   : > { %v5457_v9 = vpop.permute.xlu0 %1158 }
 0x22f   : > { %1280 = vrot.lane.b32.xlu2 %v8827_v47, %s4159_s9 }
 0x231   : > { %1278 = vrot.lane.b32.xlu1 %v8828_v49, %s4159_s9  ;;  %v5463_v62 = vpop.permute.xlu2 %1180  ;;  %v8834_v49 = vld [vmem:[#allocation38_spill] sm:$0xff] }
 0x232   : > { %8829 = vst [vmem:[#allocation25_spill] sm:$0xff] %v5463_v62 }
 0x233   : > { %v5465_v48 = vpop.permute.xlu1 %1160 }
 0x234   : > { %1282 = vrot.lane.b32.xlu0 %v8830_v50, %s4159_s9 }
 0x236   : > { %v5469_v63 = vpop.permute.xlu0 %1164 }
 0x237   : > { %1286 = vrot.lane.b32.xlu2 %v8831_v54, %s4159_s9 }
 0x239   : > { %1284 = vrot.lane.b32.xlu1 %v8832_v43, %s4159_s9  ;;  %v5475_v55 = vpop.permute.xlu2 %1186  ;;  %v8836_v43 = vld [vmem:[#allocation43_spill] sm:$0xff] }
 0x23a   : > { %8833 = vst [vmem:[#allocation26_spill] sm:$0xff] %v5475_v55 }
 0x23b   : > { %v5477_v47 = vpop.permute.xlu1 %1166 }
 0x23c   : > { %1288 = vrot.lane.b32.xlu0 %v8834_v49, %s4159_s9 }
 0x23e   : > { %v5481_v62 = vpop.permute.xlu0 %1170 }
 0x23f   : > { %1292 = vrot.lane.b32.xlu2 %v8835_v51, %s4159_s9 }
 0x241   : > { %1290 = vrot.lane.b32.xlu1 %v8726_v3, %s4159_s9  ;;  %v5487_v50 = vpop.permute.xlu2 %1192  ;;  %v8840_v3 = vld [vmem:[#allocation50_spill] sm:$0xff] }
 0x243   : > { %v5489_v54 = vpop.permute.xlu1 %1172 }
 0x244   : > { %1294 = vrot.lane.b32.xlu0 %v8836_v43, %s4159_s9  ;;  %v8842_v43 = vld [vmem:[#allocation51_spill] sm:$0xff] }
 0x246   : > { %v5493_v55 = vpop.permute.xlu0 %1176 }
 0x247   : > { %8837 = vst [vmem:[#allocation27_spill] sm:$0xff] %v5493_v55  ;;  %1298 = vrot.lane.b32.xlu2 %v8731_v27, %s4159_s9 }
 0x249   : > { %1296 = vrot.lane.b32.xlu1 %v8732_v21, %s4159_s9  ;;  %v5499_v49 = vpop.permute.xlu2 %1198 }
 0x24a   : > { %8838 = vst [vmem:[#allocation28_spill] sm:$0xff] %v5499_v49 }
 0x24b   : > { %v5501_v51 = vpop.permute.xlu1 %1178 }
 0x24c   : > { %8839 = vst [vmem:[#allocation30_spill] sm:$0xff] %v5501_v51  ;;  %1300 = vrot.lane.b32.xlu0 %v8840_v3, %s4159_s9  ;;  %v8884_v51 = vld [vmem:[#allocation66_spill] sm:$0xff] }
 0x24e   : > { %v5505_v2 = vpop.permute.xlu0 %1182 }
 0x24f   : > { %8841 = vst [vmem:[#allocation31_spill] sm:$0xff] %v5505_v2  ;;  %1304 = vrot.lane.b32.xlu2 %v4588_v17, %s4159_s9 }
 0x251   : > { %1302 = vrot.lane.b32.xlu1 %v8842_v43, %s4159_s9  ;;  %v5511_v55 = vpop.permute.xlu2 %1204  ;;  %v8847_v43 = vld [vmem:[#allocation6_spill] sm:$0xff] }
 0x252   : > { %8843 = vst [vmem:[#allocation34_spill] sm:$0xff] %v5511_v55 }
 0x253   : > { %v5513_v27 = vpop.permute.xlu1 %1184 }
 0x254   : > { %8844 = vst [vmem:[#allocation36_spill] sm:$0xff] %v5513_v27  ;;  %1306 = vrot.lane.b32.xlu0 %v4602_v41, %s4159_s9 }
 0x256   : > { %v5517_v21 = vpop.permute.xlu0 %1188 }
 0x257   : > { %8845 = vst [vmem:[#allocation38_spill] sm:$0xff] %v5517_v21  ;;  %1310 = vrot.lane.b32.xlu2 %v5127_v28, %s4159_s9  ;;  %v8850_v21 = vld [vmem:[#allocation58_spill] sm:$0xff] }
 0x259   : > { %1308 = vrot.lane.b32.xlu1 %v5132_v7, %s4159_s9  ;;  %v5523_v3 = vpop.permute.xlu2 %1210 }
 0x25a   : > { %8846 = vst [vmem:[#allocation39_spill] sm:$0xff] %v5523_v3 }
 0x25b   : > { %v5525_v17 = vpop.permute.xlu1 %1190 }
 0x25c   : > { %4118 = vrot.lane.b32.xlu0 %v8847_v43, %s4159_s9 }
 0x25e   : > { %v5529_v2 = vpop.permute.xlu0 %1194 }
 0x25f   : > { %1350 = vrot.lane.b32.xlu2 %v8745_v45, %s4160_s10 }
 0x261   : > { %1348 = vrot.lane.b32.xlu1 %v4640_v5, %s4160_s10  ;;  %v5535_v41 = vpop.permute.xlu2 %4113  ;;  %v8852_v5 = vld [vmem:[#allocation59_spill] sm:$0xff] }
 0x262   : > { %8848 = vst [vmem:[#allocation43_spill] sm:$0xff] %v5535_v41 }
 0x263   : > { %v5537_v28 = vpop.permute.xlu1 %1196 }
 0x264   : > { %1352 = vrot.lane.b32.xlu0 %v4647_v23, %s4160_s10  ;;  %v8854_v23 = vld [vmem:[#allocation62_spill] sm:$0xff] }
 0x266   : > { %v5541_v7 = vpop.permute.xlu0 %1200 }
 0x267   : > { %8849 = vst [vmem:[#allocation50_spill] sm:$0xff] %v5541_v7  ;;  %1356 = vrot.lane.b32.xlu2 %v8749_v34, %s4160_s10  ;;  %v8856_v34 = vld [vmem:[#allocation63_spill] sm:$0xff]  ;;  %v4105_v7 = vunpack.i.l.bf16 %v8884_v51 }
 0x269   : > { %1354 = vrot.lane.b32.xlu1 %v8850_v21, %s4160_s10  ;;  %v5549_v45 = vpop.permute.xlu2 %1256 }
 0x26b   : > { %v5547_v43 = vpop.permute.xlu1 %1202 }
 0x26c   : > { %8851 = vst [vmem:[#allocation51_spill] sm:$0xff] %v5547_v43  ;;  %1358 = vrot.lane.b32.xlu0 %v8852_v5, %s4160_s10  ;;  %v8858_v5 = vld [vmem:[#allocation67_spill] sm:$0xff] }
 0x26e   : > { %v5553_v41 = vpop.permute.xlu0 %1206 }
 0x26f   : > { %8853 = vst [vmem:[#allocation58_spill] sm:$0xff] %v5553_v41  ;;  %1362 = vrot.lane.b32.xlu2 %v8754_v29, %s4160_s10 }
 0x271   : > { %1360 = vrot.lane.b32.xlu1 %v8854_v23, %s4160_s10  ;;  %v5563_v21 = vpop.permute.xlu2 %1262 }
 0x273   : > { %v5559_v3 = vpop.permute.xlu1 %1208 }
 0x274   : > { %8855 = vst [vmem:[#allocation59_spill] sm:$0xff] %v5559_v3  ;;  %1364 = vrot.lane.b32.xlu0 %v8856_v34, %s4160_s10  ;;  %v8860_v34 = vld [vmem:[#allocation73_spill] sm:$0xff] }
 0x276   : > { %v5565_v27 = vpop.permute.xlu0 %1212 }
 0x277   : > { %8857 = vst [vmem:[#allocation62_spill] sm:$0xff] %v5565_v27  ;;  %1368 = vrot.lane.b32.xlu2 %v8759_v24, %s4160_s10  ;;  %v8861_v24 = vld [vmem:[#allocation74_spill] sm:$0xff] }
 0x279   : > { %1366 = vrot.lane.b32.xlu1 %v8858_v5, %s4160_s10  ;;  %v5577_v23 = vpop.permute.xlu2 %1268 }
 0x27b   : > { %v5571_v41 = vpop.permute.xlu1 %1214 }
 0x27c   : > { %8859 = vst [vmem:[#allocation63_spill] sm:$0xff] %v5571_v41  ;;  %1370 = vrot.lane.b32.xlu0 %v8761_v1, %s4160_s10  ;;  %v8862_v1 = vld [vmem:[#allocation79_spill] sm:$0xff] }
 0x27e   : > { %v5575_v29 = vpop.permute.xlu0 %1252 }
 0x27f   : > { %1374 = vrot.lane.b32.xlu2 %v8764_v38, %s4160_s10 }
 0x281   : > { %1372 = vrot.lane.b32.xlu1 %v8860_v34, %s4160_s10  ;;  %v5593_v41 = vpop.permute.xlu2 %1274 }
 0x282   : > { %8863 = vst [vmem:[#allocation67_spill] sm:$0xff] %v5593_v41 }
 0x283   : > { %v5583_v27 = vpop.permute.xlu1 %1254 }
 0x284   : > { %1376 = vrot.lane.b32.xlu0 %v8861_v24, %s4160_s10 }
 0x286   : > { %v5587_v5 = vpop.permute.xlu0 %1258 }
 0x287   : > { %1380 = vrot.lane.b32.xlu2 %v8768_v20, %s4160_s10 }
 0x289   : > { %1378 = vrot.lane.b32.xlu1 %v8862_v1, %s4160_s10  ;;  %v5607_v20 = vpop.permute.xlu2 %1280  ;;  %v8866_v1 = vld [vmem:[#allocation87_spill] sm:$0xff] }
 0x28a   : > { %8864 = vst [vmem:[#allocation73_spill] sm:$0xff] %v5607_v20  ;;  %v8870_v20 = vld [vmem:[#allocation93_spill] sm:$0xff] }
 0x28b   : > { %v5595_v3 = vpop.permute.xlu1 %1260 }
 0x28c   : > { %1382 = vrot.lane.b32.xlu0 %v8770_v60, %s4160_s10  ;;  %v8867_v60 = vld [vmem:[#allocation89_spill] sm:$0xff] }
 0x28e   : > { %v5599_v38 = vpop.permute.xlu0 %1264 }
 0x28f   : > { %1386 = vrot.lane.b32.xlu2 %v8773_v15, %s4160_s10 }
 0x291   : > { %1384 = vrot.lane.b32.xlu1 %v4783_v19, %s4160_s10  ;;  %v5621_v15 = vpop.permute.xlu2 %1286 }
 0x293   : > { %v5605_v34 = vpop.permute.xlu1 %1266 }
 0x294   : > { %1388 = vrot.lane.b32.xlu0 %v4790_v36, %s4160_s10  ;;  %v8871_v36 = vld [vmem:[#allocation95_spill] sm:$0xff] }
 0x296   : > { %v5611_v24 = vpop.permute.xlu0 %1270 }
 0x297   : > { %8865 = vst [vmem:[#allocation74_spill] sm:$0xff] %v5611_v24  ;;  %1392 = vrot.lane.b32.xlu2 %v8866_v1, %s4160_s10 }
 0x299   : > { %1390 = vrot.lane.b32.xlu1 %v8867_v60, %s4160_s10  ;;  %v5635_v60 = vpop.permute.xlu2 %1292 }
 0x29b   : > { %v5617_v55 = vpop.permute.xlu1 %1272 }
 0x29c   : > { %8868 = vst [vmem:[#allocation79_spill] sm:$0xff] %v5617_v55  ;;  %1394 = vrot.lane.b32.xlu0 %v8778_v44, %s4160_s10  ;;  %v8885_v55 = vld [vmem:[#allocation112_spill] sm:$0xff] }
 0x29e   : > { %v5623_v19 = vpop.permute.xlu0 %1276 }
 0x29f   : > { %8869 = vst [vmem:[#allocation87_spill] sm:$0xff] %v5623_v19  ;;  %1398 = vrot.lane.b32.xlu2 %v8870_v20, %s4160_s10  ;;  %v301_v20 = vld [vmem:[%s8310_s1 + $0x20] sm:$0xf] }
 0x2a0   : > { %3997 = vmatpush.msk.msra.mxu0 %vm1808_vm3, %v301_v20  ;;  %4067 = vmatpush.msk.msra.mxu3 %vm1808_vm3, %v301_v20 }
 0x2a1   : > { %1396 = vrot.lane.b32.xlu1 %v8871_v36, %s4160_s10  ;;  %v298_v36 = vld [vmem:[%s8310_s1 + $0x8] sm:$0xff] }
 0x2a3   : > { %v5629_v43 = vpop.permute.xlu1 %1278 }
 0x2a4   : > { %8872 = vst [vmem:[#allocation89_spill] sm:$0xff] %v5629_v43  ;;  %1400 = vrot.lane.b32.xlu0 %v4841_v52, %s4160_s10  ;;  %v300_v52 = vld [vmem:[%s8310_s1 + $0x18] sm:$0xff] }
 0x2a5   : > { %1824 = vmatpush.msra.mxu0 %v300_v52  ;;  %4068 = vmatpush.msra.mxu3 %v300_v52 }
 0x2a6   : > { %v5633_v1 = vpop.permute.xlu0 %1282 }
 0x2a7   : > { %8873 = vst [vmem:[#allocation93_spill] sm:$0xff] %v5633_v1  ;;  %1404 = vrot.lane.b32.xlu2 %v5261_v4, %s4160_s10  ;;  %v297_v1 = vld [vmem:[%s8310_s1] sm:$0xff] }
 0x2a9   : > { %1402 = vrot.lane.b32.xlu1 %v4853_v6, %s4160_s10  ;;  %v299_v6 = vld [vmem:[%s8310_s1 + $0x10] sm:$0xff] }
 0x2aa   : > { %1825 = vmatpush.msra.mxu0 %v299_v6  ;;  %4069 = vmatpush.msra.mxu3 %v299_v6 }
 0x2ab   : > { %v5641_v44 = vpop.permute.xlu1 %1284 }
 0x2ac   : > { %8874 = vst [vmem:[#allocation95_spill] sm:$0xff] %v5641_v44  ;;  %1406 = vrot.lane.b32.xlu0 %v5273_v26, %s4160_s10  ;;  %v8875_v26 = vld [vmem:[#allocation54_spill] sm:$0xff]  ;;  %v5663_v44 = vpop.permute.xlu2 %1298  ;;  %1826 = vmatpush.msra.mxu0 %v298_v36 }
 0x2ad   : > { %8876 = vst [vmem:[#allocation203_spill] sm:$0xff] %v5663_v44  ;;  %4070 = vmatpush.msra.mxu3 %v298_v36  ;;  %v4110_v36 = vunpack.i.l.bf16 %v8885_v55 }
 0x2ae   : > { %v5653_v4 = vpop.permute.xlu0 %1288  ;;  %1827 = vmatpush.msra.mxu0 %v297_v1 }
 0x2af   : > { %4071 = vmatpush.msra.mxu3 %v297_v1  ;;  %v1445_v1 = vsel %vm1444_vm4, %v8803_v32, %v4105_v7  ;;  %v4111_v7 = vunpack.i.h.bf16 %v8885_v55 }
 0x2b1   : > { %4123 = vrot.lane.b32.xlu1 %v8875_v26, %s4160_s10 }
 0x2b3   : > { %v5665_v20 = vpop.permute.xlu1 %1290 }
 0x2b4   : > { %v5674_v19 = vpop.permute.xlu2 %1304 }
 0x2b5   : > { %8879 = vst [vmem:[#allocation206_spill] sm:$0xff] %v5674_v19  ;;  %v1478_v19 = vsel %vm1477_vm6, %v1445_v1, %v4110_v36 }
 0x2b6   : > { %v5670_v43 = vpop.permute.xlu0 %1294 }
 0x2b7   : > { %8877 = vst [vmem:[#allocation204_spill] sm:$0xff] %v5670_v43  ;;  %v4106_v43 = vunpack.i.h.bf16 %v8884_v51 }
 0x2b9   : > { %v1446_v51 = vsel %vm1444_vm4, %v8804_v61, %v4106_v43 }
 0x2bb   : > { %v5672_v52 = vpop.permute.xlu1 %1296 }
 0x2bc   : > { %8878 = vst [vmem:[#allocation205_spill] sm:$0xff] %v5672_v52  ;;  %v5680_v44 = vpop.permute.xlu2 %1310 }
 0x2bd   : > { %8882 = vst [vmem:[#allocation209_spill] sm:$0xff] %v5680_v44 }
 0x2be   : > { %v5676_v26 = vpop.permute.xlu0 %1300 }
 0x2bf   : > { %8880 = vst [vmem:[#allocation207_spill] sm:$0xff] %v5676_v26 }
 0x2c3   : > { %v5678_v6 = vpop.permute.xlu1 %1302 }
 0x2c4   : > { %8881 = vst [vmem:[#allocation208_spill] sm:$0xff] %v5678_v6  ;;  %v8887_v6 = vld [vmem:[#allocation132_spill] sm:$0xff] }
 0x2c5   : > { %v1511_v44 = vsel %vm1510_vm5, %v1478_v19, %v8887_v6 }
 0x2c6   : > { %v5682_v41 = vpop.permute.xlu0 %1306 }
 0x2c7   : > { %8883 = vst [vmem:[#allocation210_spill] sm:$0xff] %v5682_v41  ;;  %v8888_v41 = vld [vmem:[#allocation169_spill] sm:$0xff] }
 0x2c8   : > { %v1544_v52 = vsel %vm1543_vm7, %v1511_v44, %v8888_v41  ;;  %v8889_v44 = vld [vmem:[#allocation143_spill] sm:$0xff] }
 0x2c9   : > { %v1577_v24 = vsel %vm1576_vm9, %v1544_v52, %v5321_v0  ;;  %v1479_v0 = vsel %vm1477_vm6, %v1446_v51, %v4111_v7 }
 0x2ca   : > { %v1610_v36 = vsel %vm1609_vm8, %v1577_v24, %v5415_v46  ;;  %v1512_v46 = vsel %vm1510_vm5, %v1479_v0, %v8889_v44  ;;  %v8890_v24 = vld [vmem:[#allocation162_spill] sm:$0xff] }
 0x2cb   : > { %v5686_v49 = vpop.permute.xlu1 %1308  ;;  %v1643_v19 = vsel %vm1642_vm10, %v1610_v36, %v5575_v29  ;;  %v1545_v52 = vsel %vm1543_vm7, %v1512_v46, %v8890_v24  ;;  %v8893_v0 = vld [vmem:[#allocation102_spill] sm:$0xff]  ;;  %v8894_v46 = vld [vmem:[#allocation145_spill] sm:$0xff] }
 0x2cc   : > { %8886 = vst [vmem:[#allocation66_spill] sm:$0xff] %v5686_v49  ;;  %v1351_v49 = vpop.permute.xlu2 %1350  ;;  %v1578_v29 = vsel %vm1576_vm9, %v1545_v52, %v5329_v39  ;;  %v8895_v24 = vld [vmem:[#allocation65_spill] sm:$0xff] }
 0x2cd   : > { %v1611_v1 = vsel %vm1609_vm8, %v1578_v29, %v5457_v9 }
 0x2ce   : > { %v5691_v26 = vpop.permute.xlu0 %4118  ;;  %v1644_v43 = vsel %vm1642_vm10, %v1611_v1, %v5583_v27 }
 0x2cf   : > { %v1677_v7 = vsel %vm1675_vm12, %v1644_v43, %v1351_v49 }
 0x2d3   : > { %v1349_v6 = vpop.permute.xlu1 %1348 }
 0x2d4   : > { %v1676_v41 = vsel %vm1675_vm12, %v1643_v19, %v1349_v6  ;;  %v1357_v36 = vpop.permute.xlu2 %1356  ;;  %v8891_v6 = vld [vmem:[#allocation72_spill] sm:$0xff] }
 0x2d5   : > { %3998 = vmatmul.msk.f32.vlgmr.msra.gmra.mxu0 %vm1711_vm11, %v1676_v41  ;;  %v8892_v41 = vld [vmem:[#allocation7_spill] sm:$0xff] }
 0x2d6   : > { %v1353_v55 = vpop.permute.xlu0 %1352  ;;  %v1447_v51 = vsel %vm1444_vm4, %v8892_v41, %v8891_v6  ;;  %v8896_v6 = vld [vmem:[#allocation70_spill] sm:$0xff]  ;;  %v8897_v41 = vld [vmem:[#allocation8_spill] sm:$0xff] }
 0x2d7   : > { %v1480_v44 = vsel %vm1477_vm6, %v1447_v51, %v8893_v0  ;;  %v1448_v51 = vsel %vm1444_vm4, %v8897_v41, %v8896_v6  ;;  %v8898_v0 = vld [vmem:[#allocation113_spill] sm:$0xff]  ;;  %v8902_v6 = vld [vmem:[#allocation115_spill] sm:$0xff] }
 0x2d8   : > { %v1513_v9 = vsel %vm1510_vm5, %v1480_v44, %v8894_v46  ;;  %v8900_v46 = vld [vmem:[#allocation170_spill] sm:$0xff] }
 0x2d9   : > { %v1546_v52 = vsel %vm1543_vm7, %v1513_v9, %v8895_v24 }
 0x2da   : > { %v1579_v27 = vsel %vm1576_vm9, %v1546_v52, %v5291_v30  ;;  %v1481_v30 = vsel %vm1477_vm6, %v1448_v51, %v8898_v0  ;;  %v8904_v0 = vld [vmem:[#allocation164_spill] sm:$0xff] }
 0x2db   : > { %v1355_v19 = vpop.permute.xlu1 %1354  ;;  %v1612_v49 = vsel %vm1609_vm8, %v1579_v27, %v5465_v48  ;;  %v8899_v48 = vld [vmem:[#allocation135_spill] sm:$0xff] }
 0x2dc   : > { %v1645_v29 = vsel %vm1642_vm10, %v1612_v49, %v5549_v45  ;;  %v5739_v43 = vpop.permute.xlu2 %1362  ;;  %v1514_v45 = vsel %vm1510_vm5, %v1481_v30, %v8899_v48 }
 0x2dd   : > { %3999 = vmatmul.msk.f32.gmra.mxu0 %vm1711_vm11, %v1677_v7  ;;  %v1678_v7 = vsel %vm1675_vm12, %v1645_v29, %v1353_v55  ;;  %v1547_v9 = vsel %vm1543_vm7, %v1514_v45, %v8900_v46  ;;  %v8901_v29 = vld [vmem:[#allocation76_spill] sm:$0xff] }
 0x2de   : > { %v1359_v39 = vpop.permute.xlu0 %1358  ;;  %v1580_v55 = vsel %vm1576_vm9, %v1547_v9, %v5333_v11  ;;  %v8905_v9 = vld [vmem:[#allocation56_spill] sm:$0xff] }
 0x2df   : > { %v1613_v24 = vsel %vm1609_vm8, %v1580_v55, %v5427_v40  ;;  %v8903_v40 = vld [vmem:[#allocation146_spill] sm:$0xff]  ;;  %v1450_v55 = vsel %vm1444_vm4, %v4250_v22, %v8905_v9  ;;  %v8910_v22 = vld [vmem:[#allocation117_spill] sm:$0xff] }
 0x2e0   : > { %v1646_v52 = vsel %vm1642_vm10, %v1613_v24, %v5587_v5  ;;  %v8906_v24 = vld [vmem:[#allocation105_spill] sm:$0xff] }
 0x2e1   : > { %v1679_v49 = vsel %vm1675_vm12, %v1646_v52, %v1355_v19  ;;  %v1483_v52 = vsel %vm1477_vm6, %v1450_v55, %v8906_v24  ;;  %v8914_v24 = vld [vmem:[#allocation116_spill] sm:$0xff] }
 0x2e3   : > { %v5737_v1 = vpop.permute.xlu1 %1360 }
 0x2e4   : > { %v5769_v11 = vpop.permute.xlu2 %1368 }
 0x2e5   : > { %4000 = vmatmul.msk.f32.gmra.mxu0 %vm1711_vm11, %v1678_v7  ;;  %v1449_v7 = vsel %vm1444_vm4, %v4259_v25, %v8901_v29  ;;  %v8908_v29 = vld [vmem:[#allocation97_spill] sm:$0xff] }
 0x2e6   : > { %v5748_v44 = vpop.permute.xlu0 %1364  ;;  %v1482_v41 = vsel %vm1477_vm6, %v1449_v7, %v8902_v6  ;;  %v8909_v7 = vld [vmem:[#allocation71_spill] sm:$0xff] }
 0x2e7   : > { %v1515_v5 = vsel %vm1510_vm5, %v1482_v41, %v8903_v40 }
 0x2e8   : > { %v1548_v30 = vsel %vm1543_vm7, %v1515_v5, %v8904_v0  ;;  %v8911_v5 = vld [vmem:[#allocation157_spill] sm:$0xff] }
 0x2e9   : > { %v1581_v19 = vsel %vm1576_vm9, %v1548_v30, %v5341_v59 }
 0x2ea   : > { %v1614_v25 = vsel %vm1609_vm8, %v1581_v19, %v5469_v63  ;;  %v8912_v19 = vld [vmem:[#allocation178_spill] sm:$0xff] }
 0x2eb   : > { %v5760_v27 = vpop.permute.xlu1 %1366  ;;  %v1647_v48 = vsel %vm1642_vm10, %v1614_v25, %v5595_v3  ;;  %v1462_v3 = vsel %vm1444_vm4, %v4404_v57, %v8908_v29  ;;  %v8916_v29 = vld [vmem:[#allocation81_spill] sm:$0xff] }
 0x2ec   : > { %v1680_v46 = vsel %vm1675_vm12, %v1647_v48, %v1357_v36  ;;  %v5801_v6 = vpop.permute.xlu2 %1374  ;;  %v1495_v41 = vsel %vm1477_vm6, %v1462_v3, %v8910_v22  ;;  %v8917_v3 = vld [vmem:[#allocation172_spill] sm:$0xff]  ;;  %v8919_v22 = vld [vmem:[#allocation150_spill] sm:$0xff] }
 0x2ed   : > { %4001 = vmatmul.msk.f32.gmra.mxu0 %vm1711_vm11, %v1679_v49  ;;  %v8907_v49 = vld [vmem:[#allocation148_spill] sm:$0xff]  ;;  %v1528_v0 = vsel %vm1510_vm5, %v1495_v41, %v8911_v5 }
 0x2ee   : > { %v5771_v51 = vpop.permute.xlu0 %1370  ;;  %v1516_v63 = vsel %vm1510_vm5, %v1483_v52, %v8907_v49  ;;  %v1561_v57 = vsel %vm1543_vm7, %v1528_v0, %v8912_v19 }
 0x2ef   : > { %v1549_v36 = vsel %vm1543_vm7, %v1516_v63, %v8909_v7  ;;  %v8915_v63 = vld [vmem:[#allocation138_spill] sm:$0xff]  ;;  %v8918_v7 = vld [vmem:[#allocation128_spill] sm:$0xff] }
 0x2f0   : > { %v1582_v40 = vsel %vm1576_vm9, %v1549_v36, %v5303_v14  ;;  %v8913_v14 = vld [vmem:[#allocation60_spill] sm:$0xff] }
 0x2f1   : > { %v1615_v30 = vsel %vm1609_vm8, %v1582_v40, %v5477_v47  ;;  %v1451_v55 = vsel %vm1444_vm4, %v4279_v35, %v8913_v14  ;;  %v1463_v35 = vsel %vm1444_vm4, %v4424_v18, %v8916_v29  ;;  %v8923_v14 = vld [vmem:[#allocation98_spill] sm:$0xff] }
 0x2f2   : > { %v1648_v25 = vsel %vm1642_vm10, %v1615_v30, %v5563_v21  ;;  %v1484_v52 = vsel %vm1477_vm6, %v1451_v55, %v8914_v24  ;;  %v1496_v36 = vsel %vm1477_vm6, %v1463_v35, %v8918_v7  ;;  %v8924_v55 = vld [vmem:[#allocation166_spill] sm:$0xff] }
 0x2f3   : > { %v5783_v45 = vpop.permute.xlu1 %1372  ;;  %v1681_v9 = vsel %vm1675_vm12, %v1648_v25, %v1359_v39  ;;  %v1529_v41 = vsel %vm1510_vm5, %v1496_v36, %v8919_v22  ;;  %v8932_v22 = vld [vmem:[#allocation77_spill] sm:$0xff] }
 0x2f4   : > { %v5847_v5 = vpop.permute.xlu2 %1380  ;;  %v1562_v18 = vsel %vm1543_vm7, %v1529_v41, %v5266_v10  ;;  %v8921_v10 = vld [vmem:[#allocation118_spill] sm:$0xff]  ;;  %v8933_v41 = vld [vmem:[#allocation120_spill] sm:$0xff] }
 0x2f5   : > { %4002 = vmatmul.msk.f32.gmra.mxu0 %vm1711_vm11, %v1680_v46  ;;  %v1594_v46 = vsel %vm1576_vm9, %v1561_v57, %v5351_v37  ;;  %v1517_v37 = vsel %vm1510_vm5, %v1484_v52, %v8915_v63  ;;  %v1595_v30 = vsel %vm1576_vm9, %v1562_v18, %v5397_v53  ;;  %v8920_v57 = vld [vmem:[#allocation78_spill] sm:$0xff]  ;;  %v8922_v53 = vld [vmem:[#allocation149_spill] sm:$0xff]  ;;  %v8927_v63 = vld [vmem:[#allocation80_spill] sm:$0xff] }
 0x2f6   : > { %v5792_v59 = vpop.permute.xlu0 %1376  ;;  %v1627_v47 = vsel %vm1609_vm8, %v1594_v46, %v5525_v17  ;;  %v1550_v17 = vsel %vm1543_vm7, %v1517_v37, %v8917_v3  ;;  %v1452_v25 = vsel %vm1444_vm4, %v4273_v33, %v8920_v57  ;;  %v1464_v33 = vsel %vm1444_vm4, %v4421_v16, %v8923_v14  ;;  %v8926_v52 = vld [vmem:[#allocation158_spill] sm:$0xff]  ;;  %v8934_v18 = vld [vmem:[#allocation160_spill] sm:$0xff] }
 0x2f7   : > { %v1660_v21 = vsel %vm1642_vm10, %v1627_v47, %v5621_v15  ;;  %v1583_v15 = vsel %vm1576_vm9, %v1550_v17, %v5345_v42  ;;  %v1485_v46 = vsel %vm1477_vm6, %v1452_v25, %v8921_v10  ;;  %v8925_v47 = vld [vmem:[#allocation130_spill] sm:$0xff]  ;;  %v8929_v17 = vld [vmem:[#allocation108_spill] sm:$0xff] }
 0x2f8   : > { %v1616_v40 = vsel %vm1609_vm8, %v1583_v15, %v5439_v58  ;;  %v1628_v58 = vsel %vm1609_vm8, %v1595_v30, %v5487_v50  ;;  %v1497_v24 = vsel %vm1477_vm6, %v1464_v33, %v8925_v47  ;;  %v8931_v15 = vld [vmem:[#allocation100_spill] sm:$0xff]  ;;  %v8941_v33 = vld [vmem:[#allocation85_spill] sm:$0xff] }
 0x2f9   : > { %v1649_v0 = vsel %vm1642_vm10, %v1616_v40, %v5599_v38  ;;  %v1661_v38 = vsel %vm1642_vm10, %v1628_v58, %v5653_v4  ;;  %v8936_v57 = vld [vmem:[#allocation192_spill] sm:$0xff]  ;;  %v8943_v47 = vld [vmem:[#allocation173_spill] sm:$0xff] }
 0x2fa   : > { %v1682_v42 = vsel %vm1675_vm12, %v1649_v0, %v5737_v1 }
 0x2fb   : > { %v5815_v48 = vpop.permute.xlu1 %1378 }
 0x2fc   : > { %v1387_v29 = vpop.permute.xlu2 %1386 }
 0x2fd   : > { %4003 = vmatmul.msk.f32.gmra.mxu0 %vm1711_vm11, %v1681_v9  ;;  %v1518_v9 = vsel %vm1510_vm5, %v1485_v46, %v8922_v53  ;;  %v8938_v46 = vld [vmem:[#allocation10_spill] sm:$0xff]  ;;  %v8939_v53 = vld [vmem:[#allocation119_spill] sm:$0xff] }
 0x2fe   : > { %v1383_v49 = vpop.permute.xlu0 %1382  ;;  %v1551_v50 = vsel %vm1543_vm7, %v1518_v9, %v8924_v55  ;;  %v8942_v55 = vld [vmem:[#allocation29_spill] sm:$0xff] }
 0x2ff   : > { %v1693_v39 = vsel %vm1675_vm12, %v1660_v21, %v1383_v49  ;;  %v1584_v4 = vsel %vm1576_vm9, %v1551_v50, %v5353_v13  ;;  %v1530_v21 = vsel %vm1510_vm5, %v1497_v24, %v8926_v52  ;;  %v8928_v13 = vld [vmem:[#allocation82_spill] sm:$0xff]  ;;  %v1466_v50 = vsel %vm1444_vm4, %v8942_v55, %v8941_v33  ;;  %v8944_v24 = vld [vmem:[#allocation131_spill] sm:$0xff]  ;;  %v8968_v55 = vld [vmem:[#allocation12_spill] sm:$0xff] }
 0x300   : > { %4015 = vmatmul.msk.f32.vlgmr.msra.gmra.mxu3 %vm1711_vm11, %v1693_v39  ;;  %v1617_v49 = vsel %vm1609_vm8, %v1584_v4, %v5481_v62  ;;  %v1563_v16 = vsel %vm1543_vm7, %v1530_v21, %v8927_v63  ;;  %v1453_v3 = vsel %vm1444_vm4, %v4318_v56, %v8928_v13  ;;  %v1465_v56 = vsel %vm1444_vm4, %v4462_v8, %v8931_v15  ;;  %v8945_v52 = vld [vmem:[#allocation191_spill] sm:$0xff]  ;;  %v8946_v21 = vld [vmem:[#allocation40_spill] sm:$0xff]  ;;  %v8947_v63 = vld [vmem:[#allocation21_spill] sm:$0xff] }
 0x301   : > { %v1650_v37 = vsel %vm1642_vm10, %v1617_v49, %v5605_v34  ;;  %v1596_v39 = vsel %vm1576_vm9, %v1563_v16, %v5405_v12  ;;  %v1486_v7 = vsel %vm1477_vm6, %v1453_v3, %v8929_v17  ;;  %v8930_v12 = vld [vmem:[#allocation151_spill] sm:$0xff]  ;;  %v1498_v40 = vsel %vm1477_vm6, %v1465_v56, %v8933_v41  ;;  %v8950_v13 = vld [vmem:[#allocation202_spill] sm:$0xff]  ;;  %v8954_v15 = vld [vmem:[#allocation121_spill] sm:$0xff] }
 0x302   : > { %v1683_v35 = vsel %vm1675_vm12, %v1650_v37, %v5739_v43  ;;  %v1629_v62 = vsel %vm1609_vm8, %v1596_v39, %v5529_v2  ;;  %v1519_v36 = vsel %vm1510_vm5, %v1486_v7, %v8930_v12  ;;  %v1531_v0 = vsel %vm1510_vm5, %v1498_v40, %v8934_v18  ;;  %v8948_v37 = vld [vmem:[#allocation182_spill] sm:$0xff]  ;;  %v8951_v7 = vld [vmem:[#allocation84_spill] sm:$0xff]  ;;  %v8958_v18 = vld [vmem:[#allocation33_spill] sm:$0xff] }
 0x303   : > { %v1385_v19 = vpop.permute.xlu1 %1384  ;;  %v1662_v34 = vsel %vm1642_vm10, %v1629_v62, %v5665_v20  ;;  %v1552_v2 = vsel %vm1543_vm7, %v1519_v36, %v8932_v22  ;;  %v1499_v4 = vsel %vm1477_vm6, %v1466_v50, %v8944_v24  ;;  %v8953_v36 = vld [vmem:[#allocation28_spill] sm:$0xff]  ;;  %v8967_v33 = vld [vmem:[#allocation86_spill] sm:$0xff]  ;;  %v8970_v24 = vld [vmem:[#allocation111_spill] sm:$0xff] }
 0x304   : > { %v1694_v1 = vsel %vm1675_vm12, %v1661_v38, %v1385_v19  ;;  %v1695_v43 = vsel %vm1675_vm12, %v1662_v34, %v1387_v29  ;;  %v1585_v20 = vsel %vm1576_vm9, %v1552_v2, %v5315_v31  ;;  %v8935_v19 = vld [vmem:[#allocation180_spill] sm:$0xff]  ;;  %v1532_v49 = vsel %vm1510_vm5, %v1499_v4, %v8946_v21  ;;  %v8949_v29 = vld [vmem:[#allocation74_spill] sm:$0xff]  ;;  %v8952_v34 = vld [vmem:[#allocation13_spill] sm:$0xff] }
 0x305   : > { %4004 = vmatmul.msk.f32.gmra.mxu0 %vm1711_vm11, %v1682_v42  ;;  %v1618_v30 = vsel %vm1609_vm8, %v1585_v20, %v5489_v54  ;;  %v1564_v8 = vsel %vm1543_vm7, %v1531_v0, %v8935_v19  ;;  %v8937_v31 = vld [vmem:[#allocation64_spill] sm:$0xff]  ;;  %v1565_v39 = vsel %vm1543_vm7, %v1532_v49, %v8948_v37  ;;  %v1455_v12 = vsel %vm1444_vm4, %v8952_v34, %v8951_v7  ;;  %v8957_v20 = vld [vmem:[#allocation101_spill] sm:$0xff]  ;;  %v8979_v34 = vld [vmem:[#allocation30_spill] sm:$0xff] }
 0x306   : > { %v1651_v42 = vsel %vm1642_vm10, %v1618_v30, %v5577_v23  ;;  %v1597_v25 = vsel %vm1576_vm9, %v1564_v8, %v8936_v57  ;;  %v1389_v58 = vpop.permute.xlu0 %1388  ;;  %v1454_v38 = vsel %vm1444_vm4, %v8938_v46, %v8937_v31  ;;  %v1598_v3 = vsel %vm1576_vm9, %v1565_v39, %v8950_v13  ;;  %v8955_v22 = vld [vmem:[#allocation204_spill] sm:$0xff]  ;;  %v8960_v8 = vld [vmem:[#allocation133_spill] sm:$0xff]  ;;  %v8963_v31 = vld [vmem:[#allocation27_spill] sm:$0xff] }
 0x307   : > { %v1684_v10 = vsel %vm1675_vm12, %v1651_v42, %v5748_v44  ;;  %v1630_v54 = vsel %vm1609_vm8, %v1597_v25, %v5537_v28  ;;  %v1487_v9 = vsel %vm1477_vm6, %v1454_v38, %v8939_v53  ;;  %v1488_v56 = vsel %vm1477_vm6, %v1455_v12, %v8954_v15  ;;  %v8956_v41 = vld [vmem:[#allocation152_spill] sm:$0xff]  ;;  %v8961_v57 = vld [vmem:[#allocation193_spill] sm:$0xff]  ;;  %v8964_v38 = vld [vmem:[#allocation174_spill] sm:$0xff] }
 0x308   : > { %4016 = vmatmul.msk.f32.gmra.mxu3 %vm1711_vm11, %v1694_v1  ;;  %v1663_v23 = vsel %vm1642_vm10, %v1630_v54, %v5635_v60  ;;  %v8940_v1 = vld [vmem:[#allocation141_spill] sm:$0xff]  ;;  %v1521_v40 = vsel %vm1510_vm5, %v1488_v56, %v8956_v41  ;;  %v1467_v0 = vsel %vm1444_vm4, %v8958_v18, %v8957_v20  ;;  %v8959_v30 = vld [vmem:[#allocation168_spill] sm:$0xff]  ;;  %v8965_v53 = vld [vmem:[#allocation79_spill] sm:$0xff]  ;;  %v1456_v50 = vsel %vm1444_vm4, %v8968_v55, %v8967_v33 }
 0x309   : > { %v1520_v14 = vsel %vm1510_vm5, %v1487_v9, %v8940_v1  ;;  %v1696_v44 = vsel %vm1675_vm12, %v1663_v23, %v1389_v58  ;;  %v1554_v19 = vsel %vm1543_vm7, %v1521_v40, %v8959_v30  ;;  %v1500_v42 = vsel %vm1477_vm6, %v1467_v0, %v8960_v8  ;;  %v8962_v58 = vld [vmem:[#allocation161_spill] sm:$0xff]  ;;  %v8975_v39 = vld [vmem:[#allocation83_spill] sm:$0xff] }
 0x30a   : > { %v1553_v28 = vsel %vm1543_vm7, %v1520_v14, %v8943_v47  ;;  %v1587_v25 = vsel %vm1576_vm9, %v1554_v19, %v8961_v57  ;;  %v8966_v23 = vld [vmem:[#allocation9_spill] sm:$0xff]  ;;  %v1393_v14 = vpop.permute.xlu2 %1392  ;;  %v8969_v47 = vld [vmem:[#allocation50_spill] sm:$0xff]  ;;  %v1489_v4 = vsel %vm1477_vm6, %v1456_v50, %v8970_v24  ;;  %v8981_v15 = vld [vmem:[#allocation67_spill] sm:$0xff] }
 0x30b   : > { %v1586_v60 = vsel %vm1576_vm9, %v1553_v28, %v8945_v52  ;;  %v1391_v62 = vpop.permute.xlu1 %1390  ;;  %v1620_v46 = vsel %vm1609_vm8, %v1587_v25, %v8963_v31  ;;  %v8971_v52 = vld [vmem:[#allocation205_spill] sm:$0xff]  ;;  %v8985_v0 = vld [vmem:[#allocation51_spill] sm:$0xff]  ;;  %v8986_v19 = vld [vmem:[#allocation122_spill] sm:$0xff] }
 0x30c   : > { %v1619_v16 = vsel %vm1609_vm8, %v1586_v60, %v8947_v63  ;;  %v1653_v9 = vsel %vm1642_vm10, %v1620_v46, %v8965_v53  ;;  %v8972_v21 = vld [vmem:[#allocation153_spill] sm:$0xff]  ;;  %v8973_v63 = vld [vmem:[#allocation103_spill] sm:$0xff]  ;;  %v8988_v25 = vld [vmem:[#allocation144_spill] sm:$0xff] }
 0x30d   : > { %4005 = vmatmul.msk.f32.gmra.mxu0 %vm1711_vm11, %v1683_v35  ;;  %v1652_v35 = vsel %vm1642_vm10, %v1619_v16, %v8949_v29  ;;  %v1522_v49 = vsel %vm1510_vm5, %v1489_v4, %v8972_v21  ;;  %v8974_v16 = vld [vmem:[#allocation32_spill] sm:$0xff]  ;;  %v8984_v20 = vld [vmem:[#allocation17_spill] sm:$0xff]  ;;  %v8990_v31 = vld [vmem:[#allocation35_spill] sm:$0xff] }
 0x30e   : > { %v1685_v17 = vsel %vm1675_vm12, %v1652_v35, %v5760_v27  ;;  %v1468_v37 = vsel %vm1444_vm4, %v8974_v16, %v8973_v63  ;;  %v1555_v29 = vsel %vm1543_vm7, %v1522_v49, %v8975_v39  ;;  %v8976_v35 = vld [vmem:[#allocation123_spill] sm:$0xff]  ;;  %v1395_v41 = vpop.permute.xlu0 %1394  ;;  %v8992_v53 = vld [vmem:[#allocation134_spill] sm:$0xff]  ;;  %v8995_v33 = vld [vmem:[#allocation25_spill] sm:$0xff] }
 0x30f   : > { %v1501_v13 = vsel %vm1477_vm6, %v1468_v37, %v8976_v35  ;;  %v8996_v50 = vld [vmem:[#allocation184_spill] sm:$0xff]  ;;  %v8998_v4 = vld [vmem:[#allocation11_spill] sm:$0xff]  ;;  %v9001_v16 = vld [vmem:[#allocation34_spill] sm:$0xff] }
 0x310   : > { %4017 = vmatmul.msk.f32.gmra.mxu3 %vm1711_vm11, %v1695_v43  ;;  %v1631_v43 = vsel %vm1609_vm8, %v1598_v3, %v8953_v36  ;;  %v8977_v3 = vld [vmem:[#allocation189_spill] sm:$0xff]  ;;  %v8980_v36 = vld [vmem:[#allocation183_spill] sm:$0xff]  ;;  %v8999_v49 = vld [vmem:[#allocation88_spill] sm:$0xff] }
 0x311   : > { %v1664_v2 = vsel %vm1642_vm10, %v1631_v43, %v8955_v22  ;;  %v8982_v22 = vld [vmem:[#allocation195_spill] sm:$0xff]  ;;  %v9002_v39 = vld [vmem:[#allocation124_spill] sm:$0xff] }
 0x312   : > { %v1697_v27 = vsel %vm1675_vm12, %v1664_v2, %v1391_v62  ;;  %v1588_v62 = vsel %vm1576_vm9, %v1555_v29, %v8977_v3  ;;  %v9003_v35 = vld [vmem:[#allocation207_spill] sm:$0xff]  ;;  %v9004_v3 = vld [vmem:[#allocation154_spill] sm:$0xff] }
 0x313   : > { %v1621_v12 = vsel %vm1609_vm8, %v1588_v62, %v8979_v34 }
 0x314   : > { %v1654_v56 = vsel %vm1642_vm10, %v1621_v12, %v8981_v15  ;;  %v9007_v12 = vld [vmem:[#allocation68_spill] sm:$0xff] }
 0x315   : > { %4006 = vmatmul.msk.f32.gmra.mxu0 %vm1711_vm11, %v1684_v10  ;;  %v1533_v10 = vsel %vm1510_vm5, %v1500_v42, %v8962_v58  ;;  %v1687_v40 = vsel %vm1675_vm12, %v1654_v56, %v5771_v51  ;;  %v8987_v42 = vld [vmem:[#allocation203_spill] sm:$0xff]  ;;  %v9009_v56 = vld [vmem:[#allocation196_spill] sm:$0xff] }
 0x316   : > { %v1566_v54 = vsel %vm1543_vm7, %v1533_v10, %v8964_v38  ;;  %v8989_v10 = vld [vmem:[#allocation91_spill] sm:$0xff] }
 0x317   : > { %v1599_v1 = vsel %vm1576_vm9, %v1566_v54, %v8966_v23  ;;  %v1469_v46 = vsel %vm1444_vm4, %v8990_v31, %v8989_v10  ;;  %v8991_v38 = vld [vmem:[#allocation175_spill] sm:$0xff]  ;;  %v8993_v23 = vld [vmem:[#allocation194_spill] sm:$0xff] }
 0x318   : > { %4018 = vmatmul.msk.f32.gmra.mxu3 %vm1711_vm11, %v1696_v44  ;;  %v1686_v44 = vsel %vm1675_vm12, %v1653_v9, %v5769_v11  ;;  %v1632_v28 = vsel %vm1609_vm8, %v1599_v1, %v8969_v47  ;;  %v1502_v9 = vsel %vm1477_vm6, %v1469_v46, %v8992_v53  ;;  %v9017_v10 = vld [vmem:[#allocation58_spill] sm:$0xff] }
 0x319   : > { %v1665_v60 = vsel %vm1642_vm10, %v1632_v28, %v8971_v52  ;;  %v8997_v28 = vld [vmem:[#allocation87_spill] sm:$0xff]  ;;  %v9018_v46 = vld [vmem:[#allocation114_spill] sm:$0xff] }
 0x31a   : > { %v1698_v11 = vsel %vm1675_vm12, %v1665_v60, %v1393_v14  ;;  %v8994_v14 = vld [vmem:[#allocation46_spill] sm:$0xff]  ;;  %v1397_v60 = vpop.permute.xlu1 %1396 }
 0x31d   : > { %4007 = vmatmul.msk.f32.gmra.mxu0 %vm1711_vm11, %v1685_v17  ;;  %v8978_v17 = vld [vmem:[#allocation163_spill] sm:$0xff] }
 0x31e   : > { %v1534_v7 = vsel %vm1510_vm5, %v1501_v13, %v8978_v17  ;;  %v9005_v17 = vld [vmem:[#allocation104_spill] sm:$0xff] }
 0x31f   : > { %v1567_v43 = vsel %vm1543_vm7, %v1534_v7, %v8980_v36  ;;  %v9006_v7 = vld [vmem:[#allocation37_spill] sm:$0xff] }
 0x320   : > { %4019 = vmatmul.msk.f32.gmra.mxu3 %vm1711_vm11, %v1697_v27  ;;  %v1600_v2 = vsel %vm1576_vm9, %v1567_v43, %v8982_v22  ;;  %v8983_v27 = vld [vmem:[#allocation69_spill] sm:$0xff]  ;;  %v1470_v34 = vsel %vm1444_vm4, %v9006_v7, %v9005_v17  ;;  %v9008_v43 = vld [vmem:[#allocation136_spill] sm:$0xff] }
 0x321   : > { %v1457_v18 = vsel %vm1444_vm4, %v8984_v20, %v8983_v27  ;;  %v1633_v30 = vsel %vm1609_vm8, %v1600_v2, %v8985_v0  ;;  %v1503_v15 = vsel %vm1477_vm6, %v1470_v34, %v9008_v43  ;;  %v9010_v2 = vld [vmem:[#allocation55_spill] sm:$0xff]  ;;  %v9012_v20 = vld [vmem:[#allocation90_spill] sm:$0xff]  ;;  %v9013_v0 = vld [vmem:[#allocation89_spill] sm:$0xff] }
 0x322   : > { %v1490_v8 = vsel %vm1477_vm6, %v1457_v18, %v8986_v19  ;;  %v1666_v57 = vsel %vm1642_vm10, %v1633_v30, %v8987_v42  ;;  %v9014_v19 = vld [vmem:[#allocation14_spill] sm:$0xff]  ;;  %v1399_v42 = vpop.permute.xlu2 %1398  ;;  %v9034_v7 = vld [vmem:[#allocation125_spill] sm:$0xff]  ;;  %v9036_v43 = vld [vmem:[#allocation147_spill] sm:$0xff] }
 0x323   : > { %v1523_v58 = vsel %vm1510_vm5, %v1490_v8, %v8988_v25  ;;  %v1699_v51 = vsel %vm1675_vm12, %v1666_v57, %v1395_v41  ;;  %v1536_v41 = vsel %vm1510_vm5, %v1503_v15, %v9010_v2  ;;  %v9015_v25 = vld [vmem:[#allocation92_spill] sm:$0xff] }
 0x324   : > { %v1556_v54 = vsel %vm1543_vm7, %v1523_v58, %v8991_v38  ;;  %v1569_v18 = vsel %vm1543_vm7, %v1536_v41, %v9012_v20  ;;  %v9016_v58 = vld [vmem:[#allocation20_spill] sm:$0xff]  ;;  %v9039_v41 = vld [vmem:[#allocation177_spill] sm:$0xff] }
 0x325   : > { %4008 = vmatmul.msk.f32.gmra.mxu0 %vm1711_vm11, %v1686_v44  ;;  %v1589_v1 = vsel %vm1576_vm9, %v1556_v54, %v8993_v23  ;;  %v1535_v44 = vsel %vm1510_vm5, %v1502_v9, %v8994_v14  ;;  %v1602_v8 = vsel %vm1576_vm9, %v1569_v18, %v9014_v19  ;;  %v9019_v54 = vld [vmem:[#allocation208_spill] sm:$0xff]  ;;  %v9020_v9 = vld [vmem:[#allocation47_spill] sm:$0xff]  ;;  %v9022_v14 = vld [vmem:[#allocation42_spill] sm:$0xff] }
 0x326   : > { %v1622_v55 = vsel %vm1609_vm8, %v1589_v1, %v8995_v33  ;;  %v1568_v47 = vsel %vm1543_vm7, %v1535_v44, %v8996_v50  ;;  %v1635_v31 = vsel %vm1609_vm8, %v1602_v8, %v9017_v10  ;;  %v9021_v1 = vld [vmem:[#allocation106_spill] sm:$0xff]  ;;  %v9023_v33 = vld [vmem:[#allocation176_spill] sm:$0xff]  ;;  %v9041_v18 = vld [vmem:[#allocation197_spill] sm:$0xff] }
 0x327   : > { %v1655_v24 = vsel %vm1642_vm10, %v1622_v55, %v8997_v28  ;;  %v1601_v52 = vsel %vm1576_vm9, %v1568_v47, %v8998_v4  ;;  %v1668_v53 = vsel %vm1642_vm10, %v1635_v31, %v9019_v54  ;;  %v1471_v44 = vsel %vm1444_vm4, %v9022_v14, %v9021_v1  ;;  %v9024_v50 = vld [vmem:[#allocation126_spill] sm:$0xff]  ;;  %v9026_v4 = vld [vmem:[#allocation165_spill] sm:$0xff]  ;;  %v9046_v10 = vld [vmem:[#allocation15_spill] sm:$0xff] }
 0x328   : > { %4020 = vmatmul.msk.f32.gmra.mxu3 %vm1711_vm11, %v1698_v11  ;;  %v1688_v21 = vsel %vm1675_vm12, %v1655_v24, %v5783_v45  ;;  %v9000_v11 = vld [vmem:[#allocation16_spill] sm:$0xff]  ;;  %v1634_v37 = vsel %vm1609_vm8, %v1601_v52, %v9001_v16  ;;  %v1504_v47 = vsel %vm1477_vm6, %v1471_v44, %v9024_v50  ;;  %v9025_v28 = vld [vmem:[#allocation190_spill] sm:$0xff]  ;;  %v9051_v14 = vld [vmem:[#allocation127_spill] sm:$0xff] }
 0x329   : > { %v1458_v63 = vsel %vm1444_vm4, %v9000_v11, %v8999_v49  ;;  %v1667_v13 = vsel %vm1642_vm10, %v1634_v37, %v9003_v35  ;;  %v1537_v52 = vsel %vm1510_vm5, %v1504_v47, %v9026_v4  ;;  %v9028_v49 = vld [vmem:[#allocation185_spill] sm:$0xff]  ;;  %v9030_v37 = vld [vmem:[#allocation198_spill] sm:$0xff]  ;;  %v9053_v50 = vld [vmem:[#allocation155_spill] sm:$0xff] }
 0x32a   : > { %v1491_v29 = vsel %vm1477_vm6, %v1458_v63, %v9002_v39  ;;  %v1700_v45 = vsel %vm1675_vm12, %v1667_v13, %v1397_v60  ;;  %v9027_v60 = vld [vmem:[#allocation36_spill] sm:$0xff]  ;;  %v1570_v11 = vsel %vm1543_vm7, %v1537_v52, %v9028_v49  ;;  %v9029_v63 = vld [vmem:[#allocation73_spill] sm:$0xff]  ;;  %v9031_v13 = vld [vmem:[#allocation75_spill] sm:$0xff] }
 0x32b   : > { %v1524_v62 = vsel %vm1510_vm5, %v1491_v29, %v9004_v3  ;;  %v1603_v39 = vsel %vm1576_vm9, %v1570_v11, %v9030_v37  ;;  %v1401_v29 = vpop.permute.xlu0 %1400  ;;  %v9032_v3 = vld [vmem:[#allocation22_spill] sm:$0xff]  ;;  %v9055_v4 = vld [vmem:[#allocation45_spill] sm:$0xff]  ;;  %v9057_v49 = vld [vmem:[#allocation139_spill] sm:$0xff] }
 0x32c   : > { %v1557_v36 = vsel %vm1543_vm7, %v1524_v62, %v9007_v12  ;;  %v1460_v62 = vsel %vm1444_vm4, %v9032_v3, %v9031_v13  ;;  %v9035_v12 = vld [vmem:[#allocation206_spill] sm:$0xff]  ;;  %v9059_v37 = vld [vmem:[#allocation57_spill] sm:$0xff]  ;;  %v9061_v3 = vld [vmem:[#allocation179_spill] sm:$0xff] }
 0x32d   : > { %4009 = vmatmul.msk.f32.gmra.mxu0 %vm1711_vm11, %v1687_v40  ;;  %v1590_v22 = vsel %vm1576_vm9, %v1557_v36, %v9009_v56  ;;  %v9011_v40 = vld [vmem:[#allocation31_spill] sm:$0xff]  ;;  %v1493_v34 = vsel %vm1477_vm6, %v1460_v62, %v9034_v7  ;;  %v9037_v56 = vld [vmem:[#allocation96_spill] sm:$0xff]  ;;  %v9043_v8 = vld [vmem:[#allocation26_spill] sm:$0xff] }
 0x32e   : > { %v1623_v27 = vsel %vm1609_vm8, %v1590_v22, %v9011_v40  ;;  %v1526_v15 = vsel %vm1510_vm5, %v1493_v34, %v9036_v43  ;;  %v9038_v22 = vld [vmem:[#allocation41_spill] sm:$0xff]  ;;  %v9047_v54 = vld [vmem:[#allocation94_spill] sm:$0xff] }
 0x32f   : > { %v1656_v30 = vsel %vm1642_vm10, %v1623_v27, %v9013_v0  ;;  %v1472_v2 = vsel %vm1444_vm4, %v9038_v22, %v9037_v56  ;;  %v1559_v40 = vsel %vm1543_vm7, %v1526_v15, %v9039_v41  ;;  %v9040_v27 = vld [vmem:[#allocation137_spill] sm:$0xff]  ;;  %v9050_v1 = vld [vmem:[#allocation6_spill] sm:$0xff] }
 0x330   : > { %4021 = vmatmul.msk.f32.gmra.mxu3 %vm1711_vm11, %v1699_v51  ;;  %v1689_v57 = vsel %vm1675_vm12, %v1656_v30, %v5801_v6  ;;  %v1459_v51 = vsel %vm1444_vm4, %v9016_v58, %v9015_v25  ;;  %v1701_v6 = vsel %vm1675_vm12, %v1668_v53, %v1399_v42  ;;  %v1505_v20 = vsel %vm1477_vm6, %v1472_v2, %v9040_v27  ;;  %v9042_v30 = vld [vmem:[#allocation156_spill] sm:$0xff]  ;;  %v9045_v58 = vld [vmem:[#allocation93_spill] sm:$0xff]  ;;  %v9063_v34 = vld [vmem:[#allocation18_spill] sm:$0xff] }
 0x331   : > { %v1492_v38 = vsel %vm1477_vm6, %v1459_v51, %v9018_v46  ;;  %v1592_v0 = vsel %vm1576_vm9, %v1559_v40, %v9041_v18  ;;  %v1538_v19 = vsel %vm1510_vm5, %v1505_v20, %v9042_v30  ;;  %v1403_v46 = vpop.permute.xlu1 %1402  ;;  %v9048_v53 = vld [vmem:[#allocation24_spill] sm:$0xff]  ;;  %4128 = vrot.lane.b32.xlu2 %v9050_v1, %s4154_s28  ;;  %v9064_v15 = vld [vmem:[#allocation62_spill] sm:$0xff]  ;;  %v9066_v40 = vld [vmem:[#allocation109_spill] sm:$0xff] }
 0x332   : > { %v1525_v23 = vsel %vm1510_vm5, %v1492_v38, %v9020_v9  ;;  %v1625_v42 = vsel %vm1609_vm8, %v1592_v0, %v9043_v8  ;;  %v1461_v9 = vsel %vm1444_vm4, %v9048_v53, %v9047_v54  ;;  %v9065_v56 = vld [vmem:[#allocation66_spill] sm:$0xff]  ;;  %v9067_v27 = vld [vmem:[#allocation44_spill] sm:$0xff]  ;;  %v9068_v18 = vld [vmem:[#allocation129_spill] sm:$0xff] }
 0x333   : > { %v1558_v55 = vsel %vm1543_vm7, %v1525_v23, %v9023_v33  ;;  %v1658_v51 = vsel %vm1642_vm10, %v1625_v42, %v9045_v58  ;;  %v9049_v23 = vld [vmem:[#allocation39_spill] sm:$0xff]  ;;  %v1494_v44 = vsel %vm1477_vm6, %v1461_v9, %v9051_v14  ;;  %v9052_v33 = vld [vmem:[#allocation210_spill] sm:$0xff]  ;;  %v1474_v20 = vsel %vm1444_vm4, %v9067_v27, %v9066_v40  ;;  %v9071_v58 = vld [vmem:[#allocation201_spill] sm:$0xff] }
 0x334   : > { %v1591_v24 = vsel %vm1576_vm9, %v1558_v55, %v9025_v28  ;;  %v1691_v38 = vsel %vm1675_vm12, %v1658_v51, %v5815_v48  ;;  %v1527_v48 = vsel %vm1510_vm5, %v1494_v44, %v9053_v50  ;;  %v6190_v28 = vld [vmem:[%s8311_s2] ss:$0 sm:$0xff]  ;;  %v9069_v0 = vld [vmem:[#allocation167_spill] sm:$0xff]  ;;  %v9073_v54 = vld [vmem:[#allocation209_spill] sm:$0xff]  ;;  %v4121_v40 = vunpack.i.h.bf16 %v5691_v26 }
 0x335   : > { %4010 = vmatmul.msk.f32.gmra.mxu0 %vm1711_vm11, %v1688_v21  ;;  %v1624_v21 = vsel %vm1609_vm8, %v1591_v24, %v9027_v60  ;;  %v9054_v24 = vld [vmem:[#allocation107_spill] sm:$0xff] }
 0x336   : > { %v1657_v16 = vsel %vm1642_vm10, %v1624_v21, %v9029_v63  ;;  %v1473_v52 = vsel %vm1444_vm4, %v9055_v4, %v9054_v24  ;;  %v9056_v60 = vld [vmem:[#allocation171_spill] sm:$0xff] }
 0x337   : > { %v1690_v35 = vsel %vm1675_vm12, %v1657_v16, %v5792_v59  ;;  %v1560_v21 = vsel %vm1543_vm7, %v1527_v48, %v9056_v60  ;;  %v1506_v11 = vsel %vm1477_vm6, %v1473_v52, %v9057_v49  ;;  %v9058_v63 = vld [vmem:[#allocation199_spill] sm:$0xff] }
 0x338   : > { %4022 = vmatmul.msk.f32.gmra.mxu3 %vm1711_vm11, %v1700_v45  ;;  %v9033_v45 = vld [vmem:[#allocation59_spill] sm:$0xff]  ;;  %v1593_v16 = vsel %vm1576_vm9, %v1560_v21, %v9058_v63  ;;  %v4120_v21 = vunpack.i.l.bf16 %v5691_v26 }
 0x339   : > { %v1636_v17 = vsel %vm1609_vm8, %v1603_v39, %v9033_v45  ;;  %v1539_v39 = vsel %vm1510_vm5, %v1506_v11, %v9059_v37  ;;  %v9062_v45 = vld [vmem:[#allocation95_spill] sm:$0xff]  ;;  %v4124_v50 = vpop.permute.xlu1 %4123  ;;  %v9081_v37 = vld [vmem:[#allocation188_spill] sm:$0xff] }
 0x33a   : > { %v1669_v36 = vsel %vm1642_vm10, %v1636_v17, %v9035_v12  ;;  %v1572_v62 = vsel %vm1543_vm7, %v1539_v39, %v9061_v3  ;;  %v9070_v8 = vld [vmem:[#allocation187_spill] sm:$0xff] }
 0x33b   : > { %v1702_v59 = vsel %vm1675_vm12, %v1669_v36, %v1401_v29  ;;  %v9060_v29 = vld [vmem:[#allocation38_spill] sm:$0xff]  ;;  %v1605_v12 = vsel %vm1576_vm9, %v1572_v62, %v9063_v34  ;;  %v1405_v36 = vpop.permute.xlu2 %1404  ;;  %v9074_v9 = vld [vmem:[#allocation99_spill] sm:$0xff] }
 0x33c   : > { %v9078_v48 = vld [vmem:[#allocation159_spill] sm:$0xff] }
 0x33d   : > { %4011 = vmatmul.msk.f32.gmra.mxu0 %vm1711_vm11, %v1689_v57  ;;  %v9044_v57 = vld [vmem:[#allocation186_spill] sm:$0xff]  ;;  %v9079_v24 = vld [vmem:[#allocation43_spill] sm:$0xff] }
 0x33e   : > { %v1571_v25 = vsel %vm1543_vm7, %v1538_v19, %v9044_v57  ;;  %v4115_v4 = vunpack.i.l.bf16 %v9079_v24 }
 0x33f   : > { %v1604_v31 = vsel %vm1576_vm9, %v1571_v25, %v9046_v10  ;;  %v1407_v10 = vpop.permute.xlu0 %1406 }
 0x340   : > { %4023 = vmatmul.msk.f32.gmra.mxu3 %vm1711_vm11, %v1701_v6  ;;  %v1637_v6 = vsel %vm1609_vm8, %v1604_v31, %v9049_v23  ;;  %v9072_v31 = vld [vmem:[#allocation63_spill] sm:$0xff]  ;;  %v9075_v23 = vld [vmem:[#allocation49_spill] sm:$0xff] }
 0x341   : > { %v1670_v55 = vsel %vm1642_vm10, %v1637_v6, %v9052_v33  ;;  %v1475_v6 = vsel %vm1444_vm4, %v9075_v23, %v9074_v9  ;;  %v9077_v33 = vld [vmem:[#allocation140_spill] sm:$0xff] }
 0x342   : > { %v1703_v47 = vsel %vm1675_vm12, %v1670_v55, %v1403_v46  ;;  %v1508_v55 = vsel %vm1477_vm6, %v1475_v6, %v9077_v33 }
 0x345   : > { %4012 = vmatmul.msk.f32.gmra.mxu0 %vm1711_vm11, %v1690_v35  ;;  %v1626_v35 = vsel %vm1609_vm8, %v1593_v16, %v9060_v29  ;;  %v4125_v29 = vunpack.i.l.bf16 %v4124_v50 }
 0x346   : > { %v1659_v17 = vsel %vm1642_vm10, %v1626_v35, %v9062_v45 }
 0x347   : > { %v1692_v43 = vsel %vm1675_vm12, %v1659_v17, %v5847_v5  ;;  %v1507_v5 = vsel %vm1477_vm6, %v1474_v20, %v9068_v18  ;;  %v9087_v20 = vld [vmem:[#allocation181_spill] sm:$0xff] }
 0x348   : > { %4024 = vmatmul.msk.f32.gmra.mxu3 %vm1711_vm11, %v1702_v59  ;;  %v1638_v59 = vsel %vm1609_vm8, %v1605_v12, %v9064_v15  ;;  %v1540_v30 = vsel %vm1510_vm5, %v1507_v5, %v9069_v0  ;;  %v4126_v5 = vunpack.i.h.bf16 %v4124_v50 }
 0x349   : > { %v1671_v22 = vsel %vm1642_vm10, %v1638_v59, %v9065_v56  ;;  %v1573_v42 = vsel %vm1543_vm7, %v1540_v30, %v9070_v8  ;;  %v9085_v59 = vld [vmem:[#allocation142_spill] sm:$0xff] }
 0x34a   : > { %v1704_v41 = vsel %vm1675_vm12, %v1671_v22, %v1405_v36  ;;  %v1606_v51 = vsel %vm1576_vm9, %v1573_v42, %v9071_v58  ;;  %v9083_v36 = vld [vmem:[#allocation110_spill] sm:$0xff]  ;;  %v4116_v22 = vunpack.i.h.bf16 %v9079_v24 }
 0x34b   : > { %v1639_v46 = vsel %vm1609_vm8, %v1606_v51, %v9072_v31 }
 0x34c   : > { %v1672_v53 = vsel %vm1642_vm10, %v1639_v46, %v9073_v54 }
 0x34d   : > { %4013 = vmatmul.msk.f32.gmra.mxu0 %vm1711_vm11, %v1691_v38  ;;  %v1705_v44 = vsel %vm1675_vm12, %v1672_v53, %v1407_v10 }
 0x350   : > { %4025 = vmatmul.msk.f32.gmra.mxu3 %vm1711_vm11, %v1703_v47  ;;  %v1541_v47 = vsel %vm1510_vm5, %v1508_v55, %v9078_v48 }
 0x351   : > { %v1574_v39 = vsel %vm1543_vm7, %v1541_v47, %v9081_v37 }
 0x352   : > { %v1829_v13 = vpop.f32.mrf.mxu0 }
 0x353   : > { %v1830_v7 = vadd.f32 %v6190_v28, %v1829_v13  ;;  %v9082_v13 = vld [vmem:[#allocation19_spill] sm:$0xff] }
 0x354   : > { %v1607_v3 = vsel %vm1576_vm9, %v1574_v39, %v9082_v13 }
 0x355   : > { %4014 = vmatmul.msk.f32.gmra.mxu0 %vm1711_vm11, %v1692_v43  ;;  %v1925_v2 = vmax.f32 %v1830_v7, 0.0  ;;  %v1640_v17 = vsel %vm1609_vm8, %v1607_v3, %v4115_v4  ;;  %v9084_v43 = vld [vmem:[#allocation48_spill] sm:$0xff] }
 0x356   : > { %v1673_v7 = vsel %vm1642_vm10, %v1640_v17, %v4120_v21  ;;  %v1476_v15 = vsel %vm1444_vm4, %v9084_v43, %v9083_v36  ;;  %vm3313_vm4 = vcmask 523264  }
 0x357   : > { %v1999_v57 = vrot.slane %v1925_v2, 7  ;;  %v1706_v12 = vsel %vm1675_vm12, %v1673_v7, %v4125_v29  ;;  %v1509_v56 = vsel %vm1477_vm6, %v1476_v15, %v9085_v59  ;;  %v9086_v2 = vld [vmem:[#allocation61_spill] sm:$0xff] }
 0x358   : > { %4026 = vmatmul.msk.f32.gmra.mxu3 %vm1711_vm11, %v1704_v41  ;;  %v1542_v41 = vsel %vm1510_vm5, %v1509_v56, %v9086_v2  ;;  %vm3349_vm5 = vcmask 588800  }
 0x359   : > { %v6242_v1 = vsel %vm336_vm0, 0.0, %v1999_v57  ;;  %v1575_v18 = vsel %vm1543_vm7, %v1542_v41, %v9087_v20 }
 0x35a   : > { %v1832_v19 = vpop.f32.mrf.mxu0  ;;  %9076 = vst [vmem:[#allocation112_spill] sm:$0xff] %v6242_v1  ;;  %v2156_v49 = vrot.slane %v6242_v1, 1 }
 0x35b   : > { %v1833_v25 = vadd.f32 %v6190_v28, %v1832_v19  ;;  %v9088_v19 = vld [vmem:[#allocation23_spill] sm:$0xff] }
 0x35c   : > { %v1608_v8 = vsel %vm1576_vm9, %v1575_v18, %v9088_v19  ;;  %vm3839_vm9 = vcmask 1041408  }
 0x35d   : > { %v1926_v38 = vmax.f32 %v1833_v25, 0.0 }
 0x35f   : > { %v2000_v14 = vrot.slane %v1926_v38, 7 }
 0x360   : > { %4027 = vmatmul.msk.f32.gmra.mxu3 %vm1711_vm11, %v1705_v44 }
 0x361   : > { %v6252_v52 = vsel %vm336_vm0, %v1999_v57, %v2000_v14  ;;  %v6255_v60 = vsel %vm336_vm0, %v2000_v14, 0.0  ;;  %v1641_v57 = vsel %vm1609_vm8, %v1608_v8, %v4116_v22 }
 0x362   : > { %9080 = vst [vmem:[#allocation132_spill] sm:$0xff] %v6252_v52  ;;  %v2159_v11 = vrot.slane %v6255_v60, 1  ;;  %v1835_v63 = vpop.f32.mrf.mxu0  ;;  %v2157_v16 = vrot.slane %v6252_v52, 1  ;;  %v1674_v25 = vsel %vm1642_vm10, %v1641_v57, %v4121_v40  ;;  %vm3848_vm10 = vcmask 1042432  }
 0x363   : > { %v1836_v35 = vadd.f32 %v6190_v28, %v1835_v63  ;;  %v1707_v51 = vsel %vm1675_vm12, %v1674_v25, %v4126_v5 }
 0x364   : > { %v6267_v62 = vsel %vm502_vm1, %v2157_v16, %v2159_v11  ;;  %v6270_v45 = vsel %vm502_vm1, %v2156_v49, %v2157_v16 }
 0x365   : > { %2237 = vrot.lane.b32.xlu1 %v6267_v62, %s4154_s28  ;;  %2235 = vrot.lane.b32.xlu0 %v6270_v45, %s4154_s28  ;;  %v1927_v34 = vmax.f32 %v1836_v35, 0.0 }
 0x367   : > { %v2002_v0 = vrot.slane %v1927_v34, 7 }
 0x368   : > { %4028 = vmatmul.msk.f32.gmra.mxu3 %vm1711_vm11, %v1706_v12 }
 0x369   : > { %v6297_v58 = vsel %vm336_vm0, 0.0, %v2002_v0 }
 0x36a   : > { %v1838_v27 = vpop.f32.mrf.mxu0  ;;  %9089 = vst [vmem:[#allocation169_spill] sm:$0xff] %v6297_v58  ;;  %v2161_v53 = vrot.slane %v6297_v58, 1 }
 0x36b   : > { %v1839_v30 = vadd.f32 %v6190_v28, %v1838_v27 }
 0x36d   : > { %v1928_v42 = vmax.f32 %v1839_v30, 0.0 }
 0x36f   : > { %v2003_v26 = vrot.slane %v1928_v42, 7 }
 0x370   : > { %4029 = vmatmul.msk.f32.gmra.mxu3 %vm1711_vm11, %v1707_v51  ;;  %vm3865_vm11 = vcmask 1044480  }
 0x371   : > { %v6302_v10 = vsel %vm336_vm0, %v2002_v0, %v2003_v26  ;;  %v6305_v31 = vsel %vm336_vm0, %v2003_v26, 0.0 }
 0x372   : > { %9090 = vst [vmem:[#allocation143_spill] sm:$0xff] %v6302_v10  ;;  %v2164_v46 = vrot.slane %v6305_v31, 1  ;;  %v1841_v38 = vpop.f32.mrf.mxu0  ;;  %v2162_v54 = vrot.slane %v6302_v10, 1 }
 0x373   : > { %v1842_v9 = vadd.f32 %v6190_v28, %v1841_v38 }
 0x374   : > { %v6312_v23 = vsel %vm502_vm1, %v2162_v54, %v2164_v46  ;;  %v6315_v6 = vsel %vm502_vm1, %v2161_v53, %v2162_v54 }
 0x375   : > { %2241 = vrot.lane.b32.xlu0 %v6312_v23, %s4154_s28  ;;  %2239 = vrot.lane.b32.xlu2 %v6315_v6, %s4154_s28  ;;  %v1929_v14 = vmax.f32 %v1842_v9, 0.0 }
 0x377   : > { %v2005_v33 = vrot.slane %v1929_v14, 7 }
 0x379   : > { %v6323_v48 = vsel %vm336_vm0, 0.0, %v2005_v33 }
 0x37a   : > { %v1844_v44 = vpop.f32.mrf.mxu0  ;;  %v2166_v63 = vrot.slane %v6323_v48, 1 }
 0x37b   : > { %v1845_v55 = vadd.f32 %v6190_v28, %v1844_v44 }
 0x37d   : > { %v1930_v50 = vmax.f32 %v1845_v55, 0.0 }
 0x37f   : > { %v2006_v47 = vrot.slane %v1930_v50, 7 }
 0x381   : > { %v6326_v24 = vsel %vm336_vm0, %v2005_v33, %v2006_v47  ;;  %v6329_v4 = vsel %vm336_vm0, %v2006_v47, 0.0 }
 0x382   : > { %v2169_v21 = vrot.slane %v6329_v4, 1  ;;  %v1847_v49 = vpop.f32.mrf.mxu0  ;;  %v2167_v11 = vrot.slane %v6326_v24, 1 }
 0x383   : > { %v1848_v16 = vadd.f32 %v6190_v28, %v1847_v49  ;;  %v6335_v37 = vpop.f32.mrf.mxu3 }
 0x384   : > { %v6338_v39 = vsel %vm502_vm1, %v2167_v11, %v2169_v21  ;;  %v6341_v29 = vsel %vm502_vm1, %v2166_v63, %v2167_v11 }
 0x385   : > { %2245 = vrot.lane.b32.xlu2 %v6338_v39, %s4154_s28  ;;  %2243 = vrot.lane.b32.xlu1 %v6341_v29, %s4154_s28  ;;  %v1931_v35 = vmax.f32 %v1848_v16, 0.0 }
 0x387   : > { %v2008_v3 = vrot.slane %v1931_v35, 7 }
 0x389   : > { %v6351_v12 = vsel %vm336_vm0, 0.0, %v2008_v3 }
 0x38a   : > { %v1850_v13 = vpop.f32.mrf.mxu0  ;;  %v2171_v22 = vrot.slane %v6351_v12, 1 }
 0x38b   : > { %v1851_v17 = vadd.f32 %v6190_v28, %v1850_v13  ;;  %v6348_v7 = vpop.f32.mrf.mxu3 }
 0x38d   : > { %v1932_v34 = vmax.f32 %v1851_v17, 0.0 }
 0x38f   : > { %v2009_v36 = vrot.slane %v1932_v34, 7 }
 0x391   : > { %v6354_v43 = vsel %vm336_vm0, %v2008_v3, %v2009_v36  ;;  %v6357_v15 = vsel %vm336_vm0, %v2009_v36, 0.0 }
 0x392   : > { %v2174_v59 = vrot.slane %v6357_v15, 1  ;;  %v1853_v56 = vpop.f32.mrf.mxu0  ;;  %v2172_v2 = vrot.slane %v6354_v43, 1 }
 0x393   : > { %v1854_v41 = vadd.f32 %v6190_v28, %v1853_v56  ;;  %v6363_v40 = vpop.f32.mrf.mxu3 }
 0x394   : > { %v6366_v27 = vsel %vm502_vm1, %v2171_v22, %v2172_v2  ;;  %v6369_v20 = vsel %vm502_vm1, %v2172_v2, %v2174_v59 }
 0x395   : > { %9091 = vst [vmem:[#allocation162_spill] sm:$0xff] %v6369_v20  ;;  %2247 = vrot.lane.b32.xlu0 %v6366_v27, %s4154_s28  ;;  %2249 = vrot.lane.b32.xlu1 %v6369_v20, %s4154_s28  ;;  %v1933_v18 = vmax.f32 %v1854_v41, 0.0 }
 0x397   : > { %v2011_v0 = vrot.slane %v1933_v18, 7 }
 0x399   : > { %v6379_v42 = vsel %vm336_vm0, 0.0, %v2011_v0 }
 0x39a   : > { %v1856_v5 = vpop.f32.mrf.mxu0  ;;  %9092 = vst [vmem:[#allocation72_spill] sm:$0xff] %v6379_v42  ;;  %v2176_v54 = vrot.slane %v6379_v42, 1 }
 0x39b   : > { %v1857_v30 = vadd.f32 %v6190_v28, %v1856_v5  ;;  %v6376_v19 = vpop.f32.mrf.mxu3 }
 0x39d   : > { %v1934_v8 = vmax.f32 %v1857_v30, 0.0 }
 0x39f   : > { %v2012_v57 = vrot.slane %v1934_v8, 7 }
 0x3a1   : > { %v6382_v25 = vsel %vm336_vm0, %v2011_v0, %v2012_v57  ;;  %v6385_v26 = vsel %vm336_vm0, %v2012_v57, 0.0 }
 0x3a2   : > { %9093 = vst [vmem:[#allocation7_spill] sm:$0xff] %v6382_v25  ;;  %v2179_v51 = vrot.slane %v6385_v26, 1  ;;  %v1859_v46 = vpop.f32.mrf.mxu0  ;;  %v2177_v38 = vrot.slane %v6382_v25, 1 }
 0x3a3   : > { %v1860_v53 = vadd.f32 %v6190_v28, %v1859_v46  ;;  %v1892_v9 = vpop.f32.mrf.mxu3 }
 0x3a4   : > { %v6392_v14 = vsel %vm502_vm1, %v2177_v38, %v2179_v51  ;;  %v6395_v44 = vsel %vm502_vm1, %v2176_v54, %v2177_v38 }
 0x3a5   : > { %9094 = vst [vmem:[#allocation102_spill] sm:$0xff] %v6392_v14  ;;  %2253 = vrot.lane.b32.xlu0 %v6392_v14, %s4154_s28  ;;  %2251 = vrot.lane.b32.xlu2 %v6395_v44, %s4154_s28  ;;  %v1935_v33 = vmax.f32 %v1860_v53, 0.0 }
 0x3a6   : > { %9095 = vst [vmem:[#allocation145_spill] sm:$0xff] %v6395_v44 }
 0x3a7   : > { %v2014_v50 = vrot.slane %v1935_v33, 7 }
 0x3a9   : > { %v6405_v11 = vsel %vm336_vm0, 0.0, %v2014_v50 }
 0x3aa   : > { %v1862_v55 = vpop.f32.mrf.mxu0  ;;  %v2181_v34 = vrot.slane %v6405_v11, 1 }
 0x3ab   : > { %v1863_v47 = vadd.f32 %v6190_v28, %v1862_v55  ;;  %v6402_v21 = vpop.f32.mrf.mxu3 }
 0x3ad   : > { %v1936_v49 = vmax.f32 %v1863_v47, 0.0 }
 0x3af   : > { %v2015_v63 = vrot.slane %v1936_v49, 7 }
 0x3b1   : > { %v6408_v16 = vsel %vm336_vm0, %v2014_v50, %v2015_v63  ;;  %v6411_v35 = vsel %vm336_vm0, %v2015_v63, 0.0 }
 0x3b2   : > { %v2184_v13 = vrot.slane %v6411_v35, 1  ;;  %v1865_v3 = vpop.f32.mrf.mxu0  ;;  %v2182_v17 = vrot.slane %v6408_v16, 1 }
 0x3b3   : > { %v1866_v36 = vadd.f32 %v6190_v28, %v1865_v3  ;;  %v6417_v59 = vpop.f32.mrf.mxu3 }
 0x3b4   : > { %v6420_v56 = vsel %vm502_vm1, %v2182_v17, %v2184_v13  ;;  %v6423_v22 = vsel %vm502_vm1, %v2181_v34, %v2182_v17  ;;  %v1887_v13 = vadd.f32 %v6190_v28, %v6363_v40  ;;  %v1881_v17 = vadd.f32 %v6190_v28, %v6335_v37 }
 0x3b5   : > { %9096 = vst [vmem:[#allocation65_spill] sm:$0xff] %v6420_v56  ;;  %2257 = vrot.lane.b32.xlu2 %v6420_v56, %s4154_s28  ;;  %2255 = vrot.lane.b32.xlu1 %v6423_v22, %s4154_s28  ;;  %v1937_v2 = vmax.f32 %v1866_v36, 0.0  ;;  %v1884_v34 = vadd.f32 %v6190_v28, %v6348_v7 }
 0x3b6   : > { %9097 = vst [vmem:[#allocation70_spill] sm:$0xff] %v6423_v22 }
 0x3b7   : > { %v2017_v18 = vrot.slane %v1937_v2, 7 }
 0x3b9   : > { %v6433_v8 = vsel %vm336_vm0, 0.0, %v2017_v18 }
 0x3ba   : > { %v1868_v41 = vpop.f32.mrf.mxu0  ;;  %v2186_v53 = vrot.slane %v6433_v8, 1 }
 0x3bb   : > { %v1869_v5 = vadd.f32 %v6190_v28, %v1868_v41  ;;  %v6430_v0 = vpop.f32.mrf.mxu3 }
 0x3bd   : > { %v1938_v30 = vmax.f32 %v1869_v5, 0.0 }
 0x3bf   : > { %v2018_v57 = vrot.slane %v1938_v30, 7  ;;  %v1942_v30 = vmax.f32 %v1881_v17, 0.0 }
 0x3c1   : > { %v6436_v51 = vsel %vm336_vm0, %v2017_v18, %v2018_v57  ;;  %v6439_v46 = vsel %vm336_vm0, %v2018_v57, 0.0  ;;  %v1944_v18 = vmax.f32 %v1887_v13, 0.0  ;;  %v1943_v57 = vmax.f32 %v1884_v34, 0.0 }
 0x3c2   : > { %v2189_v38 = vrot.slane %v6439_v46, 1  ;;  %v1871_v54 = vpop.f32.mrf.mxu0  ;;  %v2187_v33 = vrot.slane %v6436_v51, 1  ;;  %v1890_v34 = vadd.f32 %v6190_v28, %v6376_v19 }
 0x3c3   : > { %v1872_v55 = vadd.f32 %v6190_v28, %v1871_v54  ;;  %v1904_v50 = vpop.f32.mrf.mxu3  ;;  %v1893_v54 = vadd.f32 %v6190_v28, %v1892_v9  ;;  %v2026_v17 = vrot.slane %v1943_v57, 7 }
 0x3c4   : > { %v6446_v47 = vsel %vm502_vm1, %v2186_v53, %v2187_v33  ;;  %v6449_v49 = vsel %vm502_vm1, %v2187_v33, %v2189_v38  ;;  %v2027_v53 = vrot.slane %v1944_v18, 7  ;;  %v1945_v57 = vmax.f32 %v1890_v34, 0.0 }
 0x3c5   : > { %9098 = vst [vmem:[#allocation8_spill] sm:$0xff] %v6446_v47  ;;  %2259 = vrot.lane.b32.xlu0 %v6446_v47, %s4154_s28  ;;  %2261 = vrot.lane.b32.xlu1 %v6449_v49, %s4154_s28  ;;  %v1939_v63 = vmax.f32 %v1872_v55, 0.0 }
 0x3c6   : > { %9099 = vst [vmem:[#allocation113_spill] sm:$0xff] %v6449_v49 }
 0x3c7   : > { %v2020_v36 = vrot.slane %v1939_v63, 7 }
 0x3c9   : > { %v6465_v38 = vsel %vm336_vm0, 0.0, %v2020_v36 }
 0x3ca   : > { %v1874_v3 = vpop.f32.mrf.mxu0  ;;  %9100 = vst [vmem:[#allocation135_spill] sm:$0xff] %v6465_v38  ;;  %v2191_v13 = vrot.slane %v6465_v38, 1 }
 0x3cb   : > { %v1875_v2 = vadd.f32 %v6190_v28, %v1874_v3  ;;  %v6462_v41 = vpop.f32.mrf.mxu3  ;;  %v2024_v3 = vrot.slane %v1942_v30, 7  ;;  %v6497_v30 = vsel %vm336_vm0, 0.0, %v2026_v17 }
 0x3cd   : > { %v1940_v5 = vmax.f32 %v1875_v2, 0.0  ;;  %v6494_v19 = vsel %vm336_vm0, %v2024_v3, 0.0 }
 0x3ce   : > { %v2199_v49 = vrot.slane %v6494_v19, 1 }
 0x3cf   : > { %v2021_v40 = vrot.slane %v1940_v5, 7 }
 0x3d1   : > { %v6469_v37 = vsel %vm336_vm0, %v2020_v36, %v2021_v40  ;;  %v6472_v7 = vsel %vm336_vm0, %v2021_v40, 0.0  ;;  %v1946_v36 = vmax.f32 %v1893_v54, 0.0  ;;  %v6487_v40 = vsel %vm336_vm0, %v2026_v17, %v2027_v53 }
 0x3d2   : > { %9101 = vst [vmem:[#allocation170_spill] sm:$0xff] %v6469_v37  ;;  %v2194_v33 = vrot.slane %v6472_v7, 1  ;;  %v1877_v55 = vpop.f32.mrf.mxu0  ;;  %v2192_v63 = vrot.slane %v6469_v37, 1  ;;  %v2201_v17 = vrot.slane %v6497_v30, 1 }
 0x3d3   : > { %v1878_v9 = vadd.f32 %v6190_v28, %v1877_v55  ;;  %v1910_v2 = vpop.f32.mrf.mxu3  ;;  %v2202_v55 = vrot.slane %v6487_v40, 1 }
 0x3d4   : > { %v6481_v18 = vsel %vm502_vm1, %v2192_v63, %v2194_v33  ;;  %v6484_v5 = vsel %vm502_vm1, %v2191_v13, %v2192_v63  ;;  %v2030_v33 = vrot.slane %v1946_v36, 7  ;;  %v1899_v63 = vadd.f32 %v6190_v28, %v6417_v59 }
 0x3d5   : > { %9102 = vst [vmem:[#allocation76_spill] sm:$0xff] %v6481_v18  ;;  %v1941_v61 = vmax.f32 %v1878_v9, 0.0  ;;  %2265 = vrot.lane.b32.xlu0 %v6481_v18, %s4154_s28  ;;  %2263 = vrot.lane.b32.xlu2 %v6484_v5, %s4154_s28  ;;  %v1905_v13 = vadd.f32 %v6190_v28, %v1904_v50  ;;  %v2029_v36 = vrot.slane %v1945_v57, 7  ;;  %v1896_v59 = vadd.f32 %v6190_v28, %v6402_v21 }
 0x3d6   : > { %9103 = vst [vmem:[#allocation115_spill] sm:$0xff] %v6484_v5  ;;  %v1902_v50 = vadd.f32 %v6190_v28, %v6430_v0  ;;  %v6521_v5 = vsel %vm502_vm1, %v2201_v17, %v2202_v55  ;;  %v6533_v21 = vsel %vm336_vm0, %v2030_v33, 0.0  ;;  %v1948_v0 = vmax.f32 %v1899_v63, 0.0 }
 0x3d7   : > { %v2023_v54 = vrot.slane %v1941_v61, 7  ;;  %9106 = vst [vmem:[#allocation56_spill] sm:$0xff] %v6521_v5  ;;  %v6530_v57 = vsel %vm336_vm0, %v2029_v36, %v2030_v33  ;;  %v1950_v56 = vmax.f32 %v1905_v13, 0.0  ;;  %v2209_v33 = vrot.slane %v6533_v21, 1 }
 0x3d8   : > { %v1949_v17 = vmax.f32 %v1902_v50, 0.0  ;;  %v2207_v63 = vrot.slane %v6530_v57, 1  ;;  %v2033_v13 = vrot.slane %v1948_v0, 7 }
 0x3d9   : > { %v6504_v9 = vsel %vm336_vm0, %v2023_v54, %v2024_v3  ;;  %v6507_v32 = vsel %vm336_vm0, 0.0, %v2023_v54  ;;  %v6518_v3 = vsel %vm336_vm0, %v2027_v53, 0.0  ;;  %v1947_v53 = vmax.f32 %v1896_v59, 0.0 }
 0x3da   : > { %9104 = vst [vmem:[#allocation146_spill] sm:$0xff] %v6504_v9  ;;  %v2197_v61 = vrot.slane %v6504_v9, 1  ;;  %v2196_v34 = vrot.slane %v6507_v32, 1  ;;  %v2035_v20 = vrot.slane %v1949_v17, 7  ;;  %v6555_v50 = vsel %vm502_vm1, %v2207_v63, %v2209_v33 }
 0x3db   : > { %9105 = vst [vmem:[#allocation164_spill] sm:$0xff] %v6507_v32  ;;  %v1913_v54 = vpop.f32.mrf.mxu3  ;;  %v2032_v47 = vrot.slane %v1947_v53, 7 }
 0x3dc   : > { %v6524_v18 = vsel %vm502_vm1, %v2197_v61, %v2199_v49  ;;  %v6527_v22 = vsel %vm502_vm1, %v2196_v34, %v2197_v61  ;;  %v6542_v49 = vsel %vm336_vm0, 0.0, %v2029_v36  ;;  %v2204_v61 = vrot.slane %v6518_v3, 1  ;;  %9110 = vst [vmem:[#allocation71_spill] sm:$0xff] %v6555_v50 }
 0x3dd   : > { %9107 = vst [vmem:[#allocation105_spill] sm:$0xff] %v6524_v18  ;;  %2271 = vrot.lane.b32.xlu0 %v6521_v5, %s4154_s28  ;;  %2269 = vrot.lane.b32.xlu2 %v6524_v18, %s4154_s28  ;;  %v2036_v34 = vrot.slane %v1950_v56, 7  ;;  %v1911_v5 = vadd.f32 %v6190_v28, %v1910_v2  ;;  %v2206_v18 = vrot.slane %v6542_v49, 1  ;;  %v1908_v36 = vadd.f32 %v6190_v28, %v6462_v41 }
 0x3de   : > { %9108 = vst [vmem:[#allocation148_spill] sm:$0xff] %v6527_v22  ;;  %2267 = vrot.lane.b32.xlu1 %v6527_v22, %s4154_s28  ;;  %v6552_v59 = vsel %vm502_vm1, %v2202_v55, %v2204_v61  ;;  %v6561_v56 = vsel %vm336_vm0, %v2032_v47, %v2033_v13  ;;  %v6564_v2 = vsel %vm336_vm0, %v2033_v13, 0.0  ;;  %v6579_v17 = vsel %vm336_vm0, 0.0, %v2032_v47 }
 0x3df   : > { %9109 = vst [vmem:[#allocation97_spill] sm:$0xff] %v6552_v59  ;;  %v6558_v22 = vsel %vm502_vm1, %v2206_v18, %v2207_v63  ;;  %v6567_v0 = vsel %vm336_vm0, %v2035_v20, %v2036_v34  ;;  %v1952_v53 = vmax.f32 %v1911_v5, 0.0  ;;  %v6576_v18 = vsel %vm336_vm0, 0.0, %v2035_v20 }
 0x3e0   : > { %9111 = vst [vmem:[#allocation117_spill] sm:$0xff] %v6558_v22  ;;  %v1951_v55 = vmax.f32 %v1908_v36, 0.0  ;;  %v2214_v61 = vrot.slane %v6564_v2, 1  ;;  %v2217_v5 = vrot.slane %v6567_v0, 1  ;;  %v2212_v33 = vrot.slane %v6561_v56, 1 }
 0x3e1   : > { %9112 = vst [vmem:[#allocation157_spill] sm:$0xff] %v6567_v0  ;;  %v2039_v63 = vrot.slane %v1952_v53, 7  ;;  %v2211_v20 = vrot.slane %v6579_v17, 1 }
 0x3e2   : > { %9113 = vst [vmem:[#allocation178_spill] sm:$0xff] %v6576_v18  ;;  %v6592_v47 = vsel %vm502_vm1, %v2212_v33, %v2214_v61 }
 0x3e3   : > { %v1916_v41 = vpop.f32.mrf.mxu3  ;;  %9115 = vst [vmem:[#allocation116_spill] sm:$0xff] %v6592_v47  ;;  %v6598_v53 = vsel %vm336_vm0, %v2039_v63, 0.0 }
 0x3e4   : > { %v1917_v13 = vadd.f32 %v6190_v28, %v1916_v41 }
 0x3e5   : > { %2277 = vrot.lane.b32.xlu0 %v6555_v50, %s4154_s28  ;;  %2275 = vrot.lane.b32.xlu2 %v6558_v22, %s4154_s28  ;;  %v2216_v22 = vrot.slane %v6576_v18, 1  ;;  %v2038_v50 = vrot.slane %v1951_v55, 7 }
 0x3e6   : > { %2273 = vrot.lane.b32.xlu1 %v6552_v59, %s4154_s28  ;;  %v1914_v59 = vadd.f32 %v6190_v28, %v1913_v54  ;;  %v1954_v41 = vmax.f32 %v1917_v13, 0.0  ;;  %v6605_v54 = vsel %vm502_vm1, %v2211_v20, %v2212_v33 }
 0x3e7   : > { %v6589_v36 = vsel %vm502_vm1, %v2216_v22, %v2217_v5  ;;  %v6595_v44 = vsel %vm336_vm0, %v2038_v50, %v2039_v63  ;;  %9117 = vst [vmem:[#allocation81_spill] sm:$0xff] %v6605_v54  ;;  %v6608_v22 = vsel %vm336_vm0, %v2036_v34, 0.0  ;;  %v6613_v55 = vsel %vm336_vm0, 0.0, %v2038_v50 }
 0x3e8   : > { %9114 = vst [vmem:[#allocation60_spill] sm:$0xff] %v6589_v36  ;;  %v1953_v61 = vmax.f32 %v1914_v59, 0.0  ;;  %v2224_v63 = vrot.slane %v6598_v53, 1  ;;  %v2222_v13 = vrot.slane %v6595_v44, 1  ;;  %v2221_v33 = vrot.slane %v6613_v55, 1 }
 0x3e9   : > { %9116 = vst [vmem:[#allocation138_spill] sm:$0xff] %v6595_v44 }
 0x3ea   : > { %9118 = vst [vmem:[#allocation172_spill] sm:$0xff] %v6613_v55  ;;  %v2041_v20 = vrot.slane %v1953_v61, 7  ;;  %v6620_v34 = vsel %vm502_vm1, %v2222_v13, %v2224_v63  ;;  %v6623_v14 = vsel %vm502_vm1, %v2221_v33, %v2222_v13  ;;  %v2330_v33 = vrot.slane %v6255_v60, 2 }
 0x3eb   : > { %9119 = vst [vmem:[#allocation128_spill] sm:$0xff] %v6620_v34 }
 0x3ec   : > { %9120 = vst [vmem:[#allocation150_spill] sm:$0xff] %v6623_v14 }
 0x3ed   : > { %2283 = vrot.lane.b32.xlu0 %v6589_v36, %s4154_s28  ;;  %2281 = vrot.lane.b32.xlu2 %v6592_v47, %s4154_s28  ;;  %v2219_v36 = vrot.slane %v6608_v22, 1  ;;  %v2042_v47 = vrot.slane %v1954_v41, 7  ;;  %v6641_v41 = vsel %vm336_vm0, 0.0, %v2041_v20 }
 0x3ee   : > { %2279 = vrot.lane.b32.xlu1 %v6605_v54, %s4154_s28  ;;  %9123 = vst [vmem:[#allocation149_spill] sm:$0xff] %v6641_v41  ;;  %v2226_v63 = vrot.slane %v6641_v41, 1 }
 0x3ef   : > { %v6626_v50 = vsel %vm336_vm0, %v2041_v20, %v2042_v47  ;;  %v6629_v59 = vsel %vm336_vm0, %v2042_v47, 0.0  ;;  %v6632_v54 = vsel %vm502_vm1, %v2217_v5, %v2219_v36  ;;  %v9125_v36 = vld [vmem:[#allocation54_spill] sm:$0xff]  ;;  %v2333_v20 = vrot.slane %v6302_v10, 2 }
 0x3f0   : > { %9121 = vst [vmem:[#allocation78_spill] sm:$0xff] %v6626_v50  ;;  %v2229_v61 = vrot.slane %v6629_v59, 1  ;;  %v2227_v47 = vrot.slane %v6626_v50, 1 }
 0x3f1   : > { %9122 = vst [vmem:[#allocation118_spill] sm:$0xff] %v6632_v54 }
 0x3f2   : > { %v6647_v5 = vsel %vm502_vm1, %v2227_v47, %v2229_v61  ;;  %v6654_v13 = vsel %vm502_vm1, %v2226_v63, %v2227_v47  ;;  %v2332_v61 = vrot.slane %v6297_v58, 2  ;;  %v6669_v47 = vpop.permute.xlu2 %4128  ;;  %v2340_v63 = vrot.slane %v6329_v4, 2 }
 0x3f3   : > { %9124 = vst [vmem:[#allocation98_spill] sm:$0xff] %v6647_v5 }
 0x3f4   : > { %9126 = vst [vmem:[#allocation166_spill] sm:$0xff] %v6654_v13 }
 0x3f5   : > { %2289 = vrot.lane.b32.xlu0 %v6620_v34, %s4154_s28  ;;  %2287 = vrot.lane.b32.xlu2 %v6623_v14, %s4154_s28  ;;  %v2327_v14 = vrot.slane %v6242_v1, 2  ;;  %9128 = vst [vmem:[#allocation158_spill] sm:$0xff] %v6669_v47  ;;  %v2337_v47 = vrot.slane %v6323_v48, 2 }
 0x3f6   : > { %2285 = vrot.lane.b32.xlu1 %v6632_v54, %s4154_s28  ;;  %v2328_v54 = vrot.slane %v6252_v52, 2 }
 0x3f8   : > { %v6676_v60 = vsel %vm679_vm2, %v2327_v14, %v2328_v54  ;;  %v2345_v14 = vrot.slane %v6357_v15, 2 }
 0x3fd   : > { %4133 = vrot.lane.b32.xlu0 %v9125_v36, %s4156_s30  ;;  %2293 = vrot.lane.b32.xlu2 %v6647_v5, %s4154_s28  ;;  %v6664_v36 = vsel %vm679_vm2, %v2332_v61, %v2333_v20  ;;  %v6667_v5 = vsel %vm679_vm2, %v2328_v54, %v2330_v33  ;;  %v2338_v61 = vrot.slane %v6326_v24, 2  ;;  %v2335_v33 = vrot.slane %v6305_v31, 2  ;;  %v6699_v31 = vpop.permute.xlu2 %2239 }
 0x3fe   : > { %2291 = vrot.lane.b32.xlu1 %v6654_v13, %s4154_s28  ;;  %9127 = vst [vmem:[#allocation130_spill] sm:$0xff] %v6664_v36  ;;  %v2348_v54 = vrot.slane %v6382_v25, 2  ;;  %s4163_s28 = smov 64  }
 0x3ff   : > { %v6685_v13 = vsel %vm679_vm2, %v2338_v61, %v2340_v63  ;;  %v6695_v4 = vsel %vm679_vm2, %v2333_v20, %v2335_v33  ;;  %9131 = vst [vmem:[#allocation108_spill] sm:$0xff] %v6699_v31  ;;  %v2347_v63 = vrot.slane %v6379_v42, 2  ;;  %v2353_v31 = vrot.slane %v6408_v16, 2 }
 0x400   : > { %9129 = vst [vmem:[#allocation80_spill] sm:$0xff] %v6685_v13 }
 0x405   : > { %2410 = vrot.lane.b32.xlu0 %v6664_v36, %s4156_s30  ;;  %2408 = vrot.lane.b32.xlu2 %v6667_v5, %s4156_s30  ;;  %v6688_v36 = vsel %vm679_vm2, %v2337_v47, %v2338_v61  ;;  %v2343_v47 = vrot.slane %v6354_v43, 2  ;;  %v2342_v61 = vrot.slane %v6351_v12, 2  ;;  %v6721_v33 = vpop.permute.xlu2 %2245 }
 0x406   : > { %2406 = vrot.lane.b32.xlu1 %v6676_v60, %s4156_s30  ;;  %9130 = vst [vmem:[#allocation82_spill] sm:$0xff] %v6688_v36 }
 0x407   : > { %v6710_v20 = vsel %vm679_vm2, %v2343_v47, %v2345_v14  ;;  %v6717_v15 = vsel %vm679_vm2, %v2342_v61, %v2343_v47  ;;  %9134 = vst [vmem:[#allocation77_spill] sm:$0xff] %v6721_v33  ;;  %v2350_v14 = vrot.slane %v6385_v26, 2  ;;  %v6742_v26 = vpop.permute.xlu0 %2235  ;;  %v2360_v61 = vrot.slane %v6439_v46, 2 }
 0x408   : > { %9133 = vst [vmem:[#allocation100_spill] sm:$0xff] %v6710_v20  ;;  %v2357_v33 = vrot.slane %v6433_v8, 2 }
 0x409   : > { %9138 = vst [vmem:[#allocation192_spill] sm:$0xff] %v6742_v26 }
 0x40d   : > { %2416 = vrot.lane.b32.xlu0 %v6685_v13, %s4156_s30  ;;  %2414 = vrot.lane.b32.xlu2 %v6688_v36, %s4156_s30  ;;  %v6707_v13 = vsel %vm679_vm2, %v2347_v63, %v2348_v54  ;;  %v2355_v63 = vrot.slane %v6411_v35, 2  ;;  %v2352_v36 = vrot.slane %v6405_v11, 2  ;;  %v6738_v35 = vsel %vm679_vm2, %v2348_v54, %v2350_v14  ;;  %v6744_v47 = vpop.permute.xlu2 %2251 }
 0x40e   : > { %2412 = vrot.lane.b32.xlu1 %v6695_v4, %s4156_s30  ;;  %9132 = vst [vmem:[#allocation151_spill] sm:$0xff] %v6707_v13 }
 0x40f   : > { %9137 = vst [vmem:[#allocation180_spill] sm:$0xff] %v6738_v35 }
 0x410   : > { %9139 = vst [vmem:[#allocation64_spill] sm:$0xff] %v6744_v47  ;;  %v6766_v47 = vpop.permute.xlu0 %2241 }
 0x411   : > { %9143 = vst [vmem:[#allocation85_spill] sm:$0xff] %v6766_v47 }
 0x415   : > { %2422 = vrot.lane.b32.xlu0 %v6707_v13, %s4156_s30  ;;  %2420 = vrot.lane.b32.xlu2 %v6710_v20, %s4156_s30  ;;  %v6728_v13 = vsel %vm679_vm2, %v2353_v31, %v2355_v63  ;;  %v6731_v20 = vsel %vm679_vm2, %v2352_v36, %v2353_v31  ;;  %v2363_v36 = vrot.slane %v6469_v37, 2  ;;  %v2358_v31 = vrot.slane %v6436_v51, 2  ;;  %v6768_v26 = vpop.permute.xlu2 %2257 }
 0x416   : > { %2418 = vrot.lane.b32.xlu1 %v6717_v15, %s4156_s30  ;;  %9135 = vst [vmem:[#allocation120_spill] sm:$0xff] %v6728_v13  ;;  %v2362_v63 = vrot.slane %v6465_v38, 2 }
 0x417   : > { %9136 = vst [vmem:[#allocation160_spill] sm:$0xff] %v6731_v20  ;;  %v6755_v14 = vsel %vm679_vm2, %v2358_v31, %v2360_v61  ;;  %v6762_v46 = vsel %vm679_vm2, %v2357_v33, %v2358_v31  ;;  %v2368_v61 = vrot.slane %v6504_v9, 2 }
 0x418   : > { %v6752_v54 = vsel %vm679_vm2, %v2362_v63, %v2363_v36  ;;  %9141 = vst [vmem:[#allocation119_spill] sm:$0xff] %v6755_v14  ;;  %v6770_v63 = vpop.permute.xlu1 %2237 }
 0x419   : > { %9140 = vst [vmem:[#allocation10_spill] sm:$0xff] %v6752_v54 }
 0x41a   : > { %9142 = vst [vmem:[#allocation141_spill] sm:$0xff] %v6762_v46 }
 0x41b   : > { %9144 = vst [vmem:[#allocation29_spill] sm:$0xff] %v6768_v26  ;;  %v2377_v26 = vrot.slane %v6542_v49, 2 }
 0x41c   : > { %9145 = vst [vmem:[#allocation173_spill] sm:$0xff] %v6770_v63  ;;  %v2373_v63 = vrot.slane %v6487_v40, 2 }
 0x41d   : > { %2428 = vrot.lane.b32.xlu0 %v6728_v13, %s4156_s30  ;;  %2426 = vrot.lane.b32.xlu2 %v6731_v20, %s4156_s30  ;;  %v2367_v13 = vrot.slane %v6507_v32, 2 }
 0x41e   : > { %2424 = vrot.lane.b32.xlu1 %v6738_v35, %s4156_s30 }
 0x41f   : > { %v6780_v31 = vsel %vm679_vm2, %v2367_v13, %v2368_v61 }
 0x420   : > { %9147 = vst [vmem:[#allocation191_spill] sm:$0xff] %v6780_v31  ;;  %v6796_v13 = vpop.permute.xlu1 %2243 }
 0x421   : > { %9151 = vst [vmem:[#allocation74_spill] sm:$0xff] %v6796_v13 }
 0x425   : > { %2434 = vrot.lane.b32.xlu0 %v6752_v54, %s4156_s30  ;;  %2432 = vrot.lane.b32.xlu2 %v6755_v14, %s4156_s30  ;;  %v2365_v54 = vrot.slane %v6472_v7, 2  ;;  %v2370_v14 = vrot.slane %v6494_v19, 2  ;;  %v6791_v7 = vpop.permute.xlu0 %2247 }
 0x426   : > { %2430 = vrot.lane.b32.xlu1 %v6762_v46, %s4156_s30  ;;  %9149 = vst [vmem:[#allocation21_spill] sm:$0xff] %v6791_v7 }
 0x427   : > { %v6777_v33 = vsel %vm679_vm2, %v2368_v61, %v2370_v14  ;;  %v6787_v47 = vsel %vm679_vm2, %v2363_v36, %v2365_v54  ;;  %v2375_v14 = vrot.slane %v6518_v3, 2  ;;  %v2378_v61 = vrot.slane %v6530_v57, 2 }
 0x428   : > { %9146 = vst [vmem:[#allocation131_spill] sm:$0xff] %v6777_v33  ;;  %v2372_v36 = vrot.slane %v6497_v30, 2 }
 0x429   : > { %9148 = vst [vmem:[#allocation40_spill] sm:$0xff] %v6787_v47  ;;  %v6803_v54 = vsel %vm679_vm2, %v2377_v26, %v2378_v61  ;;  %v2385_v26 = vrot.slane %v6564_v2, 2 }
 0x42a   : > { %9152 = vst [vmem:[#allocation202_spill] sm:$0xff] %v6803_v54  ;;  %v6813_v3 = vsel %vm679_vm2, %v2372_v36, %v2373_v63 }
 0x42d   : > { %2440 = vrot.lane.b32.xlu0 %v6777_v33, %s4156_s30  ;;  %2438 = vrot.lane.b32.xlu2 %v6780_v31, %s4156_s30  ;;  %v6806_v33 = vsel %vm679_vm2, %v2373_v63, %v2375_v14  ;;  %v6817_v7 = vpop.permute.xlu0 %2253  ;;  %v6822_v14 = vpop.permute.xlu1 %2249 }
 0x42e   : > { %2436 = vrot.lane.b32.xlu1 %v6787_v47, %s4156_s30  ;;  %9153 = vst [vmem:[#allocation84_spill] sm:$0xff] %v6806_v33 }
 0x42f   : > { %v6793_v19 = vpop.permute.xlu2 %2263  ;;  %9154 = vst [vmem:[#allocation13_spill] sm:$0xff] %v6817_v7 }
 0x430   : > { %9150 = vst [vmem:[#allocation182_spill] sm:$0xff] %v6793_v19  ;;  %v2383_v19 = vrot.slane %v6561_v56, 2 }
 0x431   : > { %9156 = vst [vmem:[#allocation121_spill] sm:$0xff] %v6822_v14  ;;  %v2388_v14 = vrot.slane %v6567_v0, 2 }
 0x432   : > { %v6828_v63 = vsel %vm679_vm2, %v2383_v19, %v2385_v26  ;;  %v2390_v26 = vrot.slane %v6608_v22, 2 }
 0x433   : > { %9157 = vst [vmem:[#allocation204_spill] sm:$0xff] %v6828_v63 }
 0x435   : > { %2446 = vrot.lane.b32.xlu0 %v6803_v54, %s4156_s30  ;;  %2444 = vrot.lane.b32.xlu2 %v6806_v33, %s4156_s30  ;;  %v2380_v54 = vrot.slane %v6533_v21, 2  ;;  %v2382_v33 = vrot.slane %v6579_v17, 2 }
 0x436   : > { %2442 = vrot.lane.b32.xlu1 %v6813_v3, %s4156_s30 }
 0x437   : > { %v6819_v13 = vpop.permute.xlu2 %2269  ;;  %v6831_v36 = vsel %vm679_vm2, %v2382_v33, %v2383_v19  ;;  %v6838_v2 = vsel %vm679_vm2, %v2378_v61, %v2380_v54  ;;  %v6842_v21 = vpop.permute.xlu0 %2259  ;;  %v2393_v19 = vrot.slane %v6595_v44, 2  ;;  %v2387_v61 = vrot.slane %v6576_v18, 2 }
 0x438   : > { %9155 = vst [vmem:[#allocation28_spill] sm:$0xff] %v6819_v13  ;;  %v6847_v33 = vpop.permute.xlu1 %2255  ;;  %v2392_v13 = vrot.slane %v6613_v55, 2 }
 0x439   : > { %9158 = vst [vmem:[#allocation152_spill] sm:$0xff] %v6842_v21  ;;  %v6864_v22 = vsel %vm679_vm2, %v2387_v61, %v2388_v14 }
 0x43a   : > { %9160 = vst [vmem:[#allocation33_spill] sm:$0xff] %v6847_v33  ;;  %v6854_v54 = vsel %vm679_vm2, %v2392_v13, %v2393_v19  ;;  %v2400_v13 = vrot.slane %v6629_v59, 2  ;;  %v2398_v33 = vrot.slane %v6626_v50, 2 }
 0x43b   : > { %9161 = vst [vmem:[#allocation168_spill] sm:$0xff] %v6854_v54 }
 0x43d   : > { %2452 = vrot.lane.b32.xlu0 %v6828_v63, %s4156_s30  ;;  %2450 = vrot.lane.b32.xlu2 %v6831_v36, %s4156_s30  ;;  %v6857_v63 = vsel %vm679_vm2, %v2388_v14, %v2390_v26  ;;  %v6879_v14 = vsel %vm679_vm2, %v2398_v33, %v2400_v13 }
 0x43e   : > { %2448 = vrot.lane.b32.xlu1 %v6838_v2, %s4156_s30  ;;  %9162 = vst [vmem:[#allocation133_spill] sm:$0xff] %v6857_v63 }
 0x43f   : > { %v6844_v7 = vpop.permute.xlu2 %2275  ;;  %9165 = vst [vmem:[#allocation27_spill] sm:$0xff] %v6879_v14 }
 0x440   : > { %9159 = vst [vmem:[#allocation101_spill] sm:$0xff] %v6844_v7  ;;  %v6873_v26 = vpop.permute.xlu1 %2261 }
 0x445   : > { %2458 = vrot.lane.b32.xlu0 %v6854_v54, %s4156_s30  ;;  %2456 = vrot.lane.b32.xlu2 %v6857_v63, %s4156_s30  ;;  %v2395_v54 = vrot.slane %v6598_v53, 2  ;;  %v2397_v63 = vrot.slane %v6641_v41, 2 }
 0x446   : > { %2454 = vrot.lane.b32.xlu1 %v6864_v22, %s4156_s30 }
 0x447   : > { %v6868_v7 = vpop.permute.xlu2 %2281  ;;  %v6870_v21 = vpop.permute.xlu0 %2265  ;;  %v6882_v61 = vsel %vm679_vm2, %v2397_v63, %v2398_v33  ;;  %v6889_v59 = vsel %vm679_vm2, %v2393_v19, %v2395_v54 }
 0x448   : > { %9163 = vst [vmem:[#allocation193_spill] sm:$0xff] %v6868_v7 }
 0x449   : > { %9164 = vst [vmem:[#allocation161_spill] sm:$0xff] %v6870_v21 }
 0x44a   : > { %9166 = vst [vmem:[#allocation174_spill] sm:$0xff] %v6882_v61 }
 0x44b   : > { %9167 = vst [vmem:[#allocation79_spill] sm:$0xff] %v6889_v59 }
 0x44d   : > { %2464 = vrot.lane.b32.xlu0 %v6879_v14, %s4156_s30  ;;  %2462 = vrot.lane.b32.xlu2 %v6882_v61, %s4156_s30 }
 0x44e   : > { %2460 = vrot.lane.b32.xlu1 %v6889_v59, %s4156_s30 }
 0x44f   : > { %v6893_v53 = vpop.permute.xlu2 %2287  ;;  %v6895_v7 = vpop.permute.xlu0 %2271 }
 0x450   : > { %9168 = vst [vmem:[#allocation9_spill] sm:$0xff] %v6893_v53  ;;  %v6897_v13 = vpop.permute.xlu1 %2267 }
 0x451   : > { %9169 = vst [vmem:[#allocation86_spill] sm:$0xff] %v6895_v7 }
 0x452   : > { %9170 = vst [vmem:[#allocation12_spill] sm:$0xff] %v6897_v13  ;;  %v1919_v13 = vpop.f32.mrf.mxu3 }
 0x455   : > { %2503 = vrot.lane.b32.xlu0 %v6297_v58, %s4158_s8  ;;  %2501 = vrot.lane.b32.xlu2 %v6252_v52, %s4158_s8 }
 0x456   : > { %2499 = vrot.lane.b32.xlu1 %v6242_v1, %s4158_s8 }
 0x457   : > { %v6905_v63 = vpop.permute.xlu2 %2293  ;;  %v6907_v33 = vpop.permute.xlu0 %2277 }
 0x458   : > { %9171 = vst [vmem:[#allocation50_spill] sm:$0xff] %v6905_v63  ;;  %v6909_v19 = vpop.permute.xlu1 %2273 }
 0x459   : > { %9172 = vst [vmem:[#allocation111_spill] sm:$0xff] %v6907_v33 }
 0x45d   : > { %2509 = vrot.lane.b32.xlu0 %v6326_v24, %s4158_s8  ;;  %2507 = vrot.lane.b32.xlu2 %v6323_v48, %s4158_s8 }
 0x45e   : > { %2505 = vrot.lane.b32.xlu1 %v6302_v10, %s4158_s8 }
 0x45f   : > { %v6917_v54 = vpop.permute.xlu2 %2408  ;;  %v6919_v53 = vpop.permute.xlu0 %2283 }
 0x460   : > { %9173 = vst [vmem:[#allocation205_spill] sm:$0xff] %v6917_v54  ;;  %v6921_v14 = vpop.permute.xlu1 %2279 }
 0x461   : > { %9174 = vst [vmem:[#allocation153_spill] sm:$0xff] %v6919_v53 }
 0x465   : > { %2515 = vrot.lane.b32.xlu0 %v6379_v42, %s4158_s8  ;;  %2513 = vrot.lane.b32.xlu2 %v6354_v43, %s4158_s8 }
 0x466   : > { %2511 = vrot.lane.b32.xlu1 %v6351_v12, %s4158_s8 }
 0x467   : > { %v6929_v63 = vpop.permute.xlu2 %2414  ;;  %v6931_v61 = vpop.permute.xlu0 %2289 }
 0x468   : > { %9175 = vst [vmem:[#allocation103_spill] sm:$0xff] %v6929_v63  ;;  %v6933_v52 = vpop.permute.xlu1 %2285 }
 0x469   : > { %9176 = vst [vmem:[#allocation32_spill] sm:$0xff] %v6931_v61 }
 0x46a   : > { %9177 = vst [vmem:[#allocation83_spill] sm:$0xff] %v6933_v52 }
 0x46d   : > { %2521 = vrot.lane.b32.xlu0 %v6408_v16, %s4158_s8  ;;  %2519 = vrot.lane.b32.xlu2 %v6405_v11, %s4158_s8 }
 0x46e   : > { %2517 = vrot.lane.b32.xlu1 %v6382_v25, %s4158_s8 }
 0x46f   : > { %v6941_v53 = vpop.permute.xlu2 %2420  ;;  %v6943_v54 = vpop.permute.xlu0 %4133 }
 0x470   : > { %9178 = vst [vmem:[#allocation123_spill] sm:$0xff] %v6941_v53  ;;  %v6945_v1 = vpop.permute.xlu1 %2291 }
 0x471   : > { %9179 = vst [vmem:[#allocation189_spill] sm:$0xff] %v6943_v54 }
 0x472   : > { %9180 = vst [vmem:[#allocation163_spill] sm:$0xff] %v6945_v1 }
 0x475   : > { %2527 = vrot.lane.b32.xlu0 %v6465_v38, %s4158_s8  ;;  %2525 = vrot.lane.b32.xlu2 %v6436_v51, %s4158_s8 }
 0x476   : > { %2523 = vrot.lane.b32.xlu1 %v6433_v8, %s4158_s8 }
 0x477   : > { %v6953_v61 = vpop.permute.xlu2 %2426  ;;  %v6955_v52 = vpop.permute.xlu0 %2410 }
 0x478   : > { %9181 = vst [vmem:[#allocation30_spill] sm:$0xff] %v6955_v52  ;;  %v6957_v63 = vpop.permute.xlu1 %2406 }
 0x479   : > { %9182 = vst [vmem:[#allocation183_spill] sm:$0xff] %v6957_v63 }
 0x47d   : > { %2533 = vrot.lane.b32.xlu0 %v6504_v9, %s4158_s8  ;;  %2531 = vrot.lane.b32.xlu2 %v6507_v32, %s4158_s8 }
 0x47e   : > { %2529 = vrot.lane.b32.xlu1 %v6469_v37, %s4158_s8 }
 0x47f   : > { %v6965_v1 = vpop.permute.xlu2 %2432  ;;  %v6967_v53 = vpop.permute.xlu0 %2416 }
 0x480   : > { %9183 = vst [vmem:[#allocation67_spill] sm:$0xff] %v6967_v53  ;;  %v6969_v59 = vpop.permute.xlu1 %2412 }
 0x481   : > { %9184 = vst [vmem:[#allocation195_spill] sm:$0xff] %v6969_v59 }
 0x485   : > { %2539 = vrot.lane.b32.xlu0 %v6542_v49, %s4158_s8  ;;  %2537 = vrot.lane.b32.xlu2 %v6487_v40, %s4158_s8 }
 0x486   : > { %2535 = vrot.lane.b32.xlu1 %v6497_v30, %s4158_s8 }
 0x487   : > { %v6977_v52 = vpop.permute.xlu2 %2438  ;;  %v6979_v63 = vpop.permute.xlu0 %2422 }
 0x488   : > { %9185 = vst [vmem:[#allocation69_spill] sm:$0xff] %v6977_v52  ;;  %v6981_v32 = vpop.permute.xlu1 %2418  ;;  %v1922_v52 = vpop.f32.mrf.mxu3 }
 0x489   : > { %9186 = vst [vmem:[#allocation17_spill] sm:$0xff] %v6979_v63  ;;  %v1923_v21 = vadd.f32 %v6190_v28, %v1922_v52 }
 0x48a   : > { %9187 = vst [vmem:[#allocation51_spill] sm:$0xff] %v6981_v32 }
 0x48b   : > { %v1956_v25 = vmax.f32 %v1923_v21, 0.0 }
 0x48d   : > { %2545 = vrot.lane.b32.xlu0 %v6561_v56, %s4158_s8  ;;  %2543 = vrot.lane.b32.xlu2 %v6579_v17, %s4158_s8  ;;  %v7019_v52 = vrot.slane %v1956_v25, 7 }
 0x48e   : > { %2541 = vrot.lane.b32.xlu1 %v6530_v57, %s4158_s8 }
 0x48f   : > { %v6989_v53 = vpop.permute.xlu2 %2444  ;;  %v6991_v59 = vpop.permute.xlu0 %2428 }
 0x490   : > { %v6993_v37 = vpop.permute.xlu1 %2424 }
 0x491   : > { %9188 = vst [vmem:[#allocation122_spill] sm:$0xff] %v6993_v37  ;;  %v1920_v37 = vadd.f32 %v6190_v28, %v1919_v13 }
 0x493   : > { %v1955_v38 = vmax.f32 %v1920_v37, 0.0 }
 0x495   : > { %2551 = vrot.lane.b32.xlu0 %v6613_v55, %s4158_s8  ;;  %2549 = vrot.lane.b32.xlu2 %v6567_v0, %s4158_s8  ;;  %v2044_v28 = vrot.slane %v1955_v38, 7 }
 0x496   : > { %2547 = vrot.lane.b32.xlu1 %v6576_v18, %s4158_s8 }
 0x497   : > { %v7001_v63 = vpop.permute.xlu2 %2450  ;;  %v7003_v32 = vpop.permute.xlu0 %2434  ;;  %v7025_v37 = vsel %vm336_vm0, %v2044_v28, %v7019_v52  ;;  %v7030_v21 = vsel %vm336_vm0, 0.0, %v2044_v28 }
 0x498   : > { %9189 = vst [vmem:[#allocation203_spill] sm:$0xff] %v7003_v32  ;;  %v7006_v54 = vpop.permute.xlu1 %2430  ;;  %v2597_v18 = vrot.slane %v7025_v37, 1 }
 0x499   : > { %9193 = vst [vmem:[#allocation175_spill] sm:$0xff] %v7025_v37 }
 0x49a   : > { %9194 = vst [vmem:[#allocation134_spill] sm:$0xff] %v7030_v21 }
 0x49d   : > { %2557 = vrot.lane.b32.xlu0 %v6626_v50, %s4158_s8  ;;  %2555 = vrot.lane.b32.xlu2 %v6641_v41, %s4158_s8  ;;  %v9204_v41 = vld [vmem:[#allocation102_spill] sm:$0xff] }
 0x49e   : > { %2553 = vrot.lane.b32.xlu1 %v6595_v44, %s4158_s8  ;;  %v9206_v44 = vld [vmem:[#allocation162_spill] sm:$0xff] }
 0x49f   : > { %v7015_v55 = vpop.permute.xlu2 %2456  ;;  %v7017_v32 = vpop.permute.xlu0 %2440 }
 0x4a0   : > { %9190 = vst [vmem:[#allocation144_spill] sm:$0xff] %v7015_v55  ;;  %v7021_v0 = vpop.permute.xlu1 %2436 }
 0x4a1   : > { %9191 = vst [vmem:[#allocation91_spill] sm:$0xff] %v7017_v32  ;;  %v2596_v32 = vrot.slane %v7030_v21, 1 }
 0x4a2   : > { %9192 = vst [vmem:[#allocation35_spill] sm:$0xff] %v7021_v0 }
 0x4a3   : > { %v7153_v9 = vsel %vm502_vm1, %v2596_v32, %v2597_v18 }
 0x4a4   : > { %9241 = vst [vmem:[#allocation208_spill] sm:$0xff] %v7153_v9 }
 0x4a5   : > { %2601 = vrot.lane.b32.xlu0 %v6270_v45, %s4160_s10  ;;  %2561 = vrot.lane.b32.xlu2 %v7025_v37, %s4158_s8 }
 0x4a6   : > { %2559 = vrot.lane.b32.xlu1 %v7030_v21, %s4158_s8 }
 0x4a7   : > { %v7036_v25 = vpop.permute.xlu2 %2462  ;;  %v7038_v13 = vpop.permute.xlu0 %2446 }
 0x4a8   : > { %9195 = vst [vmem:[#allocation194_spill] sm:$0xff] %v7036_v25  ;;  %v7040_v38 = vpop.permute.xlu1 %2442 }
 0x4a9   : > { %9196 = vst [vmem:[#allocation46_spill] sm:$0xff] %v7038_v13 }
 0x4aa   : > { %9197 = vst [vmem:[#allocation25_spill] sm:$0xff] %v7040_v38  ;;  %v9227_v38 = vld [vmem:[#allocation71_spill] sm:$0xff] }
 0x4ad   : > { %2607 = vrot.lane.b32.xlu0 %v6312_v23, %s4160_s10  ;;  %2605 = vrot.lane.b32.xlu2 %v6315_v6, %s4160_s10 }
 0x4ae   : > { %2603 = vrot.lane.b32.xlu1 %v6267_v62, %s4160_s10 }
 0x4af   : > { %v7048_v45 = vpop.permute.xlu2 %2501  ;;  %v7050_v28 = vpop.permute.xlu0 %2452 }
 0x4b0   : > { %9198 = vst [vmem:[#allocation184_spill] sm:$0xff] %v7048_v45  ;;  %v7052_v55 = vpop.permute.xlu1 %2448 }
 0x4b1   : > { %9199 = vst [vmem:[#allocation87_spill] sm:$0xff] %v7050_v28  ;;  %v9205_v28 = vld [vmem:[#allocation145_spill] sm:$0xff] }
 0x4b2   : > { %9200 = vst [vmem:[#allocation11_spill] sm:$0xff] %v7052_v55 }
 0x4b5   : > { %2613 = vrot.lane.b32.xlu0 %v6366_v27, %s4160_s10  ;;  %2611 = vrot.lane.b32.xlu2 %v6338_v39, %s4160_s10 }
 0x4b6   : > { %2609 = vrot.lane.b32.xlu1 %v6341_v29, %s4160_s10 }
 0x4b7   : > { %v7060_v25 = vpop.permute.xlu2 %2507  ;;  %v7062_v50 = vpop.permute.xlu0 %2458 }
 0x4b8   : > { %9201 = vst [vmem:[#allocation88_spill] sm:$0xff] %v7060_v25  ;;  %v7064_v62 = vpop.permute.xlu1 %2454  ;;  %v9210_v25 = vld [vmem:[#allocation8_spill] sm:$0xff] }
 0x4b9   : > { %9202 = vst [vmem:[#allocation16_spill] sm:$0xff] %v7062_v50  ;;  %v9211_v50 = vld [vmem:[#allocation65_spill] sm:$0xff] }
 0x4ba   : > { %9203 = vst [vmem:[#allocation34_spill] sm:$0xff] %v7064_v62  ;;  %v9212_v62 = vld [vmem:[#allocation70_spill] sm:$0xff] }
 0x4bd   : > { %2619 = vrot.lane.b32.xlu0 %v9204_v41, %s4160_s10  ;;  %2617 = vrot.lane.b32.xlu2 %v9205_v28, %s4160_s10 }
 0x4be   : > { %2615 = vrot.lane.b32.xlu1 %v9206_v44, %s4160_s10 }
 0x4bf   : > { %v7072_v45 = vpop.permute.xlu2 %2513  ;;  %v7074_v0 = vpop.permute.xlu0 %2464 }
 0x4c0   : > { %9207 = vst [vmem:[#allocation124_spill] sm:$0xff] %v7072_v45  ;;  %v7076_v55 = vpop.permute.xlu1 %2460  ;;  %v9216_v45 = vld [vmem:[#allocation76_spill] sm:$0xff] }
 0x4c1   : > { %9208 = vst [vmem:[#allocation207_spill] sm:$0xff] %v7074_v0  ;;  %v9217_v0 = vld [vmem:[#allocation115_spill] sm:$0xff] }
 0x4c2   : > { %9209 = vst [vmem:[#allocation154_spill] sm:$0xff] %v7076_v55  ;;  %v9218_v55 = vld [vmem:[#allocation113_spill] sm:$0xff] }
 0x4c5   : > { %2625 = vrot.lane.b32.xlu0 %v9210_v25, %s4160_s10  ;;  %2623 = vrot.lane.b32.xlu2 %v9211_v50, %s4160_s10 }
 0x4c6   : > { %2621 = vrot.lane.b32.xlu1 %v9212_v62, %s4160_s10 }
 0x4c7   : > { %v7084_v41 = vpop.permute.xlu2 %2519  ;;  %v7086_v28 = vpop.permute.xlu0 %2503 }
 0x4c8   : > { %9213 = vst [vmem:[#allocation104_spill] sm:$0xff] %v7084_v41  ;;  %v7088_v33 = vpop.permute.xlu1 %2499  ;;  %v9221_v41 = vld [vmem:[#allocation56_spill] sm:$0xff] }
 0x4c9   : > { %9214 = vst [vmem:[#allocation37_spill] sm:$0xff] %v7086_v28  ;;  %v9222_v28 = vld [vmem:[#allocation105_spill] sm:$0xff] }
 0x4ca   : > { %9215 = vst [vmem:[#allocation68_spill] sm:$0xff] %v7088_v33 }
 0x4cd   : > { %2631 = vrot.lane.b32.xlu0 %v9216_v45, %s4160_s10  ;;  %2629 = vrot.lane.b32.xlu2 %v9217_v0, %s4160_s10  ;;  %v9223_v45 = vld [vmem:[#allocation148_spill] sm:$0xff] }
 0x4ce   : > { %2627 = vrot.lane.b32.xlu1 %v9218_v55, %s4160_s10 }
 0x4cf   : > { %v7096_v25 = vpop.permute.xlu2 %2525  ;;  %v7098_v50 = vpop.permute.xlu0 %2509 }
 0x4d0   : > { %9219 = vst [vmem:[#allocation136_spill] sm:$0xff] %v7098_v50  ;;  %v7100_v62 = vpop.permute.xlu1 %2505  ;;  %v9228_v50 = vld [vmem:[#allocation117_spill] sm:$0xff] }
 0x4d1   : > { %9220 = vst [vmem:[#allocation196_spill] sm:$0xff] %v7100_v62  ;;  %v9229_v62 = vld [vmem:[#allocation97_spill] sm:$0xff] }
 0x4d5   : > { %2637 = vrot.lane.b32.xlu0 %v9221_v41, %s4160_s10  ;;  %2635 = vrot.lane.b32.xlu2 %v9222_v28, %s4160_s10 }
 0x4d6   : > { %2633 = vrot.lane.b32.xlu1 %v9223_v45, %s4160_s10 }
 0x4d7   : > { %v7108_v33 = vpop.permute.xlu2 %2531  ;;  %v7110_v0 = vpop.permute.xlu0 %2515 }
 0x4d8   : > { %9224 = vst [vmem:[#allocation55_spill] sm:$0xff] %v7108_v33  ;;  %v7112_v55 = vpop.permute.xlu1 %2511  ;;  %v9233_v33 = vld [vmem:[#allocation60_spill] sm:$0xff] }
 0x4d9   : > { %9225 = vst [vmem:[#allocation31_spill] sm:$0xff] %v7110_v0  ;;  %v9234_v0 = vld [vmem:[#allocation116_spill] sm:$0xff] }
 0x4da   : > { %9226 = vst [vmem:[#allocation90_spill] sm:$0xff] %v7112_v55  ;;  %v9235_v55 = vld [vmem:[#allocation81_spill] sm:$0xff] }
 0x4dd   : > { %2643 = vrot.lane.b32.xlu0 %v9227_v38, %s4160_s10  ;;  %2641 = vrot.lane.b32.xlu2 %v9228_v50, %s4160_s10 }
 0x4de   : > { %2639 = vrot.lane.b32.xlu1 %v9229_v62, %s4160_s10 }
 0x4df   : > { %v7120_v42 = vpop.permute.xlu2 %2537  ;;  %v7122_v28 = vpop.permute.xlu0 %2521 }
 0x4e0   : > { %9230 = vst [vmem:[#allocation89_spill] sm:$0xff] %v7120_v42  ;;  %v7124_v45 = vpop.permute.xlu1 %2517 }
 0x4e1   : > { %9231 = vst [vmem:[#allocation14_spill] sm:$0xff] %v7122_v28  ;;  %v9237_v28 = vld [vmem:[#allocation150_spill] sm:$0xff] }
 0x4e2   : > { %9232 = vst [vmem:[#allocation92_spill] sm:$0xff] %v7124_v45  ;;  %v9238_v45 = vld [vmem:[#allocation118_spill] sm:$0xff] }
 0x4e5   : > { %2649 = vrot.lane.b32.xlu0 %v9233_v33, %s4160_s10  ;;  %2647 = vrot.lane.b32.xlu2 %v9234_v0, %s4160_s10 }
 0x4e6   : > { %2645 = vrot.lane.b32.xlu1 %v9235_v55, %s4160_s10 }
 0x4e7   : > { %v7132_v13 = vpop.permute.xlu2 %2543  ;;  %v7134_v7 = vpop.permute.xlu0 %2527 }
 0x4e8   : > { %9236 = vst [vmem:[#allocation20_spill] sm:$0xff] %v7132_v13  ;;  %v7136_v44 = vpop.permute.xlu1 %2523 }
 0x4ed   : > { %2655 = vrot.lane.b32.xlu0 %v6620_v34, %s4160_s10  ;;  %2653 = vrot.lane.b32.xlu2 %v9237_v28, %s4160_s10  ;;  %v9242_v34 = vld [vmem:[#allocation98_spill] sm:$0xff] }
 0x4ee   : > { %2651 = vrot.lane.b32.xlu1 %v9238_v45, %s4160_s10  ;;  %v9244_v28 = vld [vmem:[#allocation166_spill] sm:$0xff] }
 0x4ef   : > { %v7144_v33 = vpop.permute.xlu2 %2549  ;;  %v7146_v42 = vpop.permute.xlu0 %2533 }
 0x4f0   : > { %9239 = vst [vmem:[#allocation58_spill] sm:$0xff] %v7144_v33  ;;  %v7149_v13 = vpop.permute.xlu1 %2529  ;;  %v7161_v33 = vsel %vm336_vm0, %v7019_v52, 0.0 }
 0x4f1   : > { %9240 = vst [vmem:[#allocation114_spill] sm:$0xff] %v7146_v42  ;;  %v2599_v32 = vrot.slane %v7161_v33, 1 }
 0x4f2   : > { %9243 = vst [vmem:[#allocation47_spill] sm:$0xff] %v7161_v33 }
 0x4f5   : > { %2659 = vrot.lane.b32.xlu2 %v9242_v34, %s4160_s10  ;;  %2661 = vrot.lane.b32.xlu0 %v7153_v9, %s4160_s10  ;;  %v7175_v9 = vsel %vm502_vm1, %v2597_v18, %v2599_v32  ;;  %v9252_v18 = vld [vmem:[#allocation130_spill] sm:$0xff] }
 0x4f6   : > { %2657 = vrot.lane.b32.xlu1 %v9244_v28, %s4160_s10  ;;  %9248 = vst [vmem:[#allocation126_spill] sm:$0xff] %v7175_v9 }
 0x4f7   : > { %v7165_v37 = vpop.permute.xlu2 %2555  ;;  %v7167_v42 = vpop.permute.xlu0 %2539 }
 0x4f8   : > { %9245 = vst [vmem:[#allocation106_spill] sm:$0xff] %v7165_v37  ;;  %v7169_v21 = vpop.permute.xlu1 %2535 }
 0x4f9   : > { %9246 = vst [vmem:[#allocation42_spill] sm:$0xff] %v7167_v42 }
 0x4fa   : > { %9247 = vst [vmem:[#allocation176_spill] sm:$0xff] %v7169_v21 }
 0x4fd   : > { %2702 = vrot.lane.b32.xlu2 %v6676_v60, %s4161_s26  ;;  %2704 = vrot.lane.b32.xlu0 %v6667_v5, %s4161_s26  ;;  %v9251_v60 = vld [vmem:[#allocation82_spill] sm:$0xff] }
 0x4fe   : > { %2663 = vrot.lane.b32.xlu1 %v7175_v9, %s4160_s10  ;;  %v9256_v9 = vld [vmem:[#allocation80_spill] sm:$0xff] }
 0x4ff   : > { %v7181_v52 = vpop.permute.xlu0 %2545  ;;  %v7183_v37 = vpop.permute.xlu2 %2561 }
 0x500   : > { %9249 = vst [vmem:[#allocation190_spill] sm:$0xff] %v7181_v52  ;;  %v7185_v34 = vpop.permute.xlu1 %2541 }
 0x501   : > { %9250 = vst [vmem:[#allocation165_spill] sm:$0xff] %v7183_v37  ;;  %v9255_v37 = vld [vmem:[#allocation100_spill] sm:$0xff] }
 0x505   : > { %2708 = vrot.lane.b32.xlu2 %v6695_v4, %s4161_s26  ;;  %2710 = vrot.lane.b32.xlu0 %v9251_v60, %s4161_s26 }
 0x506   : > { %2706 = vrot.lane.b32.xlu1 %v9252_v18, %s4161_s26 }
 0x507   : > { %v7193_v32 = vpop.permute.xlu0 %2551  ;;  %v7195_v5 = vpop.permute.xlu2 %2605 }
 0x508   : > { %9253 = vst [vmem:[#allocation36_spill] sm:$0xff] %v7193_v32  ;;  %v7197_v33 = vpop.permute.xlu1 %2547  ;;  %v9260_v32 = vld [vmem:[#allocation151_spill] sm:$0xff] }
 0x509   : > { %9254 = vst [vmem:[#allocation185_spill] sm:$0xff] %v7195_v5 }
 0x50d   : > { %2714 = vrot.lane.b32.xlu2 %v6717_v15, %s4161_s26  ;;  %2716 = vrot.lane.b32.xlu0 %v9255_v37, %s4161_s26 }
 0x50e   : > { %2712 = vrot.lane.b32.xlu1 %v9256_v9, %s4161_s26 }
 0x50f   : > { %v7205_v28 = vpop.permute.xlu0 %2557  ;;  %v7207_v21 = vpop.permute.xlu2 %2611 }
 0x510   : > { %9257 = vst [vmem:[#allocation73_spill] sm:$0xff] %v7205_v28  ;;  %v7209_v45 = vpop.permute.xlu1 %2553  ;;  %v9264_v28 = vld [vmem:[#allocation119_spill] sm:$0xff] }
 0x511   : > { %9258 = vst [vmem:[#allocation198_spill] sm:$0xff] %v7207_v21 }
 0x512   : > { %9259 = vst [vmem:[#allocation75_spill] sm:$0xff] %v7209_v45  ;;  %v9265_v45 = vld [vmem:[#allocation120_spill] sm:$0xff] }
 0x515   : > { %2720 = vrot.lane.b32.xlu2 %v6738_v35, %s4161_s26  ;;  %2722 = vrot.lane.b32.xlu0 %v6731_v20, %s4161_s26 }
 0x516   : > { %2718 = vrot.lane.b32.xlu1 %v9260_v32, %s4161_s26 }
 0x517   : > { %v7217_v5 = vpop.permute.xlu0 %2601  ;;  %v7219_v52 = vpop.permute.xlu2 %2617 }
 0x518   : > { %9261 = vst [vmem:[#allocation22_spill] sm:$0xff] %v7217_v5  ;;  %v7221_v42 = vpop.permute.xlu1 %2559 }
 0x519   : > { %9262 = vst [vmem:[#allocation59_spill] sm:$0xff] %v7219_v52 }
 0x51a   : > { %9263 = vst [vmem:[#allocation125_spill] sm:$0xff] %v7221_v42  ;;  %v9269_v42 = vld [vmem:[#allocation10_spill] sm:$0xff] }
 0x51d   : > { %2726 = vrot.lane.b32.xlu2 %v6762_v46, %s4161_s26  ;;  %2728 = vrot.lane.b32.xlu0 %v9264_v28, %s4161_s26 }
 0x51e   : > { %2724 = vrot.lane.b32.xlu1 %v9265_v45, %s4161_s26 }
 0x51f   : > { %v7229_v21 = vpop.permute.xlu0 %2607  ;;  %v7231_v20 = vpop.permute.xlu2 %2623 }
 0x520   : > { %9266 = vst [vmem:[#allocation206_spill] sm:$0xff] %v7229_v21  ;;  %v7233_v35 = vpop.permute.xlu1 %2603 }
 0x521   : > { %9267 = vst [vmem:[#allocation147_spill] sm:$0xff] %v7231_v20  ;;  %v9272_v20 = vld [vmem:[#allocation84_spill] sm:$0xff] }
 0x522   : > { %9268 = vst [vmem:[#allocation96_spill] sm:$0xff] %v7233_v35 }
 0x525   : > { %2732 = vrot.lane.b32.xlu2 %v6787_v47, %s4161_s26  ;;  %2734 = vrot.lane.b32.xlu0 %v6780_v31, %s4161_s26  ;;  %v9273_v47 = vld [vmem:[#allocation131_spill] sm:$0xff] }
 0x526   : > { %2730 = vrot.lane.b32.xlu1 %v9269_v42, %s4161_s26 }
 0x527   : > { %v7241_v52 = vpop.permute.xlu0 %2613  ;;  %v7243_v28 = vpop.permute.xlu2 %2629 }
 0x528   : > { %9270 = vst [vmem:[#allocation41_spill] sm:$0xff] %v7241_v52  ;;  %v7245_v46 = vpop.permute.xlu1 %2609  ;;  %v9277_v52 = vld [vmem:[#allocation202_spill] sm:$0xff] }
 0x529   : > { %9271 = vst [vmem:[#allocation177_spill] sm:$0xff] %v7245_v46 }
 0x52d   : > { %2738 = vrot.lane.b32.xlu2 %v6813_v3, %s4161_s26  ;;  %2740 = vrot.lane.b32.xlu0 %v9272_v20, %s4161_s26 }
 0x52e   : > { %2736 = vrot.lane.b32.xlu1 %v9273_v47, %s4161_s26 }
 0x52f   : > { %v7253_v21 = vpop.permute.xlu0 %2619  ;;  %v7255_v31 = vpop.permute.xlu2 %2635 }
 0x530   : > { %9274 = vst [vmem:[#allocation137_spill] sm:$0xff] %v7253_v21  ;;  %v7257_v42 = vpop.permute.xlu1 %2615  ;;  %v9279_v21 = vld [vmem:[#allocation204_spill] sm:$0xff] }
 0x531   : > { %9275 = vst [vmem:[#allocation197_spill] sm:$0xff] %v7255_v31 }
 0x532   : > { %9276 = vst [vmem:[#allocation156_spill] sm:$0xff] %v7257_v42 }
 0x535   : > { %2744 = vrot.lane.b32.xlu2 %v6838_v2, %s4161_s26  ;;  %2746 = vrot.lane.b32.xlu0 %v6831_v36, %s4161_s26 }
 0x536   : > { %2742 = vrot.lane.b32.xlu1 %v9277_v52, %s4161_s26 }
 0x537   : > { %v2626_v46 = vpop.permute.xlu0 %2625  ;;  %v7265_v45 = vpop.permute.xlu2 %2641 }
 0x538   : > { %v7267_v35 = vpop.permute.xlu1 %2621 }
 0x539   : > { %9278 = vst [vmem:[#allocation26_spill] sm:$0xff] %v7267_v35 }
 0x53d   : > { %2750 = vrot.lane.b32.xlu2 %v6864_v22, %s4161_s26  ;;  %2830 = vrot.lane.b32.xlu0 %v6497_v30, %s4162_s27 }
 0x53e   : > { %2748 = vrot.lane.b32.xlu1 %v9279_v21, %s4161_s26 }
 0x53f   : > { %v2632_v47 = vpop.permute.xlu0 %2631  ;;  %v7275_v42 = vpop.permute.xlu2 %2647 }
 0x540   : > { %v7277_v31 = vpop.permute.xlu1 %2627 }
 0x545   : > { %3022 = vrot.lane.b32.xlu2 %v6813_v3, %s4163_s28  ;;  %2798 = vrot.lane.b32.xlu0 %v6297_v58, %s4162_s27 }
 0x546   : > { %2926 = vrot.lane.b32.xlu1 %v9221_v41, %s4164_s29 }
 0x547   : > { %v7285_v35 = vpop.permute.xlu0 %2637  ;;  %v7287_v5 = vpop.permute.xlu2 %2653 }
 0x548   : > { %9280 = vst [vmem:[#allocation186_spill] sm:$0xff] %v7287_v5  ;;  %v7289_v32 = vpop.permute.xlu1 %2633 }
 0x54d   : > { %2832 = vrot.lane.b32.xlu2 %v6487_v40, %s4162_s27  ;;  %2990 = vrot.lane.b32.xlu0 %v9252_v18, %s4163_s28 }
 0x54e   : > { %2894 = vrot.lane.b32.xlu1 %v6315_v6, %s4164_s29 }
 0x54f   : > { %v7297_v3 = vpop.permute.xlu0 %2643  ;;  %v7299_v58 = vpop.permute.xlu2 %2659 }
 0x550   : > { %9281 = vst [vmem:[#allocation93_spill] sm:$0xff] %v7299_v58  ;;  %v7301_v41 = vpop.permute.xlu1 %2639 }
 0x555   : > { %3024 = vrot.lane.b32.xlu2 %v9272_v20, %s4163_s28  ;;  %2800 = vrot.lane.b32.xlu0 %v6302_v10, %s4162_s27 }
 0x556   : > { %2928 = vrot.lane.b32.xlu1 %v9229_v62, %s4164_s29 }
 0x557   : > { %v7309_v5 = vpop.permute.xlu0 %2649  ;;  %v7311_v18 = vpop.permute.xlu2 %2702 }
 0x558   : > { %v7313_v6 = vpop.permute.xlu1 %2645 }
 0x55d   : > { %2834 = vrot.lane.b32.xlu2 %v6542_v49, %s4162_s27  ;;  %2992 = vrot.lane.b32.xlu0 %v6695_v4, %s4163_s28 }
 0x55e   : > { %2896 = vrot.lane.b32.xlu1 %v6312_v23, %s4164_s29 }
 0x55f   : > { %v7321_v20 = vpop.permute.xlu0 %2655  ;;  %v7323_v58 = vpop.permute.xlu2 %2708 }
 0x560   : > { %9282 = vst [vmem:[#allocation15_spill] sm:$0xff] %v7321_v20  ;;  %v7325_v62 = vpop.permute.xlu1 %2651 }
 0x561   : > { %9283 = vst [vmem:[#allocation94_spill] sm:$0xff] %v7325_v62  ;;  %v9287_v62 = vld [vmem:[#allocation33_spill] sm:$0xff] }
 0x565   : > { %3026 = vrot.lane.b32.xlu2 %v9277_v52, %s4163_s28  ;;  %2802 = vrot.lane.b32.xlu0 %v6323_v48, %s4162_s27 }
 0x566   : > { %2930 = vrot.lane.b32.xlu1 %v9228_v50, %s4164_s29 }
 0x567   : > { %v7333_v10 = vpop.permute.xlu2 %2714  ;;  %v7335_v4 = vpop.permute.xlu0 %2661 }
 0x568   : > { %9284 = vst [vmem:[#allocation24_spill] sm:$0xff] %v7335_v4  ;;  %v7337_v23 = vpop.permute.xlu1 %2657  ;;  %v3098_v4 = vsel %vm1477_vm6, %v6405_v11, %v9287_v62 }
 0x569   : > { %9285 = vst [vmem:[#allocation39_spill] sm:$0xff] %v7337_v23  ;;  %v3130_v23 = vsel %vm1543_vm7, %v3098_v4, %v6953_v61 }
 0x56d   : > { %2836 = vrot.lane.b32.xlu2 %v6530_v57, %s4162_s27  ;;  %2994 = vrot.lane.b32.xlu0 %v9251_v60, %s4163_s28 }
 0x56e   : > { %2898 = vrot.lane.b32.xlu1 %v6341_v29, %s4164_s29  ;;  %v3162_v29 = vsel %vm1609_vm8, %v3130_v23, %v7136_v44 }
 0x56f   : > { %v7345_v52 = vpop.permute.xlu2 %2720  ;;  %v7347_v20 = vpop.permute.xlu0 %2704  ;;  %v3194_v60 = vsel %vm1675_vm12, %v3162_v29, %v2626_v46  ;;  %v9288_v29 = vld [vmem:[#allocation29_spill] sm:$0xff] }
 0x570   : > { %v7349_v50 = vpop.permute.xlu1 %2663 }
 0x571   : > { %9286 = vst [vmem:[#allocation6_spill] sm:$0xff] %v7349_v50 }
 0x575   : > { %3028 = vrot.lane.b32.xlu2 %v6838_v2, %s4163_s28  ;;  %2804 = vrot.lane.b32.xlu0 %v6326_v24, %s4162_s27  ;;  %v3101_v2 = vsel %vm1477_vm6, %v6436_v51, %v6873_v26 }
 0x576   : > { %2932 = vrot.lane.b32.xlu1 %v9227_v38, %s4164_s29  ;;  %v3133_v44 = vsel %vm1543_vm7, %v3101_v2, %v6965_v1  ;;  %v3107_v2 = vsel %vm1477_vm6, %v6487_v40, %v6909_v19 }
 0x577   : > { %v2727_v50 = vpop.permute.xlu2 %2726  ;;  %v7365_v62 = vpop.permute.xlu0 %2710  ;;  %v3165_v46 = vsel %vm1609_vm8, %v3133_v44, %v7149_v13  ;;  %v1965_v13 = vld [vmem:[%s8312_s3 + $0x40] sm:$0xff]  ;;  %v3139_v44 = vsel %vm1543_vm7, %v3107_v2, %v6989_v53 }
 0x578   : > { %v7368_v61 = vsel %vm3214_vm13, %v3194_v60, %v2727_v50  ;;  %v7370_v4 = vpop.permute.xlu1 %2706  ;;  %v3197_v38 = vsel %vm1675_vm12, %v3165_v46, %v2632_v47  ;;  %4072 = vmatpush.msra.mxu2 %v1965_v13  ;;  %3453 = vmatpush.msra.mxu1 %v1965_v13  ;;  %v3099_v60 = vsel %vm1477_vm6, %v6408_v16, %v9288_v29  ;;  %v1961_v13 = vld [vmem:[%s8312_s3 + $0x20] sm:$0xff] }
 0x579   : > { %v3131_v46 = vsel %vm1543_vm7, %v3099_v60, %v6991_v59  ;;  %v3171_v40 = vsel %vm1609_vm8, %v3139_v44, %v7185_v34  ;;  %v1962_v59 = vld [vmem:[%s8312_s3 + $0x28] sm:$0xff] }
 0x57d   : > { %2838 = vrot.lane.b32.xlu2 %v6579_v17, %s4162_s27  ;;  %2996 = vrot.lane.b32.xlu0 %v9256_v9, %s4163_s28 }
 0x57e   : > { %2900 = vrot.lane.b32.xlu1 %v6338_v39, %s4164_s29 }
 0x57f   : > { %v2733_v23 = vpop.permute.xlu2 %2732  ;;  %v7386_v50 = vpop.permute.xlu0 %2716 }
 0x580   : > { %v7389_v26 = vsel %vm3214_vm13, %v3197_v38, %v2733_v23  ;;  %v7391_v1 = vpop.permute.xlu1 %2712  ;;  %v3163_v38 = vsel %vm1609_vm8, %v3131_v46, %v7096_v25 }
 0x581   : > { %v3195_v53 = vsel %vm1675_vm12, %v3163_v38, %v7277_v31  ;;  %v1960_v31 = vld [vmem:[%s8312_s3 + $0x18] sm:$0xff] }
 0x585   : > { %3030 = vrot.lane.b32.xlu2 %v6831_v36, %s4163_s28  ;;  %2806 = vrot.lane.b32.xlu0 %v6351_v12, %s4162_s27  ;;  %v1964_v36 = vld [vmem:[%s8312_s3 + $0x38] sm:$0xff] }
 0x586   : > { %2934 = vrot.lane.b32.xlu1 %v9235_v55, %s4164_s29  ;;  %v1963_v55 = vld [vmem:[%s8312_s3 + $0x30] sm:$0xff]  ;;  %4073 = vmatpush.msra.mxu2 %v1964_v36 }
 0x587   : > { %v7399_v39 = vpop.permute.xlu2 %2738  ;;  %v7401_v9 = vpop.permute.xlu0 %2722  ;;  %3454 = vmatpush.msra.mxu1 %v1964_v36  ;;  %v3110_v36 = vsel %vm1477_vm6, %v6579_v17, %v6921_v14  ;;  %v1958_v14 = vld [vmem:[%s8312_s3 + $0x8] sm:$0xff] }
 0x588   : > { %v7403_v47 = vpop.permute.xlu1 %2718  ;;  %4074 = vmatpush.msra.mxu2 %v1963_v55  ;;  %v3142_v60 = vsel %vm1543_vm7, %v3110_v36, %v7001_v63 }
 0x589   : > { %3455 = vmatpush.msra.mxu1 %v1963_v55  ;;  %v9289_v55 = vld [vmem:[#allocation152_spill] sm:$0xff]  ;;  %v3174_v17 = vsel %vm1609_vm8, %v3142_v60, %v7197_v33  ;;  %v9296_v60 = vld [vmem:[#allocation101_spill] sm:$0xff] }
 0x58a   : > { %4075 = vmatpush.msra.mxu2 %v1962_v59  ;;  %v3100_v29 = vsel %vm1477_vm6, %v6433_v8, %v9289_v55 }
 0x58b   : > { %3456 = vmatpush.msra.mxu1 %v1962_v59  ;;  %v3132_v2 = vsel %vm1543_vm7, %v3100_v29, %v7006_v54 }
 0x58c   : > { %4076 = vmatpush.msra.mxu2 %v1961_v13  ;;  %v3164_v63 = vsel %vm1609_vm8, %v3132_v2, %v7134_v7  ;;  %v1957_v7 = vld [vmem:[%s8312_s3] sm:$0xff] }
 0x58d   : > { %2840 = vrot.lane.b32.xlu2 %v6561_v56, %s4162_s27  ;;  %2998 = vrot.lane.b32.xlu0 %v6717_v15, %s4163_s28  ;;  %v3203_v15 = vsel %vm1675_vm12, %v3171_v40, %v7297_v3  ;;  %v1959_v3 = vld [vmem:[%s8312_s3 + $0x10] sm:$0xff]  ;;  %v3196_v33 = vsel %vm1675_vm12, %v3164_v63, %v7243_v28  ;;  %v9291_v40 = vld [vmem:[#allocation146_spill] sm:$0xff]  ;;  %v9292_v28 = vld [vmem:[#allocation91_spill] sm:$0xff] }
 0x58e   : > { %2902 = vrot.lane.b32.xlu1 %v6366_v27, %s4164_s29  ;;  %3457 = vmatpush.msra.mxu1 %v1961_v13  ;;  %v9295_v13 = vld [vmem:[#allocation162_spill] sm:$0xff] }
 0x58f   : > { %v2745_v19 = vpop.permute.xlu2 %2744  ;;  %v2729_v23 = vpop.permute.xlu0 %2728  ;;  %4077 = vmatpush.msra.mxu2 %v1960_v31  ;;  %v9297_v2 = vld [vmem:[#allocation86_spill] sm:$0xff] }
 0x590   : > { %v7442_v25 = vsel %vm3214_vm13, %v3203_v15, %v2745_v19  ;;  %v7444_v34 = vpop.permute.xlu1 %2724  ;;  %v7447_v27 = vsel %vm3214_vm13, %v3195_v53, %v2729_v23  ;;  %3458 = vmatpush.msra.mxu1 %v1960_v31  ;;  %v9293_v15 = vld [vmem:[#allocation178_spill] sm:$0xff]  ;;  %v9294_v19 = vld [vmem:[#allocation89_spill] sm:$0xff] }
 0x591   : > { %4078 = vmatpush.msra.mxu2 %v1959_v3 }
 0x592   : > { %3459 = vmatpush.msra.mxu1 %v1959_v3 }
 0x593   : > { %4079 = vmatpush.msra.mxu2 %v1958_v14 }
 0x594   : > { %3460 = vmatpush.msra.mxu1 %v1958_v14  ;;  %v9298_v14 = vld [vmem:[#allocation46_spill] sm:$0xff] }
 0x595   : > { %3032 = vrot.lane.b32.xlu2 %v9279_v21, %s4163_s28  ;;  %2808 = vrot.lane.b32.xlu0 %v6354_v43, %s4162_s27  ;;  %v3206_v21 = vsel %vm1675_vm12, %v3174_v17, %v7309_v5  ;;  %v9290_v5 = vld [vmem:[#allocation28_spill] sm:$0xff]  ;;  %v3106_v17 = vsel %vm1477_vm6, %v6497_v30, %v9297_v2  ;;  %v9309_v2 = vld [vmem:[#allocation190_spill] sm:$0xff] }
 0x596   : > { %2936 = vrot.lane.b32.xlu1 %v9234_v0, %s4164_s29  ;;  %4080 = vmatpush.msra.mxu2 %v1957_v7  ;;  %v3105_v59 = vsel %vm1477_vm6, %v9291_v40, %v9290_v5 }
 0x597   : > { %v2751_v44 = vpop.permute.xlu2 %2750  ;;  %v2735_v46 = vpop.permute.xlu0 %2734  ;;  %v3137_v53 = vsel %vm1543_vm7, %v3105_v59, %v9292_v28  ;;  %3461 = vmatpush.msra.mxu1 %v1957_v7  ;;  %v9303_v7 = vld [vmem:[#allocation42_spill] sm:$0xff] }
 0x598   : > { %v7486_v54 = vsel %vm3214_vm13, %v3206_v21, %v2751_v44  ;;  %v2731_v0 = vpop.permute.xlu1 %2730  ;;  %v3169_v23 = vsel %vm1609_vm8, %v3137_v53, %v9294_v19  ;;  %v9300_v21 = vld [vmem:[#allocation25_spill] sm:$0xff] }
 0x599   : > { %v7489_v38 = vsel %vm3214_vm13, %v3196_v33, %v2731_v0  ;;  %v3201_v31 = vsel %vm1675_vm12, %v3169_v23, %v7301_v41  ;;  %v9299_v41 = vld [vmem:[#allocation72_spill] sm:$0xff]  ;;  %v3138_v44 = vsel %vm1543_vm7, %v3106_v17, %v9300_v21 }
 0x59a   : > { %v9301_v33 = vld [vmem:[#allocation20_spill] sm:$0xff]  ;;  %v3170_v30 = vsel %vm1609_vm8, %v3138_v44, %v9303_v7  ;;  %v9312_v7 = vld [vmem:[#allocation203_spill] sm:$0xff] }
 0x59b   : > { %v3202_v28 = vsel %vm1675_vm12, %v3170_v30, %v7265_v45 }
 0x59d   : > { %2842 = vrot.lane.b32.xlu2 %v9293_v15, %s4162_s27  ;;  %3000 = vrot.lane.b32.xlu0 %v9255_v37, %s4163_s28  ;;  %v3108_v37 = vsel %vm1477_vm6, %v6542_v49, %v9296_v60  ;;  %v9302_v49 = vld [vmem:[#allocation60_spill] sm:$0xff]  ;;  %v9307_v60 = vld [vmem:[#allocation11_spill] sm:$0xff] }
 0x59e   : > { %2904 = vrot.lane.b32.xlu1 %v9295_v13, %s4164_s29  ;;  %v3140_v63 = vsel %vm1543_vm7, %v3108_v37, %v9298_v14  ;;  %v9304_v13 = vld [vmem:[#allocation111_spill] sm:$0xff]  ;;  %v9308_v37 = vld [vmem:[#allocation145_spill] sm:$0xff] }
 0x59f   : > { %v3023_v3 = vpop.permute.xlu2 %3022  ;;  %v2741_v36 = vpop.permute.xlu0 %2740  ;;  %v3172_v0 = vsel %vm1609_vm8, %v3140_v63, %v9301_v33  ;;  %v9310_v33 = vld [vmem:[#allocation182_spill] sm:$0xff] }
 0x5a0   : > { %v7509_v55 = vpop.permute.xlu1 %2736  ;;  %v7512_v29 = vsel %vm3214_vm13, %v3201_v31, %v2741_v36  ;;  %v3204_v5 = vsel %vm1675_vm12, %v3172_v0, %v7313_v6  ;;  %v3109_v31 = vsel %vm1477_vm6, %v6530_v57, %v9304_v13  ;;  %v9305_v36 = vld [vmem:[#allocation157_spill] sm:$0xff]  ;;  %v9306_v6 = vld [vmem:[#allocation151_spill] sm:$0xff]  ;;  %v9316_v13 = vld [vmem:[#allocation118_spill] sm:$0xff] }
 0x5a1   : > { %v3141_v45 = vsel %vm1543_vm7, %v3109_v31, %v9307_v60  ;;  %v9311_v0 = vld [vmem:[#allocation135_spill] sm:$0xff]  ;;  %v9317_v31 = vld [vmem:[#allocation158_spill] sm:$0xff] }
 0x5a2   : > { %v3173_v17 = vsel %vm1609_vm8, %v3141_v45, %v9309_v2  ;;  %v9318_v2 = vld [vmem:[#allocation189_spill] sm:$0xff] }
 0x5a3   : > { %v3205_v57 = vsel %vm1675_vm12, %v3173_v17, %v7275_v42  ;;  %v4135_v17 = vunpack.i.l.bf16 %v9318_v2 }
 0x5a5   : > { %3034 = vrot.lane.b32.xlu2 %v6864_v22, %s4163_s28  ;;  %2810 = vrot.lane.b32.xlu0 %v9299_v41, %s4162_s27 }
 0x5a6   : > { %2938 = vrot.lane.b32.xlu1 %v9302_v49, %s4164_s29  ;;  %v3102_v49 = vsel %vm1477_vm6, %v9311_v0, %v9310_v33 }
 0x5a7   : > { %v7536_v59 = vpop.permute.xlu2 %2832  ;;  %v2747_v22 = vpop.permute.xlu0 %2746  ;;  %v3134_v30 = vsel %vm1543_vm7, %v3102_v49, %v9312_v7  ;;  %v9319_v49 = vld [vmem:[#allocation3_spill] sm:$0xff] }
 0x5a8   : > { %v2743_v53 = vpop.permute.xlu1 %2742  ;;  %v7541_v19 = vsel %vm3214_vm13, %v3204_v5, %v2747_v22  ;;  %v9313_v5 = vld [vmem:[#allocation55_spill] sm:$0xff] }
 0x5a9   : > { %v7544_v23 = vsel %vm3214_vm13, %v3202_v28, %v2743_v53  ;;  %v3166_v22 = vsel %vm1609_vm8, %v3134_v30, %v9313_v5  ;;  %v9314_v28 = vld [vmem:[#allocation133_spill] sm:$0xff]  ;;  %v9315_v53 = vld [vmem:[#allocation7_spill] sm:$0xff]  ;;  %v9320_v30 = vld [vmem:[#allocation68_spill] sm:$0xff] }
 0x5aa   : > { %v3198_v42 = vsel %vm1675_vm12, %v3166_v22, %v7289_v32  ;;  %v9321_v22 = vld [vmem:[#allocation172_spill] sm:$0xff] }
 0x5ab   : > { %v3231_v60 = vsel %vm3214_vm13, %v3198_v42, %v2735_v46  ;;  %v9323_v42 = vld [vmem:[#allocation22_spill] sm:$0xff] }
 0x5ad   : > { %2844 = vrot.lane.b32.xlu2 %v9305_v36, %s4162_s27  ;;  %3002 = vrot.lane.b32.xlu0 %v9306_v6, %s4163_s28  ;;  %v4130_v6 = vunpack.i.l.bf16 %v9317_v31 }
 0x5ae   : > { %2906 = vrot.lane.b32.xlu1 %v9308_v37, %s4164_s29 }
 0x5af   : > { %v3025_v14 = vpop.permute.xlu2 %3024  ;;  %v2831_v63 = vpop.permute.xlu0 %2830  ;;  %v3086_v7 = vsel %vm1477_vm6, %v9319_v49, %v4130_v6  ;;  %v9325_v49 = vld [vmem:[#allocation161_spill] sm:$0xff] }
 0x5b0   : > { %v2749_v21 = vpop.permute.xlu1 %2748  ;;  %v3118_v46 = vsel %vm1543_vm7, %v3086_v7, %v4135_v17  ;;  %v9326_v7 = vld [vmem:[#allocation170_spill] sm:$0xff] }
 0x5b1   : > { %v7562_v44 = vsel %vm3214_vm13, %v3205_v57, %v2749_v21  ;;  %v3264_v57 = vsel %vm3247_vm15, %v3231_v60, %v2831_v63  ;;  %v3150_v5 = vsel %vm1609_vm8, %v3118_v46, %v9320_v30  ;;  %v9322_v63 = vld [vmem:[#allocation180_spill] sm:$0xff]  ;;  %v3103_v46 = vsel %vm1477_vm6, %v9326_v7, %v9325_v49  ;;  %v9327_v30 = vld [vmem:[#allocation35_spill] sm:$0xff] }
 0x5b5   : > { %3036 = vrot.lane.b32.xlu2 %v9314_v28, %s4163_s28  ;;  %2812 = vrot.lane.b32.xlu0 %v9315_v53, %s4162_s27 }
 0x5b6   : > { %2940 = vrot.lane.b32.xlu1 %v9316_v13, %s4164_s29  ;;  %v3182_v13 = vsel %vm1675_vm12, %v3150_v5, %v9323_v42  ;;  %v3135_v5 = vsel %vm1543_vm7, %v3103_v46, %v9327_v30  ;;  %v9329_v42 = vld [vmem:[#allocation168_spill] sm:$0xff]  ;;  %v9332_v30 = vld [vmem:[#allocation2_spill] sm:$0xff] }
 0x5b7   : > { %v7581_v45 = vpop.permute.xlu2 %2834  ;;  %v2799_v37 = vpop.permute.xlu0 %2798  ;;  %v3215_v6 = vsel %vm3214_vm13, %v3182_v13, %v7311_v18 }
 0x5b8   : > { %v2927_v21 = vpop.permute.xlu1 %2926 }
 0x5b9   : > { %v3297_v32 = vsel %vm3280_vm14, %v3264_v57, %v2927_v21  ;;  %v3248_v57 = vsel %vm3247_vm15, %v3215_v6, %v2799_v37  ;;  %v9330_v37 = vld [vmem:[#allocation197_spill] sm:$0xff]  ;;  %v4131_v6 = vunpack.i.h.bf16 %v9317_v31 }
 0x5ba   : > { %v3330_v33 = vsel %vm3313_vm4, %v3297_v32, %v3023_v3  ;;  %v9324_v3 = vld [vmem:[#allocation102_spill] sm:$0xff] }
 0x5bb   : > { %4046 = vmatmul.msk.f32.vlgmr.msra.gmra.mxu2 %vm3349_vm5, %v3330_v33 }
 0x5bd   : > { %2846 = vrot.lane.b32.xlu2 %v9321_v22, %s4162_s27  ;;  %3004 = vrot.lane.b32.xlu0 %v9322_v63, %s4163_s28  ;;  %v9328_v63 = vld [vmem:[#allocation114_spill] sm:$0xff] }
 0x5be   : > { %2908 = vrot.lane.b32.xlu1 %v9324_v3, %s4164_s29  ;;  %v3167_v18 = vsel %vm1609_vm8, %v3135_v5, %v9328_v63  ;;  %v9331_v3 = vld [vmem:[#allocation150_spill] sm:$0xff]  ;;  %v3087_v5 = vsel %vm1477_vm6, %v9332_v30, %v4131_v6  ;;  %v9339_v30 = vld [vmem:[#allocation69_spill] sm:$0xff] }
 0x5bf   : > { %v3027_v60 = vpop.permute.xlu2 %3026  ;;  %v2991_v17 = vpop.permute.xlu0 %2990  ;;  %v3199_v13 = vsel %vm1675_vm12, %v3167_v18, %v9330_v37  ;;  %v9336_v18 = vld [vmem:[#allocation96_spill] sm:$0xff] }
 0x5c0   : > { %v2895_v21 = vpop.permute.xlu1 %2894 }
 0x5c1   : > { %v3281_v32 = vsel %vm3280_vm14, %v3248_v57, %v2895_v21 }
 0x5c2   : > { %v3314_v33 = vsel %vm3313_vm4, %v3281_v32, %v2991_v17  ;;  %v3232_v17 = vsel %vm3214_vm13, %v3199_v13, %v7509_v55  ;;  %v4136_v32 = vunpack.i.h.bf16 %v9318_v2  ;;  %v9333_v55 = vld [vmem:[#allocation184_spill] sm:$0xff]  ;;  %v9334_v2 = vld [vmem:[#allocation70_spill] sm:$0xff] }
 0x5c3   : > { %4030 = vmatmul.msk.f32.vlgmr.msra.gmra.mxu1 %vm3349_vm5, %v3314_v33  ;;  %v3265_v33 = vsel %vm3247_vm15, %v3232_v17, %v7536_v59  ;;  %v9335_v59 = vld [vmem:[#allocation138_spill] sm:$0xff] }
 0x5c4   : > { %v3119_v31 = vsel %vm1543_vm7, %v3087_v5, %v4136_v32  ;;  %v9340_v5 = vld [vmem:[#allocation176_spill] sm:$0xff] }
 0x5c5   : > { %3038 = vrot.lane.b32.xlu2 %v9329_v42, %s4163_s28  ;;  %2814 = vrot.lane.b32.xlu0 %v6405_v11, %s4162_s27  ;;  %v3151_v63 = vsel %vm1609_vm8, %v3119_v31, %v9333_v55  ;;  %v9341_v31 = vld [vmem:[#allocation128_spill] sm:$0xff] }
 0x5c6   : > { %2942 = vrot.lane.b32.xlu1 %v9331_v3, %s4164_s29  ;;  %v3183_v37 = vsel %vm1675_vm12, %v3151_v63, %v9336_v18  ;;  %v9343_v63 = vld [vmem:[#allocation160_spill] sm:$0xff] }
 0x5c7   : > { %v2837_v57 = vpop.permute.xlu2 %2836  ;;  %v2801_v21 = vpop.permute.xlu0 %2800 }
 0x5c8   : > { %v2929_v49 = vpop.permute.xlu1 %2928 }
 0x5c9   : > { %v3298_v11 = vsel %vm3280_vm14, %v3265_v33, %v2929_v49  ;;  %v9337_v49 = vld [vmem:[#allocation12_spill] sm:$0xff] }
 0x5ca   : > { %v3331_v46 = vsel %vm3313_vm4, %v3298_v11, %v3025_v14  ;;  %v3216_v14 = vsel %vm3214_vm13, %v3183_v37, %v7347_v20  ;;  %v9338_v11 = vld [vmem:[#allocation164_spill] sm:$0xff] }
 0x5cb   : > { %4047 = vmatmul.msk.f32.gmra.mxu2 %vm3349_vm5, %v3331_v46  ;;  %v3249_v6 = vsel %vm3247_vm15, %v3216_v14, %v2801_v21  ;;  %v3104_v46 = vsel %vm1477_vm6, %v9338_v11, %v9337_v49  ;;  %v9342_v21 = vld [vmem:[#allocation79_spill] sm:$0xff] }
 0x5cc   : > { %v9346_v49 = vld [vmem:[#allocation183_spill] sm:$0xff] }
 0x5cd   : > { %2910 = vrot.lane.b32.xlu2 %v9334_v2, %s4164_s29  ;;  %2848 = vrot.lane.b32.xlu0 %v9335_v59, %s4162_s27 }
 0x5ce   : > { %2752 = vrot.lane.b32.xlu1 %v9314_v28, %s4161_s26  ;;  %v3136_v28 = vsel %vm1543_vm7, %v3104_v46, %v9339_v30 }
 0x5cf   : > { %v3029_v13 = vpop.permute.xlu2 %3028  ;;  %v2993_v3 = vpop.permute.xlu0 %2992  ;;  %v3168_v20 = vsel %vm1609_vm8, %v3136_v28, %v9340_v5  ;;  %v9349_v28 = vld [vmem:[#allocation185_spill] sm:$0xff] }
 0x5d0   : > { %v2897_v17 = vpop.permute.xlu1 %2896  ;;  %v3200_v55 = vsel %vm1675_vm12, %v3168_v20, %v7285_v35 }
 0x5d1   : > { %v3282_v32 = vsel %vm3280_vm14, %v3249_v6, %v2897_v17  ;;  %v3233_v2 = vsel %vm3214_vm13, %v3200_v55, %v7399_v39  ;;  %v9347_v39 = vld [vmem:[#allocation37_spill] sm:$0xff] }
 0x5d2   : > { %v3315_v33 = vsel %vm3313_vm4, %v3282_v32, %v2993_v3  ;;  %v3266_v14 = vsel %vm3247_vm15, %v3233_v2, %v7581_v45  ;;  %v9344_v32 = vld [vmem:[#allocation192_spill] sm:$0xff]  ;;  %v9348_v45 = vld [vmem:[#allocation65_spill] sm:$0xff] }
 0x5d3   : > { %4031 = vmatmul.msk.f32.gmra.mxu1 %vm3349_vm5, %v3315_v33  ;;  %v9345_v33 = vld [vmem:[#allocation112_spill] sm:$0xff] }
 0x5d4   : > { %v3088_v35 = vsel %vm1477_vm6, %v9345_v33, %v9344_v32 }
 0x5d5   : > { %2944 = vrot.lane.b32.xlu2 %v9341_v31, %s4164_s29  ;;  %3040 = vrot.lane.b32.xlu0 %v9342_v21, %s4163_s28  ;;  %v3120_v46 = vsel %vm1543_vm7, %v3088_v35, %v9346_v49  ;;  %v9353_v35 = vld [vmem:[#allocation173_spill] sm:$0xff]  ;;  %v9354_v49 = vld [vmem:[#allocation132_spill] sm:$0xff] }
 0x5d6   : > { %3006 = vrot.lane.b32.xlu1 %v9343_v63, %s4163_s28  ;;  %v3152_v30 = vsel %vm1609_vm8, %v3120_v46, %v9347_v39  ;;  %v3089_v46 = vsel %vm1477_vm6, %v9354_v49, %v9353_v35  ;;  %v9355_v39 = vld [vmem:[#allocation205_spill] sm:$0xff] }
 0x5d7   : > { %v2839_v18 = vpop.permute.xlu2 %2838  ;;  %v2803_v37 = vpop.permute.xlu0 %2802  ;;  %v9363_v35 = vld [vmem:[#allocation169_spill] sm:$0xff] }
 0x5d8   : > { %v2931_v3 = vpop.permute.xlu1 %2930 }
 0x5d9   : > { %v3299_v6 = vsel %vm3280_vm14, %v3266_v14, %v2931_v3  ;;  %v9350_v14 = vld [vmem:[#allocation120_spill] sm:$0xff]  ;;  %v9351_v3 = vld [vmem:[#allocation166_spill] sm:$0xff] }
 0x5da   : > { %v3332_v17 = vsel %vm3313_vm4, %v3299_v6, %v3027_v60  ;;  %v3184_v60 = vsel %vm1675_vm12, %v3152_v30, %v9349_v28  ;;  %v3121_v30 = vsel %vm1543_vm7, %v3089_v46, %v9355_v39  ;;  %v9364_v46 = vld [vmem:[#allocation30_spill] sm:$0xff] }
 0x5db   : > { %4048 = vmatmul.msk.f32.gmra.mxu2 %vm3349_vm5, %v3332_v17  ;;  %v3217_v5 = vsel %vm3214_vm13, %v3184_v60, %v7370_v4 }
 0x5dc   : > { %v3250_v55 = vsel %vm3247_vm15, %v3217_v5, %v2803_v37  ;;  %v3267_v37 = vsel %vm3247_vm15, %v7512_v29, %v2837_v57  ;;  %v9357_v29 = vld [vmem:[#allocation206_spill] sm:$0xff] }
 0x5dd   : > { %2754 = vrot.lane.b32.xlu2 %v9329_v42, %s4161_s26  ;;  %2912 = vrot.lane.b32.xlu0 %v9348_v45, %s4164_s29  ;;  %v9356_v45 = vld [vmem:[#allocation196_spill] sm:$0xff] }
 0x5de   : > { %2816 = vrot.lane.b32.xlu1 %v6408_v16, %s4162_s27  ;;  %v9352_v16 = vld [vmem:[#allocation149_spill] sm:$0xff]  ;;  %v3153_v28 = vsel %vm1609_vm8, %v3121_v30, %v9356_v45  ;;  %v9365_v30 = vld [vmem:[#allocation88_spill] sm:$0xff] }
 0x5df   : > { %v3031_v20 = vpop.permute.xlu2 %3030  ;;  %v2995_v31 = vpop.permute.xlu0 %2994  ;;  %v3185_v57 = vsel %vm1675_vm12, %v3153_v28, %v9357_v29  ;;  %v9366_v28 = vld [vmem:[#allocation27_spill] sm:$0xff] }
 0x5e0   : > { %v2899_v63 = vpop.permute.xlu1 %2898  ;;  %v3218_v60 = vsel %vm3214_vm13, %v3185_v57, %v7323_v58 }
 0x5e1   : > { %v3283_v2 = vsel %vm3280_vm14, %v3250_v55, %v2899_v63 }
 0x5e2   : > { %v3316_v42 = vsel %vm3313_vm4, %v3283_v2, %v2995_v31 }
 0x5e3   : > { %4032 = vmatmul.msk.f32.gmra.mxu1 %vm3349_vm5, %v3316_v42  ;;  %v9360_v42 = vld [vmem:[#allocation141_spill] sm:$0xff] }
 0x5e5   : > { %3008 = vrot.lane.b32.xlu2 %v9350_v14, %s4163_s28  ;;  %2946 = vrot.lane.b32.xlu0 %v9351_v3, %s4164_s29  ;;  %v9361_v14 = vld [vmem:[#allocation8_spill] sm:$0xff] }
 0x5e6   : > { %2850 = vrot.lane.b32.xlu1 %v9352_v16, %s4162_s27 }
 0x5e7   : > { %v2841_v4 = vpop.permute.xlu2 %2840  ;;  %v2805_v6 = vpop.permute.xlu0 %2804 }
 0x5e8   : > { %v2933_v17 = vpop.permute.xlu1 %2932  ;;  %v3251_v55 = vsel %vm3247_vm15, %v3218_v60, %v2805_v6  ;;  %v3268_v6 = vsel %vm3247_vm15, %v7544_v23, %v2839_v18  ;;  %v9367_v23 = vld [vmem:[#allocation177_spill] sm:$0xff] }
 0x5e9   : > { %v3300_v32 = vsel %vm3280_vm14, %v3267_v37, %v2933_v17 }
 0x5ea   : > { %v3333_v33 = vsel %vm3313_vm4, %v3300_v32, %v3029_v13  ;;  %v9358_v13 = vld [vmem:[#allocation174_spill] sm:$0xff] }
 0x5eb   : > { %4049 = vmatmul.msk.f32.gmra.mxu2 %vm3349_vm5, %v3333_v33  ;;  %v9362_v33 = vld [vmem:[#allocation108_spill] sm:$0xff] }
 0x5ec   : > { %v3090_v49 = vsel %vm1477_vm6, %v9363_v35, %v9362_v33  ;;  %v9372_v35 = vld [vmem:[#allocation85_spill] sm:$0xff] }
 0x5ed   : > { %2818 = vrot.lane.b32.xlu2 %v6433_v8, %s4162_s27  ;;  %2756 = vrot.lane.b32.xlu0 %v9342_v21, %s4161_s26  ;;  %v9359_v21 = vld [vmem:[#allocation78_spill] sm:$0xff]  ;;  %v3122_v39 = vsel %vm1543_vm7, %v3090_v49, %v9364_v46  ;;  %v9373_v49 = vld [vmem:[#allocation143_spill] sm:$0xff] }
 0x5ee   : > { %3042 = vrot.lane.b32.xlu1 %v9358_v13, %s4163_s28  ;;  %v3154_v45 = vsel %vm1609_vm8, %v3122_v39, %v9365_v30  ;;  %v3091_v46 = vsel %vm1477_vm6, %v9373_v49, %v9372_v35 }
 0x5ef   : > { %v3033_v5 = vpop.permute.xlu2 %3032  ;;  %v2997_v31 = vpop.permute.xlu0 %2996  ;;  %v3186_v18 = vsel %vm1675_vm12, %v3154_v45, %v9367_v23  ;;  %v9375_v45 = vld [vmem:[#allocation136_spill] sm:$0xff] }
 0x5f0   : > { %v2901_v63 = vpop.permute.xlu1 %2900  ;;  %v3219_v29 = vsel %vm3214_vm13, %v3186_v18, %v7365_v62  ;;  %v9378_v18 = vld [vmem:[#allocation119_spill] sm:$0xff] }
 0x5f1   : > { %v3284_v2 = vsel %vm3280_vm14, %v3251_v55, %v2901_v63 }
 0x5f2   : > { %v3317_v8 = vsel %vm3313_vm4, %v3284_v2, %v2997_v31 }
 0x5f3   : > { %4033 = vmatmul.msk.f32.gmra.mxu1 %vm3349_vm5, %v3317_v8  ;;  %v9370_v8 = vld [vmem:[#allocation134_spill] sm:$0xff] }
 0x5f5   : > { %2852 = vrot.lane.b32.xlu2 %v9359_v21, %s4162_s27  ;;  %3010 = vrot.lane.b32.xlu0 %v9360_v42, %s4163_s28 }
 0x5f6   : > { %2914 = vrot.lane.b32.xlu1 %v9361_v14, %s4164_s29  ;;  %v9371_v14 = vld [vmem:[#allocation175_spill] sm:$0xff] }
 0x5f7   : > { %v2843_v58 = vpop.permute.xlu2 %2842  ;;  %v2807_v3 = vpop.permute.xlu0 %2806 }
 0x5f8   : > { %v2935_v37 = vpop.permute.xlu1 %2934  ;;  %v3252_v31 = vsel %vm3247_vm15, %v3219_v29, %v2807_v3  ;;  %v2698_v3 = vrot.slane %v9371_v14, 2 }
 0x5f9   : > { %v3301_v17 = vsel %vm3280_vm14, %v3268_v6, %v2935_v37  ;;  %v3269_v6 = vsel %vm3247_vm15, %v7442_v25, %v2841_v4  ;;  %v9376_v4 = vld [vmem:[#allocation208_spill] sm:$0xff] }
 0x5fa   : > { %v3334_v32 = vsel %vm3313_vm4, %v3301_v17, %v3031_v20  ;;  %v9368_v20 = vld [vmem:[#allocation98_spill] sm:$0xff] }
 0x5fb   : > { %4050 = vmatmul.msk.f32.gmra.mxu2 %vm3349_vm5, %v3334_v32  ;;  %v2697_v32 = vrot.slane %v9370_v8, 2 }
 0x5fd   : > { %3044 = vrot.lane.b32.xlu2 %v9366_v28, %s4163_s28  ;;  %2820 = vrot.lane.b32.xlu0 %v6436_v51, %s4162_s27  ;;  %v9369_v51 = vld [vmem:[#allocation113_spill] sm:$0xff]  ;;  %v2699_v30 = vsel %vm679_vm2, %v2697_v32, %v2698_v3  ;;  %v9380_v32 = vld [vmem:[#allocation74_spill] sm:$0xff] }
 0x5fe   : > { %2948 = vrot.lane.b32.xlu1 %v9368_v20, %s4164_s29 }
 0x5ff   : > { %v3035_v57 = vpop.permute.xlu2 %3034  ;;  %v2999_v60 = vpop.permute.xlu0 %2998 }
 0x600   : > { %v2903_v55 = vpop.permute.xlu1 %2902 }
 0x601   : > { %v3285_v63 = vsel %vm3280_vm14, %v3252_v31, %v2903_v55 }
 0x602   : > { %v3318_v2 = vsel %vm3313_vm4, %v3285_v63, %v2999_v60 }
 0x603   : > { %4034 = vmatmul.msk.f32.gmra.mxu1 %vm3349_vm5, %v3318_v2 }
 0x605   : > { %2916 = vrot.lane.b32.xlu2 %v9369_v51, %s4164_s29  ;;  %2854 = vrot.lane.b32.xlu0 %v9370_v8, %s4162_s27  ;;  %v9379_v51 = vld [vmem:[#allocation115_spill] sm:$0xff] }
 0x606   : > { %2758 = vrot.lane.b32.xlu1 %v9358_v13, %s4161_s26  ;;  %v9374_v13 = vld [vmem:[#allocation195_spill] sm:$0xff] }
 0x607   : > { %v2845_v62 = vpop.permute.xlu2 %2844  ;;  %v2809_v42 = vpop.permute.xlu0 %2808  ;;  %v3123_v39 = vsel %vm1543_vm7, %v3091_v46, %v9374_v13  ;;  %v9383_v46 = vld [vmem:[#allocation10_spill] sm:$0xff] }
 0x608   : > { %v2937_v37 = vpop.permute.xlu1 %2936  ;;  %v3155_v25 = vsel %vm1609_vm8, %v3123_v39, %v9375_v45 }
 0x609   : > { %v3302_v17 = vsel %vm3280_vm14, %v3269_v6, %v2937_v37 }
 0x60a   : > { %v3335_v33 = vsel %vm3313_vm4, %v3302_v17, %v3033_v5  ;;  %v9377_v5 = vld [vmem:[#allocation198_spill] sm:$0xff] }
 0x60b   : > { %4051 = vmatmul.msk.f32.gmra.mxu2 %vm3349_vm5, %v3335_v33  ;;  %v3187_v23 = vsel %vm1675_vm12, %v3155_v25, %v9377_v5  ;;  %v9381_v33 = vld [vmem:[#allocation103_spill] sm:$0xff] }
 0x60c   : > { %v3220_v20 = vsel %vm3214_vm13, %v3187_v23, %v7391_v1 }
 0x60d   : > { %2950 = vrot.lane.b32.xlu2 %v9376_v4, %s4164_s29  ;;  %3046 = vrot.lane.b32.xlu0 %v2699_v30, %s4163_s28  ;;  %v3253_v31 = vsel %vm3247_vm15, %v3220_v20, %v2809_v42  ;;  %v3270_v42 = vsel %vm3247_vm15, %v7541_v19, %v2843_v58  ;;  %v9384_v19 = vld [vmem:[#allocation126_spill] sm:$0xff]  ;;  %v9385_v58 = vld [vmem:[#allocation41_spill] sm:$0xff]  ;;  %v9386_v4 = vld [vmem:[#allocation47_spill] sm:$0xff] }
 0x60e   : > { %3012 = vrot.lane.b32.xlu1 %v9378_v18, %s4163_s28  ;;  %v2700_v5 = vrot.slane %v9386_v4, 2 }
 0x60f   : > { %v3037_v29 = vpop.permute.xlu2 %3036  ;;  %v3001_v60 = vpop.permute.xlu0 %3000 }
 0x610   : > { %v2905_v55 = vpop.permute.xlu1 %2904  ;;  %v2701_v20 = vsel %vm679_vm2, %v2698_v3, %v2700_v5  ;;  %v9400_v5 = vld [vmem:[#allocation58_spill] sm:$0xff] }
 0x611   : > { %v3286_v63 = vsel %vm3280_vm14, %v3253_v31, %v2905_v55 }
 0x612   : > { %v3319_v2 = vsel %vm3313_vm4, %v3286_v63, %v3001_v60  ;;  %v3271_v60 = vsel %vm3247_vm15, %v7562_v44, %v2845_v62  ;;  %v9391_v44 = vld [vmem:[#allocation40_spill] sm:$0xff] }
 0x613   : > { %4035 = vmatmul.msk.f32.gmra.mxu1 %vm3349_vm5, %v3319_v2  ;;  %v9387_v2 = vld [vmem:[#allocation77_spill] sm:$0xff]  ;;  %v9392_v62 = vld [vmem:[#allocation156_spill] sm:$0xff] }
 0x614   : > { %v3093_v3 = vsel %vm1477_vm6, %v6326_v24, %v9387_v2 }
 0x615   : > { %2760 = vrot.lane.b32.xlu2 %v9366_v28, %s4161_s26  ;;  %2918 = vrot.lane.b32.xlu0 %v9379_v51, %s4164_s29  ;;  %v3092_v28 = vsel %vm1477_vm6, %v6323_v48, %v9380_v32  ;;  %v9389_v51 = vld [vmem:[#allocation124_spill] sm:$0xff] }
 0x616   : > { %2822 = vrot.lane.b32.xlu1 %v9311_v0, %s4162_s27  ;;  %v3124_v35 = vsel %vm1543_vm7, %v3092_v28, %v9381_v33  ;;  %v9382_v0 = vld [vmem:[#allocation90_spill] sm:$0xff] }
 0x617   : > { %v2847_v1 = vpop.permute.xlu2 %2846  ;;  %v2811_v8 = vpop.permute.xlu0 %2810  ;;  %v3156_v49 = vsel %vm1609_vm8, %v3124_v35, %v9382_v0  ;;  %v9394_v0 = vld [vmem:[#allocation52_spill] sm:$0xff] }
 0x618   : > { %v2939_v6 = vpop.permute.xlu1 %2938 }
 0x619   : > { %v3303_v37 = vsel %vm3280_vm14, %v3270_v42, %v2939_v6  ;;  %v9390_v42 = vld [vmem:[#allocation200_spill] sm:$0xff] }
 0x61a   : > { %v3336_v17 = vsel %vm3313_vm4, %v3303_v37, %v3035_v57  ;;  %v3188_v57 = vsel %vm1675_vm12, %v3156_v49, %v9385_v58  ;;  %v9393_v6 = vld [vmem:[#allocation76_spill] sm:$0xff] }
 0x61b   : > { %4052 = vmatmul.msk.f32.gmra.mxu2 %vm3349_vm5, %v3336_v17  ;;  %v3221_v48 = vsel %vm3214_vm13, %v3188_v57, %v7333_v10  ;;  %v9395_v49 = vld [vmem:[#allocation4_spill] sm:$0xff] }
 0x61c   : > { %v3254_v45 = vsel %vm3247_vm15, %v3221_v48, %v2811_v8 }
 0x61d   : > { %3014 = vrot.lane.b32.xlu2 %v9383_v46, %s4163_s28  ;;  %2952 = vrot.lane.b32.xlu0 %v9384_v19, %s4164_s29  ;;  %v3272_v19 = vsel %vm3247_vm15, %v7486_v54, %v2847_v1  ;;  %v9398_v54 = vld [vmem:[#allocation191_spill] sm:$0xff] }
 0x61e   : > { %2856 = vrot.lane.b32.xlu1 %v9371_v14, %s4162_s27  ;;  %v9399_v1 = vld [vmem:[#allocation87_spill] sm:$0xff] }
 0x61f   : > { %v3039_v13 = vpop.permute.xlu2 %3038  ;;  %v3003_v39 = vpop.permute.xlu0 %3002 }
 0x620   : > { %v2907_v25 = vpop.permute.xlu1 %2906 }
 0x621   : > { %v3287_v23 = vsel %vm3280_vm14, %v3254_v45, %v2907_v25  ;;  %v9397_v25 = vld [vmem:[#allocation148_spill] sm:$0xff] }
 0x622   : > { %v3320_v18 = vsel %vm3313_vm4, %v3287_v23, %v3003_v39  ;;  %v9396_v39 = vld [vmem:[#allocation193_spill] sm:$0xff] }
 0x623   : > { %4036 = vmatmul.msk.f32.gmra.mxu1 %vm3349_vm5, %v3320_v18  ;;  %v3111_v45 = vsel %vm1477_vm6, %v6561_v56, %v9396_v39 }
 0x625   : > { %2824 = vrot.lane.b32.xlu2 %v9326_v7, %s4162_s27  ;;  %2762 = vrot.lane.b32.xlu0 %v2699_v30, %s4161_s26  ;;  %v9388_v7 = vld [vmem:[#allocation67_spill] sm:$0xff] }
 0x626   : > { %3048 = vrot.lane.b32.xlu1 %v2701_v20, %s4163_s28  ;;  %v3125_v30 = vsel %vm1543_vm7, %v3093_v3, %v9388_v7  ;;  %v9403_v3 = vld [vmem:[#allocation51_spill] sm:$0xff] }
 0x627   : > { %v7829_v10 = vpop.permute.xlu2 %2910  ;;  %v2813_v14 = vpop.permute.xlu0 %2812  ;;  %v3157_v8 = vsel %vm1609_vm8, %v3125_v30, %v9389_v51 }
 0x628   : > { %v2941_v31 = vpop.permute.xlu1 %2940 }
 0x629   : > { %v3304_v55 = vsel %vm3280_vm14, %v3271_v60, %v2941_v31  ;;  %v9401_v60 = vld [vmem:[#allocation21_spill] sm:$0xff] }
 0x62a   : > { %v3337_v63 = vsel %vm3313_vm4, %v3304_v55, %v3037_v29  ;;  %v3189_v29 = vsel %vm1675_vm12, %v3157_v8, %v9392_v62  ;;  %v3094_v31 = vsel %vm1477_vm6, %v6351_v12, %v9401_v60  ;;  %v9402_v55 = vld [vmem:[#allocation94_spill] sm:$0xff]  ;;  %v9404_v8 = vld [vmem:[#allocation31_spill] sm:$0xff] }
 0x62b   : > { %4053 = vmatmul.msk.f32.gmra.mxu2 %vm3349_vm5, %v3337_v63  ;;  %v3222_v24 = vsel %vm3214_vm13, %v3189_v29, %v7386_v50  ;;  %v3126_v7 = vsel %vm1543_vm7, %v3094_v31, %v9403_v3  ;;  %v9414_v3 = vld [vmem:[#allocation153_spill] sm:$0xff] }
 0x62c   : > { %v3255_v32 = vsel %vm3247_vm15, %v3222_v24, %v2813_v14 }
 0x62d   : > { %4138 = vrot.lane.b32.xlu2 %v9390_v42, %s4162_s27  ;;  %3016 = vrot.lane.b32.xlu0 %v9391_v44, %s4163_s28  ;;  %v3158_v42 = vsel %vm1609_vm8, %v3126_v7, %v9404_v8  ;;  %v9405_v44 = vld [vmem:[#allocation59_spill] sm:$0xff]  ;;  %v3112_v7 = vsel %vm1477_vm6, %v9293_v15, %v9414_v3  ;;  %v9415_v8 = vld [vmem:[#allocation34_spill] sm:$0xff] }
 0x62e   : > { %2920 = vrot.lane.b32.xlu1 %v9393_v6, %s4164_s29  ;;  %v3190_v62 = vsel %vm1675_vm12, %v3158_v42, %v9405_v44  ;;  %v3144_v42 = vsel %vm1543_vm7, %v3112_v7, %v9415_v8  ;;  %v9416_v44 = vld [vmem:[#allocation36_spill] sm:$0xff]  ;;  %v9424_v3 = vld [vmem:[#allocation75_spill] sm:$0xff] }
 0x62f   : > { %v2945_v37 = vpop.permute.xlu2 %2944  ;;  %v3005_v17 = vpop.permute.xlu0 %3004  ;;  %v3223_v6 = vsel %vm3214_vm13, %v3190_v62, %v7403_v47  ;;  %v3176_v62 = vsel %vm1609_vm8, %v3144_v42, %v9416_v44  ;;  %v9425_v7 = vld [vmem:[#allocation15_spill] sm:$0xff] }
 0x630   : > { %v2909_v28 = vpop.permute.xlu1 %2908 }
 0x631   : > { %v3288_v33 = vsel %vm3280_vm14, %v3255_v32, %v2909_v28  ;;  %v9406_v32 = vld [vmem:[#allocation53_spill] sm:$0xff] }
 0x632   : > { %v3321_v35 = vsel %vm3313_vm4, %v3288_v33, %v3005_v17  ;;  %v9407_v28 = vld [vmem:[#allocation5_spill] sm:$0xff] }
 0x633   : > { %4037 = vmatmul.msk.f32.gmra.mxu1 %vm3349_vm5, %v3321_v35 }
 0x635   : > { %3050 = vrot.lane.b32.xlu2 %v9394_v0, %s4163_s28  ;;  %2826 = vrot.lane.b32.xlu0 %v9338_v11, %s4162_s27  ;;  %v7873_v11 = vld [vmem:[%s8313_s4] ss:$0 sm:$0xff] }
 0x636   : > { %2954 = vrot.lane.b32.xlu1 %v9395_v49, %s4164_s29 }
 0x637   : > { %v7863_v50 = vpop.permute.xlu2 %2754  ;;  %v2815_v46 = vpop.permute.xlu0 %2814 }
 0x638   : > { %v2943_v58 = vpop.permute.xlu1 %2942  ;;  %v3256_v17 = vsel %vm3247_vm15, %v3223_v6, %v2815_v46 }
 0x639   : > { %v3305_v57 = vsel %vm3280_vm14, %v3272_v19, %v2943_v58  ;;  %v3289_v0 = vsel %vm3280_vm14, %v3256_v17, %v7829_v10  ;;  %v9411_v10 = vld [vmem:[#allocation92_spill] sm:$0xff] }
 0x63a   : > { %v3338_v48 = vsel %vm3313_vm4, %v3305_v57, %v3039_v13  ;;  %v3143_v13 = vsel %vm1543_vm7, %v3111_v45, %v9399_v1  ;;  %v9409_v57 = vld [vmem:[#allocation123_spill] sm:$0xff]  ;;  %v9412_v45 = vld [vmem:[#allocation105_spill] sm:$0xff] }
 0x63b   : > { %4054 = vmatmul.msk.f32.gmra.mxu2 %vm3349_vm5, %v3338_v48  ;;  %v3175_v23 = vsel %vm1609_vm8, %v3143_v13, %v9400_v5  ;;  %v9410_v48 = vld [vmem:[#allocation131_spill] sm:$0xff] }
 0x63c   : > { %v3207_v63 = vsel %vm1675_vm12, %v3175_v23, %v9402_v55 }
 0x63d   : > { %2922 = vrot.lane.b32.xlu2 %v9397_v25, %s4164_s29  ;;  %3018 = vrot.lane.b32.xlu0 %v9398_v54, %s4163_s28  ;;  %v9413_v54 = vld [vmem:[#allocation137_spill] sm:$0xff] }
 0x63e   : > { %2764 = vrot.lane.b32.xlu1 %v2701_v20, %s4161_s26  ;;  %v3511_v4 = vpop.f32.mrf.mxu2  ;;  %s7900_s26 = scalar_lea.vmem %s8314_s5, %s4064_s23  ;;  %s4066_s23 = sshll.u32 %s9447_s22, 6 }
 0x63f   : > { %v7888_v18 = vadd.f32 %v7873_v11, %v3511_v4  ;;  %v3009_v14 = vpop.permute.xlu2 %3008  ;;  %v2849_v56 = vpop.permute.xlu0 %2848  ;;  %s8073_s22 = scalar_lea.vmem %s8315_s6, %s4066_s23 }
 0x640   : > { %v2753_v20 = vpop.permute.xlu1 %2752  ;;  %v3463_v2 = vpop.f32.mrf.mxu1 }
 0x641   : > { %v3575_v30 = vmax.f32 %v7888_v18, 0.0  ;;  %v3240_v12 = vsel %vm3214_vm13, %v3207_v63, %v2753_v20  ;;  %v7907_v51 = vadd.f32 %v7873_v11, %v3463_v2 }
 0x642   : > { %v3273_v24 = vsel %vm3247_vm15, %v3240_v12, %v2849_v56 }
 0x643   : > { %3607 = vst.msk [vmem:[%s7900_s26 + $0x80] sm:$0xff] %vm1477_vm6, %v3575_v30  ;;  %v3559_v29 = vmax.f32 %v7907_v51, 0.0  ;;  %v3306_v47 = vsel %vm3280_vm14, %v3273_v24, %v2945_v37 }
 0x645   : > { %3591 = vst.msk [vmem:[%s7900_s26] sm:$0xff] %vm1477_vm6, %v3559_v29  ;;  %3052 = vrot.lane.b32.xlu2 %v9406_v32, %s4163_s28  ;;  %2828 = vrot.lane.b32.xlu0 %v9291_v40, %s4162_s27  ;;  %v9408_v40 = vld [vmem:[#allocation121_spill] sm:$0xff] }
 0x646   : > { %2956 = vrot.lane.b32.xlu1 %v9407_v28, %s4164_s29  ;;  %v3095_v58 = vsel %vm1477_vm6, %v6354_v43, %v9408_v40 }
 0x647   : > { %v3041_v33 = vpop.permute.xlu0 %3040  ;;  %v2819_v46 = vpop.permute.xlu2 %2818  ;;  %v3127_v37 = vsel %vm1543_vm7, %v3095_v58, %v9409_v57  ;;  %v9418_v58 = vld [vmem:[#allocation64_spill] sm:$0xff] }
 0x648   : > { %v3007_v35 = vpop.permute.xlu1 %3006  ;;  %v3339_v49 = vsel %vm3313_vm4, %v3306_v47, %v3041_v33  ;;  %v3159_v39 = vsel %vm1609_vm8, %v3127_v37, %v9411_v10  ;;  %v3096_v57 = vsel %vm1477_vm6, %v9299_v41, %v9418_v58  ;;  %v9427_v58 = vld [vmem:[#allocation9_spill] sm:$0xff] }
 0x649   : > { %v3322_v19 = vsel %vm3313_vm4, %v3289_v0, %v3007_v35  ;;  %4055 = vmatmul.msk.f32.gmra.mxu2 %vm3349_vm5, %v3339_v49  ;;  %v3191_v1 = vsel %vm1675_vm12, %v3159_v39, %v9413_v54  ;;  %v9420_v39 = vld [vmem:[#allocation104_spill] sm:$0xff] }
 0x64a   : > { %4038 = vmatmul.msk.f32.gmra.mxu1 %vm3349_vm5, %v3322_v19  ;;  %v3224_v4 = vsel %vm3214_vm13, %v3191_v1, %v7345_v52 }
 0x64d   : > { %3020 = vrot.lane.b32.xlu2 %v9410_v48, %s4163_s28  ;;  %v9419_v48 = vld [vmem:[#allocation17_spill] sm:$0xff] }
 0x64e   : > { %2924 = vrot.lane.b32.xlu1 %v9412_v45, %s4164_s29  ;;  %v3514_v25 = vpop.f32.mrf.mxu2  ;;  %v3128_v10 = vsel %vm1543_vm7, %v3096_v57, %v9419_v48  ;;  %v3114_v57 = vsel %vm1477_vm6, %v9321_v22, %v9427_v58  ;;  %v9431_v22 = vld [vmem:[#allocation106_spill] sm:$0xff] }
 0x64f   : > { %v7953_v43 = vadd.f32 %v7873_v11, %v3514_v25  ;;  %v2913_v13 = vpop.permute.xlu0 %2912  ;;  %v2853_v63 = vpop.permute.xlu2 %2852  ;;  %v3160_v45 = vsel %vm1609_vm8, %v3128_v10, %v9420_v39  ;;  %v9421_v25 = vld [vmem:[#allocation26_spill] sm:$0xff]  ;;  %v9429_v10 = vld [vmem:[#allocation16_spill] sm:$0xff] }
 0x650   : > { %v2817_v5 = vpop.permute.xlu1 %2816  ;;  %v3466_v23 = vpop.f32.mrf.mxu1  ;;  %v3192_v54 = vsel %vm1675_vm12, %v3160_v45, %v9421_v25  ;;  %v9430_v39 = vld [vmem:[#allocation14_spill] sm:$0xff] }
 0x651   : > { %v3576_v56 = vmax.f32 %v7953_v43, 0.0  ;;  %v3257_v60 = vsel %vm3247_vm15, %v3224_v4, %v2817_v5  ;;  %v7960_v31 = vadd.f32 %v7873_v11, %v3466_v23  ;;  %v3225_v18 = vsel %vm3214_vm13, %v3192_v54, %v7401_v9  ;;  %v9422_v5 = vld [vmem:[#allocation83_spill] sm:$0xff] }
 0x652   : > { %v3290_v55 = vsel %vm3280_vm14, %v3257_v60, %v2913_v13  ;;  %v3113_v23 = vsel %vm1477_vm6, %v9305_v36, %v9422_v5  ;;  %v3258_v60 = vsel %vm3247_vm15, %v3225_v18, %v2819_v46  ;;  %v3146_v43 = vsel %vm1543_vm7, %v3114_v57, %v9429_v10  ;;  %v9432_v5 = vld [vmem:[#allocation147_spill] sm:$0xff] }
 0x653   : > { %3608 = vst.msk [vmem:[%s7900_s26 + $0x88] sm:$0xff] %vm1477_vm6, %v3576_v56  ;;  %v3560_v20 = vmax.f32 %v7960_v31, 0.0  ;;  %v3323_v52 = vsel %vm3313_vm4, %v3290_v55, %v3009_v14  ;;  %v9417_v14 = vld [vmem:[#allocation186_spill] sm:$0xff]  ;;  %v9423_v55 = vld [vmem:[#allocation144_spill] sm:$0xff]  ;;  %v3178_v25 = vsel %vm1609_vm8, %v3146_v43, %v9431_v22 }
 0x654   : > { %4039 = vmatmul.msk.f32.gmra.mxu1 %vm3349_vm5, %v3323_v52  ;;  %v3208_v6 = vsel %vm1675_vm12, %v3176_v62, %v9417_v14  ;;  %v3145_v52 = vsel %vm1543_vm7, %v3113_v23, %v9423_v55  ;;  %v9433_v23 = vld [vmem:[#allocation39_spill] sm:$0xff] }
 0x655   : > { %3592 = vst.msk [vmem:[%s7900_s26 + $0x8] sm:$0xff] %vm1477_vm6, %v3560_v20  ;;  %v3241_v24 = vsel %vm3214_vm13, %v3208_v6, %v7863_v50  ;;  %v3177_v51 = vsel %vm1609_vm8, %v3145_v52, %v9424_v3 }
 0x656   : > { %v3209_v9 = vsel %vm1675_vm12, %v3177_v51, %v9425_v7 }
 0x657   : > { %v2947_v2 = vpop.permute.xlu0 %2946  ;;  %v3045_v17 = vpop.permute.xlu2 %3044 }
 0x658   : > { %v2851_v12 = vpop.permute.xlu1 %2850 }
 0x659   : > { %v3274_v32 = vsel %vm3247_vm15, %v3241_v24, %v2851_v12 }
 0x65a   : > { %v3307_v47 = vsel %vm3280_vm14, %v3274_v32, %v2947_v2 }
 0x65e   : > { %v3517_v28 = vpop.f32.mrf.mxu2 }
 0x65f   : > { %v3518_v15 = vadd.f32 %v7873_v11, %v3517_v28  ;;  %v2757_v33 = vpop.permute.xlu0 %2756  ;;  %v8006_v1 = vpop.permute.xlu2 %2916 }
 0x660   : > { %v3043_v35 = vpop.permute.xlu1 %3042  ;;  %v3469_v0 = vpop.f32.mrf.mxu1  ;;  %v3242_v42 = vsel %vm3214_vm13, %v3209_v9, %v2757_v33 }
 0x661   : > { %v3577_v49 = vmax.f32 %v3518_v15, 0.0  ;;  %v3470_v19 = vadd.f32 %v7873_v11, %v3469_v0  ;;  %v3340_v40 = vsel %vm3313_vm4, %v3307_v47, %v3043_v35  ;;  %v3275_v24 = vsel %vm3247_vm15, %v3242_v42, %v2853_v63  ;;  %v9426_v63 = vld [vmem:[#allocation13_spill] sm:$0xff] }
 0x662   : > { %4056 = vmatmul.msk.f32.gmra.mxu2 %vm3349_vm5, %v3340_v40 }
 0x663   : > { %3609 = vst.msk [vmem:[%s7900_s26 + $0x90] sm:$0xff] %vm1477_vm6, %v3577_v49  ;;  %v3561_v50 = vmax.f32 %v3470_v19, 0.0  ;;  %v3631_v37 = vmax.f32 %v3575_v30, %v3577_v49 }
 0x665   : > { %3593 = vst.msk [vmem:[%s7900_s26 + $0x10] sm:$0xff] %vm1477_vm6, %v3561_v50  ;;  %v3623_v13 = vmax.f32 %v3559_v29, %v3561_v50  ;;  %v3651_v30 = vrot.slane %v3631_v37, 1  ;;  %v3097_v50 = vsel %vm1477_vm6, %v9315_v53, %v9426_v63 }
 0x667   : > { %v3011_v41 = vpop.permute.xlu0 %3010  ;;  %v3647_v29 = vrot.slane %v3623_v13, 1  ;;  %v3667_v12 = vmax.f32 %v3631_v37, %v3651_v30  ;;  %v8028_v28 = vpop.permute.xlu2 %2950  ;;  %v9428_v37 = vld [vmem:[#allocation122_spill] sm:$0xff] }
 0x668   : > { %v2915_v4 = vpop.permute.xlu1 %2914  ;;  %v3129_v48 = vsel %vm1543_vm7, %v3097_v50, %v9428_v37 }
 0x669   : > { %v3291_v2 = vsel %vm3280_vm14, %v3258_v60, %v2915_v4  ;;  %v3663_v46 = vmax.f32 %v3623_v13, %v3647_v29  ;;  %v3715_v14 = vrot.slane %v3667_v12, 1  ;;  %v3731_v0 = vrot.slane %v3667_v12, 2 }
 0x66a   : > { %v3324_v8 = vsel %vm3313_vm4, %v3291_v2, %v3011_v41  ;;  %v3161_v45 = vsel %vm1609_vm8, %v3129_v48, %v9430_v39  ;;  %v3747_v60 = vrot.slane %v3667_v12, 3 }
 0x66b   : > { %4040 = vmatmul.msk.f32.gmra.mxu1 %vm3349_vm5, %v3324_v8  ;;  %v3711_v49 = vrot.slane %v3663_v46, 1  ;;  %v3727_v54 = vrot.slane %v3663_v46, 2  ;;  %v3193_v31 = vsel %vm1675_vm12, %v3161_v45, %v9432_v5  ;;  %v3743_v8 = vrot.slane %v3663_v46, 3 }
 0x66c   : > { %v3226_v52 = vsel %vm3214_vm13, %v3193_v31, %v7444_v34  ;;  %v9435_v31 = vld [vmem:[#allocation154_spill] sm:$0xff] }
 0x66d   : > { %v3831_v41 = vsel %vm336_vm0, %v3663_v46, %v3711_v49 }
 0x66e   : > { %v3520_v36 = vpop.f32.mrf.mxu2  ;;  %v3840_v29 = vsel %vm3839_vm9, %v3831_v41, %v3727_v54 }
 0x66f   : > { %v3521_v44 = vadd.f32 %v7873_v11, %v3520_v36  ;;  %v2821_v62 = vpop.permute.xlu0 %2820 }
 0x670   : > { %v2949_v6 = vpop.permute.xlu1 %2948  ;;  %v3472_v32 = vpop.f32.mrf.mxu1 }
 0x671   : > { %v3578_v15 = vmax.f32 %v3521_v44, 0.0  ;;  %v3308_v47 = vsel %vm3280_vm14, %v3275_v24, %v2949_v6  ;;  %v3473_v33 = vadd.f32 %v7873_v11, %v3472_v32  ;;  %v2761_v44 = vpop.permute.xlu2 %2760  ;;  %v3849_v32 = vsel %vm3848_vm10, %v3840_v29, %v3743_v8 }
 0x672   : > { %v3341_v35 = vsel %vm3313_vm4, %v3308_v47, %v3045_v17  ;;  %v3835_v17 = vsel %vm336_vm0, %v3667_v12, %v3715_v14 }
 0x673   : > { %3610 = vst.msk [vmem:[%s7900_s26 + $0x98] sm:$0xff] %vm1477_vm6, %v3578_v15  ;;  %v3632_v19 = vmax.f32 %v3576_v56, %v3578_v15  ;;  %v3562_v40 = vmax.f32 %v3473_v33, 0.0  ;;  %4057 = vmatmul.msk.f32.gmra.mxu2 %vm3349_vm5, %v3341_v35  ;;  %v3844_v13 = vsel %vm3839_vm9, %v3835_v17, %v3731_v0  ;;  %v3259_v15 = vsel %vm3247_vm15, %v3226_v52, %v2821_v62 }
 0x674   : > { %v3853_v51 = vsel %vm3848_vm10, %v3844_v13, %v3747_v60  ;;  %v3292_v17 = vsel %vm3280_vm14, %v3259_v15, %v8006_v1 }
 0x675   : > { %v3683_v56 = vrot.slane %v3632_v19, 1  ;;  %3594 = vst.msk [vmem:[%s7900_s26 + $0x18] sm:$0xff] %vm1477_vm6, %v3562_v40  ;;  %v3624_v53 = vmax.f32 %v3560_v20, %v3562_v40  ;;  %v3210_v20 = vsel %vm1675_vm12, %v3178_v25, %v9433_v23 }
 0x677   : > { %v3699_v18 = vmax.f32 %v3632_v19, %v3683_v56  ;;  %v3679_v30 = vrot.slane %v3624_v53, 1  ;;  %v2855_v4 = vpop.permute.xlu0 %2854 }
 0x678   : > { %v2759_v55 = vpop.permute.xlu1 %2758 }
 0x679   : > { %v3771_v2 = vrot.slane %v3699_v18, 4  ;;  %v3787_v3 = vrot.slane %v3699_v18, 5  ;;  %v3695_v7 = vmax.f32 %v3624_v53, %v3679_v30  ;;  %v3243_v9 = vsel %vm3214_vm13, %v3210_v20, %v2759_v55  ;;  %v3015_v1 = vpop.permute.xlu2 %3014  ;;  %v9434_v30 = vld [vmem:[#allocation32_spill] sm:$0xff]  ;;  %v9436_v55 = vld [vmem:[#allocation73_spill] sm:$0xff] }
 0x67a   : > { %v3803_v42 = vrot.slane %v3699_v18, 6  ;;  %v3819_v36 = vrot.slane %v3699_v18, 7  ;;  %v3276_v24 = vsel %vm3247_vm15, %v3243_v9, %v2855_v4  ;;  %v3115_v4 = vsel %vm1477_vm6, %v9335_v59, %v9434_v30 }
 0x67b   : > { %v3861_v12 = vsel %vm1808_vm3, %v3853_v51, %v3771_v2  ;;  %v3767_v14 = vrot.slane %v3695_v7, 4  ;;  %v3783_v6 = vrot.slane %v3695_v7, 5  ;;  %v3799_v33 = vrot.slane %v3695_v7, 6  ;;  %v9437_v2 = vld [vmem:[#allocation93_spill] sm:$0xff] }
 0x67c   : > { %v3870_v34 = vsel %vm3865_vm11, %v3861_v12, %v3787_v3  ;;  %v3815_v49 = vrot.slane %v3695_v7, 7  ;;  %v3309_v62 = vsel %vm3280_vm14, %v3276_v24, %v8028_v28  ;;  %v3147_v23 = vsel %vm1543_vm7, %v3115_v4, %v9435_v31 }
 0x67d   : > { %v3878_v46 = vsel %vm679_vm2, %v3870_v34, %v3803_v42  ;;  %v3857_v35 = vsel %vm1808_vm3, %v3849_v32, %v3767_v14  ;;  %v3179_v52 = vsel %vm1609_vm8, %v3147_v23, %v9436_v55 }
 0x67e   : > { %v3886_v47 = vsel %vm502_vm1, %v3878_v46, %v3819_v36  ;;  %v3523_v0 = vpop.f32.mrf.mxu2  ;;  %v3866_v19 = vsel %vm3865_vm11, %v3857_v35, %v3783_v6  ;;  %v3211_v3 = vsel %vm1675_vm12, %v3179_v52, %v9437_v2  ;;  %v9443_v52 = vld [vmem:[#allocation207_spill] sm:$0xff] }
 0x67f   : > { %3894 = vst.msk [vmem:[%s8073_s22 + $0x20] sm:$0xff] %vm1477_vm6, %v3886_v47  ;;  %v8086_v40 = vadd.f32 %v7873_v11, %v3523_v0  ;;  %v3047_v63 = vpop.permute.xlu0 %3046  ;;  %v3874_v50 = vsel %vm679_vm2, %v3866_v19, %v3799_v33  ;;  %v3244_v51 = vsel %vm3214_vm13, %v3211_v3, %v2761_v44  ;;  %v9438_v47 = vld [vmem:[#allocation163_spill] sm:$0xff]  ;;  %v9439_v0 = vld [vmem:[#allocation194_spill] sm:$0xff] }
 0x680   : > { %v3013_v58 = vpop.permute.xlu1 %3012  ;;  %v3475_v57 = vpop.f32.mrf.mxu1  ;;  %v3342_v37 = vsel %vm3313_vm4, %v3309_v62, %v3047_v63  ;;  %v3882_v48 = vsel %vm502_vm1, %v3874_v50, %v3815_v49  ;;  %v3116_v33 = vsel %vm1477_vm6, %v9352_v16, %v9438_v47  ;;  %v9441_v50 = vld [vmem:[#allocation24_spill] sm:$0xff] }
 0x681   : > { %v3579_v10 = vmax.f32 %v8086_v40, 0.0  ;;  %v3476_v43 = vadd.f32 %v7873_v11, %v3475_v57  ;;  %v3325_v56 = vsel %vm3313_vm4, %v3292_v17, %v3013_v58  ;;  %4058 = vmatmul.msk.f32.gmra.mxu2 %vm3349_vm5, %v3342_v37  ;;  %3890 = vst.msk [vmem:[%s8073_s22] sm:$0xff] %vm1477_vm6, %v3882_v48  ;;  %v2825_v13 = vpop.permute.xlu2 %2824  ;;  %v3148_v49 = vsel %vm1543_vm7, %v3116_v33, %v9439_v0  ;;  %v9440_v40 = vld [vmem:[#allocation125_spill] sm:$0xff] }
 0x682   : > { %4041 = vmatmul.msk.f32.gmra.mxu1 %vm3349_vm5, %v3325_v56  ;;  %v3261_v14 = vsel %vm3247_vm15, %v7447_v27, %v2825_v13  ;;  %v3180_v63 = vsel %vm1609_vm8, %v3148_v49, %v9440_v40 }
 0x683   : > { %3611 = vst.msk [vmem:[%s7900_s26 + $0xa0] sm:$0xff] %vm1477_vm6, %v3579_v10  ;;  %v3563_v28 = vmax.f32 %v3476_v43, 0.0  ;;  %v3212_v58 = vsel %vm1675_vm12, %v3180_v63, %v9441_v50 }
 0x685   : > { %3595 = vst.msk [vmem:[%s7900_s26 + $0x20] sm:$0xff] %vm1477_vm6, %v3563_v28 }
 0x687   : > { %v2919_v53 = vpop.permute.xlu0 %2918 }
 0x688   : > { %v2823_v39 = vpop.permute.xlu1 %2822 }
 0x689   : > { %v3260_v45 = vsel %vm3247_vm15, %v7368_v61, %v2823_v39  ;;  %v8139_v42 = vpop.permute.xlu2 %4138 }
 0x68a   : > { %v3293_v22 = vsel %vm3280_vm14, %v3260_v45, %v2919_v53  ;;  %v4140_v16 = vunpack.i.l.bf16 %v8139_v42 }
 0x68b   : > { %v3326_v25 = vsel %vm3313_vm4, %v3293_v22, %v3015_v1 }
 0x68c   : > { %4042 = vmatmul.msk.f32.gmra.mxu1 %vm3349_vm5, %v3326_v25 }
 0x68e   : > { %v3526_v54 = vpop.f32.mrf.mxu2 }
 0x68f   : > { %v8112_v41 = vadd.f32 %v7873_v11, %v3526_v54  ;;  %v2953_v18 = vpop.permute.xlu0 %2952 }
 0x690   : > { %v2857_v5 = vpop.permute.xlu1 %2856  ;;  %v3478_v61 = vpop.f32.mrf.mxu1 }
 0x691   : > { %v3580_v20 = vmax.f32 %v8112_v41, 0.0  ;;  %v8121_v60 = vadd.f32 %v7873_v11, %v3478_v61  ;;  %v3277_v29 = vsel %vm3247_vm15, %v3244_v51, %v2857_v5  ;;  %v3051_v19 = vpop.permute.xlu2 %3050 }
 0x692   : > { %v3310_v9 = vsel %vm3280_vm14, %v3277_v29, %v2953_v18 }
 0x693   : > { %3612 = vst.msk [vmem:[%s7900_s26 + $0xa8] sm:$0xff] %vm1477_vm6, %v3580_v20  ;;  %v3564_v59 = vmax.f32 %v8121_v60, 0.0 }
 0x695   : > { %3596 = vst.msk [vmem:[%s7900_s26 + $0x28] sm:$0xff] %vm1477_vm6, %v3564_v59 }
 0x697   : > { %v2763_v7 = vpop.permute.xlu0 %2762 }
 0x698   : > { %v3049_v8 = vpop.permute.xlu1 %3048  ;;  %v3245_v57 = vsel %vm3214_vm13, %v3212_v58, %v2763_v7 }
 0x699   : > { %v3343_v36 = vsel %vm3313_vm4, %v3310_v9, %v3049_v8  ;;  %v3278_v56 = vsel %vm3247_vm15, %v3245_v57, %v4140_v16  ;;  %v2923_v22 = vpop.permute.xlu2 %2922  ;;  %v9444_v9 = vld [vmem:[#allocation165_spill] sm:$0xff] }
 0x69a   : > { %4059 = vmatmul.msk.f32.gmra.mxu2 %vm3349_vm5, %v3343_v36  ;;  %v9445_v36 = vld [vmem:[#allocation6_spill] sm:$0xff] }
 0x69e   : > { %v3529_v12 = vpop.f32.mrf.mxu2 }
 0x69f   : > { %v3530_v44 = vadd.f32 %v7873_v11, %v3529_v12  ;;  %v3017_v34 = vpop.permute.xlu0 %3016 }
 0x6a0   : > { %v2921_v6 = vpop.permute.xlu1 %2920  ;;  %v3481_v24 = vpop.f32.mrf.mxu1 }
 0x6a1   : > { %v3581_v32 = vmax.f32 %v3530_v44, 0.0  ;;  %v3294_v46 = vsel %vm3280_vm14, %v3261_v14, %v2921_v6  ;;  %v3482_v15 = vadd.f32 %v7873_v11, %v3481_v24  ;;  %v4141_v14 = vunpack.i.h.bf16 %v8139_v42  ;;  %v3053_v24 = vpop.permute.xlu2 %3052 }
 0x6a2   : > { %v3327_v35 = vsel %vm3313_vm4, %v3294_v46, %v3017_v34 }
 0x6a3   : > { %3613 = vst.msk [vmem:[%s7900_s26 + $0xb0] sm:$0xff] %vm1477_vm6, %v3581_v32  ;;  %v3565_v27 = vmax.f32 %v3482_v15, 0.0  ;;  %4043 = vmatmul.msk.f32.gmra.mxu1 %vm3349_vm5, %v3327_v35  ;;  %v3633_v62 = vmax.f32 %v3579_v10, %v3581_v32 }
 0x6a5   : > { %3597 = vst.msk [vmem:[%s7900_s26 + $0x30] sm:$0xff] %vm1477_vm6, %v3565_v27  ;;  %v3625_v17 = vmax.f32 %v3563_v28, %v3565_v27  ;;  %v3652_v48 = vrot.slane %v3633_v62, 1 }
 0x6a7   : > { %v2827_v37 = vpop.permute.xlu0 %2826  ;;  %v3648_v53 = vrot.slane %v3625_v17, 1  ;;  %v3668_v39 = vmax.f32 %v3633_v62, %v3652_v48 }
 0x6a8   : > { %v2955_v43 = vpop.permute.xlu1 %2954  ;;  %v3262_v10 = vsel %vm3247_vm15, %v7489_v38, %v2827_v37  ;;  %v9442_v38 = vld [vmem:[#allocation50_spill] sm:$0xff] }
 0x6a9   : > { %v3311_v1 = vsel %vm3280_vm14, %v3278_v56, %v2955_v43  ;;  %v3664_v28 = vmax.f32 %v3625_v17, %v3648_v53  ;;  %v3295_v18 = vsel %vm3280_vm14, %v3262_v10, %v2923_v22  ;;  %v3716_v30 = vrot.slane %v3668_v39, 1 }
 0x6aa   : > { %v3344_v45 = vsel %vm3313_vm4, %v3311_v1, %v3051_v19  ;;  %v3117_v31 = vsel %vm1477_vm6, %v9359_v21, %v9442_v38  ;;  %v3732_v3 = vrot.slane %v3668_v39, 2  ;;  %v3748_v47 = vrot.slane %v3668_v39, 3 }
 0x6ab   : > { %4060 = vmatmul.msk.f32.gmra.mxu2 %vm3349_vm5, %v3344_v45  ;;  %v3149_v2 = vsel %vm1543_vm7, %v3117_v31, %v9443_v52  ;;  %v3712_v51 = vrot.slane %v3664_v28, 1  ;;  %v3836_v21 = vsel %vm336_vm0, %v3668_v39, %v3716_v30  ;;  %v3728_v6 = vrot.slane %v3664_v28, 2 }
 0x6ac   : > { %v3181_v8 = vsel %vm1609_vm8, %v3149_v2, %v9444_v9  ;;  %v3744_v27 = vrot.slane %v3664_v28, 3 }
 0x6ad   : > { %v3213_v12 = vsel %vm1675_vm12, %v3181_v8, %v9445_v36  ;;  %v3832_v32 = vsel %vm336_vm0, %v3664_v28, %v3712_v51 }
 0x6ae   : > { %v3532_v25 = vpop.f32.mrf.mxu2 }
 0x6af   : > { %v3533_v54 = vadd.f32 %v7873_v11, %v3532_v25  ;;  %v3019_v13 = vpop.permute.xlu0 %3018 }
 0x6b0   : > { %v2765_v4 = vpop.permute.xlu1 %2764  ;;  %v3484_v5 = vpop.f32.mrf.mxu1  ;;  %v3328_v61 = vsel %vm3313_vm4, %v3295_v18, %v3019_v13 }
 0x6b1   : > { %v3582_v23 = vmax.f32 %v3533_v54, 0.0  ;;  %v3485_v55 = vadd.f32 %v7873_v11, %v3484_v5  ;;  %4044 = vmatmul.msk.f32.gmra.mxu1 %vm3349_vm5, %v3328_v61  ;;  %v3246_v41 = vsel %vm3214_vm13, %v3213_v12, %v2765_v4  ;;  %v3021_v54 = vpop.permute.xlu2 %3020 }
 0x6b2   : > { %v3279_v49 = vsel %vm3247_vm15, %v3246_v41, %v4141_v14 }
 0x6b3   : > { %3614 = vst.msk [vmem:[%s7900_s26 + $0xb8] sm:$0xff] %vm1477_vm6, %v3582_v23  ;;  %v3634_v29 = vmax.f32 %v3580_v20, %v3582_v23  ;;  %v3566_v7 = vmax.f32 %v3485_v55, 0.0  ;;  %v3845_v20 = vsel %vm3839_vm9, %v3836_v21, %v3732_v3 }
 0x6b4   : > { %v3854_v60 = vsel %vm3848_vm10, %v3845_v20, %v3748_v47 }
 0x6b5   : > { %v3684_v44 = vrot.slane %v3634_v29, 1  ;;  %3598 = vst.msk [vmem:[%s7900_s26 + $0x38] sm:$0xff] %vm1477_vm6, %v3566_v7  ;;  %v3626_v34 = vmax.f32 %v3564_v59, %v3566_v7  ;;  %v3841_v59 = vsel %vm3839_vm9, %v3832_v32, %v3728_v6 }
 0x6b6   : > { %v3850_v17 = vsel %vm3848_vm10, %v3841_v59, %v3744_v27 }
 0x6b7   : > { %v3700_v46 = vmax.f32 %v3634_v29, %v3684_v44  ;;  %v3680_v15 = vrot.slane %v3626_v34, 1  ;;  %v2829_v48 = vpop.permute.xlu0 %2828 }
 0x6b8   : > { %v2957_v33 = vpop.permute.xlu1 %2956  ;;  %v3263_v25 = vsel %vm3247_vm15, %v7389_v26, %v2829_v48 }
 0x6b9   : > { %v3772_v35 = vrot.slane %v3700_v46, 4  ;;  %v3788_v0 = vrot.slane %v3700_v46, 5  ;;  %v3696_v42 = vmax.f32 %v3626_v34, %v3680_v15  ;;  %v3312_v19 = vsel %vm3280_vm14, %v3279_v49, %v2957_v33 }
 0x6ba   : > { %v3804_v40 = vrot.slane %v3700_v46, 6  ;;  %v3345_v62 = vsel %vm3313_vm4, %v3312_v19, %v3053_v24  ;;  %v3820_v50 = vrot.slane %v3700_v46, 7 }
 0x6bb   : > { %v3862_v63 = vsel %vm1808_vm3, %v3854_v60, %v3772_v35  ;;  %v3768_v16 = vrot.slane %v3696_v42, 4  ;;  %v3784_v57 = vrot.slane %v3696_v42, 5  ;;  %4061 = vmatmul.msk.f32.gmra.mxu2 %vm3349_vm5, %v3345_v62  ;;  %v3800_v56 = vrot.slane %v3696_v42, 6 }
 0x6bc   : > { %v3871_v58 = vsel %vm3865_vm11, %v3862_v63, %v3788_v0  ;;  %v3816_v39 = vrot.slane %v3696_v42, 7 }
 0x6bd   : > { %v3879_v37 = vsel %vm679_vm2, %v3871_v58, %v3804_v40  ;;  %v3858_v1 = vsel %vm1808_vm3, %v3850_v17, %v3768_v16 }
 0x6be   : > { %v3887_v43 = vsel %vm502_vm1, %v3879_v37, %v3820_v50  ;;  %v3535_v53 = vpop.f32.mrf.mxu2  ;;  %v3867_v10 = vsel %vm3865_vm11, %v3858_v1, %v3784_v57 }
 0x6bf   : > { %3895 = vst.msk [vmem:[%s8073_s22 + $0x28] sm:$0xff] %vm1477_vm6, %v3887_v43  ;;  %v3536_v45 = vadd.f32 %v7873_v11, %v3535_v53  ;;  %v3875_v22 = vsel %vm679_vm2, %v3867_v10, %v3800_v56 }
 0x6c0   : > { %v2925_v28 = vpop.permute.xlu1 %2924  ;;  %v3883_v13 = vsel %vm502_vm1, %v3875_v22, %v3816_v39 }
 0x6c1   : > { %v3583_v18 = vmax.f32 %v3536_v45, 0.0  ;;  %v3296_v30 = vsel %vm3280_vm14, %v3263_v25, %v2925_v28  ;;  %3891 = vst.msk [vmem:[%s8073_s22 + $0x8] sm:$0xff] %vm1477_vm6, %v3883_v13 }
 0x6c2   : > { %v3329_v4 = vsel %vm3313_vm4, %v3296_v30, %v3021_v54 }
 0x6c3   : > { %3615 = vst.msk [vmem:[%s7900_s26 + $0xc0] sm:$0xff] %vm1477_vm6, %v3583_v18  ;;  %4045 = vmatmul.msk.f32.gmra.mxu1 %vm3349_vm5, %v3329_v4 }
 0x6c7   : > { %v3487_v5 = vpop.f32.mrf.mxu1 }
 0x6c8   : > { %v3488_v26 = vadd.f32 %v7873_v11, %v3487_v5 }
 0x6ca   : > { %v3567_v61 = vmax.f32 %v3488_v26, 0.0 }
 0x6cc   : > { %3599 = vst.msk [vmem:[%s7900_s26 + $0x40] sm:$0xff] %vm1477_vm6, %v3567_v61  ;;  %v3538_v38 = vpop.f32.mrf.mxu2 }
 0x6cd   : > { %v3539_v31 = vadd.f32 %v7873_v11, %v3538_v38 }
 0x6cf   : > { %v3584_v23 = vmax.f32 %v3539_v31, 0.0 }
 0x6d1   : > { %3616 = vst.msk [vmem:[%s7900_s26 + $0xc8] sm:$0xff] %vm1477_vm6, %v3584_v23  ;;  %v3490_v55 = vpop.f32.mrf.mxu1 }
 0x6d2   : > { %v3491_v52 = vadd.f32 %v7873_v11, %v3490_v55 }
 0x6d4   : > { %v3568_v2 = vmax.f32 %v3491_v52, 0.0 }
 0x6d6   : > { %3600 = vst.msk [vmem:[%s7900_s26 + $0x48] sm:$0xff] %vm1477_vm6, %v3568_v2 }
 0x6e5   : > { %v3541_v3 = vpop.f32.mrf.mxu2 }
 0x6e6   : > { %v3542_v51 = vadd.f32 %v7873_v11, %v3541_v3 }
 0x6e8   : > { %v3585_v29 = vmax.f32 %v3542_v51, 0.0  ;;  %v3493_v7 = vpop.f32.mrf.mxu1 }
 0x6e9   : > { %v3494_v9 = vadd.f32 %v7873_v11, %v3493_v7 }
 0x6ea   : > { %3617 = vst.msk [vmem:[%s7900_s26 + $0xd0] sm:$0xff] %vm1477_vm6, %v3585_v29  ;;  %v3635_v8 = vmax.f32 %v3583_v18, %v3585_v29 }
 0x6eb   : > { %v3569_v21 = vmax.f32 %v3494_v9, 0.0 }
 0x6ec   : > { %v3653_v36 = vrot.slane %v3635_v8, 1 }
 0x6ed   : > { %3601 = vst.msk [vmem:[%s7900_s26 + $0x50] sm:$0xff] %vm1477_vm6, %v3569_v21  ;;  %v3627_v44 = vmax.f32 %v3567_v61, %v3569_v21 }
 0x6ee   : > { %v3669_v12 = vmax.f32 %v3635_v8, %v3653_v36 }
 0x6ef   : > { %v3649_v41 = vrot.slane %v3627_v44, 1 }
 0x6f0   : > { %v3717_v6 = vrot.slane %v3669_v12, 1  ;;  %v3733_v24 = vrot.slane %v3669_v12, 2  ;;  %v3749_v49 = vrot.slane %v3669_v12, 3 }
 0x6f1   : > { %v3665_v15 = vmax.f32 %v3627_v44, %v3649_v41 }
 0x6f2   : > { %v3837_v46 = vsel %vm336_vm0, %v3669_v12, %v3717_v6 }
 0x6f3   : > { %v3846_v33 = vsel %vm3839_vm9, %v3837_v46, %v3733_v24  ;;  %v3713_v59 = vrot.slane %v3665_v15, 1  ;;  %v3729_v50 = vrot.slane %v3665_v15, 2  ;;  %v3745_v45 = vrot.slane %v3665_v15, 3 }
 0x6f4   : > { %v3855_v27 = vsel %vm3848_vm10, %v3846_v33, %v3749_v49 }
 0x6f5   : > { %v3833_v37 = vsel %vm336_vm0, %v3665_v15, %v3713_v59 }
 0x6f6   : > { %v3544_v34 = vpop.f32.mrf.mxu2  ;;  %v3842_v39 = vsel %vm3839_vm9, %v3833_v37, %v3729_v50 }
 0x6f7   : > { %v3545_v14 = vadd.f32 %v7873_v11, %v3544_v34  ;;  %v3851_v54 = vsel %vm3848_vm10, %v3842_v39, %v3745_v45 }
 0x6f9   : > { %v3586_v20 = vmax.f32 %v3545_v14, 0.0 }
 0x6fb   : > { %3618 = vst.msk [vmem:[%s7900_s26 + $0xd8] sm:$0xff] %vm1477_vm6, %v3586_v20  ;;  %v3636_v32 = vmax.f32 %v3584_v23, %v3586_v20 }
 0x6fd   : > { %v3685_v47 = vrot.slane %v3636_v32, 1 }
 0x6ff   : > { %v3701_v35 = vmax.f32 %v3636_v32, %v3685_v47  ;;  %v3496_v0 = vpop.f32.mrf.mxu1 }
 0x700   : > { %v3497_v60 = vadd.f32 %v7873_v11, %v3496_v0 }
 0x701   : > { %v3773_v42 = vrot.slane %v3701_v35, 4  ;;  %v3789_v19 = vrot.slane %v3701_v35, 5  ;;  %v3805_v63 = vrot.slane %v3701_v35, 6  ;;  %v3821_v58 = vrot.slane %v3701_v35, 7 }
 0x702   : > { %v3570_v40 = vmax.f32 %v3497_v60, 0.0 }
 0x703   : > { %v3863_v62 = vsel %vm1808_vm3, %v3855_v27, %v3773_v42 }
 0x704   : > { %v3872_v16 = vsel %vm3865_vm11, %v3863_v62, %v3789_v19  ;;  %3602 = vst.msk [vmem:[%s7900_s26 + $0x58] sm:$0xff] %vm1477_vm6, %v3570_v40  ;;  %v3628_v57 = vmax.f32 %v3568_v2, %v3570_v40  ;;  %v3547_v17 = vpop.f32.mrf.mxu2 }
 0x705   : > { %v3880_v48 = vsel %vm679_vm2, %v3872_v16, %v3805_v63  ;;  %v3548_v43 = vadd.f32 %v7873_v11, %v3547_v17 }
 0x706   : > { %v3888_v56 = vsel %vm502_vm1, %v3880_v48, %v3821_v58  ;;  %v3681_v1 = vrot.slane %v3628_v57, 1 }
 0x707   : > { %3896 = vst.msk [vmem:[%s8073_s22 + $0x30] sm:$0xff] %vm1477_vm6, %v3888_v56  ;;  %v3587_v53 = vmax.f32 %v3548_v43, 0.0 }
 0x708   : > { %v3697_v10 = vmax.f32 %v3628_v57, %v3681_v1 }
 0x709   : > { %3619 = vst.msk [vmem:[%s7900_s26 + $0xe0] sm:$0xff] %vm1477_vm6, %v3587_v53  ;;  %v3499_v22 = vpop.f32.mrf.mxu1 }
 0x70a   : > { %v3769_v25 = vrot.slane %v3697_v10, 4  ;;  %v3785_v28 = vrot.slane %v3697_v10, 5  ;;  %v3500_v13 = vadd.f32 %v7873_v11, %v3499_v22  ;;  %v3801_v18 = vrot.slane %v3697_v10, 6 }
 0x70b   : > { %v3817_v4 = vrot.slane %v3697_v10, 7 }
 0x70c   : > { %v3859_v30 = vsel %vm1808_vm3, %v3851_v54, %v3769_v25  ;;  %v3571_v26 = vmax.f32 %v3500_v13, 0.0 }
 0x70d   : > { %v3868_v5 = vsel %vm3865_vm11, %v3859_v30, %v3785_v28 }
 0x70e   : > { %v3876_v61 = vsel %vm679_vm2, %v3868_v5, %v3801_v18  ;;  %3603 = vst.msk [vmem:[%s7900_s26 + $0x60] sm:$0xff] %vm1477_vm6, %v3571_v26 }
 0x70f   : > { %v3884_v38 = vsel %vm502_vm1, %v3876_v61, %v3817_v4 }
 0x710   : > { %3892 = vst.msk [vmem:[%s8073_s22 + $0x10] sm:$0xff] %vm1477_vm6, %v3884_v38 }
 0x71d   : > { %v3550_v31 = vpop.f32.mrf.mxu2 }
 0x71e   : > { %v3551_v23 = vadd.f32 %v7873_v11, %v3550_v31 }
 0x720   : > { %v3588_v55 = vmax.f32 %v3551_v23, 0.0  ;;  %v3502_v52 = vpop.f32.mrf.mxu1 }
 0x721   : > { %v3503_v2 = vadd.f32 %v7873_v11, %v3502_v52 }
 0x722   : > { %3620 = vst.msk [vmem:[%s7900_s26 + $0xe8] sm:$0xff] %vm1477_vm6, %v3588_v55 }
 0x723   : > { %v3572_v3 = vmax.f32 %v3503_v2, 0.0 }
 0x725   : > { %3604 = vst.msk [vmem:[%s7900_s26 + $0x68] sm:$0xff] %vm1477_vm6, %v3572_v3 }
 0x72e   : > { %v3505_v51 = vpop.f32.mrf.mxu1  ;;  %v3553_v7 = vpop.f32.mrf.mxu2 }
 0x72f   : > { %v3506_v29 = vadd.f32 %v7873_v11, %v3505_v51  ;;  %v3554_v9 = vadd.f32 %v7873_v11, %v3553_v7 }
 0x731   : > { %v3573_v8 = vmax.f32 %v3506_v29, 0.0  ;;  %v3589_v21 = vmax.f32 %v3554_v9, 0.0 }
 0x733   : > { %3605 = vst.msk [vmem:[%s7900_s26 + $0x70] sm:$0xff] %vm1477_vm6, %v3573_v8  ;;  %v3637_v36 = vmax.f32 %v3587_v53, %v3589_v21  ;;  %v3629_v12 = vmax.f32 %v3571_v26, %v3573_v8 }
 0x734   : > { %3621 = vst.msk [vmem:[%s7900_s26 + $0xf0] sm:$0xff] %vm1477_vm6, %v3589_v21 }
 0x735   : > { %v3654_v44 = vrot.slane %v3637_v36, 1  ;;  %v3650_v34 = vrot.slane %v3629_v12, 1 }
 0x737   : > { %v3670_v14 = vmax.f32 %v3637_v36, %v3654_v44  ;;  %v3666_v6 = vmax.f32 %v3629_v12, %v3650_v34 }
 0x739   : > { %v3718_v32 = vrot.slane %v3670_v14, 1  ;;  %v3714_v15 = vrot.slane %v3666_v6, 1  ;;  %v3734_v35 = vrot.slane %v3670_v14, 2  ;;  %v3730_v60 = vrot.slane %v3666_v6, 2 }
 0x73a   : > { %v3750_v63 = vrot.slane %v3670_v14, 3  ;;  %v3746_v58 = vrot.slane %v3666_v6, 3 }
 0x73b   : > { %v3838_v49 = vsel %vm336_vm0, %v3670_v14, %v3718_v32  ;;  %v3834_v42 = vsel %vm336_vm0, %v3666_v6, %v3714_v15 }
 0x73c   : > { %v3847_v40 = vsel %vm3839_vm9, %v3838_v49, %v3734_v35  ;;  %v3843_v62 = vsel %vm3839_vm9, %v3834_v42, %v3730_v60 }
 0x73d   : > { %v3856_v17 = vsel %vm3848_vm10, %v3847_v40, %v3750_v63  ;;  %v3852_v43 = vsel %vm3848_vm10, %v3843_v62, %v3746_v58 }
 0x73e   : > { %v3556_v41 = vpop.f32.mrf.mxu2 }
 0x73f   : > { %v3557_v20 = vadd.f32 %v7873_v11, %v3556_v41 }
 0x740   : > { %v3508_v24 = vpop.f32.mrf.mxu1 }
 0x741   : > { %v3509_v46 = vadd.f32 %v7873_v11, %v3508_v24  ;;  %v3590_v47 = vmax.f32 %v3557_v20, 0.0 }
 0x743   : > { %v3574_v33 = vmax.f32 %v3509_v46, 0.0  ;;  %3622 = vst.msk [vmem:[%s7900_s26 + $0xf8] sm:$0xff] %vm1477_vm6, %v3590_v47  ;;  %v3638_v0 = vmax.f32 %v3588_v55, %v3590_v47 }
 0x745   : > { %3606 = vst.msk [vmem:[%s7900_s26 + $0x78] sm:$0xff] %vm1477_vm6, %v3574_v33  ;;  %v3630_v59 = vmax.f32 %v3572_v3, %v3574_v33  ;;  %v3686_v19 = vrot.slane %v3638_v0, 1 }
 0x747   : > { %v3682_v27 = vrot.slane %v3630_v59, 1  ;;  %v3702_v11 = vmax.f32 %v3638_v0, %v3686_v19 }
 0x749   : > { %v3698_v50 = vmax.f32 %v3630_v59, %v3682_v27  ;;  %v3774_v16 = vrot.slane %v3702_v11, 4  ;;  %v3790_v57 = vrot.slane %v3702_v11, 5  ;;  %v3806_v56 = vrot.slane %v3702_v11, 6 }
 0x74a   : > { %v3822_v53 = vrot.slane %v3702_v11, 7 }
 0x74b   : > { %v3770_v37 = vrot.slane %v3698_v50, 4  ;;  %v3786_v48 = vrot.slane %v3698_v50, 5  ;;  %v3864_v1 = vsel %vm1808_vm3, %v3856_v17, %v3774_v16  ;;  %v3802_v10 = vrot.slane %v3698_v50, 6 }
 0x74c   : > { %v3873_v39 = vsel %vm3865_vm11, %v3864_v1, %v3790_v57  ;;  %v3818_v25 = vrot.slane %v3698_v50, 7 }
 0x74d   : > { %v3860_v45 = vsel %vm1808_vm3, %v3852_v43, %v3770_v37  ;;  %v3881_v22 = vsel %vm679_vm2, %v3873_v39, %v3806_v56 }
 0x74e   : > { %v3869_v28 = vsel %vm3865_vm11, %v3860_v45, %v3786_v48  ;;  %v3889_v54 = vsel %vm502_vm1, %v3881_v22, %v3822_v53 }
 0x74f   : > { %v3877_v13 = vsel %vm679_vm2, %v3869_v28, %v3802_v10  ;;  %3897 = vst.msk [vmem:[%s8073_s22 + $0x38] sm:$0xff] %vm1477_vm6, %v3889_v54 }
 0x750   : > { %v3885_v18 = vsel %vm502_vm1, %v3877_v13, %v3818_v25 }
 0x751   : > { %3893 = vst.msk [vmem:[%s8073_s22 + $0x18] sm:$0xff] %vm1477_vm6, %v3885_v18 }
 0x752 PF: > { %s17_s21 = sadd.s32 1, %s4150_s21  }
 0x753   : > { %p14_p4 = scmp.ge.s32.totalorder %s17_s21, 4  }
 0x755   :  { %16 = sbr.rel (!%p14_p4) target bundleno = 1 (0x1), region = 82 }

</bundles_post_ra>
